<compile_context>
chip_gen: v6e
topology: v6e:2x2x1
jax: 0.10.0
libtpu: 0.0.40
codegen_flags: <defaults>
</compile_context>

<pallas_src>
import math
from functools import partial

import numpy as np
import jax
import jax.numpy as jnp
from jax import lax
from jax.experimental import pallas as pl
from jax.experimental.pallas import tpu as pltpu

_INV_SQRT2 = 1.0 / math.sqrt(2.0)
_EPS = 1e-6  # both LayerNorms in the module use eps=1e-6 (channels_first)


def _gelu(x):
    # exact (erf) GELU, matching torch.nn.GELU()
    return 0.5 * x * (1.0 + lax.erf(x * _INV_SQRT2))


def _bspec(*shape):
    """Per-batch block (leading array dim is batch)."""
    n = len(shape)
    return pl.BlockSpec((1,) + tuple(shape), lambda b: (b,) + (0,) * n)


def _cspec(*shape):
    """Broadcast (batch-invariant) block covering the full array."""
    n = len(shape)
    return pl.BlockSpec(tuple(shape), lambda b: (0,) * n)


def _tap_masks(ksize, H, W):
    """Host-side halo masks: (kk, 1, HW) f32, 1.0 where the shifted tap stays inside the
    image ('same' padding), 0.0 in the halo. One fused multiply per tap in the kernel."""
    HW = H * W
    p = ksize // 2
    xs = np.arange(HW) % W
    ys = np.arange(HW) // W
    m = np.empty((ksize * ksize, 1, HW), np.float32)
    for t in range(ksize * ksize):
        dy = t // ksize - p
        dx = t % ksize - p
        m[t, 0] = ((xs + dx >= 0) & (xs + dx < W) & (ys + dy >= 0) & (ys + dy < H))
    return jnp.asarray(m)


def _dw_same_conv(x, w_col_of_tap, mask_ref, ksize, W, HW):
    """Depthwise 'same' conv on a channels-first (C, HW) tile.

    Spatial shifts are lane rotations (pltpu.roll, XLU) with one precomputed-mask
    multiply per tap. w_col_of_tap(t) returns the (C, 1) per-channel weight of tap t
    (tap order t = ky*ksize + kx, cross-correlation like F.conv2d)."""
    p = ksize // 2
    acc = None
    for t in range(ksize * ksize):
        dy = t // ksize - p
        dx = t % ksize - p
        d = dy * W + dx
        if d == 0:
            term = x * w_col_of_tap(t)                       # center tap: mask is all 1
        else:
            shifted = pltpu.roll(x, shift=(-d) % HW, axis=1)
            term = (shifted * mask_ref[t]) * w_col_of_tap(t)
        acc = term if acc is None else acc + term
    return acc


def _ln_channels_first(x, w_col, b_col, C):
    """channels-first LayerNorm on a (C, HW) tile; channel (sublane) reductions via a
    ones-row MXU dot, normalization via rsqrt (EUP)."""
    ones_row = jnp.ones((1, C), jnp.float32)
    inv_c = 1.0 / C
    u = jnp.dot(ones_row, x, preferred_element_type=jnp.float32) * inv_c        # (1, HW)
    xc = x - u
    s = jnp.dot(ones_row, xc * xc, preferred_element_type=jnp.float32) * inv_c  # (1, HW)
    return xc * lax.rsqrt(s + _EPS) * w_col + b_col


# --------------------------- K1: LayerNorm before the FFT ---------------------------

def _ln_kernel(x_ref, lnw_ref, lnb_ref, xn_ref, *, C):
    xn_ref[0] = _ln_channels_first(x_ref[0], lnw_ref[...], lnb_ref[...], C)


# ---------------- K2: fused attention-combine + whole MixFFN (post-irfft) -----------

def _fused_attn_ffn_kernel(
        a_ref, xn_ref, x_ref,
        m3_ref, m5_ref, m7_ref,
        cpew_ref, cpeb_ref, wv_ref, bv_ref, ls_ref, wp_ref, bp_ref,
        lnw_ref, lnb_ref, win_ref, bin_ref,
        w11_ref, b11_ref, w12_ref, b12_ref, wk1_ref, bk1_ref,
        w21_ref, b21_ref, w22_ref, b22_ref, wk2_ref, bk2_ref,
        wo_ref, bo_ref,
        o_ref, *, C, H, W):
    HW = H * W
    x = x_ref[0]                                   # (C, HW) original block input (shortcut)
    xn = xn_ref[0]                                 # LN(x)
    a = a_ref[0]                                   # FourierUnit output

    # ---------------- FConvMod ----------------
    # CPE: depthwise 3x3 'same' conv with static per-channel weights
    pos = _dw_same_conv(x, lambda t: cpew_ref[t], m3_ref, 3, W, HW) + cpeb_ref[...]
    # v = 1x1 conv of the normalized features
    v = jnp.dot(wv_ref[...], xn, preferred_element_type=jnp.float32) + bv_ref[...]

    # layer_scale * (a * v) -> softmax over the spatial axis (per channel)
    # (the spatial chunk/cat in the reference forward is an identity.)
    logits = ls_ref[...] * a * v                   # (C, HW)
    mmax = jnp.max(logits, axis=1, keepdims=True)
    e = jnp.exp(logits - mmax)
    ones_col = jnp.ones((HW, 1), jnp.float32)
    denom = jnp.dot(e, ones_col, preferred_element_type=jnp.float32)   # (C, 1) via MXU
    sm = e * pl.reciprocal(denom, approx=True)
    z = sm + pos
    attn_out = (jnp.dot(wp_ref[...], z, preferred_element_type=jnp.float32)
                + bp_ref[...] + x)                 # FConvMod output == FFN input/shortcut

    # ---------------- MixFFN ----------------
    xf = _ln_channels_first(attn_out, lnw_ref[...], lnb_ref[...], C)
    y = _gelu(jnp.dot(win_ref[...], xf, preferred_element_type=jnp.float32) + bin_ref[...])

    inv_hw = 1.0 / HW

    def dyconv_branch(yh, w1, b1, w2, b2, wk_flat, bk, mask_ref, ksize):
        # KernelAttention: global average pool (MXU ones-column dot) -> 1x1 -> GELU ->
        # 1x1 -> sigmoid, on the post-GELU proj_in half (matches torch DyConv input).
        pooled = jnp.dot(yh, ones_col, preferred_element_type=jnp.float32) * inv_hw  # (C,1)
        h = _gelu(jnp.dot(w1, pooled, preferred_element_type=jnp.float32) + b1)
        att = jax.nn.sigmoid(jnp.dot(w2, h, preferred_element_type=jnp.float32) + b2)  # (K,1)
        # KernelAggregation: mix ALL taps' per-channel weights with ONE MXU dot, then
        # slice per tap (sublane-aligned static slices of width C).
        wt = jnp.dot(wk_flat, att, preferred_element_type=jnp.float32)   # (kk*C, 1)
        db = jnp.dot(bk, att, preferred_element_type=jnp.float32)        # (C, 1)
        conv = _dw_same_conv(yh, lambda tp: wt[tp * C:(tp + 1) * C],
                             mask_ref, ksize, W, HW) + db
        return _gelu(conv)

    g1 = dyconv_branch(y[:C], w11_ref[...], b11_ref[...], w12_ref[...], b12_ref[...],
                       wk1_ref[...], bk1_ref[...], m5_ref, 5)
    g2 = dyconv_branch(y[C:], w21_ref[...], b21_ref[...], w22_ref[...], b22_ref[...],
                       wk2_ref[...], bk2_ref[...], m7_ref, 7)

    # proj_out: the 'b c g h w -> b (c g) h w' interleave is absorbed as a column
    # permutation of the weight, so a single (C,2C)@(2C,HW) MXU dot finishes the block.
    g = jnp.concatenate([g1, g2], axis=0)          # (2C, HW)
    o_ref[0] = (jnp.dot(wo_ref[...], g, preferred_element_type=jnp.float32)
                + bo_ref[...] + attn_out)


# ----------------------------------- BasicBlock ------------------------------------

def basic_block_forward(x_nchw, params):
    B, C, H, W = x_nchw.shape
    HW = H * W
    pa, pf = params["attn"], params["ffn"]
    x_cf = x_nchw.reshape(B, C, HW)                # channels-first, lane-dense layout

    # K1: channels-first LayerNorm that feeds the FourierUnit
    xn = pl.pallas_call(
        partial(_ln_kernel, C=C),
        out_shape=jax.ShapeDtypeStruct((B, C, HW), jnp.float32),
        grid=(B,),
        in_specs=[_bspec(C, HW), _cspec(C, 1), _cspec(C, 1)],
        out_specs=_bspec(C, HW),
        compiler_params=pltpu.CompilerParams(dimension_semantics=("parallel",)),
    )(x_cf, pa["ln_w"], pa["ln_b"])

    # FourierUnit: rfft2 -> 1x1 conv (2C->2C, no bias) + GELU on interleaved (re, im)
    # channels -> irfft2.
    # TODO(synk): the 2-D real FFTs have no Pallas TPU equivalent; they run as XLA ops.
    # The tiny (2C,2C) conv + GELU is deliberately left to XLA so it fuses with the FFT
    # reshuffles instead of paying a pallas_call round-trip on a lane-sparse H*Wr slab.
    ff = jnp.fft.rfft2(xn.reshape(B, C, H, W), norm="ortho")          # (B, C, H, Wr) c64
    Wr = ff.shape[-1]
    ff_ri = jnp.stack([jnp.real(ff), jnp.imag(ff)], axis=2)           # (B, C, 2, H, Wr)
    ff_ri = ff_ri.reshape(B, 2 * C, H * Wr).astype(jnp.float32)
    ff_conv = _gelu(jnp.einsum("oc,bcn->bon", pa["w_fu"], ff_ri))
    ff_conv = ff_conv.reshape(B, C, 2, H, Wr)
    a_cf = jnp.fft.irfft2(lax.complex(ff_conv[:, :, 0], ff_conv[:, :, 1]),
                          s=(H, W), norm="ortho").reshape(B, C, HW).astype(jnp.float32)

    # precomputed 'same'-padding halo masks (constants folded by XLA)
    m3 = _tap_masks(3, H, W)
    m5 = _tap_masks(5, H, W)
    m7 = _tap_masks(7, H, W)

    K = pf["dy1"]["w2"].shape[0]
    mid = pf["dy1"]["w1"].shape[0]

    # K2: everything after the irfft, fused (attention combine + full MixFFN)
    out = pl.pallas_call(
        partial(_fused_attn_ffn_kernel, C=C, H=H, W=W),
        out_shape=jax.ShapeDtypeStruct((B, C, HW), jnp.float32),
        grid=(B,),
        in_specs=[
            _bspec(C, HW), _bspec(C, HW), _bspec(C, HW),
            _cspec(9, 1, HW), _cspec(25, 1, HW), _cspec(49, 1, HW),
            _cspec(9, C, 1), _cspec(C, 1),
            _cspec(C, C), _cspec(C, 1),
            _cspec(C, 1),
            _cspec(C, C), _cspec(C, 1),
            _cspec(C, 1), _cspec(C, 1),
            _cspec(2 * C, C), _cspec(2 * C, 1),
            _cspec(mid, C), _cspec(mid, 1), _cspec(K, mid), _cspec(K, 1),
            _cspec(25 * C, K), _cspec(C, K),
            _cspec(mid, C), _cspec(mid, 1), _cspec(K, mid), _cspec(K, 1),
            _cspec(49 * C, K), _cspec(C, K),
            _cspec(C, 2 * C), _cspec(C, 1),
        ],
        out_specs=_bspec(C, HW),
        compiler_params=pltpu.CompilerParams(dimension_semantics=("parallel",)),
    )(a_cf, xn, x_cf, m3, m5, m7,
      pa["cpe_w"], pa["cpe_b"], pa["w_v"], pa["b_v"], pa["ls"], pa["w_proj"], pa["b_proj"],
      pf["ln_w"], pf["ln_b"], pf["w_in"], pf["b_in"],
      pf["dy1"]["w1"], pf["dy1"]["b1"], pf["dy1"]["w2"], pf["dy1"]["b2"],
      pf["dy1"]["wk_flat"], pf["dy1"]["bk_t"],
      pf["dy2"]["w1"], pf["dy2"]["b1"], pf["dy2"]["w2"], pf["dy2"]["b2"],
      pf["dy2"]["wk_flat"], pf["dy2"]["bk_t"],
      pf["w_out"], pf["b_out"])

    return out.reshape(B, C, H, W)


# -------------------------- deterministic parameter init ---------------------------

def init_params(key, dim, num_heads, num_kernels):
    C = dim
    mid = C // 8 if C != 3 else num_kernels        # KernelAttention reduction=8
    c_head = C // num_heads
    keys = iter(jax.random.split(key, 40))

    def nrm(shape, scale):
        return scale * jax.random.normal(next(keys), shape, jnp.float32)

    attn = {
        "cpe_w": nrm((9, C, 1), 1.0 / 3.0),        # depthwise 3x3, tap-major (tap, c, 1)
        "cpe_b": nrm((C, 1), 0.02),
        "ln_w": jnp.ones((C, 1), jnp.float32),
        "ln_b": jnp.zeros((C, 1), jnp.float32),
        "w_v": nrm((C, C), 1.0 / math.sqrt(C)),
        "b_v": nrm((C, 1), 0.02),
        "w_fu": nrm((2 * C, 2 * C), 1.0 / math.sqrt(2 * C)),   # FourierUnit conv, no bias
        "ls": jnp.repeat(1e-6 * jnp.ones((num_heads,), jnp.float32), c_head).reshape(C, 1),
        "w_proj": nrm((C, C), 1.0 / math.sqrt(C)),
        "b_proj": nrm((C, 1), 0.02),
    }

    def dyconv_params(ksize):
        kk = ksize * ksize
        # torch KernelAggregation.weight is (K, C, 1, k, k); store tap-major flattened
        # (kk*C, K) so one MXU dot mixes every tap's per-channel weight at once.
        wk = nrm((num_kernels, C, kk), 1.0 / math.sqrt(kk))
        bk = nrm((num_kernels, C), 0.02)
        return {
            "w1": nrm((mid, C), 1.0 / math.sqrt(C)),   # KernelAttention conv1 (out, in)
            "b1": nrm((mid, 1), 0.02),
            "w2": nrm((num_kernels, mid), 1.0 / math.sqrt(max(mid, 1))),
            "b2": nrm((num_kernels, 1), 0.02),
            "wk_flat": jnp.transpose(wk, (2, 1, 0)).reshape(kk * C, num_kernels),
            "bk_t": jnp.transpose(bk, (1, 0)),         # (C, K)
        }

    w_out = nrm((C, 2 * C), 1.0 / math.sqrt(2 * C))    # proj_out on interleaved channels
    ffn = {
        "ln_w": jnp.ones((C, 1), jnp.float32),
        "ln_b": jnp.zeros((C, 1), jnp.float32),
        "w_in": nrm((2 * C, C), 1.0 / math.sqrt(C)),
        "b_in": nrm((2 * C, 1), 0.02),
        "dy1": dyconv_params(5),
        "dy2": dyconv_params(7),
        # 'b c g h w -> b (c g) h w' interleave == fixed column permutation of proj_out:
        # even input columns read branch-1, odd columns read branch-2.
        "w_out": jnp.concatenate([w_out[:, 0::2], w_out[:, 1::2]], axis=1),
        "b_out": nrm((C, 1), 0.02),
    }
    return {"attn": attn, "ffn": ffn}


if __name__ == "__main__":
    dim, num_heads, num_kernels = 16, 4, 4     # num_kernels > 1 => DynamicKernelAggregation
    B, H, W = 2, 16, 16
    key = jax.random.PRNGKey(0)
    kx, kp = jax.random.split(key)
    x = jax.random.normal(kx, (B, dim, H, W), jnp.float32)   # NCHW, like the torch module
    params = init_params(kp, dim, num_heads, num_kernels)

    fwd = jax.jit(lambda inp: basic_block_forward(inp, params))
    out = fwd(x)
    jax.block_until_ready(out)
    assert out.shape == (B, dim, H, W)
    assert bool(jnp.all(jnp.isfinite(out)))
    print("KERNEL_OK")
</pallas_src>

<mosaic_0001>
module attributes {stable_mosaic.version = 11 : i64} {
  func.func @_ln_kernel(%arg0: i32, %arg1: memref<1x16x256xf32, #tpu.memory_space<vmem>>, %arg2: memref<16x1xf32, #tpu.memory_space<vmem>>, %arg3: memref<16x1xf32, #tpu.memory_space<vmem>>, %arg4: memref<1x16x256xf32, #tpu.memory_space<vmem>>) attributes {dimension_semantics = [#tpu.dimension_semantics<parallel>], iteration_bounds = array<i64: 2>, scalar_prefetch = 0 : i64, scratch_operands = 0 : i64, tpu.core_type = #tpu.core_type<tc>, window_params = [{transform_indices = @transform_0, window_bounds = array<i64: 1, 16, 256>}, {pipeline_mode = #tpu.pipeline_mode<synchronous>, transform_indices = @transform_1, window_bounds = array<i64: 16, 1>}, {pipeline_mode = #tpu.pipeline_mode<synchronous>, transform_indices = @transform_2, window_bounds = array<i64: 16, 1>}, {transform_indices = @transform_3, window_bounds = array<i64: 1, 16, 256>}]} {
    %c0 = arith.constant 0 : index
    %c0_0 = arith.constant 0 : index
    %c0_1 = arith.constant 0 : index
    %0 = vector.load %arg1[%c0, %c0_0, %c0_1] : memref<1x16x256xf32, #tpu.memory_space<vmem>>, vector<1x16x256xf32>
    %1 = vector.shape_cast %0 : vector<1x16x256xf32> to vector<16x256xf32>
    %c0_2 = arith.constant 0 : index
    %c0_3 = arith.constant 0 : index
    %2 = vector.load %arg2[%c0_2, %c0_3] : memref<16x1xf32, #tpu.memory_space<vmem>>, vector<16x1xf32>
    %c0_4 = arith.constant 0 : index
    %c0_5 = arith.constant 0 : index
    %3 = vector.load %arg3[%c0_4, %c0_5] : memref<16x1xf32, #tpu.memory_space<vmem>>, vector<16x1xf32>
    %cst = arith.constant 1.000000e+00 : f32
    %4 = vector.broadcast %cst : f32 to vector<1x16xf32>
    %cst_6 = arith.constant dense<0.000000e+00> : vector<1x256xf32>
    %5 = tpu.matmul %4, %1, %cst_6 {dimension_numbers = #tpu.dot_dimension_numbers<[1], [0], [0], [1], [0, 0, 1, 1], [], []>} : vector<1x16xf32>, vector<16x256xf32>, vector<1x256xf32> -> vector<1x256xf32>
    %cst_7 = arith.constant 6.250000e-02 : f32
    %6 = vector.broadcast %cst_7 : f32 to vector<1x256xf32>
    %7 = arith.mulf %5, %6 : vector<1x256xf32>
    %8 = vector.broadcast %7 : vector<1x256xf32> to vector<16x256xf32>
    %9 = arith.subf %1, %8 : vector<16x256xf32>
    %10 = arith.mulf %9, %9 : vector<16x256xf32>
    %cst_8 = arith.constant dense<0.000000e+00> : vector<1x256xf32>
    %11 = tpu.matmul %4, %10, %cst_8 {dimension_numbers = #tpu.dot_dimension_numbers<[1], [0], [0], [1], [0, 0, 1, 1], [], []>} : vector<1x16xf32>, vector<16x256xf32>, vector<1x256xf32> -> vector<1x256xf32>
    %cst_9 = arith.constant 6.250000e-02 : f32
    %12 = vector.broadcast %cst_9 : f32 to vector<1x256xf32>
    %13 = arith.mulf %11, %12 : vector<1x256xf32>
    %cst_10 = arith.constant 9.99999997E-7 : f32
    %14 = vector.broadcast %cst_10 : f32 to vector<1x256xf32>
    %15 = arith.addf %13, %14 : vector<1x256xf32>
    %16 = math.rsqrt %15 : vector<1x256xf32>
    %17 = vector.broadcast %16 : vector<1x256xf32> to vector<16x256xf32>
    %18 = arith.mulf %9, %17 : vector<16x256xf32>
    %19 = vector.broadcast %2 : vector<16x1xf32> to vector<16x256xf32>
    %20 = arith.mulf %18, %19 : vector<16x256xf32>
    %21 = vector.broadcast %3 : vector<16x1xf32> to vector<16x256xf32>
    %22 = arith.addf %20, %21 : vector<16x256xf32>
    %c0_11 = arith.constant 0 : index
    %c0_12 = arith.constant 0 : index
    %c0_13 = arith.constant 0 : index
    %23 = vector.load %arg4[%c0_11, %c0_12, %c0_13] : memref<1x16x256xf32, #tpu.memory_space<vmem>>, vector<1x16x256xf32>
    %24 = vector.shape_cast %23 : vector<1x16x256xf32> to vector<16x256xf32>
    %25 = vector.shape_cast %22 : vector<16x256xf32> to vector<1x16x256xf32>
    tpu.vector_store %arg4[%c0_11, %c0_12, %c0_13], %25 {strides = array<i32>} : memref<1x16x256xf32, #tpu.memory_space<vmem>>, vector<1x16x256xf32>,
    return
  }
  func.func @transform_0(%arg0: i32) -> (i32, i32, i32) {
    %c0_i32 = arith.constant 0 : i32
    %c0_i32_0 = arith.constant 0 : i32
    %c0_i32_1 = arith.constant 0 : i32
    return %arg0, %c0_i32, %c0_i32_0 : i32, i32, i32
  }
  func.func @transform_1(%arg0: i32) -> (i32, i32) {
    %c0_i32 = arith.constant 0 : i32
    %c0_i32_0 = arith.constant 0 : i32
    %c0_i32_1 = arith.constant 0 : i32
    return %c0_i32, %c0_i32_0 : i32, i32
  }
  func.func @transform_2(%arg0: i32) -> (i32, i32) {
    %c0_i32 = arith.constant 0 : i32
    %c0_i32_0 = arith.constant 0 : i32
    %c0_i32_1 = arith.constant 0 : i32
    return %c0_i32, %c0_i32_0 : i32, i32
  }
  func.func @transform_3(%arg0: i32) -> (i32, i32, i32) {
    %c0_i32 = arith.constant 0 : i32
    %c0_i32_0 = arith.constant 0 : i32
    %c0_i32_1 = arith.constant 0 : i32
    return %arg0, %c0_i32, %c0_i32_0 : i32, i32, i32
  }
}

module attributes {stable_mosaic.version = 11 : i64} {
  func.func @_fused_attn_ffn_kernel(%arg0: i32, %arg1: memref<1x16x256xf32, #tpu.memory_space<vmem>>, %arg2: memref<1x16x256xf32, #tpu.memory_space<vmem>>, %arg3: memref<1x16x256xf32, #tpu.memory_space<vmem>>, %arg4: memref<9x1x256xf32, #tpu.memory_space<vmem>>, %arg5: memref<25x1x256xf32, #tpu.memory_space<vmem>>, %arg6: memref<49x1x256xf32, #tpu.memory_space<vmem>>, %arg7: memref<9x16x1xf32, #tpu.memory_space<vmem>>, %arg8: memref<16x1xf32, #tpu.memory_space<vmem>>, %arg9: memref<16x16xf32, #tpu.memory_space<vmem>>, %arg10: memref<16x1xf32, #tpu.memory_space<vmem>>, %arg11: memref<16x1xf32, #tpu.memory_space<vmem>>, %arg12: memref<16x16xf32, #tpu.memory_space<vmem>>, %arg13: memref<16x1xf32, #tpu.memory_space<vmem>>, %arg14: memref<16x1xf32, #tpu.memory_space<vmem>>, %arg15: memref<16x1xf32, #tpu.memory_space<vmem>>, %arg16: memref<32x16xf32, #tpu.memory_space<vmem>>, %arg17: memref<32x1xf32, #tpu.memory_space<vmem>>, %arg18: memref<2x16xf32, #tpu.memory_space<vmem>>, %arg19: memref<2x1xf32, #tpu.memory_space<vmem>>, %arg20: memref<4x2xf32, #tpu.memory_space<vmem>>, %arg21: memref<4x1xf32, #tpu.memory_space<vmem>>, %arg22: memref<400x4xf32, #tpu.memory_space<vmem>>, %arg23: memref<16x4xf32, #tpu.memory_space<vmem>>, %arg24: memref<2x16xf32, #tpu.memory_space<vmem>>, %arg25: memref<2x1xf32, #tpu.memory_space<vmem>>, %arg26: memref<4x2xf32, #tpu.memory_space<vmem>>, %arg27: memref<4x1xf32, #tpu.memory_space<vmem>>, %arg28: memref<784x4xf32, #tpu.memory_space<vmem>>, %arg29: memref<16x4xf32, #tpu.memory_space<vmem>>, %arg30: memref<16x32xf32, #tpu.memory_space<vmem>>, %arg31: memref<16x1xf32, #tpu.memory_space<vmem>>, %arg32: memref<1x16x256xf32, #tpu.memory_space<vmem>>) attributes {dimension_semantics = [#tpu.dimension_semantics<parallel>], iteration_bounds = array<i64: 2>, scalar_prefetch = 0 : i64, scratch_operands = 0 : i64, tpu.core_type = #tpu.core_type<tc>, window_params = [{transform_indices = @transform_0, window_bounds = array<i64: 1, 16, 256>}, {transform_indices = @transform_1, window_bounds = array<i64: 1, 16, 256>}, {transform_indices = @transform_2, window_bounds = array<i64: 1, 16, 256>}, {pipeline_mode = #tpu.pipeline_mode<synchronous>, transform_indices = @transform_3, window_bounds = array<i64: 9, 1, 256>}, {pipeline_mode = #tpu.pipeline_mode<synchronous>, transform_indices = @transform_4, window_bounds = array<i64: 25, 1, 256>}, {pipeline_mode = #tpu.pipeline_mode<synchronous>, transform_indices = @transform_5, window_bounds = array<i64: 49, 1, 256>}, {pipeline_mode = #tpu.pipeline_mode<synchronous>, transform_indices = @transform_6, window_bounds = array<i64: 9, 16, 1>}, {pipeline_mode = #tpu.pipeline_mode<synchronous>, transform_indices = @transform_7, window_bounds = array<i64: 16, 1>}, {pipeline_mode = #tpu.pipeline_mode<synchronous>, transform_indices = @transform_8, window_bounds = array<i64: 16, 16>}, {pipeline_mode = #tpu.pipeline_mode<synchronous>, transform_indices = @transform_9, window_bounds = array<i64: 16, 1>}, {pipeline_mode = #tpu.pipeline_mode<synchronous>, transform_indices = @transform_10, window_bounds = array<i64: 16, 1>}, {pipeline_mode = #tpu.pipeline_mode<synchronous>, transform_indices = @transform_11, window_bounds = array<i64: 16, 16>}, {pipeline_mode = #tpu.pipeline_mode<synchronous>, transform_indices = @transform_12, window_bounds = array<i64: 16, 1>}, {pipeline_mode = #tpu.pipeline_mode<synchronous>, transform_indices = @transform_13, window_bounds = array<i64: 16, 1>}, {pipeline_mode = #tpu.pipeline_mode<synchronous>, transform_indices = @transform_14, window_bounds = array<i64: 16, 1>}, {pipeline_mode = #tpu.pipeline_mode<synchronous>, transform_indices = @transform_15, window_bounds = array<i64: 32, 16>}, {pipeline_mode = #tpu.pipeline_mode<synchronous>, transform_indices = @transform_16, window_bounds = array<i64: 32, 1>}, {pipeline_mode = #tpu.pipeline_mode<synchronous>, transform_indices = @transform_17, window_bounds = array<i64: 2, 16>}, {pipeline_mode = #tpu.pipeline_mode<synchronous>, transform_indices = @transform_18, window_bounds = array<i64: 2, 1>}, {pipeline_mode = #tpu.pipeline_mode<synchronous>, transform_indices = @transform_19, window_bounds = array<i64: 4, 2>}, {pipeline_mode = #tpu.pipeline_mode<synchronous>, transform_indices = @transform_20, window_bounds = array<i64: 4, 1>}, {pipeline_mode = #tpu.pipeline_mode<synchronous>, transform_indices = @transform_21, window_bounds = array<i64: 400, 4>}, {pipeline_mode = #tpu.pipeline_mode<synchronous>, transform_indices = @transform_22, window_bounds = array<i64: 16, 4>}, {pipeline_mode = #tpu.pipeline_mode<synchronous>, transform_indices = @transform_23, window_bounds = array<i64: 2, 16>}, {pipeline_mode = #tpu.pipeline_mode<synchronous>, transform_indices = @transform_24, window_bounds = array<i64: 2, 1>}, {pipeline_mode = #tpu.pipeline_mode<synchronous>, transform_indices = @transform_25, window_bounds = array<i64: 4, 2>}, {pipeline_mode = #tpu.pipeline_mode<synchronous>, transform_indices = @transform_26, window_bounds = array<i64: 4, 1>}, {pipeline_mode = #tpu.pipeline_mode<synchronous>, transform_indices = @transform_27, window_bounds = array<i64: 784, 4>}, {pipeline_mode = #tpu.pipeline_mode<synchronous>, transform_indices = @transform_28, window_bounds = array<i64: 16, 4>}, {pipeline_mode = #tpu.pipeline_mode<synchronous>, transform_indices = @transform_29, window_bounds = array<i64: 16, 32>}, {pipeline_mode = #tpu.pipeline_mode<synchronous>, transform_indices = @transform_30, window_bounds = array<i64: 16, 1>}, {transform_indices = @transform_31, window_bounds = array<i64: 1, 16, 256>}]} {
    %c0 = arith.constant 0 : index
    %c0_0 = arith.constant 0 : index
    %c0_1 = arith.constant 0 : index
    %0 = vector.load %arg3[%c0, %c0_0, %c0_1] : memref<1x16x256xf32, #tpu.memory_space<vmem>>, vector<1x16x256xf32>
    %1 = vector.shape_cast %0 : vector<1x16x256xf32> to vector<16x256xf32>
    %c0_2 = arith.constant 0 : index
    %c0_3 = arith.constant 0 : index
    %c0_4 = arith.constant 0 : index
    %2 = vector.load %arg2[%c0_2, %c0_3, %c0_4] : memref<1x16x256xf32, #tpu.memory_space<vmem>>, vector<1x16x256xf32>
    %3 = vector.shape_cast %2 : vector<1x16x256xf32> to vector<16x256xf32>
    %c0_5 = arith.constant 0 : index
    %c0_6 = arith.constant 0 : index
    %c0_7 = arith.constant 0 : index
    %4 = vector.load %arg1[%c0_5, %c0_6, %c0_7] : memref<1x16x256xf32, #tpu.memory_space<vmem>>, vector<1x16x256xf32>
    %5 = vector.shape_cast %4 : vector<1x16x256xf32> to vector<16x256xf32>
    %c17_i32 = arith.constant 17 : i32
    %6 = tpu.dynamic_rotate %1 by %c17_i32 dim 1 : vector<16x256xf32>, i32 -> vector<16x256xf32>
    %c0_8 = arith.constant 0 : index
    %c0_9 = arith.constant 0 : index
    %c0_10 = arith.constant 0 : index
    %7 = vector.load %arg4[%c0_8, %c0_9, %c0_10] : memref<9x1x256xf32, #tpu.memory_space<vmem>>, vector<1x1x256xf32>
    %8 = vector.shape_cast %7 : vector<1x1x256xf32> to vector<1x256xf32>
    %9 = vector.broadcast %8 : vector<1x256xf32> to vector<16x256xf32>
    %10 = arith.mulf %6, %9 : vector<16x256xf32>
    %c0_11 = arith.constant 0 : index
    %c0_12 = arith.constant 0 : index
    %c0_13 = arith.constant 0 : index
    %11 = vector.load %arg7[%c0_11, %c0_12, %c0_13] : memref<9x16x1xf32, #tpu.memory_space<vmem>>, vector<1x16x1xf32>
    %12 = vector.shape_cast %11 : vector<1x16x1xf32> to vector<16x1xf32>
    %13 = vector.broadcast %12 : vector<16x1xf32> to vector<16x256xf32>
    %14 = arith.mulf %10, %13 : vector<16x256xf32>
    %c16_i32 = arith.constant 16 : i32
    %15 = tpu.dynamic_rotate %1 by %c16_i32 dim 1 : vector<16x256xf32>, i32 -> vector<16x256xf32>
    %c1 = arith.constant 1 : index
    %c0_14 = arith.constant 0 : index
    %c0_15 = arith.constant 0 : index
    %16 = vector.load %arg4[%c1, %c0_14, %c0_15] : memref<9x1x256xf32, #tpu.memory_space<vmem>>, vector<1x1x256xf32>
    %17 = vector.shape_cast %16 : vector<1x1x256xf32> to vector<1x256xf32>
    %18 = vector.broadcast %17 : vector<1x256xf32> to vector<16x256xf32>
    %19 = arith.mulf %15, %18 : vector<16x256xf32>
    %c1_16 = arith.constant 1 : index
    %c0_17 = arith.constant 0 : index
    %c0_18 = arith.constant 0 : index
    %20 = vector.load %arg7[%c1_16, %c0_17, %c0_18] : memref<9x16x1xf32, #tpu.memory_space<vmem>>, vector<1x16x1xf32>
    %21 = vector.shape_cast %20 : vector<1x16x1xf32> to vector<16x1xf32>
    %22 = vector.broadcast %21 : vector<16x1xf32> to vector<16x256xf32>
    %23 = arith.mulf %19, %22 : vector<16x256xf32>
    %24 = arith.addf %14, %23 : vector<16x256xf32>
    %c15_i32 = arith.constant 15 : i32
    %25 = tpu.dynamic_rotate %1 by %c15_i32 dim 1 : vector<16x256xf32>, i32 -> vector<16x256xf32>
    %c2 = arith.constant 2 : index
    %c0_19 = arith.constant 0 : index
    %c0_20 = arith.constant 0 : index
    %26 = vector.load %arg4[%c2, %c0_19, %c0_20] : memref<9x1x256xf32, #tpu.memory_space<vmem>>, vector<1x1x256xf32>
    %27 = vector.shape_cast %26 : vector<1x1x256xf32> to vector<1x256xf32>
    %28 = vector.broadcast %27 : vector<1x256xf32> to vector<16x256xf32>
    %29 = arith.mulf %25, %28 : vector<16x256xf32>
    %c2_21 = arith.constant 2 : index
    %c0_22 = arith.constant 0 : index
    %c0_23 = arith.constant 0 : index
    %30 = vector.load %arg7[%c2_21, %c0_22, %c0_23] : memref<9x16x1xf32, #tpu.memory_space<vmem>>, vector<1x16x1xf32>
    %31 = vector.shape_cast %30 : vector<1x16x1xf32> to vector<16x1xf32>
    %32 = vector.broadcast %31 : vector<16x1xf32> to vector<16x256xf32>
    %33 = arith.mulf %29, %32 : vector<16x256xf32>
    %34 = arith.addf %24, %33 : vector<16x256xf32>
    %c1_i32 = arith.constant 1 : i32
    %35 = tpu.dynamic_rotate %1 by %c1_i32 dim 1 : vector<16x256xf32>, i32 -> vector<16x256xf32>
    %c3 = arith.constant 3 : index
    %c0_24 = arith.constant 0 : index
    %c0_25 = arith.constant 0 : index
    %36 = vector.load %arg4[%c3, %c0_24, %c0_25] : memref<9x1x256xf32, #tpu.memory_space<vmem>>, vector<1x1x256xf32>
    %37 = vector.shape_cast %36 : vector<1x1x256xf32> to vector<1x256xf32>
    %38 = vector.broadcast %37 : vector<1x256xf32> to vector<16x256xf32>
    %39 = arith.mulf %35, %38 : vector<16x256xf32>
    %c3_26 = arith.constant 3 : index
    %c0_27 = arith.constant 0 : index
    %c0_28 = arith.constant 0 : index
    %40 = vector.load %arg7[%c3_26, %c0_27, %c0_28] : memref<9x16x1xf32, #tpu.memory_space<vmem>>, vector<1x16x1xf32>
    %41 = vector.shape_cast %40 : vector<1x16x1xf32> to vector<16x1xf32>
    %42 = vector.broadcast %41 : vector<16x1xf32> to vector<16x256xf32>
    %43 = arith.mulf %39, %42 : vector<16x256xf32>
    %44 = arith.addf %34, %43 : vector<16x256xf32>
    %c4 = arith.constant 4 : index
    %c0_29 = arith.constant 0 : index
    %c0_30 = arith.constant 0 : index
    %45 = vector.load %arg7[%c4, %c0_29, %c0_30] : memref<9x16x1xf32, #tpu.memory_space<vmem>>, vector<1x16x1xf32>
    %46 = vector.shape_cast %45 : vector<1x16x1xf32> to vector<16x1xf32>
    %47 = vector.broadcast %46 : vector<16x1xf32> to vector<16x256xf32>
    %48 = arith.mulf %1, %47 : vector<16x256xf32>
    %49 = arith.addf %44, %48 : vector<16x256xf32>
    %c255_i32 = arith.constant 255 : i32
    %50 = tpu.dynamic_rotate %1 by %c255_i32 dim 1 : vector<16x256xf32>, i32 -> vector<16x256xf32>
    %c5 = arith.constant 5 : index
    %c0_31 = arith.constant 0 : index
    %c0_32 = arith.constant 0 : index
    %51 = vector.load %arg4[%c5, %c0_31, %c0_32] : memref<9x1x256xf32, #tpu.memory_space<vmem>>, vector<1x1x256xf32>
    %52 = vector.shape_cast %51 : vector<1x1x256xf32> to vector<1x256xf32>
    %53 = vector.broadcast %52 : vector<1x256xf32> to vector<16x256xf32>
    %54 = arith.mulf %50, %53 : vector<16x256xf32>
    %c5_33 = arith.constant 5 : index
    %c0_34 = arith.constant 0 : index
    %c0_35 = arith.constant 0 : index
    %55 = vector.load %arg7[%c5_33, %c0_34, %c0_35] : memref<9x16x1xf32, #tpu.memory_space<vmem>>, vector<1x16x1xf32>
    %56 = vector.shape_cast %55 : vector<1x16x1xf32> to vector<16x1xf32>
    %57 = vector.broadcast %56 : vector<16x1xf32> to vector<16x256xf32>
    %58 = arith.mulf %54, %57 : vector<16x256xf32>
    %59 = arith.addf %49, %58 : vector<16x256xf32>
    %c241_i32 = arith.constant 241 : i32
    %60 = tpu.dynamic_rotate %1 by %c241_i32 dim 1 : vector<16x256xf32>, i32 -> vector<16x256xf32>
    %c6 = arith.constant 6 : index
    %c0_36 = arith.constant 0 : index
    %c0_37 = arith.constant 0 : index
    %61 = vector.load %arg4[%c6, %c0_36, %c0_37] : memref<9x1x256xf32, #tpu.memory_space<vmem>>, vector<1x1x256xf32>
    %62 = vector.shape_cast %61 : vector<1x1x256xf32> to vector<1x256xf32>
    %63 = vector.broadcast %62 : vector<1x256xf32> to vector<16x256xf32>
    %64 = arith.mulf %60, %63 : vector<16x256xf32>
    %c6_38 = arith.constant 6 : index
    %c0_39 = arith.constant 0 : index
    %c0_40 = arith.constant 0 : index
    %65 = vector.load %arg7[%c6_38, %c0_39, %c0_40] : memref<9x16x1xf32, #tpu.memory_space<vmem>>, vector<1x16x1xf32>
    %66 = vector.shape_cast %65 : vector<1x16x1xf32> to vector<16x1xf32>
    %67 = vector.broadcast %66 : vector<16x1xf32> to vector<16x256xf32>
    %68 = arith.mulf %64, %67 : vector<16x256xf32>
    %69 = arith.addf %59, %68 : vector<16x256xf32>
    %c240_i32 = arith.constant 240 : i32
    %70 = tpu.dynamic_rotate %1 by %c240_i32 dim 1 : vector<16x256xf32>, i32 -> vector<16x256xf32>
    %c7 = arith.constant 7 : index
    %c0_41 = arith.constant 0 : index
    %c0_42 = arith.constant 0 : index
    %71 = vector.load %arg4[%c7, %c0_41, %c0_42] : memref<9x1x256xf32, #tpu.memory_space<vmem>>, vector<1x1x256xf32>
    %72 = vector.shape_cast %71 : vector<1x1x256xf32> to vector<1x256xf32>
    %73 = vector.broadcast %72 : vector<1x256xf32> to vector<16x256xf32>
    %74 = arith.mulf %70, %73 : vector<16x256xf32>
    %c7_43 = arith.constant 7 : index
    %c0_44 = arith.constant 0 : index
    %c0_45 = arith.constant 0 : index
    %75 = vector.load %arg7[%c7_43, %c0_44, %c0_45] : memref<9x16x1xf32, #tpu.memory_space<vmem>>, vector<1x16x1xf32>
    %76 = vector.shape_cast %75 : vector<1x16x1xf32> to vector<16x1xf32>
    %77 = vector.broadcast %76 : vector<16x1xf32> to vector<16x256xf32>
    %78 = arith.mulf %74, %77 : vector<16x256xf32>
    %79 = arith.addf %69, %78 : vector<16x256xf32>
    %c239_i32 = arith.constant 239 : i32
    %80 = tpu.dynamic_rotate %1 by %c239_i32 dim 1 : vector<16x256xf32>, i32 -> vector<16x256xf32>
    %c8 = arith.constant 8 : index
    %c0_46 = arith.constant 0 : index
    %c0_47 = arith.constant 0 : index
    %81 = vector.load %arg4[%c8, %c0_46, %c0_47] : memref<9x1x256xf32, #tpu.memory_space<vmem>>, vector<1x1x256xf32>
    %82 = vector.shape_cast %81 : vector<1x1x256xf32> to vector<1x256xf32>
    %83 = vector.broadcast %82 : vector<1x256xf32> to vector<16x256xf32>
    %84 = arith.mulf %80, %83 : vector<16x256xf32>
    %c8_48 = arith.constant 8 : index
    %c0_49 = arith.constant 0 : index
    %c0_50 = arith.constant 0 : index
    %85 = vector.load %arg7[%c8_48, %c0_49, %c0_50] : memref<9x16x1xf32, #tpu.memory_space<vmem>>, vector<1x16x1xf32>
    %86 = vector.shape_cast %85 : vector<1x16x1xf32> to vector<16x1xf32>
    %87 = vector.broadcast %86 : vector<16x1xf32> to vector<16x256xf32>
    %88 = arith.mulf %84, %87 : vector<16x256xf32>
    %89 = arith.addf %79, %88 : vector<16x256xf32>
    %c0_51 = arith.constant 0 : index
    %c0_52 = arith.constant 0 : index
    %90 = vector.load %arg8[%c0_51, %c0_52] : memref<16x1xf32, #tpu.memory_space<vmem>>, vector<16x1xf32>
    %91 = vector.broadcast %90 : vector<16x1xf32> to vector<16x256xf32>
    %92 = arith.addf %89, %91 : vector<16x256xf32>
    %c0_53 = arith.constant 0 : index
    %c0_54 = arith.constant 0 : index
    %93 = vector.load %arg9[%c0_53, %c0_54] : memref<16x16xf32, #tpu.memory_space<vmem>>, vector<16x16xf32>
    %cst = arith.constant dense<0.000000e+00> : vector<16x256xf32>
    %94 = tpu.matmul %93, %3, %cst {dimension_numbers = #tpu.dot_dimension_numbers<[1], [0], [0], [1], [0, 0, 1, 1], [], []>} : vector<16x16xf32>, vector<16x256xf32>, vector<16x256xf32> -> vector<16x256xf32>
    %c0_55 = arith.constant 0 : index
    %c0_56 = arith.constant 0 : index
    %95 = vector.load %arg10[%c0_55, %c0_56] : memref<16x1xf32, #tpu.memory_space<vmem>>, vector<16x1xf32>
    %96 = vector.broadcast %95 : vector<16x1xf32> to vector<16x256xf32>
    %97 = arith.addf %94, %96 : vector<16x256xf32>
    %c0_57 = arith.constant 0 : index
    %c0_58 = arith.constant 0 : index
    %98 = vector.load %arg11[%c0_57, %c0_58] : memref<16x1xf32, #tpu.memory_space<vmem>>, vector<16x1xf32>
    %99 = vector.broadcast %98 : vector<16x1xf32> to vector<16x256xf32>
    %100 = arith.mulf %99, %5 : vector<16x256xf32>
    %101 = arith.mulf %100, %97 : vector<16x256xf32>
    %cst_59 = arith.constant dense<0xFF800000> : vector<16xf32>
    %102 = vector.multi_reduction <maximumf>, %101, %cst_59 [1] : vector<16x256xf32> to vector<16xf32>
    %103 = vector.shape_cast %102 : vector<16xf32> to vector<16x1xf32>
    %104 = vector.broadcast %103 : vector<16x1xf32> to vector<16x256xf32>
    %105 = arith.subf %101, %104 : vector<16x256xf32>
    %106 = math.exp %105 : vector<16x256xf32>
    %cst_60 = arith.constant 1.000000e+00 : f32
    %107 = vector.broadcast %cst_60 : f32 to vector<256x1xf32>
    %cst_61 = arith.constant dense<0.000000e+00> : vector<16x1xf32>
    %108 = tpu.matmul %106, %107, %cst_61 {dimension_numbers = #tpu.dot_dimension_numbers<[1], [0], [0], [1], [0, 0, 1, 1], [], []>} : vector<16x256xf32>, vector<256x1xf32>, vector<16x1xf32> -> vector<16x1xf32>
    %109 = tpu.reciprocal %108 {approx = true} : vector<16x1xf32> -> vector<16x1xf32>
    %110 = vector.broadcast %109 : vector<16x1xf32> to vector<16x256xf32>
    %111 = arith.mulf %106, %110 : vector<16x256xf32>
    %112 = arith.addf %111, %92 : vector<16x256xf32>
    %c0_62 = arith.constant 0 : index
    %c0_63 = arith.constant 0 : index
    %113 = vector.load %arg12[%c0_62, %c0_63] : memref<16x16xf32, #tpu.memory_space<vmem>>, vector<16x16xf32>
    %cst_64 = arith.constant dense<0.000000e+00> : vector<16x256xf32>
    %114 = tpu.matmul %113, %112, %cst_64 {dimension_numbers = #tpu.dot_dimension_numbers<[1], [0], [0], [1], [0, 0, 1, 1], [], []>} : vector<16x16xf32>, vector<16x256xf32>, vector<16x256xf32> -> vector<16x256xf32>
    %c0_65 = arith.constant 0 : index
    %c0_66 = arith.constant 0 : index
    %115 = vector.load %arg13[%c0_65, %c0_66] : memref<16x1xf32, #tpu.memory_space<vmem>>, vector<16x1xf32>
    %116 = vector.broadcast %115 : vector<16x1xf32> to vector<16x256xf32>
    %117 = arith.addf %114, %116 : vector<16x256xf32>
    %118 = arith.addf %117, %1 : vector<16x256xf32>
    %c0_67 = arith.constant 0 : index
    %c0_68 = arith.constant 0 : index
    %119 = vector.load %arg14[%c0_67, %c0_68] : memref<16x1xf32, #tpu.memory_space<vmem>>, vector<16x1xf32>
    %c0_69 = arith.constant 0 : index
    %c0_70 = arith.constant 0 : index
    %120 = vector.load %arg15[%c0_69, %c0_70] : memref<16x1xf32, #tpu.memory_space<vmem>>, vector<16x1xf32>
    %cst_71 = arith.constant 1.000000e+00 : f32
    %121 = vector.broadcast %cst_71 : f32 to vector<1x16xf32>
    %cst_72 = arith.constant dense<0.000000e+00> : vector<1x256xf32>
    %122 = tpu.matmul %121, %118, %cst_72 {dimension_numbers = #tpu.dot_dimension_numbers<[1], [0], [0], [1], [0, 0, 1, 1], [], []>} : vector<1x16xf32>, vector<16x256xf32>, vector<1x256xf32> -> vector<1x256xf32>
    %cst_73 = arith.constant 6.250000e-02 : f32
    %123 = vector.broadcast %cst_73 : f32 to vector<1x256xf32>
    %124 = arith.mulf %122, %123 : vector<1x256xf32>
    %125 = vector.broadcast %124 : vector<1x256xf32> to vector<16x256xf32>
    %126 = arith.subf %118, %125 : vector<16x256xf32>
    %127 = arith.mulf %126, %126 : vector<16x256xf32>
    %cst_74 = arith.constant dense<0.000000e+00> : vector<1x256xf32>
    %128 = tpu.matmul %121, %127, %cst_74 {dimension_numbers = #tpu.dot_dimension_numbers<[1], [0], [0], [1], [0, 0, 1, 1], [], []>} : vector<1x16xf32>, vector<16x256xf32>, vector<1x256xf32> -> vector<1x256xf32>
    %cst_75 = arith.constant 6.250000e-02 : f32
    %129 = vector.broadcast %cst_75 : f32 to vector<1x256xf32>
    %130 = arith.mulf %128, %129 : vector<1x256xf32>
    %cst_76 = arith.constant 9.99999997E-7 : f32
    %131 = vector.broadcast %cst_76 : f32 to vector<1x256xf32>
    %132 = arith.addf %130, %131 : vector<1x256xf32>
    %133 = math.rsqrt %132 : vector<1x256xf32>
    %134 = vector.broadcast %133 : vector<1x256xf32> to vector<16x256xf32>
    %135 = arith.mulf %126, %134 : vector<16x256xf32>
    %136 = vector.broadcast %119 : vector<16x1xf32> to vector<16x256xf32>
    %137 = arith.mulf %135, %136 : vector<16x256xf32>
    %138 = vector.broadcast %120 : vector<16x1xf32> to vector<16x256xf32>
    %139 = arith.addf %137, %138 : vector<16x256xf32>
    %c0_77 = arith.constant 0 : index
    %c0_78 = arith.constant 0 : index
    %140 = vector.load %arg16[%c0_77, %c0_78] : memref<32x16xf32, #tpu.memory_space<vmem>>, vector<32x16xf32>
    %cst_79 = arith.constant dense<0.000000e+00> : vector<32x256xf32>
    %141 = tpu.matmul %140, %139, %cst_79 {dimension_numbers = #tpu.dot_dimension_numbers<[1], [0], [0], [1], [0, 0, 1, 1], [], []>} : vector<32x16xf32>, vector<16x256xf32>, vector<32x256xf32> -> vector<32x256xf32>
    %c0_80 = arith.constant 0 : index
    %c0_81 = arith.constant 0 : index
    %142 = vector.load %arg17[%c0_80, %c0_81] : memref<32x1xf32, #tpu.memory_space<vmem>>, vector<32x1xf32>
    %143 = vector.broadcast %142 : vector<32x1xf32> to vector<32x256xf32>
    %144 = arith.addf %141, %143 : vector<32x256xf32>
    %cst_82 = arith.constant 5.000000e-01 : f32
    %145 = vector.broadcast %cst_82 : f32 to vector<32x256xf32>
    %146 = arith.mulf %145, %144 : vector<32x256xf32>
    %cst_83 = arith.constant 0.707106769 : f32
    %147 = vector.broadcast %cst_83 : f32 to vector<32x256xf32>
    %148 = arith.mulf %144, %147 : vector<32x256xf32>
    %149 = math.erf %148 : vector<32x256xf32>
    %cst_84 = arith.constant 1.000000e+00 : f32
    %150 = vector.broadcast %cst_84 : f32 to vector<32x256xf32>
    %151 = arith.addf %150, %149 : vector<32x256xf32>
    %152 = arith.mulf %146, %151 : vector<32x256xf32>
    %153 = vector.extract_strided_slice %152 {offsets = [0, 0], sizes = [16, 256], strides = [1, 1]} : vector<32x256xf32> to vector<16x256xf32>
    %c0_85 = arith.constant 0 : index
    %c0_86 = arith.constant 0 : index
    %154 = vector.load %arg18[%c0_85, %c0_86] : memref<2x16xf32, #tpu.memory_space<vmem>>, vector<2x16xf32>
    %c0_87 = arith.constant 0 : index
    %c0_88 = arith.constant 0 : index
    %155 = vector.load %arg19[%c0_87, %c0_88] : memref<2x1xf32, #tpu.memory_space<vmem>>, vector<2x1xf32>
    %c0_89 = arith.constant 0 : index
    %c0_90 = arith.constant 0 : index
    %156 = vector.load %arg20[%c0_89, %c0_90] : memref<4x2xf32, #tpu.memory_space<vmem>>, vector<4x2xf32>
    %c0_91 = arith.constant 0 : index
    %c0_92 = arith.constant 0 : index
    %157 = vector.load %arg21[%c0_91, %c0_92] : memref<4x1xf32, #tpu.memory_space<vmem>>, vector<4x1xf32>
    %c0_93 = arith.constant 0 : index
    %c0_94 = arith.constant 0 : index
    %158 = vector.load %arg22[%c0_93, %c0_94] : memref<400x4xf32, #tpu.memory_space<vmem>>, vector<400x4xf32>
    %c0_95 = arith.constant 0 : index
    %c0_96 = arith.constant 0 : index
    %159 = vector.load %arg23[%c0_95, %c0_96] : memref<16x4xf32, #tpu.memory_space<vmem>>, vector<16x4xf32>
    %cst_97 = arith.constant dense<0.000000e+00> : vector<16x1xf32>
    %160 = tpu.matmul %153, %107, %cst_97 {dimension_numbers = #tpu.dot_dimension_numbers<[1], [0], [0], [1], [0, 0, 1, 1], [], []>} : vector<16x256xf32>, vector<256x1xf32>, vector<16x1xf32> -> vector<16x1xf32>
    %cst_98 = arith.constant 3.906250e-03 : f32
    %161 = vector.broadcast %cst_98 : f32 to vector<16x1xf32>
    %162 = arith.mulf %160, %161 : vector<16x1xf32>
    %cst_99 = arith.constant dense<0.000000e+00> : vector<2x1xf32>
    %163 = tpu.matmul %154, %162, %cst_99 {dimension_numbers = #tpu.dot_dimension_numbers<[1], [0], [0], [1], [0, 0, 1, 1], [], []>} : vector<2x16xf32>, vector<16x1xf32>, vector<2x1xf32> -> vector<2x1xf32>
    %164 = arith.addf %163, %155 : vector<2x1xf32>
    %cst_100 = arith.constant 5.000000e-01 : f32
    %165 = vector.broadcast %cst_100 : f32 to vector<2x1xf32>
    %166 = arith.mulf %165, %164 : vector<2x1xf32>
    %cst_101 = arith.constant 0.707106769 : f32
    %167 = vector.broadcast %cst_101 : f32 to vector<2x1xf32>
    %168 = arith.mulf %164, %167 : vector<2x1xf32>
    %169 = math.erf %168 : vector<2x1xf32>
    %cst_102 = arith.constant 1.000000e+00 : f32
    %170 = vector.broadcast %cst_102 : f32 to vector<2x1xf32>
    %171 = arith.addf %170, %169 : vector<2x1xf32>
    %172 = arith.mulf %166, %171 : vector<2x1xf32>
    %cst_103 = arith.constant dense<0.000000e+00> : vector<4x1xf32>
    %173 = tpu.matmul %156, %172, %cst_103 {dimension_numbers = #tpu.dot_dimension_numbers<[1], [0], [0], [1], [0, 0, 1, 1], [], []>} : vector<4x2xf32>, vector<2x1xf32>, vector<4x1xf32> -> vector<4x1xf32>
    %174 = arith.addf %173, %157 : vector<4x1xf32>
    %175 = arith.negf %174 : vector<4x1xf32>
    %176 = math.exp %175 : vector<4x1xf32>
    %cst_104 = arith.constant 1.000000e+00 : f32
    %177 = vector.broadcast %cst_104 : f32 to vector<4x1xf32>
    %178 = arith.addf %177, %176 : vector<4x1xf32>
    %179 = arith.divf %177, %178 : vector<4x1xf32>
    %cst_105 = arith.constant dense<0.000000e+00> : vector<400x1xf32>
    %180 = tpu.matmul %158, %179, %cst_105 {dimension_numbers = #tpu.dot_dimension_numbers<[1], [0], [0], [1], [0, 0, 1, 1], [], []>} : vector<400x4xf32>, vector<4x1xf32>, vector<400x1xf32> -> vector<400x1xf32>
    %cst_106 = arith.constant dense<0.000000e+00> : vector<16x1xf32>
    %181 = tpu.matmul %159, %179, %cst_106 {dimension_numbers = #tpu.dot_dimension_numbers<[1], [0], [0], [1], [0, 0, 1, 1], [], []>} : vector<16x4xf32>, vector<4x1xf32>, vector<16x1xf32> -> vector<16x1xf32>
    %c34_i32 = arith.constant 34 : i32
    %182 = tpu.dynamic_rotate %153 by %c34_i32 dim 1 : vector<16x256xf32>, i32 -> vector<16x256xf32>
    %c0_107 = arith.constant 0 : index
    %c0_108 = arith.constant 0 : index
    %c0_109 = arith.constant 0 : index
    %183 = vector.load %arg5[%c0_107, %c0_108, %c0_109] : memref<25x1x256xf32, #tpu.memory_space<vmem>>, vector<1x1x256xf32>
    %184 = vector.shape_cast %183 : vector<1x1x256xf32> to vector<1x256xf32>
    %185 = vector.broadcast %184 : vector<1x256xf32> to vector<16x256xf32>
    %186 = arith.mulf %182, %185 : vector<16x256xf32>
    %187 = vector.extract_strided_slice %180 {offsets = [0, 0], sizes = [16, 1], strides = [1, 1]} : vector<400x1xf32> to vector<16x1xf32>
    %188 = vector.broadcast %187 : vector<16x1xf32> to vector<16x256xf32>
    %189 = arith.mulf %186, %188 : vector<16x256xf32>
    %c33_i32 = arith.constant 33 : i32
    %190 = tpu.dynamic_rotate %153 by %c33_i32 dim 1 : vector<16x256xf32>, i32 -> vector<16x256xf32>
    %c1_110 = arith.constant 1 : index
    %c0_111 = arith.constant 0 : index
    %c0_112 = arith.constant 0 : index
    %191 = vector.load %arg5[%c1_110, %c0_111, %c0_112] : memref<25x1x256xf32, #tpu.memory_space<vmem>>, vector<1x1x256xf32>
    %192 = vector.shape_cast %191 : vector<1x1x256xf32> to vector<1x256xf32>
    %193 = vector.broadcast %192 : vector<1x256xf32> to vector<16x256xf32>
    %194 = arith.mulf %190, %193 : vector<16x256xf32>
    %195 = vector.extract_strided_slice %180 {offsets = [16, 0], sizes = [16, 1], strides = [1, 1]} : vector<400x1xf32> to vector<16x1xf32>
    %196 = vector.broadcast %195 : vector<16x1xf32> to vector<16x256xf32>
    %197 = arith.mulf %194, %196 : vector<16x256xf32>
    %198 = arith.addf %189, %197 : vector<16x256xf32>
    %c32_i32 = arith.constant 32 : i32
    %199 = tpu.dynamic_rotate %153 by %c32_i32 dim 1 : vector<16x256xf32>, i32 -> vector<16x256xf32>
    %c2_113 = arith.constant 2 : index
    %c0_114 = arith.constant 0 : index
    %c0_115 = arith.constant 0 : index
    %200 = vector.load %arg5[%c2_113, %c0_114, %c0_115] : memref<25x1x256xf32, #tpu.memory_space<vmem>>, vector<1x1x256xf32>
    %201 = vector.shape_cast %200 : vector<1x1x256xf32> to vector<1x256xf32>
    %202 = vector.broadcast %201 : vector<1x256xf32> to vector<16x256xf32>
    %203 = arith.mulf %199, %202 : vector<16x256xf32>
    %204 = vector.extract_strided_slice %180 {offsets = [32, 0], sizes = [16, 1], strides = [1, 1]} : vector<400x1xf32> to vector<16x1xf32>
    %205 = vector.broadcast %204 : vector<16x1xf32> to vector<16x256xf32>
    %206 = arith.mulf %203, %205 : vector<16x256xf32>
    %207 = arith.addf %198, %206 : vector<16x256xf32>
    %c31_i32 = arith.constant 31 : i32
    %208 = tpu.dynamic_rotate %153 by %c31_i32 dim 1 : vector<16x256xf32>, i32 -> vector<16x256xf32>
    %c3_116 = arith.constant 3 : index
    %c0_117 = arith.constant 0 : index
    %c0_118 = arith.constant 0 : index
    %209 = vector.load %arg5[%c3_116, %c0_117, %c0_118] : memref<25x1x256xf32, #tpu.memory_space<vmem>>, vector<1x1x256xf32>
    %210 = vector.shape_cast %209 : vector<1x1x256xf32> to vector<1x256xf32>
    %211 = vector.broadcast %210 : vector<1x256xf32> to vector<16x256xf32>
    %212 = arith.mulf %208, %211 : vector<16x256xf32>
    %213 = vector.extract_strided_slice %180 {offsets = [48, 0], sizes = [16, 1], strides = [1, 1]} : vector<400x1xf32> to vector<16x1xf32>
    %214 = vector.broadcast %213 : vector<16x1xf32> to vector<16x256xf32>
    %215 = arith.mulf %212, %214 : vector<16x256xf32>
    %216 = arith.addf %207, %215 : vector<16x256xf32>
    %c30_i32 = arith.constant 30 : i32
    %217 = tpu.dynamic_rotate %153 by %c30_i32 dim 1 : vector<16x256xf32>, i32 -> vector<16x256xf32>
    %c4_119 = arith.constant 4 : index
    %c0_120 = arith.constant 0 : index
    %c0_121 = arith.constant 0 : index
    %218 = vector.load %arg5[%c4_119, %c0_120, %c0_121] : memref<25x1x256xf32, #tpu.memory_space<vmem>>, vector<1x1x256xf32>
    %219 = vector.shape_cast %218 : vector<1x1x256xf32> to vector<1x256xf32>
    %220 = vector.broadcast %219 : vector<1x256xf32> to vector<16x256xf32>
    %221 = arith.mulf %217, %220 : vector<16x256xf32>
    %222 = vector.extract_strided_slice %180 {offsets = [64, 0], sizes = [16, 1], strides = [1, 1]} : vector<400x1xf32> to vector<16x1xf32>
    %223 = vector.broadcast %222 : vector<16x1xf32> to vector<16x256xf32>
    %224 = arith.mulf %221, %223 : vector<16x256xf32>
    %225 = arith.addf %216, %224 : vector<16x256xf32>
    %c18_i32 = arith.constant 18 : i32
    %226 = tpu.dynamic_rotate %153 by %c18_i32 dim 1 : vector<16x256xf32>, i32 -> vector<16x256xf32>
    %c5_122 = arith.constant 5 : index
    %c0_123 = arith.constant 0 : index
    %c0_124 = arith.constant 0 : index
    %227 = vector.load %arg5[%c5_122, %c0_123, %c0_124] : memref<25x1x256xf32, #tpu.memory_space<vmem>>, vector<1x1x256xf32>
    %228 = vector.shape_cast %227 : vector<1x1x256xf32> to vector<1x256xf32>
    %229 = vector.broadcast %228 : vector<1x256xf32> to vector<16x256xf32>
    %230 = arith.mulf %226, %229 : vector<16x256xf32>
    %231 = vector.extract_strided_slice %180 {offsets = [80, 0], sizes = [16, 1], strides = [1, 1]} : vector<400x1xf32> to vector<16x1xf32>
    %232 = vector.broadcast %231 : vector<16x1xf32> to vector<16x256xf32>
    %233 = arith.mulf %230, %232 : vector<16x256xf32>
    %234 = arith.addf %225, %233 : vector<16x256xf32>
    %c17_i32_125 = arith.constant 17 : i32
    %235 = tpu.dynamic_rotate %153 by %c17_i32_125 dim 1 : vector<16x256xf32>, i32 -> vector<16x256xf32>
    %c6_126 = arith.constant 6 : index
    %c0_127 = arith.constant 0 : index
    %c0_128 = arith.constant 0 : index
    %236 = vector.load %arg5[%c6_126, %c0_127, %c0_128] : memref<25x1x256xf32, #tpu.memory_space<vmem>>, vector<1x1x256xf32>
    %237 = vector.shape_cast %236 : vector<1x1x256xf32> to vector<1x256xf32>
    %238 = vector.broadcast %237 : vector<1x256xf32> to vector<16x256xf32>
    %239 = arith.mulf %235, %238 : vector<16x256xf32>
    %240 = vector.extract_strided_slice %180 {offsets = [96, 0], sizes = [16, 1], strides = [1, 1]} : vector<400x1xf32> to vector<16x1xf32>
    %241 = vector.broadcast %240 : vector<16x1xf32> to vector<16x256xf32>
    %242 = arith.mulf %239, %241 : vector<16x256xf32>
    %243 = arith.addf %234, %242 : vector<16x256xf32>
    %c16_i32_129 = arith.constant 16 : i32
    %244 = tpu.dynamic_rotate %153 by %c16_i32_129 dim 1 : vector<16x256xf32>, i32 -> vector<16x256xf32>
    %c7_130 = arith.constant 7 : index
    %c0_131 = arith.constant 0 : index
    %c0_132 = arith.constant 0 : index
    %245 = vector.load %arg5[%c7_130, %c0_131, %c0_132] : memref<25x1x256xf32, #tpu.memory_space<vmem>>, vector<1x1x256xf32>
    %246 = vector.shape_cast %245 : vector<1x1x256xf32> to vector<1x256xf32>
    %247 = vector.broadcast %246 : vector<1x256xf32> to vector<16x256xf32>
    %248 = arith.mulf %244, %247 : vector<16x256xf32>
    %249 = vector.extract_strided_slice %180 {offsets = [112, 0], sizes = [16, 1], strides = [1, 1]} : vector<400x1xf32> to vector<16x1xf32>
    %250 = vector.broadcast %249 : vector<16x1xf32> to vector<16x256xf32>
    %251 = arith.mulf %248, %250 : vector<16x256xf32>
    %252 = arith.addf %243, %251 : vector<16x256xf32>
    %c15_i32_133 = arith.constant 15 : i32
    %253 = tpu.dynamic_rotate %153 by %c15_i32_133 dim 1 : vector<16x256xf32>, i32 -> vector<16x256xf32>
    %c8_134 = arith.constant 8 : index
    %c0_135 = arith.constant 0 : index
    %c0_136 = arith.constant 0 : index
    %254 = vector.load %arg5[%c8_134, %c0_135, %c0_136] : memref<25x1x256xf32, #tpu.memory_space<vmem>>, vector<1x1x256xf32>
    %255 = vector.shape_cast %254 : vector<1x1x256xf32> to vector<1x256xf32>
    %256 = vector.broadcast %255 : vector<1x256xf32> to vector<16x256xf32>
    %257 = arith.mulf %253, %256 : vector<16x256xf32>
    %258 = vector.extract_strided_slice %180 {offsets = [128, 0], sizes = [16, 1], strides = [1, 1]} : vector<400x1xf32> to vector<16x1xf32>
    %259 = vector.broadcast %258 : vector<16x1xf32> to vector<16x256xf32>
    %260 = arith.mulf %257, %259 : vector<16x256xf32>
    %261 = arith.addf %252, %260 : vector<16x256xf32>
    %c14_i32 = arith.constant 14 : i32
    %262 = tpu.dynamic_rotate %153 by %c14_i32 dim 1 : vector<16x256xf32>, i32 -> vector<16x256xf32>
    %c9 = arith.constant 9 : index
    %c0_137 = arith.constant 0 : index
    %c0_138 = arith.constant 0 : index
    %263 = vector.load %arg5[%c9, %c0_137, %c0_138] : memref<25x1x256xf32, #tpu.memory_space<vmem>>, vector<1x1x256xf32>
    %264 = vector.shape_cast %263 : vector<1x1x256xf32> to vector<1x256xf32>
    %265 = vector.broadcast %264 : vector<1x256xf32> to vector<16x256xf32>
    %266 = arith.mulf %262, %265 : vector<16x256xf32>
    %267 = vector.extract_strided_slice %180 {offsets = [144, 0], sizes = [16, 1], strides = [1, 1]} : vector<400x1xf32> to vector<16x1xf32>
    %268 = vector.broadcast %267 : vector<16x1xf32> to vector<16x256xf32>
    %269 = arith.mulf %266, %268 : vector<16x256xf32>
    %270 = arith.addf %261, %269 : vector<16x256xf32>
    %c2_i32 = arith.constant 2 : i32
    %271 = tpu.dynamic_rotate %153 by %c2_i32 dim 1 : vector<16x256xf32>, i32 -> vector<16x256xf32>
    %c10 = arith.constant 10 : index
    %c0_139 = arith.constant 0 : index
    %c0_140 = arith.constant 0 : index
    %272 = vector.load %arg5[%c10, %c0_139, %c0_140] : memref<25x1x256xf32, #tpu.memory_space<vmem>>, vector<1x1x256xf32>
    %273 = vector.shape_cast %272 : vector<1x1x256xf32> to vector<1x256xf32>
    %274 = vector.broadcast %273 : vector<1x256xf32> to vector<16x256xf32>
    %275 = arith.mulf %271, %274 : vector<16x256xf32>
    %276 = vector.extract_strided_slice %180 {offsets = [160, 0], sizes = [16, 1], strides = [1, 1]} : vector<400x1xf32> to vector<16x1xf32>
    %277 = vector.broadcast %276 : vector<16x1xf32> to vector<16x256xf32>
    %278 = arith.mulf %275, %277 : vector<16x256xf32>
    %279 = arith.addf %270, %278 : vector<16x256xf32>
    %c1_i32_141 = arith.constant 1 : i32
    %280 = tpu.dynamic_rotate %153 by %c1_i32_141 dim 1 : vector<16x256xf32>, i32 -> vector<16x256xf32>
    %c11 = arith.constant 11 : index
    %c0_142 = arith.constant 0 : index
    %c0_143 = arith.constant 0 : index
    %281 = vector.load %arg5[%c11, %c0_142, %c0_143] : memref<25x1x256xf32, #tpu.memory_space<vmem>>, vector<1x1x256xf32>
    %282 = vector.shape_cast %281 : vector<1x1x256xf32> to vector<1x256xf32>
    %283 = vector.broadcast %282 : vector<1x256xf32> to vector<16x256xf32>
    %284 = arith.mulf %280, %283 : vector<16x256xf32>
    %285 = vector.extract_strided_slice %180 {offsets = [176, 0], sizes = [16, 1], strides = [1, 1]} : vector<400x1xf32> to vector<16x1xf32>
    %286 = vector.broadcast %285 : vector<16x1xf32> to vector<16x256xf32>
    %287 = arith.mulf %284, %286 : vector<16x256xf32>
    %288 = arith.addf %279, %287 : vector<16x256xf32>
    %289 = vector.extract_strided_slice %180 {offsets = [192, 0], sizes = [16, 1], strides = [1, 1]} : vector<400x1xf32> to vector<16x1xf32>
    %290 = vector.broadcast %289 : vector<16x1xf32> to vector<16x256xf32>
    %291 = arith.mulf %153, %290 : vector<16x256xf32>
    %292 = arith.addf %288, %291 : vector<16x256xf32>
    %c255_i32_144 = arith.constant 255 : i32
    %293 = tpu.dynamic_rotate %153 by %c255_i32_144 dim 1 : vector<16x256xf32>, i32 -> vector<16x256xf32>
    %c13 = arith.constant 13 : index
    %c0_145 = arith.constant 0 : index
    %c0_146 = arith.constant 0 : index
    %294 = vector.load %arg5[%c13, %c0_145, %c0_146] : memref<25x1x256xf32, #tpu.memory_space<vmem>>, vector<1x1x256xf32>
    %295 = vector.shape_cast %294 : vector<1x1x256xf32> to vector<1x256xf32>
    %296 = vector.broadcast %295 : vector<1x256xf32> to vector<16x256xf32>
    %297 = arith.mulf %293, %296 : vector<16x256xf32>
    %298 = vector.extract_strided_slice %180 {offsets = [208, 0], sizes = [16, 1], strides = [1, 1]} : vector<400x1xf32> to vector<16x1xf32>
    %299 = vector.broadcast %298 : vector<16x1xf32> to vector<16x256xf32>
    %300 = arith.mulf %297, %299 : vector<16x256xf32>
    %301 = arith.addf %292, %300 : vector<16x256xf32>
    %c254_i32 = arith.constant 254 : i32
    %302 = tpu.dynamic_rotate %153 by %c254_i32 dim 1 : vector<16x256xf32>, i32 -> vector<16x256xf32>
    %c14 = arith.constant 14 : index
    %c0_147 = arith.constant 0 : index
    %c0_148 = arith.constant 0 : index
    %303 = vector.load %arg5[%c14, %c0_147, %c0_148] : memref<25x1x256xf32, #tpu.memory_space<vmem>>, vector<1x1x256xf32>
    %304 = vector.shape_cast %303 : vector<1x1x256xf32> to vector<1x256xf32>
    %305 = vector.broadcast %304 : vector<1x256xf32> to vector<16x256xf32>
    %306 = arith.mulf %302, %305 : vector<16x256xf32>
    %307 = vector.extract_strided_slice %180 {offsets = [224, 0], sizes = [16, 1], strides = [1, 1]} : vector<400x1xf32> to vector<16x1xf32>
    %308 = vector.broadcast %307 : vector<16x1xf32> to vector<16x256xf32>
    %309 = arith.mulf %306, %308 : vector<16x256xf32>
    %310 = arith.addf %301, %309 : vector<16x256xf32>
    %c242_i32 = arith.constant 242 : i32
    %311 = tpu.dynamic_rotate %153 by %c242_i32 dim 1 : vector<16x256xf32>, i32 -> vector<16x256xf32>
    %c15 = arith.constant 15 : index
    %c0_149 = arith.constant 0 : index
    %c0_150 = arith.constant 0 : index
    %312 = vector.load %arg5[%c15, %c0_149, %c0_150] : memref<25x1x256xf32, #tpu.memory_space<vmem>>, vector<1x1x256xf32>
    %313 = vector.shape_cast %312 : vector<1x1x256xf32> to vector<1x256xf32>
    %314 = vector.broadcast %313 : vector<1x256xf32> to vector<16x256xf32>
    %315 = arith.mulf %311, %314 : vector<16x256xf32>
    %316 = vector.extract_strided_slice %180 {offsets = [240, 0], sizes = [16, 1], strides = [1, 1]} : vector<400x1xf32> to vector<16x1xf32>
    %317 = vector.broadcast %316 : vector<16x1xf32> to vector<16x256xf32>
    %318 = arith.mulf %315, %317 : vector<16x256xf32>
    %319 = arith.addf %310, %318 : vector<16x256xf32>
    %c241_i32_151 = arith.constant 241 : i32
    %320 = tpu.dynamic_rotate %153 by %c241_i32_151 dim 1 : vector<16x256xf32>, i32 -> vector<16x256xf32>
    %c16 = arith.constant 16 : index
    %c0_152 = arith.constant 0 : index
    %c0_153 = arith.constant 0 : index
    %321 = vector.load %arg5[%c16, %c0_152, %c0_153] : memref<25x1x256xf32, #tpu.memory_space<vmem>>, vector<1x1x256xf32>
    %322 = vector.shape_cast %321 : vector<1x1x256xf32> to vector<1x256xf32>
    %323 = vector.broadcast %322 : vector<1x256xf32> to vector<16x256xf32>
    %324 = arith.mulf %320, %323 : vector<16x256xf32>
    %325 = vector.extract_strided_slice %180 {offsets = [256, 0], sizes = [16, 1], strides = [1, 1]} : vector<400x1xf32> to vector<16x1xf32>
    %326 = vector.broadcast %325 : vector<16x1xf32> to vector<16x256xf32>
    %327 = arith.mulf %324, %326 : vector<16x256xf32>
    %328 = arith.addf %319, %327 : vector<16x256xf32>
    %c240_i32_154 = arith.constant 240 : i32
    %329 = tpu.dynamic_rotate %153 by %c240_i32_154 dim 1 : vector<16x256xf32>, i32 -> vector<16x256xf32>
    %c17 = arith.constant 17 : index
    %c0_155 = arith.constant 0 : index
    %c0_156 = arith.constant 0 : index
    %330 = vector.load %arg5[%c17, %c0_155, %c0_156] : memref<25x1x256xf32, #tpu.memory_space<vmem>>, vector<1x1x256xf32>
    %331 = vector.shape_cast %330 : vector<1x1x256xf32> to vector<1x256xf32>
    %332 = vector.broadcast %331 : vector<1x256xf32> to vector<16x256xf32>
    %333 = arith.mulf %329, %332 : vector<16x256xf32>
    %334 = vector.extract_strided_slice %180 {offsets = [272, 0], sizes = [16, 1], strides = [1, 1]} : vector<400x1xf32> to vector<16x1xf32>
    %335 = vector.broadcast %334 : vector<16x1xf32> to vector<16x256xf32>
    %336 = arith.mulf %333, %335 : vector<16x256xf32>
    %337 = arith.addf %328, %336 : vector<16x256xf32>
    %c239_i32_157 = arith.constant 239 : i32
    %338 = tpu.dynamic_rotate %153 by %c239_i32_157 dim 1 : vector<16x256xf32>, i32 -> vector<16x256xf32>
    %c18 = arith.constant 18 : index
    %c0_158 = arith.constant 0 : index
    %c0_159 = arith.constant 0 : index
    %339 = vector.load %arg5[%c18, %c0_158, %c0_159] : memref<25x1x256xf32, #tpu.memory_space<vmem>>, vector<1x1x256xf32>
    %340 = vector.shape_cast %339 : vector<1x1x256xf32> to vector<1x256xf32>
    %341 = vector.broadcast %340 : vector<1x256xf32> to vector<16x256xf32>
    %342 = arith.mulf %338, %341 : vector<16x256xf32>
    %343 = vector.extract_strided_slice %180 {offsets = [288, 0], sizes = [16, 1], strides = [1, 1]} : vector<400x1xf32> to vector<16x1xf32>
    %344 = vector.broadcast %343 : vector<16x1xf32> to vector<16x256xf32>
    %345 = arith.mulf %342, %344 : vector<16x256xf32>
    %346 = arith.addf %337, %345 : vector<16x256xf32>
    %c238_i32 = arith.constant 238 : i32
    %347 = tpu.dynamic_rotate %153 by %c238_i32 dim 1 : vector<16x256xf32>, i32 -> vector<16x256xf32>
    %c19 = arith.constant 19 : index
    %c0_160 = arith.constant 0 : index
    %c0_161 = arith.constant 0 : index
    %348 = vector.load %arg5[%c19, %c0_160, %c0_161] : memref<25x1x256xf32, #tpu.memory_space<vmem>>, vector<1x1x256xf32>
    %349 = vector.shape_cast %348 : vector<1x1x256xf32> to vector<1x256xf32>
    %350 = vector.broadcast %349 : vector<1x256xf32> to vector<16x256xf32>
    %351 = arith.mulf %347, %350 : vector<16x256xf32>
    %352 = vector.extract_strided_slice %180 {offsets = [304, 0], sizes = [16, 1], strides = [1, 1]} : vector<400x1xf32> to vector<16x1xf32>
    %353 = vector.broadcast %352 : vector<16x1xf32> to vector<16x256xf32>
    %354 = arith.mulf %351, %353 : vector<16x256xf32>
    %355 = arith.addf %346, %354 : vector<16x256xf32>
    %c226_i32 = arith.constant 226 : i32
    %356 = tpu.dynamic_rotate %153 by %c226_i32 dim 1 : vector<16x256xf32>, i32 -> vector<16x256xf32>
    %c20 = arith.constant 20 : index
    %c0_162 = arith.constant 0 : index
    %c0_163 = arith.constant 0 : index
    %357 = vector.load %arg5[%c20, %c0_162, %c0_163] : memref<25x1x256xf32, #tpu.memory_space<vmem>>, vector<1x1x256xf32>
    %358 = vector.shape_cast %357 : vector<1x1x256xf32> to vector<1x256xf32>
    %359 = vector.broadcast %358 : vector<1x256xf32> to vector<16x256xf32>
    %360 = arith.mulf %356, %359 : vector<16x256xf32>
    %361 = vector.extract_strided_slice %180 {offsets = [320, 0], sizes = [16, 1], strides = [1, 1]} : vector<400x1xf32> to vector<16x1xf32>
    %362 = vector.broadcast %361 : vector<16x1xf32> to vector<16x256xf32>
    %363 = arith.mulf %360, %362 : vector<16x256xf32>
    %364 = arith.addf %355, %363 : vector<16x256xf32>
    %c225_i32 = arith.constant 225 : i32
    %365 = tpu.dynamic_rotate %153 by %c225_i32 dim 1 : vector<16x256xf32>, i32 -> vector<16x256xf32>
    %c21 = arith.constant 21 : index
    %c0_164 = arith.constant 0 : index
    %c0_165 = arith.constant 0 : index
    %366 = vector.load %arg5[%c21, %c0_164, %c0_165] : memref<25x1x256xf32, #tpu.memory_space<vmem>>, vector<1x1x256xf32>
    %367 = vector.shape_cast %366 : vector<1x1x256xf32> to vector<1x256xf32>
    %368 = vector.broadcast %367 : vector<1x256xf32> to vector<16x256xf32>
    %369 = arith.mulf %365, %368 : vector<16x256xf32>
    %370 = vector.extract_strided_slice %180 {offsets = [336, 0], sizes = [16, 1], strides = [1, 1]} : vector<400x1xf32> to vector<16x1xf32>
    %371 = vector.broadcast %370 : vector<16x1xf32> to vector<16x256xf32>
    %372 = arith.mulf %369, %371 : vector<16x256xf32>
    %373 = arith.addf %364, %372 : vector<16x256xf32>
    %c224_i32 = arith.constant 224 : i32
    %374 = tpu.dynamic_rotate %153 by %c224_i32 dim 1 : vector<16x256xf32>, i32 -> vector<16x256xf32>
    %c22 = arith.constant 22 : index
    %c0_166 = arith.constant 0 : index
    %c0_167 = arith.constant 0 : index
    %375 = vector.load %arg5[%c22, %c0_166, %c0_167] : memref<25x1x256xf32, #tpu.memory_space<vmem>>, vector<1x1x256xf32>
    %376 = vector.shape_cast %375 : vector<1x1x256xf32> to vector<1x256xf32>
    %377 = vector.broadcast %376 : vector<1x256xf32> to vector<16x256xf32>
    %378 = arith.mulf %374, %377 : vector<16x256xf32>
    %379 = vector.extract_strided_slice %180 {offsets = [352, 0], sizes = [16, 1], strides = [1, 1]} : vector<400x1xf32> to vector<16x1xf32>
    %380 = vector.broadcast %379 : vector<16x1xf32> to vector<16x256xf32>
    %381 = arith.mulf %378, %380 : vector<16x256xf32>
    %382 = arith.addf %373, %381 : vector<16x256xf32>
    %c223_i32 = arith.constant 223 : i32
    %383 = tpu.dynamic_rotate %153 by %c223_i32 dim 1 : vector<16x256xf32>, i32 -> vector<16x256xf32>
    %c23 = arith.constant 23 : index
    %c0_168 = arith.constant 0 : index
    %c0_169 = arith.constant 0 : index
    %384 = vector.load %arg5[%c23, %c0_168, %c0_169] : memref<25x1x256xf32, #tpu.memory_space<vmem>>, vector<1x1x256xf32>
    %385 = vector.shape_cast %384 : vector<1x1x256xf32> to vector<1x256xf32>
    %386 = vector.broadcast %385 : vector<1x256xf32> to vector<16x256xf32>
    %387 = arith.mulf %383, %386 : vector<16x256xf32>
    %388 = vector.extract_strided_slice %180 {offsets = [368, 0], sizes = [16, 1], strides = [1, 1]} : vector<400x1xf32> to vector<16x1xf32>
    %389 = vector.broadcast %388 : vector<16x1xf32> to vector<16x256xf32>
    %390 = arith.mulf %387, %389 : vector<16x256xf32>
    %391 = arith.addf %382, %390 : vector<16x256xf32>
    %c222_i32 = arith.constant 222 : i32
    %392 = tpu.dynamic_rotate %153 by %c222_i32 dim 1 : vector<16x256xf32>, i32 -> vector<16x256xf32>
    %c24 = arith.constant 24 : index
    %c0_170 = arith.constant 0 : index
    %c0_171 = arith.constant 0 : index
    %393 = vector.load %arg5[%c24, %c0_170, %c0_171] : memref<25x1x256xf32, #tpu.memory_space<vmem>>, vector<1x1x256xf32>
    %394 = vector.shape_cast %393 : vector<1x1x256xf32> to vector<1x256xf32>
    %395 = vector.broadcast %394 : vector<1x256xf32> to vector<16x256xf32>
    %396 = arith.mulf %392, %395 : vector<16x256xf32>
    %397 = vector.extract_strided_slice %180 {offsets = [384, 0], sizes = [16, 1], strides = [1, 1]} : vector<400x1xf32> to vector<16x1xf32>
    %398 = vector.broadcast %397 : vector<16x1xf32> to vector<16x256xf32>
    %399 = arith.mulf %396, %398 : vector<16x256xf32>
    %400 = arith.addf %391, %399 : vector<16x256xf32>
    %401 = vector.broadcast %181 : vector<16x1xf32> to vector<16x256xf32>
    %402 = arith.addf %400, %401 : vector<16x256xf32>
    %cst_172 = arith.constant 5.000000e-01 : f32
    %403 = vector.broadcast %cst_172 : f32 to vector<16x256xf32>
    %404 = arith.mulf %403, %402 : vector<16x256xf32>
    %cst_173 = arith.constant 0.707106769 : f32
    %405 = vector.broadcast %cst_173 : f32 to vector<16x256xf32>
    %406 = arith.mulf %402, %405 : vector<16x256xf32>
    %407 = math.erf %406 : vector<16x256xf32>
    %cst_174 = arith.constant 1.000000e+00 : f32
    %408 = vector.broadcast %cst_174 : f32 to vector<16x256xf32>
    %409 = arith.addf %408, %407 : vector<16x256xf32>
    %410 = arith.mulf %404, %409 : vector<16x256xf32>
    %411 = vector.extract_strided_slice %152 {offsets = [16, 0], sizes = [16, 256], strides = [1, 1]} : vector<32x256xf32> to vector<16x256xf32>
    %c0_175 = arith.constant 0 : index
    %c0_176 = arith.constant 0 : index
    %412 = vector.load %arg24[%c0_175, %c0_176] : memref<2x16xf32, #tpu.memory_space<vmem>>, vector<2x16xf32>
    %c0_177 = arith.constant 0 : index
    %c0_178 = arith.constant 0 : index
    %413 = vector.load %arg25[%c0_177, %c0_178] : memref<2x1xf32, #tpu.memory_space<vmem>>, vector<2x1xf32>
    %c0_179 = arith.constant 0 : index
    %c0_180 = arith.constant 0 : index
    %414 = vector.load %arg26[%c0_179, %c0_180] : memref<4x2xf32, #tpu.memory_space<vmem>>, vector<4x2xf32>
    %c0_181 = arith.constant 0 : index
    %c0_182 = arith.constant 0 : index
    %415 = vector.load %arg27[%c0_181, %c0_182] : memref<4x1xf32, #tpu.memory_space<vmem>>, vector<4x1xf32>
    %c0_183 = arith.constant 0 : index
    %c0_184 = arith.constant 0 : index
    %416 = vector.load %arg28[%c0_183, %c0_184] : memref<784x4xf32, #tpu.memory_space<vmem>>, vector<784x4xf32>
    %c0_185 = arith.constant 0 : index
    %c0_186 = arith.constant 0 : index
    %417 = vector.load %arg29[%c0_185, %c0_186] : memref<16x4xf32, #tpu.memory_space<vmem>>, vector<16x4xf32>
    %cst_187 = arith.constant dense<0.000000e+00> : vector<16x1xf32>
    %418 = tpu.matmul %411, %107, %cst_187 {dimension_numbers = #tpu.dot_dimension_numbers<[1], [0], [0], [1], [0, 0, 1, 1], [], []>} : vector<16x256xf32>, vector<256x1xf32>, vector<16x1xf32> -> vector<16x1xf32>
    %cst_188 = arith.constant 3.906250e-03 : f32
    %419 = vector.broadcast %cst_188 : f32 to vector<16x1xf32>
    %420 = arith.mulf %418, %419 : vector<16x1xf32>
    %cst_189 = arith.constant dense<0.000000e+00> : vector<2x1xf32>
    %421 = tpu.matmul %412, %420, %cst_189 {dimension_numbers = #tpu.dot_dimension_numbers<[1], [0], [0], [1], [0, 0, 1, 1], [], []>} : vector<2x16xf32>, vector<16x1xf32>, vector<2x1xf32> -> vector<2x1xf32>
    %422 = arith.addf %421, %413 : vector<2x1xf32>
    %cst_190 = arith.constant 5.000000e-01 : f32
    %423 = vector.broadcast %cst_190 : f32 to vector<2x1xf32>
    %424 = arith.mulf %423, %422 : vector<2x1xf32>
    %cst_191 = arith.constant 0.707106769 : f32
    %425 = vector.broadcast %cst_191 : f32 to vector<2x1xf32>
    %426 = arith.mulf %422, %425 : vector<2x1xf32>
    %427 = math.erf %426 : vector<2x1xf32>
    %cst_192 = arith.constant 1.000000e+00 : f32
    %428 = vector.broadcast %cst_192 : f32 to vector<2x1xf32>
    %429 = arith.addf %428, %427 : vector<2x1xf32>
    %430 = arith.mulf %424, %429 : vector<2x1xf32>
    %cst_193 = arith.constant dense<0.000000e+00> : vector<4x1xf32>
    %431 = tpu.matmul %414, %430, %cst_193 {dimension_numbers = #tpu.dot_dimension_numbers<[1], [0], [0], [1], [0, 0, 1, 1], [], []>} : vector<4x2xf32>, vector<2x1xf32>, vector<4x1xf32> -> vector<4x1xf32>
    %432 = arith.addf %431, %415 : vector<4x1xf32>
    %433 = arith.negf %432 : vector<4x1xf32>
    %434 = math.exp %433 : vector<4x1xf32>
    %cst_194 = arith.constant 1.000000e+00 : f32
    %435 = vector.broadcast %cst_194 : f32 to vector<4x1xf32>
    %436 = arith.addf %435, %434 : vector<4x1xf32>
    %437 = arith.divf %435, %436 : vector<4x1xf32>
    %cst_195 = arith.constant dense<0.000000e+00> : vector<784x1xf32>
    %438 = tpu.matmul %416, %437, %cst_195 {dimension_numbers = #tpu.dot_dimension_numbers<[1], [0], [0], [1], [0, 0, 1, 1], [], []>} : vector<784x4xf32>, vector<4x1xf32>, vector<784x1xf32> -> vector<784x1xf32>
    %cst_196 = arith.constant dense<0.000000e+00> : vector<16x1xf32>
    %439 = tpu.matmul %417, %437, %cst_196 {dimension_numbers = #tpu.dot_dimension_numbers<[1], [0], [0], [1], [0, 0, 1, 1], [], []>} : vector<16x4xf32>, vector<4x1xf32>, vector<16x1xf32> -> vector<16x1xf32>
    %c51_i32 = arith.constant 51 : i32
    %440 = tpu.dynamic_rotate %411 by %c51_i32 dim 1 : vector<16x256xf32>, i32 -> vector<16x256xf32>
    %c0_197 = arith.constant 0 : index
    %c0_198 = arith.constant 0 : index
    %c0_199 = arith.constant 0 : index
    %441 = vector.load %arg6[%c0_197, %c0_198, %c0_199] : memref<49x1x256xf32, #tpu.memory_space<vmem>>, vector<1x1x256xf32>
    %442 = vector.shape_cast %441 : vector<1x1x256xf32> to vector<1x256xf32>
    %443 = vector.broadcast %442 : vector<1x256xf32> to vector<16x256xf32>
    %444 = arith.mulf %440, %443 : vector<16x256xf32>
    %445 = vector.extract_strided_slice %438 {offsets = [0, 0], sizes = [16, 1], strides = [1, 1]} : vector<784x1xf32> to vector<16x1xf32>
    %446 = vector.broadcast %445 : vector<16x1xf32> to vector<16x256xf32>
    %447 = arith.mulf %444, %446 : vector<16x256xf32>
    %c50_i32 = arith.constant 50 : i32
    %448 = tpu.dynamic_rotate %411 by %c50_i32 dim 1 : vector<16x256xf32>, i32 -> vector<16x256xf32>
    %c1_200 = arith.constant 1 : index
    %c0_201 = arith.constant 0 : index
    %c0_202 = arith.constant 0 : index
    %449 = vector.load %arg6[%c1_200, %c0_201, %c0_202] : memref<49x1x256xf32, #tpu.memory_space<vmem>>, vector<1x1x256xf32>
    %450 = vector.shape_cast %449 : vector<1x1x256xf32> to vector<1x256xf32>
    %451 = vector.broadcast %450 : vector<1x256xf32> to vector<16x256xf32>
    %452 = arith.mulf %448, %451 : vector<16x256xf32>
    %453 = vector.extract_strided_slice %438 {offsets = [16, 0], sizes = [16, 1], strides = [1, 1]} : vector<784x1xf32> to vector<16x1xf32>
    %454 = vector.broadcast %453 : vector<16x1xf32> to vector<16x256xf32>
    %455 = arith.mulf %452, %454 : vector<16x256xf32>
    %456 = arith.addf %447, %455 : vector<16x256xf32>
    %c49_i32 = arith.constant 49 : i32
    %457 = tpu.dynamic_rotate %411 by %c49_i32 dim 1 : vector<16x256xf32>, i32 -> vector<16x256xf32>
    %c2_203 = arith.constant 2 : index
    %c0_204 = arith.constant 0 : index
    %c0_205 = arith.constant 0 : index
    %458 = vector.load %arg6[%c2_203, %c0_204, %c0_205] : memref<49x1x256xf32, #tpu.memory_space<vmem>>, vector<1x1x256xf32>
    %459 = vector.shape_cast %458 : vector<1x1x256xf32> to vector<1x256xf32>
    %460 = vector.broadcast %459 : vector<1x256xf32> to vector<16x256xf32>
    %461 = arith.mulf %457, %460 : vector<16x256xf32>
    %462 = vector.extract_strided_slice %438 {offsets = [32, 0], sizes = [16, 1], strides = [1, 1]} : vector<784x1xf32> to vector<16x1xf32>
    %463 = vector.broadcast %462 : vector<16x1xf32> to vector<16x256xf32>
    %464 = arith.mulf %461, %463 : vector<16x256xf32>
    %465 = arith.addf %456, %464 : vector<16x256xf32>
    %c48_i32 = arith.constant 48 : i32
    %466 = tpu.dynamic_rotate %411 by %c48_i32 dim 1 : vector<16x256xf32>, i32 -> vector<16x256xf32>
    %c3_206 = arith.constant 3 : index
    %c0_207 = arith.constant 0 : index
    %c0_208 = arith.constant 0 : index
    %467 = vector.load %arg6[%c3_206, %c0_207, %c0_208] : memref<49x1x256xf32, #tpu.memory_space<vmem>>, vector<1x1x256xf32>
    %468 = vector.shape_cast %467 : vector<1x1x256xf32> to vector<1x256xf32>
    %469 = vector.broadcast %468 : vector<1x256xf32> to vector<16x256xf32>
    %470 = arith.mulf %466, %469 : vector<16x256xf32>
    %471 = vector.extract_strided_slice %438 {offsets = [48, 0], sizes = [16, 1], strides = [1, 1]} : vector<784x1xf32> to vector<16x1xf32>
    %472 = vector.broadcast %471 : vector<16x1xf32> to vector<16x256xf32>
    %473 = arith.mulf %470, %472 : vector<16x256xf32>
    %474 = arith.addf %465, %473 : vector<16x256xf32>
    %c47_i32 = arith.constant 47 : i32
    %475 = tpu.dynamic_rotate %411 by %c47_i32 dim 1 : vector<16x256xf32>, i32 -> vector<16x256xf32>
    %c4_209 = arith.constant 4 : index
    %c0_210 = arith.constant 0 : index
    %c0_211 = arith.constant 0 : index
    %476 = vector.load %arg6[%c4_209, %c0_210, %c0_211] : memref<49x1x256xf32, #tpu.memory_space<vmem>>, vector<1x1x256xf32>
    %477 = vector.shape_cast %476 : vector<1x1x256xf32> to vector<1x256xf32>
    %478 = vector.broadcast %477 : vector<1x256xf32> to vector<16x256xf32>
    %479 = arith.mulf %475, %478 : vector<16x256xf32>
    %480 = vector.extract_strided_slice %438 {offsets = [64, 0], sizes = [16, 1], strides = [1, 1]} : vector<784x1xf32> to vector<16x1xf32>
    %481 = vector.broadcast %480 : vector<16x1xf32> to vector<16x256xf32>
    %482 = arith.mulf %479, %481 : vector<16x256xf32>
    %483 = arith.addf %474, %482 : vector<16x256xf32>
    %c46_i32 = arith.constant 46 : i32
    %484 = tpu.dynamic_rotate %411 by %c46_i32 dim 1 : vector<16x256xf32>, i32 -> vector<16x256xf32>
    %c5_212 = arith.constant 5 : index
    %c0_213 = arith.constant 0 : index
    %c0_214 = arith.constant 0 : index
    %485 = vector.load %arg6[%c5_212, %c0_213, %c0_214] : memref<49x1x256xf32, #tpu.memory_space<vmem>>, vector<1x1x256xf32>
    %486 = vector.shape_cast %485 : vector<1x1x256xf32> to vector<1x256xf32>
    %487 = vector.broadcast %486 : vector<1x256xf32> to vector<16x256xf32>
    %488 = arith.mulf %484, %487 : vector<16x256xf32>
    %489 = vector.extract_strided_slice %438 {offsets = [80, 0], sizes = [16, 1], strides = [1, 1]} : vector<784x1xf32> to vector<16x1xf32>
    %490 = vector.broadcast %489 : vector<16x1xf32> to vector<16x256xf32>
    %491 = arith.mulf %488, %490 : vector<16x256xf32>
    %492 = arith.addf %483, %491 : vector<16x256xf32>
    %c45_i32 = arith.constant 45 : i32
    %493 = tpu.dynamic_rotate %411 by %c45_i32 dim 1 : vector<16x256xf32>, i32 -> vector<16x256xf32>
    %c6_215 = arith.constant 6 : index
    %c0_216 = arith.constant 0 : index
    %c0_217 = arith.constant 0 : index
    %494 = vector.load %arg6[%c6_215, %c0_216, %c0_217] : memref<49x1x256xf32, #tpu.memory_space<vmem>>, vector<1x1x256xf32>
    %495 = vector.shape_cast %494 : vector<1x1x256xf32> to vector<1x256xf32>
    %496 = vector.broadcast %495 : vector<1x256xf32> to vector<16x256xf32>
    %497 = arith.mulf %493, %496 : vector<16x256xf32>
    %498 = vector.extract_strided_slice %438 {offsets = [96, 0], sizes = [16, 1], strides = [1, 1]} : vector<784x1xf32> to vector<16x1xf32>
    %499 = vector.broadcast %498 : vector<16x1xf32> to vector<16x256xf32>
    %500 = arith.mulf %497, %499 : vector<16x256xf32>
    %501 = arith.addf %492, %500 : vector<16x256xf32>
    %c35_i32 = arith.constant 35 : i32
    %502 = tpu.dynamic_rotate %411 by %c35_i32 dim 1 : vector<16x256xf32>, i32 -> vector<16x256xf32>
    %c7_218 = arith.constant 7 : index
    %c0_219 = arith.constant 0 : index
    %c0_220 = arith.constant 0 : index
    %503 = vector.load %arg6[%c7_218, %c0_219, %c0_220] : memref<49x1x256xf32, #tpu.memory_space<vmem>>, vector<1x1x256xf32>
    %504 = vector.shape_cast %503 : vector<1x1x256xf32> to vector<1x256xf32>
    %505 = vector.broadcast %504 : vector<1x256xf32> to vector<16x256xf32>
    %506 = arith.mulf %502, %505 : vector<16x256xf32>
    %507 = vector.extract_strided_slice %438 {offsets = [112, 0], sizes = [16, 1], strides = [1, 1]} : vector<784x1xf32> to vector<16x1xf32>
    %508 = vector.broadcast %507 : vector<16x1xf32> to vector<16x256xf32>
    %509 = arith.mulf %506, %508 : vector<16x256xf32>
    %510 = arith.addf %501, %509 : vector<16x256xf32>
    %c34_i32_221 = arith.constant 34 : i32
    %511 = tpu.dynamic_rotate %411 by %c34_i32_221 dim 1 : vector<16x256xf32>, i32 -> vector<16x256xf32>
    %c8_222 = arith.constant 8 : index
    %c0_223 = arith.constant 0 : index
    %c0_224 = arith.constant 0 : index
    %512 = vector.load %arg6[%c8_222, %c0_223, %c0_224] : memref<49x1x256xf32, #tpu.memory_space<vmem>>, vector<1x1x256xf32>
    %513 = vector.shape_cast %512 : vector<1x1x256xf32> to vector<1x256xf32>
    %514 = vector.broadcast %513 : vector<1x256xf32> to vector<16x256xf32>
    %515 = arith.mulf %511, %514 : vector<16x256xf32>
    %516 = vector.extract_strided_slice %438 {offsets = [128, 0], sizes = [16, 1], strides = [1, 1]} : vector<784x1xf32> to vector<16x1xf32>
    %517 = vector.broadcast %516 : vector<16x1xf32> to vector<16x256xf32>
    %518 = arith.mulf %515, %517 : vector<16x256xf32>
    %519 = arith.addf %510, %518 : vector<16x256xf32>
    %c33_i32_225 = arith.constant 33 : i32
    %520 = tpu.dynamic_rotate %411 by %c33_i32_225 dim 1 : vector<16x256xf32>, i32 -> vector<16x256xf32>
    %c9_226 = arith.constant 9 : index
    %c0_227 = arith.constant 0 : index
    %c0_228 = arith.constant 0 : index
    %521 = vector.load %arg6[%c9_226, %c0_227, %c0_228] : memref<49x1x256xf32, #tpu.memory_space<vmem>>, vector<1x1x256xf32>
    %522 = vector.shape_cast %521 : vector<1x1x256xf32> to vector<1x256xf32>
    %523 = vector.broadcast %522 : vector<1x256xf32> to vector<16x256xf32>
    %524 = arith.mulf %520, %523 : vector<16x256xf32>
    %525 = vector.extract_strided_slice %438 {offsets = [144, 0], sizes = [16, 1], strides = [1, 1]} : vector<784x1xf32> to vector<16x1xf32>
    %526 = vector.broadcast %525 : vector<16x1xf32> to vector<16x256xf32>
    %527 = arith.mulf %524, %526 : vector<16x256xf32>
    %528 = arith.addf %519, %527 : vector<16x256xf32>
    %c32_i32_229 = arith.constant 32 : i32
    %529 = tpu.dynamic_rotate %411 by %c32_i32_229 dim 1 : vector<16x256xf32>, i32 -> vector<16x256xf32>
    %c10_230 = arith.constant 10 : index
    %c0_231 = arith.constant 0 : index
    %c0_232 = arith.constant 0 : index
    %530 = vector.load %arg6[%c10_230, %c0_231, %c0_232] : memref<49x1x256xf32, #tpu.memory_space<vmem>>, vector<1x1x256xf32>
    %531 = vector.shape_cast %530 : vector<1x1x256xf32> to vector<1x256xf32>
    %532 = vector.broadcast %531 : vector<1x256xf32> to vector<16x256xf32>
    %533 = arith.mulf %529, %532 : vector<16x256xf32>
    %534 = vector.extract_strided_slice %438 {offsets = [160, 0], sizes = [16, 1], strides = [1, 1]} : vector<784x1xf32> to vector<16x1xf32>
    %535 = vector.broadcast %534 : vector<16x1xf32> to vector<16x256xf32>
    %536 = arith.mulf %533, %535 : vector<16x256xf32>
    %537 = arith.addf %528, %536 : vector<16x256xf32>
    %c31_i32_233 = arith.constant 31 : i32
    %538 = tpu.dynamic_rotate %411 by %c31_i32_233 dim 1 : vector<16x256xf32>, i32 -> vector<16x256xf32>
    %c11_234 = arith.constant 11 : index
    %c0_235 = arith.constant 0 : index
    %c0_236 = arith.constant 0 : index
    %539 = vector.load %arg6[%c11_234, %c0_235, %c0_236] : memref<49x1x256xf32, #tpu.memory_space<vmem>>, vector<1x1x256xf32>
    %540 = vector.shape_cast %539 : vector<1x1x256xf32> to vector<1x256xf32>
    %541 = vector.broadcast %540 : vector<1x256xf32> to vector<16x256xf32>
    %542 = arith.mulf %538, %541 : vector<16x256xf32>
    %543 = vector.extract_strided_slice %438 {offsets = [176, 0], sizes = [16, 1], strides = [1, 1]} : vector<784x1xf32> to vector<16x1xf32>
    %544 = vector.broadcast %543 : vector<16x1xf32> to vector<16x256xf32>
    %545 = arith.mulf %542, %544 : vector<16x256xf32>
    %546 = arith.addf %537, %545 : vector<16x256xf32>
    %c30_i32_237 = arith.constant 30 : i32
    %547 = tpu.dynamic_rotate %411 by %c30_i32_237 dim 1 : vector<16x256xf32>, i32 -> vector<16x256xf32>
    %c12 = arith.constant 12 : index
    %c0_238 = arith.constant 0 : index
    %c0_239 = arith.constant 0 : index
    %548 = vector.load %arg6[%c12, %c0_238, %c0_239] : memref<49x1x256xf32, #tpu.memory_space<vmem>>, vector<1x1x256xf32>
    %549 = vector.shape_cast %548 : vector<1x1x256xf32> to vector<1x256xf32>
    %550 = vector.broadcast %549 : vector<1x256xf32> to vector<16x256xf32>
    %551 = arith.mulf %547, %550 : vector<16x256xf32>
    %552 = vector.extract_strided_slice %438 {offsets = [192, 0], sizes = [16, 1], strides = [1, 1]} : vector<784x1xf32> to vector<16x1xf32>
    %553 = vector.broadcast %552 : vector<16x1xf32> to vector<16x256xf32>
    %554 = arith.mulf %551, %553 : vector<16x256xf32>
    %555 = arith.addf %546, %554 : vector<16x256xf32>
    %c29_i32 = arith.constant 29 : i32
    %556 = tpu.dynamic_rotate %411 by %c29_i32 dim 1 : vector<16x256xf32>, i32 -> vector<16x256xf32>
    %c13_240 = arith.constant 13 : index
    %c0_241 = arith.constant 0 : index
    %c0_242 = arith.constant 0 : index
    %557 = vector.load %arg6[%c13_240, %c0_241, %c0_242] : memref<49x1x256xf32, #tpu.memory_space<vmem>>, vector<1x1x256xf32>
    %558 = vector.shape_cast %557 : vector<1x1x256xf32> to vector<1x256xf32>
    %559 = vector.broadcast %558 : vector<1x256xf32> to vector<16x256xf32>
    %560 = arith.mulf %556, %559 : vector<16x256xf32>
    %561 = vector.extract_strided_slice %438 {offsets = [208, 0], sizes = [16, 1], strides = [1, 1]} : vector<784x1xf32> to vector<16x1xf32>
    %562 = vector.broadcast %561 : vector<16x1xf32> to vector<16x256xf32>
    %563 = arith.mulf %560, %562 : vector<16x256xf32>
    %564 = arith.addf %555, %563 : vector<16x256xf32>
    %c19_i32 = arith.constant 19 : i32
    %565 = tpu.dynamic_rotate %411 by %c19_i32 dim 1 : vector<16x256xf32>, i32 -> vector<16x256xf32>
    %c14_243 = arith.constant 14 : index
    %c0_244 = arith.constant 0 : index
    %c0_245 = arith.constant 0 : index
    %566 = vector.load %arg6[%c14_243, %c0_244, %c0_245] : memref<49x1x256xf32, #tpu.memory_space<vmem>>, vector<1x1x256xf32>
    %567 = vector.shape_cast %566 : vector<1x1x256xf32> to vector<1x256xf32>
    %568 = vector.broadcast %567 : vector<1x256xf32> to vector<16x256xf32>
    %569 = arith.mulf %565, %568 : vector<16x256xf32>
    %570 = vector.extract_strided_slice %438 {offsets = [224, 0], sizes = [16, 1], strides = [1, 1]} : vector<784x1xf32> to vector<16x1xf32>
    %571 = vector.broadcast %570 : vector<16x1xf32> to vector<16x256xf32>
    %572 = arith.mulf %569, %571 : vector<16x256xf32>
    %573 = arith.addf %564, %572 : vector<16x256xf32>
    %c18_i32_246 = arith.constant 18 : i32
    %574 = tpu.dynamic_rotate %411 by %c18_i32_246 dim 1 : vector<16x256xf32>, i32 -> vector<16x256xf32>
    %c15_247 = arith.constant 15 : index
    %c0_248 = arith.constant 0 : index
    %c0_249 = arith.constant 0 : index
    %575 = vector.load %arg6[%c15_247, %c0_248, %c0_249] : memref<49x1x256xf32, #tpu.memory_space<vmem>>, vector<1x1x256xf32>
    %576 = vector.shape_cast %575 : vector<1x1x256xf32> to vector<1x256xf32>
    %577 = vector.broadcast %576 : vector<1x256xf32> to vector<16x256xf32>
    %578 = arith.mulf %574, %577 : vector<16x256xf32>
    %579 = vector.extract_strided_slice %438 {offsets = [240, 0], sizes = [16, 1], strides = [1, 1]} : vector<784x1xf32> to vector<16x1xf32>
    %580 = vector.broadcast %579 : vector<16x1xf32> to vector<16x256xf32>
    %581 = arith.mulf %578, %580 : vector<16x256xf32>
    %582 = arith.addf %573, %581 : vector<16x256xf32>
    %c17_i32_250 = arith.constant 17 : i32
    %583 = tpu.dynamic_rotate %411 by %c17_i32_250 dim 1 : vector<16x256xf32>, i32 -> vector<16x256xf32>
    %c16_251 = arith.constant 16 : index
    %c0_252 = arith.constant 0 : index
    %c0_253 = arith.constant 0 : index
    %584 = vector.load %arg6[%c16_251, %c0_252, %c0_253] : memref<49x1x256xf32, #tpu.memory_space<vmem>>, vector<1x1x256xf32>
    %585 = vector.shape_cast %584 : vector<1x1x256xf32> to vector<1x256xf32>
    %586 = vector.broadcast %585 : vector<1x256xf32> to vector<16x256xf32>
    %587 = arith.mulf %583, %586 : vector<16x256xf32>
    %588 = vector.extract_strided_slice %438 {offsets = [256, 0], sizes = [16, 1], strides = [1, 1]} : vector<784x1xf32> to vector<16x1xf32>
    %589 = vector.broadcast %588 : vector<16x1xf32> to vector<16x256xf32>
    %590 = arith.mulf %587, %589 : vector<16x256xf32>
    %591 = arith.addf %582, %590 : vector<16x256xf32>
    %c16_i32_254 = arith.constant 16 : i32
    %592 = tpu.dynamic_rotate %411 by %c16_i32_254 dim 1 : vector<16x256xf32>, i32 -> vector<16x256xf32>
    %c17_255 = arith.constant 17 : index
    %c0_256 = arith.constant 0 : index
    %c0_257 = arith.constant 0 : index
    %593 = vector.load %arg6[%c17_255, %c0_256, %c0_257] : memref<49x1x256xf32, #tpu.memory_space<vmem>>, vector<1x1x256xf32>
    %594 = vector.shape_cast %593 : vector<1x1x256xf32> to vector<1x256xf32>
    %595 = vector.broadcast %594 : vector<1x256xf32> to vector<16x256xf32>
    %596 = arith.mulf %592, %595 : vector<16x256xf32>
    %597 = vector.extract_strided_slice %438 {offsets = [272, 0], sizes = [16, 1], strides = [1, 1]} : vector<784x1xf32> to vector<16x1xf32>
    %598 = vector.broadcast %597 : vector<16x1xf32> to vector<16x256xf32>
    %599 = arith.mulf %596, %598 : vector<16x256xf32>
    %600 = arith.addf %591, %599 : vector<16x256xf32>
    %c15_i32_258 = arith.constant 15 : i32
    %601 = tpu.dynamic_rotate %411 by %c15_i32_258 dim 1 : vector<16x256xf32>, i32 -> vector<16x256xf32>
    %c18_259 = arith.constant 18 : index
    %c0_260 = arith.constant 0 : index
    %c0_261 = arith.constant 0 : index
    %602 = vector.load %arg6[%c18_259, %c0_260, %c0_261] : memref<49x1x256xf32, #tpu.memory_space<vmem>>, vector<1x1x256xf32>
    %603 = vector.shape_cast %602 : vector<1x1x256xf32> to vector<1x256xf32>
    %604 = vector.broadcast %603 : vector<1x256xf32> to vector<16x256xf32>
    %605 = arith.mulf %601, %604 : vector<16x256xf32>
    %606 = vector.extract_strided_slice %438 {offsets = [288, 0], sizes = [16, 1], strides = [1, 1]} : vector<784x1xf32> to vector<16x1xf32>
    %607 = vector.broadcast %606 : vector<16x1xf32> to vector<16x256xf32>
    %608 = arith.mulf %605, %607 : vector<16x256xf32>
    %609 = arith.addf %600, %608 : vector<16x256xf32>
    %c14_i32_262 = arith.constant 14 : i32
    %610 = tpu.dynamic_rotate %411 by %c14_i32_262 dim 1 : vector<16x256xf32>, i32 -> vector<16x256xf32>
    %c19_263 = arith.constant 19 : index
    %c0_264 = arith.constant 0 : index
    %c0_265 = arith.constant 0 : index
    %611 = vector.load %arg6[%c19_263, %c0_264, %c0_265] : memref<49x1x256xf32, #tpu.memory_space<vmem>>, vector<1x1x256xf32>
    %612 = vector.shape_cast %611 : vector<1x1x256xf32> to vector<1x256xf32>
    %613 = vector.broadcast %612 : vector<1x256xf32> to vector<16x256xf32>
    %614 = arith.mulf %610, %613 : vector<16x256xf32>
    %615 = vector.extract_strided_slice %438 {offsets = [304, 0], sizes = [16, 1], strides = [1, 1]} : vector<784x1xf32> to vector<16x1xf32>
    %616 = vector.broadcast %615 : vector<16x1xf32> to vector<16x256xf32>
    %617 = arith.mulf %614, %616 : vector<16x256xf32>
    %618 = arith.addf %609, %617 : vector<16x256xf32>
    %c13_i32 = arith.constant 13 : i32
    %619 = tpu.dynamic_rotate %411 by %c13_i32 dim 1 : vector<16x256xf32>, i32 -> vector<16x256xf32>
    %c20_266 = arith.constant 20 : index
    %c0_267 = arith.constant 0 : index
    %c0_268 = arith.constant 0 : index
    %620 = vector.load %arg6[%c20_266, %c0_267, %c0_268] : memref<49x1x256xf32, #tpu.memory_space<vmem>>, vector<1x1x256xf32>
    %621 = vector.shape_cast %620 : vector<1x1x256xf32> to vector<1x256xf32>
    %622 = vector.broadcast %621 : vector<1x256xf32> to vector<16x256xf32>
    %623 = arith.mulf %619, %622 : vector<16x256xf32>
    %624 = vector.extract_strided_slice %438 {offsets = [320, 0], sizes = [16, 1], strides = [1, 1]} : vector<784x1xf32> to vector<16x1xf32>
    %625 = vector.broadcast %624 : vector<16x1xf32> to vector<16x256xf32>
    %626 = arith.mulf %623, %625 : vector<16x256xf32>
    %627 = arith.addf %618, %626 : vector<16x256xf32>
    %c3_i32 = arith.constant 3 : i32
    %628 = tpu.dynamic_rotate %411 by %c3_i32 dim 1 : vector<16x256xf32>, i32 -> vector<16x256xf32>
    %c21_269 = arith.constant 21 : index
    %c0_270 = arith.constant 0 : index
    %c0_271 = arith.constant 0 : index
    %629 = vector.load %arg6[%c21_269, %c0_270, %c0_271] : memref<49x1x256xf32, #tpu.memory_space<vmem>>, vector<1x1x256xf32>
    %630 = vector.shape_cast %629 : vector<1x1x256xf32> to vector<1x256xf32>
    %631 = vector.broadcast %630 : vector<1x256xf32> to vector<16x256xf32>
    %632 = arith.mulf %628, %631 : vector<16x256xf32>
    %633 = vector.extract_strided_slice %438 {offsets = [336, 0], sizes = [16, 1], strides = [1, 1]} : vector<784x1xf32> to vector<16x1xf32>
    %634 = vector.broadcast %633 : vector<16x1xf32> to vector<16x256xf32>
    %635 = arith.mulf %632, %634 : vector<16x256xf32>
    %636 = arith.addf %627, %635 : vector<16x256xf32>
    %c2_i32_272 = arith.constant 2 : i32
    %637 = tpu.dynamic_rotate %411 by %c2_i32_272 dim 1 : vector<16x256xf32>, i32 -> vector<16x256xf32>
    %c22_273 = arith.constant 22 : index
    %c0_274 = arith.constant 0 : index
    %c0_275 = arith.constant 0 : index
    %638 = vector.load %arg6[%c22_273, %c0_274, %c0_275] : memref<49x1x256xf32, #tpu.memory_space<vmem>>, vector<1x1x256xf32>
    %639 = vector.shape_cast %638 : vector<1x1x256xf32> to vector<1x256xf32>
    %640 = vector.broadcast %639 : vector<1x256xf32> to vector<16x256xf32>
    %641 = arith.mulf %637, %640 : vector<16x256xf32>
    %642 = vector.extract_strided_slice %438 {offsets = [352, 0], sizes = [16, 1], strides = [1, 1]} : vector<784x1xf32> to vector<16x1xf32>
    %643 = vector.broadcast %642 : vector<16x1xf32> to vector<16x256xf32>
    %644 = arith.mulf %641, %643 : vector<16x256xf32>
    %645 = arith.addf %636, %644 : vector<16x256xf32>
    %c1_i32_276 = arith.constant 1 : i32
    %646 = tpu.dynamic_rotate %411 by %c1_i32_276 dim 1 : vector<16x256xf32>, i32 -> vector<16x256xf32>
    %c23_277 = arith.constant 23 : index
    %c0_278 = arith.constant 0 : index
    %c0_279 = arith.constant 0 : index
    %647 = vector.load %arg6[%c23_277, %c0_278, %c0_279] : memref<49x1x256xf32, #tpu.memory_space<vmem>>, vector<1x1x256xf32>
    %648 = vector.shape_cast %647 : vector<1x1x256xf32> to vector<1x256xf32>
    %649 = vector.broadcast %648 : vector<1x256xf32> to vector<16x256xf32>
    %650 = arith.mulf %646, %649 : vector<16x256xf32>
    %651 = vector.extract_strided_slice %438 {offsets = [368, 0], sizes = [16, 1], strides = [1, 1]} : vector<784x1xf32> to vector<16x1xf32>
    %652 = vector.broadcast %651 : vector<16x1xf32> to vector<16x256xf32>
    %653 = arith.mulf %650, %652 : vector<16x256xf32>
    %654 = arith.addf %645, %653 : vector<16x256xf32>
    %655 = vector.extract_strided_slice %438 {offsets = [384, 0], sizes = [16, 1], strides = [1, 1]} : vector<784x1xf32> to vector<16x1xf32>
    %656 = vector.broadcast %655 : vector<16x1xf32> to vector<16x256xf32>
    %657 = arith.mulf %411, %656 : vector<16x256xf32>
    %658 = arith.addf %654, %657 : vector<16x256xf32>
    %c255_i32_280 = arith.constant 255 : i32
    %659 = tpu.dynamic_rotate %411 by %c255_i32_280 dim 1 : vector<16x256xf32>, i32 -> vector<16x256xf32>
    %c25 = arith.constant 25 : index
    %c0_281 = arith.constant 0 : index
    %c0_282 = arith.constant 0 : index
    %660 = vector.load %arg6[%c25, %c0_281, %c0_282] : memref<49x1x256xf32, #tpu.memory_space<vmem>>, vector<1x1x256xf32>
    %661 = vector.shape_cast %660 : vector<1x1x256xf32> to vector<1x256xf32>
    %662 = vector.broadcast %661 : vector<1x256xf32> to vector<16x256xf32>
    %663 = arith.mulf %659, %662 : vector<16x256xf32>
    %664 = vector.extract_strided_slice %438 {offsets = [400, 0], sizes = [16, 1], strides = [1, 1]} : vector<784x1xf32> to vector<16x1xf32>
    %665 = vector.broadcast %664 : vector<16x1xf32> to vector<16x256xf32>
    %666 = arith.mulf %663, %665 : vector<16x256xf32>
    %667 = arith.addf %658, %666 : vector<16x256xf32>
    %c254_i32_283 = arith.constant 254 : i32
    %668 = tpu.dynamic_rotate %411 by %c254_i32_283 dim 1 : vector<16x256xf32>, i32 -> vector<16x256xf32>
    %c26 = arith.constant 26 : index
    %c0_284 = arith.constant 0 : index
    %c0_285 = arith.constant 0 : index
    %669 = vector.load %arg6[%c26, %c0_284, %c0_285] : memref<49x1x256xf32, #tpu.memory_space<vmem>>, vector<1x1x256xf32>
    %670 = vector.shape_cast %669 : vector<1x1x256xf32> to vector<1x256xf32>
    %671 = vector.broadcast %670 : vector<1x256xf32> to vector<16x256xf32>
    %672 = arith.mulf %668, %671 : vector<16x256xf32>
    %673 = vector.extract_strided_slice %438 {offsets = [416, 0], sizes = [16, 1], strides = [1, 1]} : vector<784x1xf32> to vector<16x1xf32>
    %674 = vector.broadcast %673 : vector<16x1xf32> to vector<16x256xf32>
    %675 = arith.mulf %672, %674 : vector<16x256xf32>
    %676 = arith.addf %667, %675 : vector<16x256xf32>
    %c253_i32 = arith.constant 253 : i32
    %677 = tpu.dynamic_rotate %411 by %c253_i32 dim 1 : vector<16x256xf32>, i32 -> vector<16x256xf32>
    %c27 = arith.constant 27 : index
    %c0_286 = arith.constant 0 : index
    %c0_287 = arith.constant 0 : index
    %678 = vector.load %arg6[%c27, %c0_286, %c0_287] : memref<49x1x256xf32, #tpu.memory_space<vmem>>, vector<1x1x256xf32>
    %679 = vector.shape_cast %678 : vector<1x1x256xf32> to vector<1x256xf32>
    %680 = vector.broadcast %679 : vector<1x256xf32> to vector<16x256xf32>
    %681 = arith.mulf %677, %680 : vector<16x256xf32>
    %682 = vector.extract_strided_slice %438 {offsets = [432, 0], sizes = [16, 1], strides = [1, 1]} : vector<784x1xf32> to vector<16x1xf32>
    %683 = vector.broadcast %682 : vector<16x1xf32> to vector<16x256xf32>
    %684 = arith.mulf %681, %683 : vector<16x256xf32>
    %685 = arith.addf %676, %684 : vector<16x256xf32>
    %c243_i32 = arith.constant 243 : i32
    %686 = tpu.dynamic_rotate %411 by %c243_i32 dim 1 : vector<16x256xf32>, i32 -> vector<16x256xf32>
    %c28 = arith.constant 28 : index
    %c0_288 = arith.constant 0 : index
    %c0_289 = arith.constant 0 : index
    %687 = vector.load %arg6[%c28, %c0_288, %c0_289] : memref<49x1x256xf32, #tpu.memory_space<vmem>>, vector<1x1x256xf32>
    %688 = vector.shape_cast %687 : vector<1x1x256xf32> to vector<1x256xf32>
    %689 = vector.broadcast %688 : vector<1x256xf32> to vector<16x256xf32>
    %690 = arith.mulf %686, %689 : vector<16x256xf32>
    %691 = vector.extract_strided_slice %438 {offsets = [448, 0], sizes = [16, 1], strides = [1, 1]} : vector<784x1xf32> to vector<16x1xf32>
    %692 = vector.broadcast %691 : vector<16x1xf32> to vector<16x256xf32>
    %693 = arith.mulf %690, %692 : vector<16x256xf32>
    %694 = arith.addf %685, %693 : vector<16x256xf32>
    %c242_i32_290 = arith.constant 242 : i32
    %695 = tpu.dynamic_rotate %411 by %c242_i32_290 dim 1 : vector<16x256xf32>, i32 -> vector<16x256xf32>
    %c29 = arith.constant 29 : index
    %c0_291 = arith.constant 0 : index
    %c0_292 = arith.constant 0 : index
    %696 = vector.load %arg6[%c29, %c0_291, %c0_292] : memref<49x1x256xf32, #tpu.memory_space<vmem>>, vector<1x1x256xf32>
    %697 = vector.shape_cast %696 : vector<1x1x256xf32> to vector<1x256xf32>
    %698 = vector.broadcast %697 : vector<1x256xf32> to vector<16x256xf32>
    %699 = arith.mulf %695, %698 : vector<16x256xf32>
    %700 = vector.extract_strided_slice %438 {offsets = [464, 0], sizes = [16, 1], strides = [1, 1]} : vector<784x1xf32> to vector<16x1xf32>
    %701 = vector.broadcast %700 : vector<16x1xf32> to vector<16x256xf32>
    %702 = arith.mulf %699, %701 : vector<16x256xf32>
    %703 = arith.addf %694, %702 : vector<16x256xf32>
    %c241_i32_293 = arith.constant 241 : i32
    %704 = tpu.dynamic_rotate %411 by %c241_i32_293 dim 1 : vector<16x256xf32>, i32 -> vector<16x256xf32>
    %c30 = arith.constant 30 : index
    %c0_294 = arith.constant 0 : index
    %c0_295 = arith.constant 0 : index
    %705 = vector.load %arg6[%c30, %c0_294, %c0_295] : memref<49x1x256xf32, #tpu.memory_space<vmem>>, vector<1x1x256xf32>
    %706 = vector.shape_cast %705 : vector<1x1x256xf32> to vector<1x256xf32>
    %707 = vector.broadcast %706 : vector<1x256xf32> to vector<16x256xf32>
    %708 = arith.mulf %704, %707 : vector<16x256xf32>
    %709 = vector.extract_strided_slice %438 {offsets = [480, 0], sizes = [16, 1], strides = [1, 1]} : vector<784x1xf32> to vector<16x1xf32>
    %710 = vector.broadcast %709 : vector<16x1xf32> to vector<16x256xf32>
    %711 = arith.mulf %708, %710 : vector<16x256xf32>
    %712 = arith.addf %703, %711 : vector<16x256xf32>
    %c240_i32_296 = arith.constant 240 : i32
    %713 = tpu.dynamic_rotate %411 by %c240_i32_296 dim 1 : vector<16x256xf32>, i32 -> vector<16x256xf32>
    %c31 = arith.constant 31 : index
    %c0_297 = arith.constant 0 : index
    %c0_298 = arith.constant 0 : index
    %714 = vector.load %arg6[%c31, %c0_297, %c0_298] : memref<49x1x256xf32, #tpu.memory_space<vmem>>, vector<1x1x256xf32>
    %715 = vector.shape_cast %714 : vector<1x1x256xf32> to vector<1x256xf32>
    %716 = vector.broadcast %715 : vector<1x256xf32> to vector<16x256xf32>
    %717 = arith.mulf %713, %716 : vector<16x256xf32>
    %718 = vector.extract_strided_slice %438 {offsets = [496, 0], sizes = [16, 1], strides = [1, 1]} : vector<784x1xf32> to vector<16x1xf32>
    %719 = vector.broadcast %718 : vector<16x1xf32> to vector<16x256xf32>
    %720 = arith.mulf %717, %719 : vector<16x256xf32>
    %721 = arith.addf %712, %720 : vector<16x256xf32>
    %c239_i32_299 = arith.constant 239 : i32
    %722 = tpu.dynamic_rotate %411 by %c239_i32_299 dim 1 : vector<16x256xf32>, i32 -> vector<16x256xf32>
    %c32 = arith.constant 32 : index
    %c0_300 = arith.constant 0 : index
    %c0_301 = arith.constant 0 : index
    %723 = vector.load %arg6[%c32, %c0_300, %c0_301] : memref<49x1x256xf32, #tpu.memory_space<vmem>>, vector<1x1x256xf32>
    %724 = vector.shape_cast %723 : vector<1x1x256xf32> to vector<1x256xf32>
    %725 = vector.broadcast %724 : vector<1x256xf32> to vector<16x256xf32>
    %726 = arith.mulf %722, %725 : vector<16x256xf32>
    %727 = vector.extract_strided_slice %438 {offsets = [512, 0], sizes = [16, 1], strides = [1, 1]} : vector<784x1xf32> to vector<16x1xf32>
    %728 = vector.broadcast %727 : vector<16x1xf32> to vector<16x256xf32>
    %729 = arith.mulf %726, %728 : vector<16x256xf32>
    %730 = arith.addf %721, %729 : vector<16x256xf32>
    %c238_i32_302 = arith.constant 238 : i32
    %731 = tpu.dynamic_rotate %411 by %c238_i32_302 dim 1 : vector<16x256xf32>, i32 -> vector<16x256xf32>
    %c33 = arith.constant 33 : index
    %c0_303 = arith.constant 0 : index
    %c0_304 = arith.constant 0 : index
    %732 = vector.load %arg6[%c33, %c0_303, %c0_304] : memref<49x1x256xf32, #tpu.memory_space<vmem>>, vector<1x1x256xf32>
    %733 = vector.shape_cast %732 : vector<1x1x256xf32> to vector<1x256xf32>
    %734 = vector.broadcast %733 : vector<1x256xf32> to vector<16x256xf32>
    %735 = arith.mulf %731, %734 : vector<16x256xf32>
    %736 = vector.extract_strided_slice %438 {offsets = [528, 0], sizes = [16, 1], strides = [1, 1]} : vector<784x1xf32> to vector<16x1xf32>
    %737 = vector.broadcast %736 : vector<16x1xf32> to vector<16x256xf32>
    %738 = arith.mulf %735, %737 : vector<16x256xf32>
    %739 = arith.addf %730, %738 : vector<16x256xf32>
    %c237_i32 = arith.constant 237 : i32
    %740 = tpu.dynamic_rotate %411 by %c237_i32 dim 1 : vector<16x256xf32>, i32 -> vector<16x256xf32>
    %c34 = arith.constant 34 : index
    %c0_305 = arith.constant 0 : index
    %c0_306 = arith.constant 0 : index
    %741 = vector.load %arg6[%c34, %c0_305, %c0_306] : memref<49x1x256xf32, #tpu.memory_space<vmem>>, vector<1x1x256xf32>
    %742 = vector.shape_cast %741 : vector<1x1x256xf32> to vector<1x256xf32>
    %743 = vector.broadcast %742 : vector<1x256xf32> to vector<16x256xf32>
    %744 = arith.mulf %740, %743 : vector<16x256xf32>
    %745 = vector.extract_strided_slice %438 {offsets = [544, 0], sizes = [16, 1], strides = [1, 1]} : vector<784x1xf32> to vector<16x1xf32>
    %746 = vector.broadcast %745 : vector<16x1xf32> to vector<16x256xf32>
    %747 = arith.mulf %744, %746 : vector<16x256xf32>
    %748 = arith.addf %739, %747 : vector<16x256xf32>
    %c227_i32 = arith.constant 227 : i32
    %749 = tpu.dynamic_rotate %411 by %c227_i32 dim 1 : vector<16x256xf32>, i32 -> vector<16x256xf32>
    %c35 = arith.constant 35 : index
    %c0_307 = arith.constant 0 : index
    %c0_308 = arith.constant 0 : index
    %750 = vector.load %arg6[%c35, %c0_307, %c0_308] : memref<49x1x256xf32, #tpu.memory_space<vmem>>, vector<1x1x256xf32>
    %751 = vector.shape_cast %750 : vector<1x1x256xf32> to vector<1x256xf32>
    %752 = vector.broadcast %751 : vector<1x256xf32> to vector<16x256xf32>
    %753 = arith.mulf %749, %752 : vector<16x256xf32>
    %754 = vector.extract_strided_slice %438 {offsets = [560, 0], sizes = [16, 1], strides = [1, 1]} : vector<784x1xf32> to vector<16x1xf32>
    %755 = vector.broadcast %754 : vector<16x1xf32> to vector<16x256xf32>
    %756 = arith.mulf %753, %755 : vector<16x256xf32>
    %757 = arith.addf %748, %756 : vector<16x256xf32>
    %c226_i32_309 = arith.constant 226 : i32
    %758 = tpu.dynamic_rotate %411 by %c226_i32_309 dim 1 : vector<16x256xf32>, i32 -> vector<16x256xf32>
    %c36 = arith.constant 36 : index
    %c0_310 = arith.constant 0 : index
    %c0_311 = arith.constant 0 : index
    %759 = vector.load %arg6[%c36, %c0_310, %c0_311] : memref<49x1x256xf32, #tpu.memory_space<vmem>>, vector<1x1x256xf32>
    %760 = vector.shape_cast %759 : vector<1x1x256xf32> to vector<1x256xf32>
    %761 = vector.broadcast %760 : vector<1x256xf32> to vector<16x256xf32>
    %762 = arith.mulf %758, %761 : vector<16x256xf32>
    %763 = vector.extract_strided_slice %438 {offsets = [576, 0], sizes = [16, 1], strides = [1, 1]} : vector<784x1xf32> to vector<16x1xf32>
    %764 = vector.broadcast %763 : vector<16x1xf32> to vector<16x256xf32>
    %765 = arith.mulf %762, %764 : vector<16x256xf32>
    %766 = arith.addf %757, %765 : vector<16x256xf32>
    %c225_i32_312 = arith.constant 225 : i32
    %767 = tpu.dynamic_rotate %411 by %c225_i32_312 dim 1 : vector<16x256xf32>, i32 -> vector<16x256xf32>
    %c37 = arith.constant 37 : index
    %c0_313 = arith.constant 0 : index
    %c0_314 = arith.constant 0 : index
    %768 = vector.load %arg6[%c37, %c0_313, %c0_314] : memref<49x1x256xf32, #tpu.memory_space<vmem>>, vector<1x1x256xf32>
    %769 = vector.shape_cast %768 : vector<1x1x256xf32> to vector<1x256xf32>
    %770 = vector.broadcast %769 : vector<1x256xf32> to vector<16x256xf32>
    %771 = arith.mulf %767, %770 : vector<16x256xf32>
    %772 = vector.extract_strided_slice %438 {offsets = [592, 0], sizes = [16, 1], strides = [1, 1]} : vector<784x1xf32> to vector<16x1xf32>
    %773 = vector.broadcast %772 : vector<16x1xf32> to vector<16x256xf32>
    %774 = arith.mulf %771, %773 : vector<16x256xf32>
    %775 = arith.addf %766, %774 : vector<16x256xf32>
    %c224_i32_315 = arith.constant 224 : i32
    %776 = tpu.dynamic_rotate %411 by %c224_i32_315 dim 1 : vector<16x256xf32>, i32 -> vector<16x256xf32>
    %c38 = arith.constant 38 : index
    %c0_316 = arith.constant 0 : index
    %c0_317 = arith.constant 0 : index
    %777 = vector.load %arg6[%c38, %c0_316, %c0_317] : memref<49x1x256xf32, #tpu.memory_space<vmem>>, vector<1x1x256xf32>
    %778 = vector.shape_cast %777 : vector<1x1x256xf32> to vector<1x256xf32>
    %779 = vector.broadcast %778 : vector<1x256xf32> to vector<16x256xf32>
    %780 = arith.mulf %776, %779 : vector<16x256xf32>
    %781 = vector.extract_strided_slice %438 {offsets = [608, 0], sizes = [16, 1], strides = [1, 1]} : vector<784x1xf32> to vector<16x1xf32>
    %782 = vector.broadcast %781 : vector<16x1xf32> to vector<16x256xf32>
    %783 = arith.mulf %780, %782 : vector<16x256xf32>
    %784 = arith.addf %775, %783 : vector<16x256xf32>
    %c223_i32_318 = arith.constant 223 : i32
    %785 = tpu.dynamic_rotate %411 by %c223_i32_318 dim 1 : vector<16x256xf32>, i32 -> vector<16x256xf32>
    %c39 = arith.constant 39 : index
    %c0_319 = arith.constant 0 : index
    %c0_320 = arith.constant 0 : index
    %786 = vector.load %arg6[%c39, %c0_319, %c0_320] : memref<49x1x256xf32, #tpu.memory_space<vmem>>, vector<1x1x256xf32>
    %787 = vector.shape_cast %786 : vector<1x1x256xf32> to vector<1x256xf32>
    %788 = vector.broadcast %787 : vector<1x256xf32> to vector<16x256xf32>
    %789 = arith.mulf %785, %788 : vector<16x256xf32>
    %790 = vector.extract_strided_slice %438 {offsets = [624, 0], sizes = [16, 1], strides = [1, 1]} : vector<784x1xf32> to vector<16x1xf32>
    %791 = vector.broadcast %790 : vector<16x1xf32> to vector<16x256xf32>
    %792 = arith.mulf %789, %791 : vector<16x256xf32>
    %793 = arith.addf %784, %792 : vector<16x256xf32>
    %c222_i32_321 = arith.constant 222 : i32
    %794 = tpu.dynamic_rotate %411 by %c222_i32_321 dim 1 : vector<16x256xf32>, i32 -> vector<16x256xf32>
    %c40 = arith.constant 40 : index
    %c0_322 = arith.constant 0 : index
    %c0_323 = arith.constant 0 : index
    %795 = vector.load %arg6[%c40, %c0_322, %c0_323] : memref<49x1x256xf32, #tpu.memory_space<vmem>>, vector<1x1x256xf32>
    %796 = vector.shape_cast %795 : vector<1x1x256xf32> to vector<1x256xf32>
    %797 = vector.broadcast %796 : vector<1x256xf32> to vector<16x256xf32>
    %798 = arith.mulf %794, %797 : vector<16x256xf32>
    %799 = vector.extract_strided_slice %438 {offsets = [640, 0], sizes = [16, 1], strides = [1, 1]} : vector<784x1xf32> to vector<16x1xf32>
    %800 = vector.broadcast %799 : vector<16x1xf32> to vector<16x256xf32>
    %801 = arith.mulf %798, %800 : vector<16x256xf32>
    %802 = arith.addf %793, %801 : vector<16x256xf32>
    %c221_i32 = arith.constant 221 : i32
    %803 = tpu.dynamic_rotate %411 by %c221_i32 dim 1 : vector<16x256xf32>, i32 -> vector<16x256xf32>
    %c41 = arith.constant 41 : index
    %c0_324 = arith.constant 0 : index
    %c0_325 = arith.constant 0 : index
    %804 = vector.load %arg6[%c41, %c0_324, %c0_325] : memref<49x1x256xf32, #tpu.memory_space<vmem>>, vector<1x1x256xf32>
    %805 = vector.shape_cast %804 : vector<1x1x256xf32> to vector<1x256xf32>
    %806 = vector.broadcast %805 : vector<1x256xf32> to vector<16x256xf32>
    %807 = arith.mulf %803, %806 : vector<16x256xf32>
    %808 = vector.extract_strided_slice %438 {offsets = [656, 0], sizes = [16, 1], strides = [1, 1]} : vector<784x1xf32> to vector<16x1xf32>
    %809 = vector.broadcast %808 : vector<16x1xf32> to vector<16x256xf32>
    %810 = arith.mulf %807, %809 : vector<16x256xf32>
    %811 = arith.addf %802, %810 : vector<16x256xf32>
    %c211_i32 = arith.constant 211 : i32
    %812 = tpu.dynamic_rotate %411 by %c211_i32 dim 1 : vector<16x256xf32>, i32 -> vector<16x256xf32>
    %c42 = arith.constant 42 : index
    %c0_326 = arith.constant 0 : index
    %c0_327 = arith.constant 0 : index
    %813 = vector.load %arg6[%c42, %c0_326, %c0_327] : memref<49x1x256xf32, #tpu.memory_space<vmem>>, vector<1x1x256xf32>
    %814 = vector.shape_cast %813 : vector<1x1x256xf32> to vector<1x256xf32>
    %815 = vector.broadcast %814 : vector<1x256xf32> to vector<16x256xf32>
    %816 = arith.mulf %812, %815 : vector<16x256xf32>
    %817 = vector.extract_strided_slice %438 {offsets = [672, 0], sizes = [16, 1], strides = [1, 1]} : vector<784x1xf32> to vector<16x1xf32>
    %818 = vector.broadcast %817 : vector<16x1xf32> to vector<16x256xf32>
    %819 = arith.mulf %816, %818 : vector<16x256xf32>
    %820 = arith.addf %811, %819 : vector<16x256xf32>
    %c210_i32 = arith.constant 210 : i32
    %821 = tpu.dynamic_rotate %411 by %c210_i32 dim 1 : vector<16x256xf32>, i32 -> vector<16x256xf32>
    %c43 = arith.constant 43 : index
    %c0_328 = arith.constant 0 : index
    %c0_329 = arith.constant 0 : index
    %822 = vector.load %arg6[%c43, %c0_328, %c0_329] : memref<49x1x256xf32, #tpu.memory_space<vmem>>, vector<1x1x256xf32>
    %823 = vector.shape_cast %822 : vector<1x1x256xf32> to vector<1x256xf32>
    %824 = vector.broadcast %823 : vector<1x256xf32> to vector<16x256xf32>
    %825 = arith.mulf %821, %824 : vector<16x256xf32>
    %826 = vector.extract_strided_slice %438 {offsets = [688, 0], sizes = [16, 1], strides = [1, 1]} : vector<784x1xf32> to vector<16x1xf32>
    %827 = vector.broadcast %826 : vector<16x1xf32> to vector<16x256xf32>
    %828 = arith.mulf %825, %827 : vector<16x256xf32>
    %829 = arith.addf %820, %828 : vector<16x256xf32>
    %c209_i32 = arith.constant 209 : i32
    %830 = tpu.dynamic_rotate %411 by %c209_i32 dim 1 : vector<16x256xf32>, i32 -> vector<16x256xf32>
    %c44 = arith.constant 44 : index
    %c0_330 = arith.constant 0 : index
    %c0_331 = arith.constant 0 : index
    %831 = vector.load %arg6[%c44, %c0_330, %c0_331] : memref<49x1x256xf32, #tpu.memory_space<vmem>>, vector<1x1x256xf32>
    %832 = vector.shape_cast %831 : vector<1x1x256xf32> to vector<1x256xf32>
    %833 = vector.broadcast %832 : vector<1x256xf32> to vector<16x256xf32>
    %834 = arith.mulf %830, %833 : vector<16x256xf32>
    %835 = vector.extract_strided_slice %438 {offsets = [704, 0], sizes = [16, 1], strides = [1, 1]} : vector<784x1xf32> to vector<16x1xf32>
    %836 = vector.broadcast %835 : vector<16x1xf32> to vector<16x256xf32>
    %837 = arith.mulf %834, %836 : vector<16x256xf32>
    %838 = arith.addf %829, %837 : vector<16x256xf32>
    %c208_i32 = arith.constant 208 : i32
    %839 = tpu.dynamic_rotate %411 by %c208_i32 dim 1 : vector<16x256xf32>, i32 -> vector<16x256xf32>
    %c45 = arith.constant 45 : index
    %c0_332 = arith.constant 0 : index
    %c0_333 = arith.constant 0 : index
    %840 = vector.load %arg6[%c45, %c0_332, %c0_333] : memref<49x1x256xf32, #tpu.memory_space<vmem>>, vector<1x1x256xf32>
    %841 = vector.shape_cast %840 : vector<1x1x256xf32> to vector<1x256xf32>
    %842 = vector.broadcast %841 : vector<1x256xf32> to vector<16x256xf32>
    %843 = arith.mulf %839, %842 : vector<16x256xf32>
    %844 = vector.extract_strided_slice %438 {offsets = [720, 0], sizes = [16, 1], strides = [1, 1]} : vector<784x1xf32> to vector<16x1xf32>
    %845 = vector.broadcast %844 : vector<16x1xf32> to vector<16x256xf32>
    %846 = arith.mulf %843, %845 : vector<16x256xf32>
    %847 = arith.addf %838, %846 : vector<16x256xf32>
    %c207_i32 = arith.constant 207 : i32
    %848 = tpu.dynamic_rotate %411 by %c207_i32 dim 1 : vector<16x256xf32>, i32 -> vector<16x256xf32>
    %c46 = arith.constant 46 : index
    %c0_334 = arith.constant 0 : index
    %c0_335 = arith.constant 0 : index
    %849 = vector.load %arg6[%c46, %c0_334, %c0_335] : memref<49x1x256xf32, #tpu.memory_space<vmem>>, vector<1x1x256xf32>
    %850 = vector.shape_cast %849 : vector<1x1x256xf32> to vector<1x256xf32>
    %851 = vector.broadcast %850 : vector<1x256xf32> to vector<16x256xf32>
    %852 = arith.mulf %848, %851 : vector<16x256xf32>
    %853 = vector.extract_strided_slice %438 {offsets = [736, 0], sizes = [16, 1], strides = [1, 1]} : vector<784x1xf32> to vector<16x1xf32>
    %854 = vector.broadcast %853 : vector<16x1xf32> to vector<16x256xf32>
    %855 = arith.mulf %852, %854 : vector<16x256xf32>
    %856 = arith.addf %847, %855 : vector<16x256xf32>
    %c206_i32 = arith.constant 206 : i32
    %857 = tpu.dynamic_rotate %411 by %c206_i32 dim 1 : vector<16x256xf32>, i32 -> vector<16x256xf32>
    %c47 = arith.constant 47 : index
    %c0_336 = arith.constant 0 : index
    %c0_337 = arith.constant 0 : index
    %858 = vector.load %arg6[%c47, %c0_336, %c0_337] : memref<49x1x256xf32, #tpu.memory_space<vmem>>, vector<1x1x256xf32>
    %859 = vector.shape_cast %858 : vector<1x1x256xf32> to vector<1x256xf32>
    %860 = vector.broadcast %859 : vector<1x256xf32> to vector<16x256xf32>
    %861 = arith.mulf %857, %860 : vector<16x256xf32>
    %862 = vector.extract_strided_slice %438 {offsets = [752, 0], sizes = [16, 1], strides = [1, 1]} : vector<784x1xf32> to vector<16x1xf32>
    %863 = vector.broadcast %862 : vector<16x1xf32> to vector<16x256xf32>
    %864 = arith.mulf %861, %863 : vector<16x256xf32>
    %865 = arith.addf %856, %864 : vector<16x256xf32>
    %c205_i32 = arith.constant 205 : i32
    %866 = tpu.dynamic_rotate %411 by %c205_i32 dim 1 : vector<16x256xf32>, i32 -> vector<16x256xf32>
    %c48 = arith.constant 48 : index
    %c0_338 = arith.constant 0 : index
    %c0_339 = arith.constant 0 : index
    %867 = vector.load %arg6[%c48, %c0_338, %c0_339] : memref<49x1x256xf32, #tpu.memory_space<vmem>>, vector<1x1x256xf32>
    %868 = vector.shape_cast %867 : vector<1x1x256xf32> to vector<1x256xf32>
    %869 = vector.broadcast %868 : vector<1x256xf32> to vector<16x256xf32>
    %870 = arith.mulf %866, %869 : vector<16x256xf32>
    %871 = vector.extract_strided_slice %438 {offsets = [768, 0], sizes = [16, 1], strides = [1, 1]} : vector<784x1xf32> to vector<16x1xf32>
    %872 = vector.broadcast %871 : vector<16x1xf32> to vector<16x256xf32>
    %873 = arith.mulf %870, %872 : vector<16x256xf32>
    %874 = arith.addf %865, %873 : vector<16x256xf32>
    %875 = vector.broadcast %439 : vector<16x1xf32> to vector<16x256xf32>
    %876 = arith.addf %874, %875 : vector<16x256xf32>
    %cst_340 = arith.constant 5.000000e-01 : f32
    %877 = vector.broadcast %cst_340 : f32 to vector<16x256xf32>
    %878 = arith.mulf %877, %876 : vector<16x256xf32>
    %cst_341 = arith.constant 0.707106769 : f32
    %879 = vector.broadcast %cst_341 : f32 to vector<16x256xf32>
    %880 = arith.mulf %876, %879 : vector<16x256xf32>
    %881 = math.erf %880 : vector<16x256xf32>
    %cst_342 = arith.constant 1.000000e+00 : f32
    %882 = vector.broadcast %cst_342 : f32 to vector<16x256xf32>
    %883 = arith.addf %882, %881 : vector<16x256xf32>
    %884 = arith.mulf %878, %883 : vector<16x256xf32>
    %885 = tpu.concatenate %410, %884 in 0 : vector<16x256xf32>, vector<16x256xf32> -> vector<32x256xf32>
    %c0_343 = arith.constant 0 : index
    %c0_344 = arith.constant 0 : index
    %886 = vector.load %arg30[%c0_343, %c0_344] : memref<16x32xf32, #tpu.memory_space<vmem>>, vector<16x32xf32>
    %cst_345 = arith.constant dense<0.000000e+00> : vector<16x256xf32>
    %887 = tpu.matmul %886, %885, %cst_345 {dimension_numbers = #tpu.dot_dimension_numbers<[1], [0], [0], [1], [0, 0, 1, 1], [], []>} : vector<16x32xf32>, vector<32x256xf32>, vector<16x256xf32> -> vector<16x256xf32>
    %c0_346 = arith.constant 0 : index
    %c0_347 = arith.constant 0 : index
    %888 = vector.load %arg31[%c0_346, %c0_347] : memref<16x1xf32, #tpu.memory_space<vmem>>, vector<16x1xf32>
    %889 = vector.broadcast %888 : vector<16x1xf32> to vector<16x256xf32>
    %890 = arith.addf %887, %889 : vector<16x256xf32>
    %891 = arith.addf %890, %118 : vector<16x256xf32>
    %c0_348 = arith.constant 0 : index
    %c0_349 = arith.constant 0 : index
    %c0_350 = arith.constant 0 : index
    %892 = vector.load %arg32[%c0_348, %c0_349, %c0_350] : memref<1x16x256xf32, #tpu.memory_space<vmem>>, vector<1x16x256xf32>
    %893 = vector.shape_cast %892 : vector<1x16x256xf32> to vector<16x256xf32>
    %894 = vector.shape_cast %891 : vector<16x256xf32> to vector<1x16x256xf32>
    tpu.vector_store %arg32[%c0_348, %c0_349, %c0_350], %894 {strides = array<i32>} : memref<1x16x256xf32, #tpu.memory_space<vmem>>, vector<1x16x256xf32>,
    return
  }
  func.func @transform_0(%arg0: i32) -> (i32, i32, i32) {
    %c0_i32 = arith.constant 0 : i32
    %c0_i32_0 = arith.constant 0 : i32
    %c0_i32_1 = arith.constant 0 : i32
    return %arg0, %c0_i32, %c0_i32_0 : i32, i32, i32
  }
  func.func @transform_1(%arg0: i32) -> (i32, i32, i32) {
    %c0_i32 = arith.constant 0 : i32
    %c0_i32_0 = arith.constant 0 : i32
    %c0_i32_1 = arith.constant 0 : i32
    return %arg0, %c0_i32, %c0_i32_0 : i32, i32, i32
  }
  func.func @transform_2(%arg0: i32) -> (i32, i32, i32) {
    %c0_i32 = arith.constant 0 : i32
    %c0_i32_0 = arith.constant 0 : i32
    %c0_i32_1 = arith.constant 0 : i32
    return %arg0, %c0_i32, %c0_i32_0 : i32, i32, i32
  }
  func.func @transform_3(%arg0: i32) -> (i32, i32, i32) {
    %c0_i32 = arith.constant 0 : i32
    %c0_i32_0 = arith.constant 0 : i32
    %c0_i32_1 = arith.constant 0 : i32
    %c0_i32_2 = arith.constant 0 : i32
    return %c0_i32, %c0_i32_0, %c0_i32_1 : i32, i32, i32
  }
  func.func @transform_4(%arg0: i32) -> (i32, i32, i32) {
    %c0_i32 = arith.constant 0 : i32
    %c0_i32_0 = arith.constant 0 : i32
    %c0_i32_1 = arith.constant 0 : i32
    %c0_i32_2 = arith.constant 0 : i32
    return %c0_i32, %c0_i32_0, %c0_i32_1 : i32, i32, i32
  }
  func.func @transform_5(%arg0: i32) -> (i32, i32, i32) {
    %c0_i32 = arith.constant 0 : i32
    %c0_i32_0 = arith.constant 0 : i32
    %c0_i32_1 = arith.constant 0 : i32
    %c0_i32_2 = arith.constant 0 : i32
    return %c0_i32, %c0_i32_0, %c0_i32_1 : i32, i32, i32
  }
  func.func @transform_6(%arg0: i32) -> (i32, i32, i32) {
    %c0_i32 = arith.constant 0 : i32
    %c0_i32_0 = arith.constant 0 : i32
    %c0_i32_1 = arith.constant 0 : i32
    %c0_i32_2 = arith.constant 0 : i32
    return %c0_i32, %c0_i32_0, %c0_i32_1 : i32, i32, i32
  }
  func.func @transform_7(%arg0: i32) -> (i32, i32) {
    %c0_i32 = arith.constant 0 : i32
    %c0_i32_0 = arith.constant 0 : i32
    %c0_i32_1 = arith.constant 0 : i32
    return %c0_i32, %c0_i32_0 : i32, i32
  }
  func.func @transform_8(%arg0: i32) -> (i32, i32) {
    %c0_i32 = arith.constant 0 : i32
    %c0_i32_0 = arith.constant 0 : i32
    %c0_i32_1 = arith.constant 0 : i32
    return %c0_i32, %c0_i32_0 : i32, i32
  }
  func.func @transform_9(%arg0: i32) -> (i32, i32) {
    %c0_i32 = arith.constant 0 : i32
    %c0_i32_0 = arith.constant 0 : i32
    %c0_i32_1 = arith.constant 0 : i32
    return %c0_i32, %c0_i32_0 : i32, i32
  }
  func.func @transform_10(%arg0: i32) -> (i32, i32) {
    %c0_i32 = arith.constant 0 : i32
    %c0_i32_0 = arith.constant 0 : i32
    %c0_i32_1 = arith.constant 0 : i32
    return %c0_i32, %c0_i32_0 : i32, i32
  }
  func.func @transform_11(%arg0: i32) -> (i32, i32) {
    %c0_i32 = arith.constant 0 : i32
    %c0_i32_0 = arith.constant 0 : i32
    %c0_i32_1 = arith.constant 0 : i32
    return %c0_i32, %c0_i32_0 : i32, i32
  }
  func.func @transform_12(%arg0: i32) -> (i32, i32) {
    %c0_i32 = arith.constant 0 : i32
    %c0_i32_0 = arith.constant 0 : i32
    %c0_i32_1 = arith.constant 0 : i32
    return %c0_i32, %c0_i32_0 : i32, i32
  }
  func.func @transform_13(%arg0: i32) -> (i32, i32) {
    %c0_i32 = arith.constant 0 : i32
    %c0_i32_0 = arith.constant 0 : i32
    %c0_i32_1 = arith.constant 0 : i32
    return %c0_i32, %c0_i32_0 : i32, i32
  }
  func.func @transform_14(%arg0: i32) -> (i32, i32) {
    %c0_i32 = arith.constant 0 : i32
    %c0_i32_0 = arith.constant 0 : i32
    %c0_i32_1 = arith.constant 0 : i32
    return %c0_i32, %c0_i32_0 : i32, i32
  }
  func.func @transform_15(%arg0: i32) -> (i32, i32) {
    %c0_i32 = arith.constant 0 : i32
    %c0_i32_0 = arith.constant 0 : i32
    %c0_i32_1 = arith.constant 0 : i32
    return %c0_i32, %c0_i32_0 : i32, i32
  }
  func.func @transform_16(%arg0: i32) -> (i32, i32) {
    %c0_i32 = arith.constant 0 : i32
    %c0_i32_0 = arith.constant 0 : i32
    %c0_i32_1 = arith.constant 0 : i32
    return %c0_i32, %c0_i32_0 : i32, i32
  }
  func.func @transform_17(%arg0: i32) -> (i32, i32) {
    %c0_i32 = arith.constant 0 : i32
    %c0_i32_0 = arith.constant 0 : i32
    %c0_i32_1 = arith.constant 0 : i32
    return %c0_i32, %c0_i32_0 : i32, i32
  }
  func.func @transform_18(%arg0: i32) -> (i32, i32) {
    %c0_i32 = arith.constant 0 : i32
    %c0_i32_0 = arith.constant 0 : i32
    %c0_i32_1 = arith.constant 0 : i32
    return %c0_i32, %c0_i32_0 : i32, i32
  }
  func.func @transform_19(%arg0: i32) -> (i32, i32) {
    %c0_i32 = arith.constant 0 : i32
    %c0_i32_0 = arith.constant 0 : i32
    %c0_i32_1 = arith.constant 0 : i32
    return %c0_i32, %c0_i32_0 : i32, i32
  }
  func.func @transform_20(%arg0: i32) -> (i32, i32) {
    %c0_i32 = arith.constant 0 : i32
    %c0_i32_0 = arith.constant 0 : i32
    %c0_i32_1 = arith.constant 0 : i32
    return %c0_i32, %c0_i32_0 : i32, i32
  }
  func.func @transform_21(%arg0: i32) -> (i32, i32) {
    %c0_i32 = arith.constant 0 : i32
    %c0_i32_0 = arith.constant 0 : i32
    %c0_i32_1 = arith.constant 0 : i32
    return %c0_i32, %c0_i32_0 : i32, i32
  }
  func.func @transform_22(%arg0: i32) -> (i32, i32) {
    %c0_i32 = arith.constant 0 : i32
    %c0_i32_0 = arith.constant 0 : i32
    %c0_i32_1 = arith.constant 0 : i32
    return %c0_i32, %c0_i32_0 : i32, i32
  }
  func.func @transform_23(%arg0: i32) -> (i32, i32) {
    %c0_i32 = arith.constant 0 : i32
    %c0_i32_0 = arith.constant 0 : i32
    %c0_i32_1 = arith.constant 0 : i32
    return %c0_i32, %c0_i32_0 : i32, i32
  }
  func.func @transform_24(%arg0: i32) -> (i32, i32) {
    %c0_i32 = arith.constant 0 : i32
    %c0_i32_0 = arith.constant 0 : i32
    %c0_i32_1 = arith.constant 0 : i32
    return %c0_i32, %c0_i32_0 : i32, i32
  }
  func.func @transform_25(%arg0: i32) -> (i32, i32) {
    %c0_i32 = arith.constant 0 : i32
    %c0_i32_0 = arith.constant 0 : i32
    %c0_i32_1 = arith.constant 0 : i32
    return %c0_i32, %c0_i32_0 : i32, i32
  }
  func.func @transform_26(%arg0: i32) -> (i32, i32) {
    %c0_i32 = arith.constant 0 : i32
    %c0_i32_0 = arith.constant 0 : i32
    %c0_i32_1 = arith.constant 0 : i32
    return %c0_i32, %c0_i32_0 : i32, i32
  }
  func.func @transform_27(%arg0: i32) -> (i32, i32) {
    %c0_i32 = arith.constant 0 : i32
    %c0_i32_0 = arith.constant 0 : i32
    %c0_i32_1 = arith.constant 0 : i32
    return %c0_i32, %c0_i32_0 : i32, i32
  }
  func.func @transform_28(%arg0: i32) -> (i32, i32) {
    %c0_i32 = arith.constant 0 : i32
    %c0_i32_0 = arith.constant 0 : i32
    %c0_i32_1 = arith.constant 0 : i32
    return %c0_i32, %c0_i32_0 : i32, i32
  }
  func.func @transform_29(%arg0: i32) -> (i32, i32) {
    %c0_i32 = arith.constant 0 : i32
    %c0_i32_0 = arith.constant 0 : i32
    %c0_i32_1 = arith.constant 0 : i32
    return %c0_i32, %c0_i32_0 : i32, i32
  }
  func.func @transform_30(%arg0: i32) -> (i32, i32) {
    %c0_i32 = arith.constant 0 : i32
    %c0_i32_0 = arith.constant 0 : i32
    %c0_i32_1 = arith.constant 0 : i32
    return %c0_i32, %c0_i32_0 : i32, i32
  }
  func.func @transform_31(%arg0: i32) -> (i32, i32, i32) {
    %c0_i32 = arith.constant 0 : i32
    %c0_i32_0 = arith.constant 0 : i32
    %c0_i32_1 = arith.constant 0 : i32
    return %arg0, %c0_i32, %c0_i32_0 : i32, i32, i32
  }
}

</mosaic_0001>

<bundles_post_ra>
// kernel: _lambda_.2
= control target key start
LH: loop header
LB: loop body
LE: loop exit
PB: predicated region body
PF: predicated region fallthrough
CT: control target
= control target key end

     0   :  { %s511_s12 = smov 0   ;;  %s549_s0 = inlined_call_operand.vmem [shape: f32[2,16,256], index: 0, kind: input, shape index: {}]   ;;  %s550_s1 = inlined_call_operand.vmem [shape: f32[16,1], index: 1, kind: input, shape index: {}]   ;;  %s551_s2 = inlined_call_operand.vmem [shape: f32[16,1], index: 2, kind: input, shape index: {}]   ;;  %s552_s3 = inlined_call_operand.vmem [shape: f32[2,16,256], index: 3, kind: output, shape index: {}]  }
   0x1 LB: > { %s448_s13 = sadd.s32 4294967295, %s486_s12   ;;  %p452_p0 = scmp.ge.s32.totalorder %s486_s12, 1  ;;  %s486_s12 = sphi %s511_s12, %s13_s12  }
   0x2   : > { %p137_p1 = scmp.lt.s32.totalorder %s486_s12, 3 }
   0x4   : > { %p138_p2 = pnand %p452_p0, %p137_p1 }
   0x5   : > { %p161_p3 = scmp.lt.s32.totalorder (!%p138_p2), %s448_s13, 1 }
   0x6   : > { %141 = sbr.rel (%p138_p2) target bundleno = 448 (0x1c0), region = 32 }
   0xb   : > { %v488_v0 = vmov 0.0   ;;  %s554_s13 = smov (!%p161_p3, %s448_s13), 1  ;;  %vm179_vm0 = vcmask 130048   ;;  %v489_v5 = vmov 1.0   ;;  %v175_v6 = vld [vmem:[%s550_s1] sm:$0xff]  ;;  %v490_v8 = vmov 0  }
   0xc   : > { %247 = vmatprep.mubr.f32.mxu0 %v488_v0  ;;  %336 = vmatprep.mubr.f32.mxu1 %v488_v0  ;;  %s461_s14 = sshll.u32 %s554_s13, 5  ;;  %v177_v7 = vld [vmem:[%s551_s2] sm:$0xff]  ;;  %v176_v9 = vld [vmem:[%s550_s1 + $0x8] sm:$0xff]  ;;  %v256_v11 = vlaneseq }
   0xd   : > { %s165_s17 = scalar_lea.vmem %s549_s0, %s461_s14  ;;  %474 = vset.pattern.permute.xlu0 %v490_v8  ;;  %475 = vset.pattern.permute.xlu1 %v490_v8  ;;  %v178_v10 = vld [vmem:[%s551_s2 + $0x8] sm:$0xff]  ;;  %s170_s28 = scalar_lea.vmem %s552_s3, %s461_s14 }
   0xe   : > { %v174_v1 = vld [vmem:[%s165_s17 + $0x18] sm:$0xff]  ;;  %v173_v2 = vld [vmem:[%s165_s17 + $0x10] sm:$0xff]  ;;  %v172_v3 = vld [vmem:[%s165_s17 + $0x8] sm:$0xff]  ;;  %363 = vperm.xlu0 %474, %v175_v6   ;;  %377 = vperm.xlu1 %475, %v177_v7   ;;  %v257_v12 = vshrl.u32 %v256_v11, 7 }
   0xf   : > { %211 = vmatprep.subr.mxu0 %v174_v1  ;;  %v171_v4 = vld [vmem:[%s165_s17] sm:$0xff] }
  0x10   : > { %212 = vmatpush1.msra.mxu0 %v173_v2  ;;  %v258_v13 = vsub.s32 0, %v257_v12 }
  0x11   : > { %213 = vmatprep.subr.mxu0 %v172_v3 }
  0x12   : > { %214 = vmatpush1.msra.mxu0 %v171_v4  ;;  %368 = vperm.xlu0 %474, %v176_v9  }
  0x13   : > { %457 = vmatmul.mubr.msk.f32.vlgmr.msra.gmra.mxu0 %vm179_vm0, %v489_v5  ;;  %382 = vperm.xlu1 %475, %v178_v10  }
  0x89   : > { %v364_v34 = vpop.permute.xlu0 %363  ;;  %v378_v36 = vpop.permute.xlu1 %377 }
  0x8d   : > { %v369_v42 = vpop.permute.xlu0 %368 }
  0x8e   : > { %v383_v47 = vpop.permute.xlu1 %382 }
  0xd3   : > { %v249_v14 = vpop.f32.mrf.mxu0 }
  0xd4   : > { %v254_v15 = vmul.f32 0.0625, %v249_v14 }
  0xd5   : > { %v251_v16 = vpop.f32.mrf.mxu0 }
  0xd6   : > { %v259_v17 = vrot.slane %v254_v15, %v258_v13  ;;  %v255_v18 = vmul.f32 0.0625, %v251_v16 }
  0xd8   : > { %v263_v19 = vrot.slane %v255_v18, %v258_v13  ;;  %v266_v20 = vsub.f32 %v173_v2, %v259_v17  ;;  %v264_v23 = vsub.f32 %v171_v4, %v259_v17 }
  0xda   : > { %v265_v21 = vsub.f32 %v172_v3, %v263_v19  ;;  %v267_v22 = vsub.f32 %v174_v1, %v263_v19  ;;  %v270_v25 = vmul.f32 %v266_v20, %v266_v20  ;;  %v268_v27 = vmul.f32 %v264_v23, %v264_v23 }
  0xdc   : > { %v271_v24 = vmul.f32 %v267_v22, %v267_v22  ;;  %v269_v26 = vmul.f32 %v265_v21, %v265_v21 }
  0xde   : > { %300 = vmatprep.subr.mxu1 %v271_v24 }
  0xdf   : > { %301 = vmatpush1.msra.mxu1 %v270_v25 }
  0xe0   : > { %302 = vmatprep.subr.mxu1 %v269_v26 }
  0xe1   : > { %303 = vmatpush1.msra.mxu1 %v268_v27 }
  0xe2   : > { %458 = vmatmul.mubr.msk.f32.vlgmr.msra.gmra.mxu1 %vm179_vm0, %v489_v5 }
 0x1a2   : > { %v338_v28 = vpop.f32.mrf.mxu1 }
 0x1a3   : > { %v343_v29 = vmul.f32 0.0625, %v338_v28 }
 0x1a4   : > { %v340_v30 = vpop.f32.mrf.mxu1 }
 0x1a5   : > { %v345_v31 = vadd.f32 1e-06, %v343_v29  ;;  %v344_v32 = vmul.f32 0.0625, %v340_v30 }
 0x1a7   : > { %476 = vrsqrt.f32 %v345_v31  ;;  %v346_v33 = vadd.f32 1e-06, %v344_v32 }
 0x1a9   : > { %478 = vrsqrt.f32 %v346_v33 }
 0x1b4   : > { %v477_v35 = vpop.eup %476 }
 0x1b5   : > { %v352_v37 = vrot.slane %v477_v35, %v258_v13 }
 0x1b6   : > { %v479_v38 = vpop.eup %478 }
 0x1b7   : > { %v356_v39 = vrot.slane %v479_v38, %v258_v13  ;;  %v357_v40 = vmul.f32 %v352_v37, %v264_v23  ;;  %v359_v41 = vmul.f32 %v352_v37, %v266_v20 }
 0x1b9   : > { %v358_v43 = vmul.f32 %v356_v39, %v265_v21  ;;  %v371_v44 = vmul.f32 %v364_v34, %v357_v40  ;;  %v360_v45 = vmul.f32 %v356_v39, %v267_v22  ;;  %v373_v46 = vmul.f32 %v369_v42, %v359_v41 }
 0x1bb   : > { %v372_v48 = vmul.f32 %v364_v34, %v358_v43  ;;  %v385_v49 = vadd.f32 %v378_v36, %v371_v44  ;;  %v374_v50 = vmul.f32 %v369_v42, %v360_v45  ;;  %v387_v51 = vadd.f32 %v383_v47, %v373_v46 }
 0x1bd   : > { %v386_v52 = vadd.f32 %v378_v36, %v372_v48  ;;  %389 = vst [vmem:[%s170_s28] sm:$0xff] %v385_v49  ;;  %v388_v53 = vadd.f32 %v383_v47, %v374_v50  ;;  %391 = vst [vmem:[%s170_s28 + $0x10] sm:$0xff] %v387_v51 }
 0x1bf   : > { %390 = vst [vmem:[%s170_s28 + $0x8] sm:$0xff] %v386_v52  ;;  %392 = vst [vmem:[%s170_s28 + $0x18] sm:$0xff] %v388_v53 }
 0x1c0 PF: > { %s13_s12 = sadd.s32 1, %s486_s12  }
 0x1c1   : > { %p10_p4 = scmp.ge.s32.totalorder %s13_s12, 4  }
 0x1c3   :  { %12 = sbr.rel (!%p10_p4) target bundleno = 1 (0x1), region = 62 }

// kernel: reverse.1
= control target key start
LH: loop header
LB: loop body
LE: loop exit
PB: predicated region body
PF: predicated region fallthrough
CT: control target
= control target key end

     0   :  { %s344_s0 = inlined_call_operand.vmem [shape: f32[2,16,16,7], index: 0, kind: input, shape index: {}]   ;;  %s345_s1 = inlined_call_operand.vmem [shape: f32[2,16,16,7], index: 1, kind: output, shape index: {}]  }
   0x1   :  { %v112_v0 = vld [vmem:[%s344_s0 + $0x60] sm:$0xff]  ;;  %v113_v1 = vld [vmem:[%s344_s0 + $0xd0] sm:$0xff]  ;;  %v138_v14 = vld [vmem:[%s344_s0 + $0x68] sm:$0xff] }
   0x2   :  { %v115_v2 = vld [vmem:[%s344_s0 + $0x50] sm:$0xff]  ;;  %4 = vst [vmem:[%s345_s1] sm:$0xff] %v112_v0  ;;  %114 = vst [vmem:[%s345_s1 + $0x70] sm:$0xff] %v113_v1  ;;  %v117_v3 = vld [vmem:[%s344_s0 + $0xc0] sm:$0xff] }
   0x3   :  { %116 = vst [vmem:[%s345_s1 + $0x10] sm:$0xff] %v115_v2  ;;  %v119_v4 = vld [vmem:[%s344_s0 + $0x40] sm:$0xff]  ;;  %v121_v5 = vld [vmem:[%s344_s0 + $0xb0] sm:$0xff]  ;;  %118 = vst [vmem:[%s345_s1 + $0x80] sm:$0xff] %v117_v3 }
   0x4   :  { %120 = vst [vmem:[%s345_s1 + $0x20] sm:$0xff] %v119_v4  ;;  %122 = vst [vmem:[%s345_s1 + $0x90] sm:$0xff] %v121_v5  ;;  %v123_v6 = vld [vmem:[%s344_s0 + $0x30] sm:$0xff]  ;;  %v125_v7 = vld [vmem:[%s344_s0 + $0xa0] sm:$0xff] }
   0x5   :  { %v127_v8 = vld [vmem:[%s344_s0 + $0x20] sm:$0xff]  ;;  %124 = vst [vmem:[%s345_s1 + $0x30] sm:$0xff] %v123_v6  ;;  %126 = vst [vmem:[%s345_s1 + $0xa0] sm:$0xff] %v125_v7  ;;  %v129_v9 = vld [vmem:[%s344_s0 + $0x90] sm:$0xff] }
   0x6   :  { %128 = vst [vmem:[%s345_s1 + $0x40] sm:$0xff] %v127_v8  ;;  %v131_v10 = vld [vmem:[%s344_s0 + $0x10] sm:$0xff]  ;;  %v133_v11 = vld [vmem:[%s344_s0 + $0x80] sm:$0xff]  ;;  %130 = vst [vmem:[%s345_s1 + $0xb0] sm:$0xff] %v129_v9 }
   0x7   :  { %132 = vst [vmem:[%s345_s1 + $0x50] sm:$0xff] %v131_v10  ;;  %134 = vst [vmem:[%s345_s1 + $0xc0] sm:$0xff] %v133_v11  ;;  %v49_v12 = vld [vmem:[%s344_s0] sm:$0xff]  ;;  %v136_v13 = vld [vmem:[%s344_s0 + $0x70] sm:$0xff] }
   0x8   :  { %135 = vst [vmem:[%s345_s1 + $0x60] sm:$0xff] %v49_v12  ;;  %137 = vst [vmem:[%s345_s1 + $0xd0] sm:$0xff] %v136_v13  ;;  %v140_v15 = vld [vmem:[%s344_s0 + $0xd8] sm:$0xff]  ;;  %v144_v17 = vld [vmem:[%s344_s0 + $0xc8] sm:$0xff] }
   0x9   :  { %139 = vst [vmem:[%s345_s1 + $0x8] sm:$0xff] %v138_v14  ;;  %v142_v16 = vld [vmem:[%s344_s0 + $0x58] sm:$0xff]  ;;  %141 = vst [vmem:[%s345_s1 + $0x78] sm:$0xff] %v140_v15  ;;  %v146_v18 = vld [vmem:[%s344_s0 + $0x48] sm:$0xff] }
   0xa   :  { %143 = vst [vmem:[%s345_s1 + $0x18] sm:$0xff] %v142_v16  ;;  %145 = vst [vmem:[%s345_s1 + $0x88] sm:$0xff] %v144_v17  ;;  %v148_v19 = vld [vmem:[%s344_s0 + $0xb8] sm:$0xff]  ;;  %v152_v21 = vld [vmem:[%s344_s0 + $0xa8] sm:$0xff] }
   0xb   :  { %v150_v20 = vld [vmem:[%s344_s0 + $0x38] sm:$0xff]  ;;  %147 = vst [vmem:[%s345_s1 + $0x28] sm:$0xff] %v146_v18  ;;  %149 = vst [vmem:[%s345_s1 + $0x98] sm:$0xff] %v148_v19  ;;  %v154_v22 = vld [vmem:[%s344_s0 + $0x28] sm:$0xff] }
   0xc   :  { %151 = vst [vmem:[%s345_s1 + $0x38] sm:$0xff] %v150_v20  ;;  %v156_v23 = vld [vmem:[%s344_s0 + $0x98] sm:$0xff]  ;;  %153 = vst [vmem:[%s345_s1 + $0xa8] sm:$0xff] %v152_v21  ;;  %v160_v25 = vld [vmem:[%s344_s0 + $0x88] sm:$0xff] }
   0xd   :  { %155 = vst [vmem:[%s345_s1 + $0x48] sm:$0xff] %v154_v22  ;;  %157 = vst [vmem:[%s345_s1 + $0xb8] sm:$0xff] %v156_v23  ;;  %v158_v24 = vld [vmem:[%s344_s0 + $0x18] sm:$0xff]  ;;  %v162_v26 = vld [vmem:[%s344_s0 + $0x8] sm:$0xff] }
   0xe   :  { %159 = vst [vmem:[%s345_s1 + $0x58] sm:$0xff] %v158_v24  ;;  %161 = vst [vmem:[%s345_s1 + $0xc8] sm:$0xff] %v160_v25  ;;  %v164_v27 = vld [vmem:[%s344_s0 + $0x78] sm:$0xff] }
   0xf   :  { %163 = vst [vmem:[%s345_s1 + $0x68] sm:$0xff] %v162_v26  ;;  %165 = vst [vmem:[%s345_s1 + $0xd8] sm:$0xff] %v164_v27 }

// kernel: _lambda_.3
= control target key start
LH: loop header
LB: loop body
LE: loop exit
PB: predicated region body
PF: predicated region fallthrough
CT: control target
= control target key end

     0   :  { %s9011_s6 = smov 1   ;;  %s9012_s10 = smov 2   ;;  %s14934_s0 = inlined_call_operand.smem [shape: u32[32], index: -1, kind: input, shape index: {}] }
   0x1   :  { %s9102_s5 = sld [smem:[%s14934_s0]]   ;;  %s9013_s14 = smov 3  }
   0x2   :  { %s9107_s9 = sld [smem:[%s14934_s0 + %s9011_s6]]   ;;  %s9014_s18 = smov 4  }
   0x3   :  { %s9112_s13 = sld [smem:[%s14934_s0 + %s9012_s10]]   ;;  %s9015_s22 = smov 5  }
   0x4   :  { %s9117_s17 = sld [smem:[%s14934_s0 + %s9013_s14]]   ;;  %s9016_s26 = smov 6  }
   0x5   :  { %s9122_s21 = sld [smem:[%s14934_s0 + %s9014_s18]]   ;;  %s9017_s30 = smov 7  }
   0x6   :  { %s9127_s25 = sld [smem:[%s14934_s0 + %s9015_s22]]   ;;  %s9018_s4 = smov 8  }
   0x7   :  { %15577 = sst [smem:[#allocation2_spill]] %s9102_s5  ;;  %s9019_s10 = smov 9  }
   0x8   :  { %15578 = sst [smem:[#allocation3_spill]] %s9107_s9  ;;  %s9020_s15 = smov 10  }
   0x9   :  { %15579 = sst [smem:[#allocation4_spill]] %s9112_s13  ;;  %s9021_s20 = smov 11  }
   0xa   :  { %15580 = sst [smem:[#allocation5_spill]] %s9117_s17  ;;  %s9023_s1 = smov 13  }
   0xb   :  { %15581 = sst [smem:[#allocation6_spill]] %s9122_s21  ;;  %s9024_s7 = smov 14  }
   0xc   :  { %15582 = sst [smem:[#allocation7_spill]] %s9127_s25  ;;  %s9026_s22 = smov 16  }
   0xd   :  { %s9132_s29 = sld [smem:[%s14934_s0 + %s9016_s26]]   ;;  %s9022_s26 = smov 12  }
   0xe   :  { %s9137_s3 = sld [smem:[%s14934_s0 + %s9017_s30]]   ;;  %s9027_s28 = smov 17  }
   0xf   :  { %s9142_s8 = sld [smem:[%s14934_s0 + %s9018_s4]]  }
  0x10   :  { %s9147_s14 = sld [smem:[%s14934_s0 + %s9019_s10]]  }
  0x11   :  { %s9152_s19 = sld [smem:[%s14934_s0 + %s9020_s15]]   ;;  %s9025_s15 = smov 15  }
  0x12   :  { %s9157_s24 = sld [smem:[%s14934_s0 + %s9021_s20]]  }
  0x13   :  { %15583 = sst [smem:[#allocation8_spill]] %s9132_s29 }
  0x14   :  { %15584 = sst [smem:[#allocation9_spill]] %s9137_s3 }
  0x15   :  { %15585 = sst [smem:[#allocation10_spill]] %s9142_s8 }
  0x16   :  { %15586 = sst [smem:[#allocation11_spill]] %s9147_s14 }
  0x17   :  { %15587 = sst [smem:[#allocation12_spill]] %s9152_s19 }
  0x18   :  { %15588 = sst [smem:[#allocation13_spill]] %s9157_s24 }
  0x19   :  { %s9162_s30 = sld [smem:[%s14934_s0 + %s9022_s26]]  }
  0x1a   :  { %s9167_s6 = sld [smem:[%s14934_s0 + %s9023_s1]]  }
  0x1b   :  { %s9172_s12 = sld [smem:[%s14934_s0 + %s9024_s7]]   ;;  %s9028_s7 = smov 18  }
  0x1c   :  { %s9177_s20 = sld [smem:[%s14934_s0 + %s9025_s15]]   ;;  %s9029_s15 = smov 19  }
  0x1d   :  { %s9182_s27 = sld [smem:[%s14934_s0 + %s9026_s22]]   ;;  %s9030_s22 = smov 20  }
  0x1e   :  { %s9187_s4 = sld [smem:[%s14934_s0 + %s9027_s28]]   ;;  %s9031_s28 = smov 21  }
  0x1f   :  { %15589 = sst [smem:[#allocation14_spill]] %s9162_s30 }
  0x20   :  { %15590 = sst [smem:[#allocation15_spill]] %s9167_s6 }
  0x21   :  { %15591 = sst [smem:[#allocation16_spill]] %s9172_s12 }
  0x22   :  { %15592 = sst [smem:[#allocation17_spill]] %s9177_s20 }
  0x23   :  { %15593 = sst [smem:[#allocation18_spill]] %s9182_s27 }
  0x24   :  { %15594 = sst [smem:[#allocation19_spill]] %s9187_s4 }
  0x25   :  { %s9192_s25 = sld [smem:[%s14934_s0 + %s9028_s7]]   ;;  %s9032_s7 = smov 22  }
  0x26   :  { %s9197_s21 = sld [smem:[%s14934_s0 + %s9029_s15]]   ;;  %s9033_s15 = smov 23  }
  0x27   :  { %s9202_s20 = sld [smem:[%s14934_s0 + %s9030_s22]]   ;;  %s9034_s22 = smov 24  }
  0x28   :  { %s9207_s4 = sld [smem:[%s14934_s0 + %s9031_s28]]   ;;  %s9035_s28 = smov 25  }
  0x2b   :  { %15595 = sst [smem:[#allocation20_spill]] %s9192_s25 }
  0x2c   :  { %15596 = sst [smem:[#allocation21_spill]] %s9197_s21 }
  0x2d   :  { %15597 = sst [smem:[#allocation22_spill]] %s9202_s20 }
  0x2e   :  { %15598 = sst [smem:[#allocation23_spill]] %s9207_s4 }
  0x2f   :  { %s9212_s25 = sld [smem:[%s14934_s0 + %s9032_s7]]   ;;  %s9036_s7 = smov 26  }
  0x30   :  { %s9217_s21 = sld [smem:[%s14934_s0 + %s9033_s15]]   ;;  %s9037_s15 = smov 27  }
  0x31   :  { %s9222_s20 = sld [smem:[%s14934_s0 + %s9034_s22]]   ;;  %s9038_s22 = smov 28  }
  0x32   :  { %s9227_s4 = sld [smem:[%s14934_s0 + %s9035_s28]]   ;;  %s9039_s28 = smov 29  }
  0x35   :  { %15599 = sst [smem:[#allocation24_spill]] %s9212_s25 }
  0x36   :  { %15600 = sst [smem:[#allocation25_spill]] %s9217_s21 }
  0x37   :  { %15601 = sst [smem:[#allocation26_spill]] %s9222_s20 }
  0x38   :  { %15602 = sst [smem:[#allocation27_spill]] %s9227_s4 }
  0x39   :  { %s9232_s25 = sld [smem:[%s14934_s0 + %s9036_s7]]   ;;  %s9040_s7 = smov 30  }
  0x3a   :  { %s9237_s21 = sld [smem:[%s14934_s0 + %s9037_s15]]   ;;  %s9041_s15 = smov 31  }
  0x3b   :  { %s9242_s20 = sld [smem:[%s14934_s0 + %s9038_s22]]   ;;  %s9259_s22 = smov 0  }
  0x3c   :  { %s9247_s4 = sld [smem:[%s14934_s0 + %s9039_s28]]  }
  0x3f   :  { %15603 = sst [smem:[#allocation28_spill]] %s9232_s25 }
  0x40   :  { %15604 = sst [smem:[#allocation29_spill]] %s9237_s21 }
  0x41   :  { %15605 = sst [smem:[#allocation30_spill]] %s9242_s20 }
  0x42   :  { %15606 = sst [smem:[#allocation31_spill]] %s9247_s4 }
  0x43   :  { %s9252_s25 = sld [smem:[%s14934_s0 + %s9040_s7]]  }
  0x44   :  { %s9257_s21 = sld [smem:[%s14934_s0 + %s9041_s15]]  }
  0x49   :  { %15607 = sst [smem:[#allocation32_spill]] %s9252_s25 }
  0x4a   :  { %15608 = sst [smem:[#allocation33_spill]] %s9257_s21 }
  0x4b LB: > { %s15609_s30 = sld [smem:[#allocation14_spill]]  ;;  %s8020_s23 = sadd.s32 4294967295, %s9009_s22   ;;  %s9009_s22 = sphi %s9259_s22, %s73_s22  }
  0x4c   : > { %s15610_s29 = sld [smem:[#allocation8_spill]]  ;;  %p8024_p0 = scmp.ge.s32.totalorder %s9009_s22, 1 }
  0x4d   : > { %s15611_s27 = sld [smem:[#allocation18_spill]]  ;;  %p889_p1 = scmp.lt.s32.totalorder %s9009_s22, 3 }
  0x4e   : > { %s15612_s24 = sld [smem:[#allocation13_spill]] }
  0x4f   : > { %s15613_s19 = sld [smem:[#allocation12_spill]]  ;;  %p890_p2 = pnand %p8024_p0, %p889_p1 }
  0x50   : > { %s15614_s17 = sld [smem:[#allocation5_spill]] }
  0x51   : > { %s15615_s14 = sld [smem:[#allocation11_spill]] }
  0x52   : > { %s15616_s12 = sld [smem:[#allocation16_spill]]  ;;  %893 = sbr.rel (%p890_p2) target bundleno = 3851 (0xf0b), region = 144 }
  0x53   : > { %s15617_s8 = sld [smem:[#allocation10_spill]] }
  0x54   : > { %s15618_s6 = sld [smem:[#allocation15_spill]] }
  0x55   : > { %s15619_s3 = sld [smem:[#allocation9_spill]] }
  0x56   : > { %15620 = sst [smem:[#allocation34_spill]] %s9009_s22 }
  0x57   : > { %p979_p3 = scmp.lt.s32.totalorder %s8020_s23, 1  ;;  %s15621_s9 = sld [smem:[#allocation3_spill]]  ;;  %v14943_v0 = vmov 0.0   ;;  %v9043_v1 = vmov 0   ;;  %v1454_v2 = vld [vmem:[%s15615_s14] sm:$0xff]  ;;  %v1455_v3 = vld [vmem:[%s15615_s14 + $0x8] sm:$0xff] }
  0x58   : > { %1537 = vmatprep.mubr.f32.mxu0 %v14943_v0  ;;  %8941 = vset.pattern.permute.xlu0 %v9043_v1  ;;  %v1550_v4 = vld [vmem:[%s15613_s19] sm:$0xff]  ;;  %v1551_v5 = vld [vmem:[%s15613_s19 + $0x8] sm:$0xff]  ;;  %s15623_s5 = sld [smem:[#allocation2_spill]]  ;;  %vm1466_vm0 = vcmask 130048   ;;  %v14941_v27 = vmov 1.0   ;;  %v8035_v39 = vld [vmem:[%s15610_s29 + $0x18] sm:$0xff] }
  0x59   : > { %s17259_s23 = smov (!%p979_p3, %s8020_s23), 1  ;;  %1458 = vperm.xlu0 %8941, %v1454_v2   ;;  %8942 = vset.pattern.permute.xlu1 %v9043_v1  ;;  %v1452_v10 = vld [vmem:[%s15617_s8] sm:$0xff]  ;;  %v1453_v11 = vld [vmem:[%s15617_s8 + $0x8] sm:$0xff]  ;;  %s15624_s13 = sld [smem:[#allocation4_spill]]  ;;  %v8034_v44 = vld [vmem:[%s15610_s29 + $0x10] sm:$0xff]  ;;  %vm9066_vm9 = vmmov 0  }
  0x5a   : > { %1463 = vperm.xlu1 %8942, %v1455_v3   ;;  %s9271_s0 = sshll.u32 %s17259_s23, 5  ;;  %8308 = vmatprep.subr.mxu1 %v14941_v27  ;;  %v1043_v40 = vld [vmem:[%s15610_s29 + $0x8] sm:$0xff]  ;;  %s14965_s2 = smov 17   ;;  %v1042_v43 = vld [vmem:[%s15610_s29] sm:$0xff]  ;;  %v8041_v49 = vld [vmem:[%s15610_s29 + $0x38] sm:$0xff]  ;;  %vm2381_vm10 = vcmask 1041408  }
  0x5b   : > { %15622 = sst [smem:[#allocation35_spill]] %s9271_s0  ;;  %8309 = vmatpush3.msra.mxu1 %v14941_v27  ;;  %s14999_s7 = smov 16   ;;  %v8038_v46 = vld [vmem:[%s15610_s29 + $0x28] sm:$0xff]  ;;  %v8037_v48 = vld [vmem:[%s15610_s29 + $0x20] sm:$0xff]  ;;  %v8040_v50 = vld [vmem:[%s15610_s29 + $0x30] sm:$0xff]  ;;  %vm2377_vm11 = vcmask 15360  }
  0x5c   : > { %8310 = vmatprep.subr.mxu1 %v14941_v27  ;;  %s14981_s10 = smov 15   ;;  %s14975_s11 = smov 1   ;;  %v8043_v51 = vld [vmem:[%s15610_s29 + $0x48] sm:$0xff]  ;;  %v8042_v52 = vld [vmem:[%s15610_s29 + $0x40] sm:$0xff]  ;;  %v8046_v53 = vld [vmem:[%s15610_s29 + $0x58] sm:$0xff]  ;;  %vm2461_vm12 = vcmask 31744  }
  0x5d   : > { %s988_s26 = scalar_lea.vmem %s15621_s9, %s9271_s0  ;;  %1554 = vperm.xlu0 %8941, %v1550_v4   ;;  %8311 = vmatpush3.msra.mxu1 %v14941_v27  ;;  %s14971_s15 = smov 127   ;;  %v8045_v54 = vld [vmem:[%s15610_s29 + $0x50] sm:$0xff]  ;;  %v8049_v55 = vld [vmem:[%s15610_s29 + $0x68] sm:$0xff]  ;;  %v8048_v56 = vld [vmem:[%s15610_s29 + $0x60] sm:$0xff]  ;;  %vm2612_vm13 = vcmask 1043456  }
  0x5e   : > { %v1006_v6 = vld [vmem:[%s988_s26 + $0x18] sm:$0xff]  ;;  %v1005_v7 = vld [vmem:[%s988_s26 + $0x10] sm:$0xff]  ;;  %1559 = vperm.xlu1 %8942, %v1551_v5   ;;  %v1004_v8 = vld [vmem:[%s988_s26 + $0x8] sm:$0xff]  ;;  %s983_s28 = scalar_lea.vmem %s15623_s5, %s9271_s0  ;;  %8312 = vmatprep.subr.mxu1 %v14941_v27  ;;  %s14977_s16 = smov 113  }
  0x5f   : > { %1501 = vmatprep.subr.mxu0 %v1006_v6  ;;  %v1003_v9 = vld [vmem:[%s988_s26] sm:$0xff]  ;;  %v1008_v16 = vld [vmem:[%s983_s28 + $0x8] sm:$0xff]  ;;  %v1009_v24 = vld [vmem:[%s983_s28 + $0x10] sm:$0xff]  ;;  %8313 = vmatpush3.msra.mxu1 %v14941_v27  ;;  %s993_s1 = scalar_lea.vmem %s15624_s13, %s9271_s0  ;;  %s14957_s18 = smov 112  }
  0x60   : > { %1502 = vmatpush1.msra.mxu0 %v1005_v7  ;;  %v1007_v15 = vld [vmem:[%s983_s28] sm:$0xff]  ;;  %v1010_v25 = vld [vmem:[%s983_s28 + $0x18] sm:$0xff]  ;;  %8314 = vmatprep.subr.mxu1 %v14941_v27  ;;  %v9330_v42 = vld [vmem:[%s993_s1 + $0x10] sm:$0xff]  ;;  %s14955_s23 = smov 111   ;;  %s15653_s26 = sld [smem:[#allocation17_spill]] }
  0x61   : > { %1503 = vmatprep.subr.mxu0 %v1004_v8  ;;  %8315 = vmatpush3.msra.mxu1 %v14941_v27  ;;  %v9327_v41 = vld [vmem:[%s993_s1 + $0x18] sm:$0xff]  ;;  %v9345_v45 = vld [vmem:[%s993_s1] sm:$0xff]  ;;  %v9352_v47 = vld [vmem:[%s993_s1 + $0x8] sm:$0xff]  ;;  %s14959_s28 = smov 34   ;;  %s14961_s1 = smov 33  }
  0x62   : > { %1504 = vmatpush1.msra.mxu0 %v1003_v9  ;;  %8316 = vmatprep.subr.mxu1 %v14941_v27  ;;  %v8052_v57 = vld [vmem:[%s15610_s29 + $0x78] sm:$0xff]  ;;  %v8051_v58 = vld [vmem:[%s15610_s29 + $0x70] sm:$0xff]  ;;  %v8055_v59 = vld [vmem:[%s15610_s29 + $0x88] sm:$0xff]  ;;  %s15672_s5 = smov 126   ;;  %s15678_s8 = smov 113  }
  0x63   : > { %8056 = vmatmul.mubr.msk.f32.vlgmr.msra.gmra.mxu0 %vm1466_vm0, %v1452_v10  ;;  %8317 = vmatpush3.msra.mxu1 %v14941_v27  ;;  %v8054_v60 = vld [vmem:[%s15610_s29 + $0x80] sm:$0xff]  ;;  %v1437_v61 = vld [vmem:[%s15619_s3 + $0x8] sm:$0xff]  ;;  %s15685_s9 = smov 110   ;;  %s15691_s13 = smov 97  }
  0x64   : > { %1543 = vmatprep.mubr.f32.mxu0 %v14943_v0  ;;  %8318 = vmatprep.subr.mxu1 %v14941_v27  ;;  %v1436_v62 = vld [vmem:[%s15619_s3] sm:$0xff]  ;;  %v1686_v63 = vld [vmem:[%s15609_s30 + $0x8] sm:$0xff]  ;;  %s15669_s3 = smov 127   ;;  %s15694_s14 = smov 96  }
  0x65   : > { %8319 = vmatpush3.msra.mxu1 %v14941_v27  ;;  %v1785_v1 = vld [vmem:[%s15618_s6 + $0x8] sm:$0xff]  ;;  %v2001_v6 = vld [vmem:[%s15611_s27] sm:$0xff]  ;;  %s15700_s19 = smov 94   ;;  %s15040_s29 = smov 99  }
  0x66   : > { %8320 = vmatprep.subr.mxu1 %v14941_v27  ;;  %v1787_v2 = vld [vmem:[%s15616_s12 + $0x8] sm:$0xff]  ;;  %s15075_s22 = smov 19   ;;  %s15737_s21 = smov 49  }
  0x67   : > { %8057 = vmatmul.mubr.msk.f32.gmra.mxu0 %vm1466_vm0, %v1453_v11  ;;  %8321 = vmatpush3.msra.mxu1 %v14941_v27  ;;  %s15093_s0 = smov 13   ;;  %s15740_s4 = smov 48  }
  0x68   : > { %1767 = vmatprep.mubr.f32.mxu0 %v14943_v0  ;;  %8322 = vmatprep.subr.mxu1 %v14941_v27  ;;  %s15098_s25 = smov 3   ;;  %s15746_s20 = smov 46  }
  0x69   : > { %8323 = vmatpush3.msra.mxu1 %v14941_v27 }
  0x6a   : > { %8324 = vmatprep.subr.mxu1 %v14941_v27 }
  0x6b   : > { %8325 = vmatpush3.msra.mxu1 %v14941_v27 }
  0x6c   : > { %8326 = vmatprep.subr.mxu1 %v14941_v27 }
  0x6d   : > { %8327 = vmatpush3.msra.mxu1 %v14941_v27 }
  0x6e   : > { %8328 = vmatprep.subr.mxu1 %v14941_v27 }
  0x6f   : > { %8329 = vmatpush3.msra.mxu1 %v14941_v27 }
  0x70   : > { %8330 = vmatprep.subr.mxu1 %v14941_v27 }
  0x71   : > { %8331 = vmatpush3.msra.mxu1 %v14941_v27 }
  0x72   : > { %8332 = vmatprep.subr.mxu1 %v14941_v27 }
  0x73   : > { %8333 = vmatpush3.msra.mxu1 %v14941_v27 }
  0x74   : > { %8334 = vmatprep.subr.mxu1 %v14941_v27 }
  0x75   : > { %8335 = vmatpush3.msra.mxu1 %v14941_v27 }
  0x76   : > { %8336 = vmatprep.subr.mxu1 %v14941_v27 }
  0x77   : > { %8337 = vmatpush3.msra.mxu1 %v14941_v27 }
  0x78   : > { %8338 = vmatprep.subr.mxu1 %v14941_v27 }
  0x79   : > { %8339 = vmatpush3.msra.mxu1 %v14941_v27 }
  0x7a   : > { %8588 = vmatprep.subr.mxu1 %v14943_v0 }
  0xd4   : > { %v1459_v12 = vpop.permute.xlu0 %1458 }
  0xd5   : > { %v1464_v13 = vpop.permute.xlu1 %1463 }
  0xd8   : > { %v1555_v14 = vpop.permute.xlu0 %1554 }
  0xd9   : > { %v1562_v20 = vmul.f32 %v1555_v14, %v1007_v15  ;;  %v1563_v21 = vmul.f32 %v1555_v14, %v1008_v16  ;;  %v1560_v23 = vpop.permute.xlu1 %1559 }
  0xda   : > { %v1564_v32 = vmul.f32 %v1560_v23, %v1009_v24  ;;  %v1565_v33 = vmul.f32 %v1560_v23, %v1010_v25 }
 0x123   : > { %v1539_v17 = vpop.f32.mrf.mxu0 }
 0x124   : > { %v1540_v18 = vadd.f32 %v1539_v17, %v1459_v12 }
 0x125   : > { %v1541_v19 = vpop.f32.mrf.mxu0 }
 0x126   : > { %v1542_v22 = vadd.f32 %v1541_v19, %v1459_v12  ;;  %v9285_v28 = vmul.f32 %v1562_v20, %v1540_v18  ;;  %v2003_v12 = vld [vmem:[%s15611_s27 + $0x10] sm:$0xff] }
 0x127   : > { %v1545_v26 = vpop.f32.mrf.mxu0 }
 0x128   : > { %v9287_v29 = vmul.f32 %v1563_v21, %v1542_v22  ;;  %v1546_v30 = vadd.f32 %v1545_v26, %v1464_v13 }
 0x129   : > { %v1547_v31 = vpop.f32.mrf.mxu0 }
 0x12a   : > { %v1548_v34 = vadd.f32 %v1547_v31, %v1464_v13  ;;  %v1570_v35 = vmax.f32 %v9285_v28, %v9287_v29  ;;  %v9295_v36 = vmul.f32 %v1564_v32, %v1546_v30 }
 0x12c   : > { %v9297_v37 = vmul.f32 %v1565_v33, %v1548_v34  ;;  %1571 = vmax.xlane.f32.xlu0 %v1570_v35 }
 0x12e   : > { %v1573_v38 = vmax.f32 %v9295_v36, %v9297_v37 }
 0x130   : > { %1574 = vmax.xlane.f32.xlu1 %v1573_v38 }
 0x141   : > { %1098 = vperm.xlu1 %8942, %v8035_v39  }
 0x142   : > { %1051 = vperm.xlu0 %8941, %v1043_v40  }
 0x145   : > { %1017 = vrot.lane.b32.xlu1 %v9327_v41, %s14965_s2 }
 0x146   : > { %1013 = vrot.lane.b32.xlu0 %v9330_v42, %s14965_s2 }
 0x149   : > { %1060 = vrot.lane.b32.xlu1 %v9330_v42, %s14999_s7 }
 0x14a   : > { %1046 = vperm.xlu0 %8941, %v1042_v43  }
 0x14d   : > { %1093 = vperm.xlu1 %8942, %v8034_v44   ;;  %v1685_v44 = vld [vmem:[%s15609_s30] sm:$0xff]  ;;  %s15067_s30 = smov 83  }
 0x14e   : > { %1064 = vrot.lane.b32.xlu0 %v9327_v41, %s14999_s7 }
 0x151   : > { %1011 = vrot.lane.b32.xlu1 %v9345_v45, %s14965_s2 }
 0x152   : > { %1149 = vperm.xlu0 %8941, %v8038_v46  }
 0x155   : > { %1058 = vrot.lane.b32.xlu1 %v9345_v45, %s14999_s7 }
 0x156   : > { %1015 = vrot.lane.b32.xlu0 %v9352_v47, %s14965_s2 }
 0x159   : > { %1111 = vrot.lane.b32.xlu1 %v9330_v42, %s14981_s10 }
 0x15a   : > { %1062 = vrot.lane.b32.xlu0 %v9352_v47, %s14999_s7 }
 0x15d   : > { %1144 = vperm.xlu1 %8942, %v8037_v48  }
 0x15e   : > { %1115 = vrot.lane.b32.xlu0 %v9327_v41, %s14981_s10 }
 0x161   : > { %1109 = vrot.lane.b32.xlu1 %v9345_v45, %s14981_s10 }
 0x162   : > { %1200 = vperm.xlu0 %8941, %v8041_v49   ;;  %v1784_v49 = vld [vmem:[%s15618_s6] sm:$0xff]  ;;  %s15675_s6 = smov 114  }
 0x165   : > { %1162 = vrot.lane.b32.xlu1 %v9330_v42, %s14975_s11 }
 0x166   : > { %1113 = vrot.lane.b32.xlu0 %v9352_v47, %s14981_s10 }
 0x169   : > { %1195 = vperm.xlu1 %8942, %v8040_v50   ;;  %v1786_v50 = vld [vmem:[%s15616_s12] sm:$0xff]  ;;  %s15688_s12 = smov 98  }
 0x16a   : > { %1166 = vrot.lane.b32.xlu0 %v9327_v41, %s14975_s11 }
 0x16d   : > { %1160 = vrot.lane.b32.xlu1 %v9345_v45, %s14975_s11 }
 0x16e   : > { %1221 = vperm.xlu0 %8941, %v8043_v51  }
 0x171   : > { %1216 = vperm.xlu1 %8942, %v8042_v52  }
 0x172   : > { %1164 = vrot.lane.b32.xlu0 %v9352_v47, %s14975_s11 }
 0x175   : > { %1234 = vrot.lane.b32.xlu1 %v9330_v42, %s14971_s15 }
 0x176   : > { %1272 = vperm.xlu0 %8941, %v8046_v53   ;;  %v2002_v53 = vld [vmem:[%s15611_s27 + $0x8] sm:$0xff] }
 0x179   : > { %1267 = vperm.xlu1 %8942, %v8045_v54  }
 0x17a   : > { %1238 = vrot.lane.b32.xlu0 %v9327_v41, %s14971_s15 }
 0x17d   : > { %1232 = vrot.lane.b32.xlu1 %v9345_v45, %s14971_s15 }
 0x17e   : > { %1323 = vperm.xlu0 %8941, %v8049_v55  }
 0x181   : > { %1285 = vrot.lane.b32.xlu1 %v9330_v42, %s14977_s16 }
 0x182   : > { %1236 = vrot.lane.b32.xlu0 %v9352_v47, %s14971_s15 }
 0x185   : > { %1318 = vperm.xlu1 %8942, %v8048_v56   ;;  %v2004_v56 = vld [vmem:[%s15611_s27 + $0x18] sm:$0xff]  ;;  %s15027_s27 = smov 49  }
 0x186   : > { %1289 = vrot.lane.b32.xlu0 %v9327_v41, %s14977_s16 }
 0x189   : > { %1283 = vrot.lane.b32.xlu1 %v9345_v45, %s14977_s16 }
 0x18a   : > { %1374 = vperm.xlu0 %8941, %v8052_v57  }
 0x18d   : > { %1336 = vrot.lane.b32.xlu1 %v9330_v42, %s14957_s18 }
 0x18e   : > { %1287 = vrot.lane.b32.xlu0 %v9352_v47, %s14977_s16 }
 0x191   : > { %1369 = vperm.xlu1 %8942, %v8051_v58  }
 0x192   : > { %1340 = vrot.lane.b32.xlu0 %v9327_v41, %s14957_s18 }
 0x195   : > { %1334 = vrot.lane.b32.xlu1 %v9345_v45, %s14957_s18 }
 0x196   : > { %1425 = vperm.xlu0 %8941, %v8055_v59  }
 0x199   : > { %1387 = vrot.lane.b32.xlu1 %v9330_v42, %s14955_s23 }
 0x19a   : > { %1338 = vrot.lane.b32.xlu0 %v9352_v47, %s14957_s18  ;;  %s14993_s18 = smov 31  }
 0x19d   : > { %1420 = vperm.xlu1 %8942, %v8054_v60  }
 0x19e   : > { %1391 = vrot.lane.b32.xlu0 %v9327_v41, %s14955_s23 }
 0x1a1   : > { %1389 = vrot.lane.b32.xlu1 %v9352_v47, %s14955_s23 }
 0x1a2   : > { %1385 = vrot.lane.b32.xlu0 %v9345_v45, %s14955_s23  ;;  %s14997_s23 = smov 32  }
 0x1a6   : > { %1445 = vperm.xlu0 %8941, %v1437_v61  }
 0x1aa   : > { %1440 = vperm.xlu0 %8941, %v1436_v62  }
 0x1ae   : > { %1694 = vperm.xlu0 %8941, %v1686_v63  }
 0x1b2   : > { %1976 = vperm.xlu0 %8941, %v1785_v1  }
 0x1b5   : > { %v1572_v3 = vpop.xlane.xlu0 %1571 }
 0x1b6   : > { %v1576_v4 = vsub.f32 %v9285_v28, %v1572_v3  ;;  %v1577_v5 = vsub.f32 %v9287_v29, %v1572_v3  ;;  %1990 = vperm.xlu0 %8941, %v1787_v2  }
 0x1b8   : > { %v1580_v7 = vmul.f32 1.442695, %v1576_v4  ;;  %v1582_v8 = vmul.f32 1.442695, %v1577_v5 }
 0x1b9   : > { %v1575_v9 = vpop.xlane.xlu1 %1574 }
 0x1ba   : > { %8943 = vpow2.f32 %v1580_v7  ;;  %v1578_v10 = vsub.f32 %v9295_v36, %v1575_v9  ;;  %v1579_v11 = vsub.f32 %v9297_v37, %v1575_v9  ;;  %2007 = vperm.xlu0 %8941, %v2001_v6  }
 0x1bb   : > { %8945 = vpow2.f32 %v1582_v8 }
 0x1bc   : > { %v1584_v13 = vmul.f32 1.442695, %v1578_v10  ;;  %v1586_v14 = vmul.f32 1.442695, %v1579_v11  ;;  %v1019_v10 = vlaneseq }
 0x1bd   : > { %v9444_v19 = vpop.permute.xlu1 %1098  ;;  %v9446_v20 = vpop.permute.xlu0 %1051 }
 0x1be   : > { %8947 = vpow2.f32 %v1584_v13  ;;  %2017 = vperm.xlu0 %8941, %v2003_v12   ;;  %v1029_v11 = vshrl.u32 %v1019_v10, 7 }
 0x1bf   : > { %8949 = vpow2.f32 %v1586_v14  ;;  %v9525_v14 = vand.u32 127, %v1019_v10 }
 0x1c1   : > { %v9448_v21 = vpop.permute.xlu1 %1017  ;;  %v9450_v22 = vpop.permute.xlu0 %1013  ;;  %vm15498_vm1 = vcmp.lt.s32.totalorder %v9525_v14, 17  ;;  %vm15507_vm2 = vcmp.lt.s32.totalorder %v9525_v14, 16  ;;  %vm15401_vm3 = vcmp.lt.s32.totalorder %v9525_v14, 15  ;;  %vm15405_vm4 = vcmp.lt.s32.totalorder %v9525_v14, 1 }
 0x1c2   : > { %v1023_v10 = vsel %vm15498_vm1, %v9450_v22, %v9448_v21  ;;  %vm15406_vm5 = vcmp.lt.s32.totalorder %v9525_v14, 127  ;;  %vm15432_vm6 = vcmp.lt.s32.totalorder %v9525_v14, 113  ;;  %vm15410_vm7 = vcmp.lt.s32.totalorder %v9525_v14, 112 }
 0x1c3   : > { %vm15427_vm8 = vcmp.lt.s32.totalorder %v9525_v14, 111  ;;  %vm3020_vm14 = vcmp.lt.s32.totalorder %v9525_v14, 34  ;;  %vm15482_vm15 = vcmp.lt.s32.totalorder %v9525_v14, 33 }
 0x1c5   : > { %v9452_v24 = vpop.permute.xlu1 %1060  ;;  %v9454_v25 = vpop.permute.xlu0 %1046 }
 0x1c7   : > { %v9432_v15 = vpop.eup %8943 }
 0x1c8   : > { %15625 = vst [vmem:[#allocation36_spill] sm:$0xff] %v9432_v15  ;;  %v9434_v16 = vpop.eup %8945 }
 0x1c9   : > { %15626 = vst [vmem:[#allocation37_spill] sm:$0xff] %v9434_v16  ;;  %1652 = vmatprep.mubr.f32.mxu1 %v9434_v16  ;;  %v9456_v30 = vpop.permute.xlu1 %1093  ;;  %v9458_v31 = vpop.permute.xlu0 %1064 }
 0x1ca   : > { %1653 = vmatmul.mubr.f32.vlgmr.msra.gmra.mxu1 %v9432_v15  ;;  %v1068_v16 = vsel %vm15507_vm2, %v9452_v24, %v9458_v31 }
 0x1cb   : > { %v9438_v17 = vpop.eup %8947 }
 0x1cc   : > { %15627 = vst [vmem:[#allocation38_spill] sm:$0xff] %v9438_v17  ;;  %v9440_v18 = vpop.eup %8949 }
 0x1cd   : > { %15628 = vst [vmem:[#allocation39_spill] sm:$0xff] %v9440_v18  ;;  %1657 = vmatprep.mubr.f32.mxu1 %v9440_v18  ;;  %v9460_v34 = vpop.permute.xlu1 %1011  ;;  %v9462_v35 = vpop.permute.xlu0 %1149 }
 0x1ce   : > { %1658 = vmatmul.mubr.f32.gmra.mxu1 %v9438_v17 }
 0x1d1   : > { %v9464_v36 = vpop.permute.xlu1 %1058  ;;  %v9466_v37 = vpop.permute.xlu0 %1015 }
 0x1d5   : > { %v9468_v39 = vpop.permute.xlu1 %1111  ;;  %v9470_v40 = vpop.permute.xlu0 %1062 }
 0x1d9   : > { %v9473_v46 = vpop.permute.xlu1 %1144  ;;  %v9475_v48 = vpop.permute.xlu0 %1115 }
 0x1dd   : > { %v9479_v51 = vpop.permute.xlu1 %1109  ;;  %v9481_v52 = vpop.permute.xlu0 %1200 }
 0x1e1   : > { %v9484_v54 = vpop.permute.xlu1 %1162  ;;  %v9486_v55 = vpop.permute.xlu0 %1113 }
 0x1e5   : > { %v9489_v57 = vpop.permute.xlu1 %1195  ;;  %v9491_v58 = vpop.permute.xlu0 %1166 }
 0x1e9   : > { %v9493_v59 = vpop.permute.xlu1 %1160  ;;  %v9495_v60 = vpop.permute.xlu0 %1221 }
 0x1ed   : > { %v9497_v61 = vpop.permute.xlu1 %1216  ;;  %v9499_v62 = vpop.permute.xlu0 %1164 }
 0x1f1   : > { %v9501_v63 = vpop.permute.xlu1 %1234  ;;  %v9503_v1 = vpop.permute.xlu0 %1272 }
 0x1f5   : > { %v9505_v2 = vpop.permute.xlu1 %1267  ;;  %v9507_v3 = vpop.permute.xlu0 %1238 }
 0x1f6   : > { %15629 = vst [vmem:[#allocation40_spill] sm:$0xff] %v9505_v2 }
 0x1f9   : > { %v9509_v4 = vpop.permute.xlu1 %1232  ;;  %v9511_v5 = vpop.permute.xlu0 %1323 }
 0x1fa   : > { %15630 = vst [vmem:[#allocation41_spill] sm:$0xff] %v9511_v5 }
 0x1fd   : > { %v9513_v6 = vpop.permute.xlu1 %1285  ;;  %v9515_v7 = vpop.permute.xlu0 %1236 }
 0x201   : > { %v9517_v8 = vpop.permute.xlu1 %1318  ;;  %v9519_v9 = vpop.permute.xlu0 %1289 }
 0x202   : > { %15631 = vst [vmem:[#allocation42_spill] sm:$0xff] %v9517_v8  ;;  %v1067_v8 = vsel %vm15507_vm2, %v9464_v36, %v9470_v40 }
 0x205   : > { %v9521_v12 = vpop.permute.xlu1 %1283  ;;  %v9523_v13 = vpop.permute.xlu0 %1374 }
 0x206   : > { %15632 = vst [vmem:[#allocation43_spill] sm:$0xff] %v9521_v12  ;;  %15633 = vst [vmem:[#allocation44_spill] sm:$0xff] %v9523_v13  ;;  %v1170_v13 = vsel %vm15405_vm4, %v9484_v54, %v9491_v58 }
 0x28a   : > { %v8340_v23 = vpop.f32.mrf.mxu1 }
 0x28c   : > { %v8341_v26 = vpop.f32.mrf.mxu1 }
 0x28d   : > { %v8342_v33 = vadd.f32 %v8341_v26, %v8340_v23  ;;  %v9527_v23 = vsub.s32 0, %v1029_v11  ;;  %v1026_v26 = vld [vmem:[%s15614_s17] sm:$0x3] }
 0x28e   : > { %v8343_v28 = vpop.f32.mrf.mxu1 }
 0x28f   : > { %15634 = vst [vmem:[#allocation45_spill] sm:$0xff] %v9527_v23 }
 0x290   : > { %v8344_v29 = vpop.f32.mrf.mxu1 }
 0x291   : > { %v8345_v32 = vadd.f32 %v8344_v29, %v8343_v28  ;;  %v9530_v28 = vsub.s32 1, %v1029_v11  ;;  %v8033_v29 = vld [vmem:[%s15614_s17 + $0x2] sm:$0x3]  ;;  %v1025_v11 = vsel %vm15498_vm1, %v9448_v21, %v9450_v22  ;;  %v1070_v21 = vsel %vm15507_vm2, %v9458_v31, %v9452_v24 }
 0x292   : > { %v1069_v24 = vsel %vm15507_vm2, %v9470_v40, %v9464_v36  ;;  %v1022_v31 = vsel %vm15498_vm1, %v9460_v34, %v9466_v37  ;;  %v1121_v36 = vsel %vm15401_vm3, %v9475_v48, %v9468_v39 }
 0x293   : > { %8951 = vrcp.f32 %v8345_v32  ;;  %15635 = vst [vmem:[#allocation46_spill] sm:$0xff] %v9530_v28  ;;  %v9533_v32 = vpop.permute.xlu1 %1336 }
 0x294   : > { %8953 = vrcp.f32 %v8342_v33  ;;  %v9535_v33 = vpop.permute.xlu0 %1287 }
 0x297   : > { %v9574_v15 = vpop.permute.xlu1 %1369 }
 0x298   : > { %15636 = vst [vmem:[#allocation47_spill] sm:$0xff] %v9574_v15  ;;  %v9576_v18 = vpop.permute.xlu0 %1340  ;;  %v1118_v15 = vsel %vm15401_vm3, %v9479_v51, %v9486_v55 }
 0x2a0   : > { %v8952_v38 = vpop.eup %8951 }
 0x2a1   : > { %1672 = vperm.xlu1 %8942, %v8952_v38   ;;  %v8954_v43 = vpop.eup %8953  ;;  %v8036_v38 = vld [vmem:[%s15614_s17 + $0x4] sm:$0x3] }
 0x2a2   : > { %v1132_v27 = vrot.slane %v8036_v38, %v9530_v28 }
 0x2a5   : > { %1667 = vperm.xlu1 %8942, %v8954_v43   ;;  %v1031_v43 = vrot.slane %v1026_v26, %v9527_v23 }
 0x2a9   : > { %1689 = vperm.xlu1 %8942, %v1685_v44   ;;  %v8039_v44 = vld [vmem:[%s15614_s17 + $0x6] sm:$0x3] }
 0x2aa   : > { %v1183_v0 = vrot.slane %v8039_v44, %v9530_v28 }
 0x2ad   : > { %1971 = vperm.xlu1 %8942, %v1784_v49   ;;  %v1035_v49 = vrot.slane %v1026_v26, %v9530_v28  ;;  %v1128_v26 = vrot.slane %v8036_v38, %v9527_v23 }
 0x2af   : > { %v1041_v17 = vmul.f32 %v1035_v49, %v1023_v10  ;;  %v1119_v10 = vsel %vm15401_vm3, %v9468_v39, %v9475_v48  ;;  %v1039_v48 = vmul.f32 %v1035_v49, %v1022_v31  ;;  %v1189_v49 = vmul.f32 %v1183_v0, %v1170_v13 }
 0x2b0   : > { %v1138_v5 = vmul.f32 %v1132_v27, %v1119_v10  ;;  %v8047_v10 = vld [vmem:[%s15614_s17 + $0xc] sm:$0x3] }
 0x2b1   : > { %1985 = vperm.xlu1 %8942, %v1786_v50   ;;  %v1077_v50 = vrot.slane %v8033_v29, %v9527_v23 }
 0x2b3   : > { %v1086_v40 = vmul.f32 %v1077_v50, %v1070_v21  ;;  %v1137_v21 = vmul.f32 %v1128_v26, %v1121_v36 }
 0x2b5   : > { %2012 = vperm.xlu1 %8942, %v2002_v53   ;;  %v1081_v53 = vrot.slane %v8033_v29, %v9530_v28  ;;  %v1179_v29 = vrot.slane %v8039_v44, %v9527_v23  ;;  %v1040_v44 = vmul.f32 %v1031_v43, %v1025_v11 }
 0x2b7   : > { %v1087_v11 = vmul.f32 %v1081_v53, %v1068_v16  ;;  %v1085_v2 = vmul.f32 %v1081_v53, %v1067_v8  ;;  %v1172_v16 = vsel %vm15405_vm4, %v9491_v58, %v9484_v54  ;;  %v1171_v8 = vsel %vm15405_vm4, %v9499_v62, %v9493_v59  ;;  %v9628_v54 = vpop.permute.xlu1 %1334  ;;  %v9630_v58 = vpop.permute.xlu0 %1425 }
 0x2b8   : > { %v1057_v53 = vmul.f32 %v9446_v20, %v1041_v17  ;;  %v1186_v31 = vmul.f32 %v1179_v29, %v1171_v8  ;;  %v8053_v8 = vld [vmem:[%s15614_s17 + $0x10] sm:$0x3] }
 0x2b9   : > { %2022 = vperm.xlu1 %8942, %v2004_v56   ;;  %v8044_v56 = vld [vmem:[%s15614_s17 + $0xa] sm:$0x3] }
 0x2ba   : > { %v9569_v22 = vrot.slane %v8044_v56, %v9527_v23  ;;  %v9572_v38 = vrot.slane %v8044_v56, %v9530_v28  ;;  %v1024_v56 = vsel %vm15498_vm1, %v9466_v37, %v9460_v34  ;;  %v1120_v34 = vsel %vm15401_vm3, %v9486_v55, %v9479_v51 }
 0x2bb   : > { %v1084_v37 = vmul.f32 %v1077_v50, %v1069_v24  ;;  %v1038_v39 = vmul.f32 %v1031_v43, %v1024_v56  ;;  %v1135_v12 = vmul.f32 %v1128_v26, %v1120_v34  ;;  %v1136_v51 = vmul.f32 %v1132_v27, %v1118_v15 }
 0x2bc   : > { %v1169_v55 = vsel %vm15405_vm4, %v9493_v59, %v9499_v62  ;;  %v1103_v43 = vmul.f32 %v9444_v19, %v1086_v40  ;;  %v1104_v27 = vmul.f32 %v9444_v19, %v1087_v11  ;;  %v1188_v15 = vmul.f32 %v1179_v29, %v1172_v16 }
 0x2bd   : > { %v1056_v50 = vmul.f32 %v9446_v20, %v1040_v44  ;;  %v1101_v26 = vmul.f32 %v9456_v30, %v1084_v37  ;;  %v1102_v59 = vmul.f32 %v9456_v30, %v1085_v2  ;;  %v1154_v62 = vmul.f32 %v9462_v35, %v1137_v21  ;;  %v8050_v37 = vld [vmem:[%s15614_s17 + $0xe] sm:$0x3]  ;;  %s15697_s17 = smov 95  }
 0x2be   : > { %v1155_v24 = vmul.f32 %v9462_v35, %v1138_v5  ;;  %v1187_v56 = vmul.f32 %v1183_v0, %v1169_v55  ;;  %v1054_v36 = vmul.f32 %v9454_v25, %v1038_v39  ;;  %v1055_v19 = vmul.f32 %v9454_v25, %v1039_v48  ;;  %v1388_v25 = vpop.permute.xlu1 %1387 }
 0x2bf   : > { %v1152_v13 = vmul.f32 %v9473_v46, %v1135_v12  ;;  %v1153_v17 = vmul.f32 %v9473_v46, %v1136_v51  ;;  %v1107_v20 = vadd.f32 %v1103_v43, %v1056_v50  ;;  %v1108_v44 = vadd.f32 %v1104_v27, %v1057_v53  ;;  %v1339_v12 = vpop.permute.xlu0 %1338 }
 0x2c0   : > { %v1205_v30 = vmul.f32 %v9481_v52, %v1188_v15  ;;  %v1206_v2 = vmul.f32 %v9481_v52, %v1189_v49  ;;  %v1105_v40 = vadd.f32 %v1101_v26, %v1054_v36  ;;  %v1106_v35 = vadd.f32 %v1102_v59, %v1055_v19 }
 0x2c1   : > { %v9648_v0 = vrot.slane %v8047_v10, %v9527_v23  ;;  %v9651_v5 = vrot.slane %v8047_v10, %v9530_v28  ;;  %v1158_v29 = vadd.f32 %v1154_v62, %v1107_v20  ;;  %v1159_v11 = vadd.f32 %v1155_v24, %v1108_v44 }
 0x2c2   : > { %v1203_v46 = vmul.f32 %v9489_v57, %v1186_v31  ;;  %v1204_v34 = vmul.f32 %v9489_v57, %v1187_v56  ;;  %v1156_v16 = vadd.f32 %v1152_v13, %v1105_v40  ;;  %v1157_v52 = vadd.f32 %v1153_v17, %v1106_v35  ;;  %v9683_v53 = vpop.permute.xlu1 %1420 }
 0x2c3   : > { %v1226_v39 = vmul.f32 %v9495_v60, %v9330_v42  ;;  %v1227_v48 = vmul.f32 %v9495_v60, %v9327_v41  ;;  %v1209_v21 = vadd.f32 %v1205_v30, %v1158_v29  ;;  %v1210_v51 = vadd.f32 %v1206_v2, %v1159_v11  ;;  %v1392_v62 = vpop.permute.xlu0 %1391  ;;  %v15638_v11 = vld [vmem:[#allocation41_spill] sm:$0xff] }
 0x2c4   : > { %v1242_v55 = vsel %vm15406_vm5, %v9501_v63, %v9507_v3  ;;  %v1244_v57 = vsel %vm15406_vm5, %v9507_v3, %v9501_v63  ;;  %v1353_v43 = vrot.slane %v8050_v37, %v9527_v23  ;;  %v1357_v27 = vrot.slane %v8050_v37, %v9530_v28 }
 0x2c5   : > { %v1207_v60 = vadd.f32 %v1203_v46, %v1156_v16  ;;  %v1208_v15 = vadd.f32 %v1204_v34, %v1157_v52  ;;  %v1293_v49 = vsel %vm15432_vm6, %v9513_v6, %v9519_v9  ;;  %v1295_v63 = vsel %vm15432_vm6, %v9519_v9, %v9513_v6 }
 0x2c6   : > { %v1260_v3 = vmul.f32 %v9569_v22, %v1242_v55  ;;  %v1261_v50 = vmul.f32 %v9572_v38, %v1244_v57  ;;  %v1404_v26 = vrot.slane %v8053_v8, %v9527_v23  ;;  %v1408_v59 = vrot.slane %v8053_v8, %v9530_v28  ;;  %v1390_v34 = vpop.permute.xlu1 %1389 }
 0x2c7   : > { %v1230_v24 = vadd.f32 %v1226_v39, %v1209_v21  ;;  %v1231_v31 = vadd.f32 %v1227_v48, %v1210_v51  ;;  %v1224_v56 = vmul.f32 %v9497_v61, %v9345_v45  ;;  %v1225_v10 = vmul.f32 %v9497_v61, %v9352_v47  ;;  %v1386_v37 = vpop.permute.xlu0 %1385  ;;  %v15639_v51 = vld [vmem:[#allocation44_spill] sm:$0xff] }
 0x2c8   : > { %v1311_v6 = vmul.f32 %v9648_v0, %v1293_v49  ;;  %v1312_v9 = vmul.f32 %v9651_v5, %v1295_v63  ;;  %v1344_v36 = vsel %vm15410_vm7, %v9533_v32, %v9576_v18  ;;  %v1346_v19 = vsel %vm15410_vm7, %v9576_v18, %v9533_v32  ;;  %v15637_v32 = vld [vmem:[#allocation43_spill] sm:$0xff] }
 0x2c9   : > { %v1228_v13 = vadd.f32 %v1224_v56, %v1207_v60  ;;  %v1229_v17 = vadd.f32 %v1225_v10, %v1208_v15  ;;  %v1241_v61 = vsel %vm15406_vm5, %v9509_v4, %v9515_v7  ;;  %v1243_v20 = vsel %vm15406_vm5, %v9515_v7, %v9509_v4  ;;  %v15640_v15 = vld [vmem:[#allocation40_spill] sm:$0xff] }
 0x2ca   : > { %v1277_v44 = vmul.f32 %v9503_v1, %v1260_v3  ;;  %v1278_v30 = vmul.f32 %v9503_v1, %v1261_v50  ;;  %v1395_v2 = vsel %vm15427_vm8, %v1388_v25, %v1392_v62  ;;  %v1397_v18 = vsel %vm15427_vm8, %v1392_v62, %v1388_v25  ;;  %v15641_v62 = vld [vmem:[#allocation42_spill] sm:$0xff] }
 0x2cb   : > { %v1292_v40 = vsel %vm15432_vm6, %v15637_v32, %v9535_v33  ;;  %v1294_v4 = vsel %vm15432_vm6, %v9535_v33, %v15637_v32  ;;  %v1362_v7 = vmul.f32 %v1353_v43, %v1344_v36  ;;  %v1363_v35 = vmul.f32 %v1357_v27, %v1346_v19 }
 0x2cc   : > { %v1258_v1 = vmul.f32 %v9569_v22, %v1241_v61  ;;  %v1259_v29 = vmul.f32 %v9572_v38, %v1243_v20  ;;  %v1328_v46 = vmul.f32 %v15638_v11, %v1311_v6  ;;  %v1329_v25 = vmul.f32 %v15638_v11, %v1312_v9  ;;  %v15642_v61 = vld [vmem:[#allocation47_spill] sm:$0xff] }
 0x2cd   : > { %v1343_v16 = vsel %vm15410_vm7, %v9628_v54, %v1339_v12  ;;  %v1345_v33 = vsel %vm15410_vm7, %v1339_v12, %v9628_v54  ;;  %v1413_v52 = vmul.f32 %v1404_v26, %v1395_v2  ;;  %v1414_v39 = vmul.f32 %v1408_v59, %v1397_v18 }
 0x2ce   : > { %v1281_v48 = vadd.f32 %v1277_v44, %v1230_v24  ;;  %v1282_v22 = vadd.f32 %v1278_v30, %v1231_v31  ;;  %v1309_v38 = vmul.f32 %v9648_v0, %v1292_v40  ;;  %v1310_v21 = vmul.f32 %v9651_v5, %v1294_v4  ;;  %v1446_v30 = vpop.permute.xlu0 %1445 }
 0x2cf   : > { %v1379_v55 = vmul.f32 %v15639_v51, %v1362_v7  ;;  %v1380_v57 = vmul.f32 %v15639_v51, %v1363_v35  ;;  %v1394_v8 = vsel %vm15427_vm8, %v1386_v37, %v1390_v34  ;;  %v1396_v60 = vsel %vm15427_vm8, %v1390_v34, %v1386_v37  ;;  %v15643_v35 = vld [vmem:[#allocation38_spill] sm:$0xff] }
 0x2d0   : > { %v1275_v54 = vmul.f32 %v15640_v15, %v1258_v1  ;;  %v1276_v12 = vmul.f32 %v15640_v15, %v1259_v29  ;;  %v1360_v49 = vmul.f32 %v1353_v43, %v1343_v16  ;;  %v1361_v63 = vmul.f32 %v1357_v27, %v1345_v33  ;;  %v15644_v29 = vld [vmem:[#allocation39_spill] sm:$0xff] }
 0x2d1   : > { %v1332_v3 = vadd.f32 %v1328_v46, %v1281_v48  ;;  %v1333_v0 = vadd.f32 %v1329_v25, %v1282_v22  ;;  %v1430_v5 = vmul.f32 %v9630_v58, %v1413_v52  ;;  %v1431_v50 = vmul.f32 %v9630_v58, %v1414_v39  ;;  %v15646_v39 = vld [vmem:[#allocation37_spill] sm:$0xff] }
 0x2d2   : > { %v1326_v24 = vmul.f32 %v15641_v62, %v1309_v38  ;;  %v1327_v31 = vmul.f32 %v15641_v62, %v1310_v21  ;;  %v1411_v56 = vmul.f32 %v1404_v26, %v1394_v8  ;;  %v1412_v10 = vmul.f32 %v1408_v59, %v1396_v60  ;;  %v1441_v46 = vpop.permute.xlu0 %1440  ;;  %v1683_v21 = vld [vmem:[%s15612_s24] sm:$0xff] }
 0x2d3   : > { %v1383_v6 = vadd.f32 %v1379_v55, %v1332_v3  ;;  %v1384_v9 = vadd.f32 %v1380_v57, %v1333_v0  ;;  %v1279_v36 = vadd.f32 %v1275_v54, %v1228_v13  ;;  %v1280_v19 = vadd.f32 %v1276_v12, %v1229_v17  ;;  %v1684_v55 = vld [vmem:[%s15612_s24 + $0x8] sm:$0xff]  ;;  %s15013_s24 = smov 51  }
 0x2d4   : > { %v1377_v20 = vmul.f32 %v15642_v61, %v1360_v49  ;;  %v1378_v43 = vmul.f32 %v15642_v61, %v1361_v63  ;;  %v1428_v58 = vmul.f32 %v9683_v53, %v1411_v56  ;;  %v1429_v32 = vmul.f32 %v9683_v53, %v1412_v10  ;;  %v15645_v53 = vld [vmem:[#allocation36_spill] sm:$0xff] }
 0x2d5   : > { %v1434_v27 = vadd.f32 %v1430_v5, %v1383_v6  ;;  %v1435_v44 = vadd.f32 %v1431_v50, %v1384_v9  ;;  %v1330_v2 = vadd.f32 %v1326_v24, %v1279_v36  ;;  %v1331_v18 = vadd.f32 %v1327_v31, %v1280_v19 }
 0x2d6   : > { %v15647_v51 = vmov 0.0   ;;  %v1695_v15 = vpop.permute.xlu0 %1694  ;;  %v15652_v31 = vmov 1.0  }
 0x2d7   : > { %v1381_v40 = vadd.f32 %v1377_v20, %v1330_v2  ;;  %v1382_v26 = vadd.f32 %v1378_v43, %v1331_v18  ;;  %v1450_v59 = vadd.f32 %v1446_v30, %v1434_v27  ;;  %v1451_v4 = vadd.f32 %v1446_v30, %v1435_v44  ;;  %8592 = vmatprep.mubr.msk.f32.mxu1 %vm9066_vm9, %v15647_v51 }
 0x2d9   : > { %v1432_v13 = vadd.f32 %v1428_v58, %v1381_v40  ;;  %v1433_v17 = vadd.f32 %v1429_v32, %v1382_v26 }
 0x2db   : > { %v1448_v16 = vadd.f32 %v1441_v46, %v1432_v13  ;;  %v1449_v33 = vadd.f32 %v1441_v46, %v1433_v17 }
 0x31c   : > { %v1673_v7 = vpop.permute.xlu1 %1672 }
 0x31d   : > { %v1677_v1 = vmul.f32 %v15643_v35, %v1673_v7  ;;  %v1678_v11 = vmul.f32 %v15644_v29, %v1673_v7 }
 0x31f   : > { %v1681_v25 = vadd.f32 %v1677_v1, %v1450_v59  ;;  %v1682_v34 = vadd.f32 %v1678_v11, %v1451_v4  ;;  %v1977_v4 = vpop.permute.xlu0 %1976 }
 0x320   : > { %v1668_v37 = vpop.permute.xlu1 %1667 }
 0x321   : > { %v1675_v52 = vmul.f32 %v15645_v53, %v1668_v37  ;;  %v1676_v48 = vmul.f32 %v15646_v39, %v1668_v37  ;;  %1731 = vmatprep.subr.mxu0 %v1682_v34 }
 0x322   : > { %1732 = vmatpush1.msra.mxu0 %v1681_v25 }
 0x323   : > { %v1679_v22 = vadd.f32 %v1675_v52, %v1448_v16  ;;  %v1680_v38 = vadd.f32 %v1676_v48, %v1449_v33  ;;  %v1991_v34 = vpop.permute.xlu0 %1990  ;;  %v1997_v48 = vld [vmem:[%s15653_s26] sm:$0xff] }
 0x324   : > { %v1690_v54 = vpop.permute.xlu1 %1689 }
 0x325   : > { %1733 = vmatprep.subr.mxu0 %v1680_v38  ;;  %v1999_v38 = vld [vmem:[%s15653_s26 + $0x10] sm:$0xff] }
 0x326   : > { %1734 = vmatpush1.msra.mxu0 %v1679_v22  ;;  %v1998_v22 = vld [vmem:[%s15653_s26 + $0x8] sm:$0xff] }
 0x327   : > { %8058 = vmatmul.mubr.msk.f32.vlgmr.msra.gmra.mxu0 %vm1466_vm0, %v1683_v21  ;;  %v2000_v21 = vld [vmem:[%s15653_s26 + $0x18] sm:$0xff]  ;;  %s15022_s26 = smov 50  }
 0x328   : > { %1773 = vmatprep.mubr.f32.mxu0 %v15647_v51  ;;  %v1972_v17 = vpop.permute.xlu1 %1971 }
 0x32b   : > { %8059 = vmatmul.mubr.msk.f32.gmra.mxu0 %vm1466_vm0, %v1684_v55  ;;  %v2008_v55 = vpop.permute.xlu0 %2007 }
 0x32c   : > { %1855 = vmatprep.mubr.f32.mxu0 %v15647_v51  ;;  %v1986_v33 = vpop.permute.xlu1 %1985 }
 0x3e7   : > { %v1769_v57 = vpop.f32.mrf.mxu0 }
 0x3e8   : > { %v1770_v0 = vadd.f32 %v1769_v57, %v1690_v54 }
 0x3e9   : > { %v1771_v8 = vpop.f32.mrf.mxu0 }
 0x3ea   : > { %v1772_v63 = vadd.f32 %v1771_v8, %v1690_v54  ;;  %v9772_v24 = vadd.f32 %v1770_v0, %v9345_v45 }
 0x3eb   : > { %v1775_v60 = vpop.f32.mrf.mxu0 }
 0x3ec   : > { %v1776_v12 = vadd.f32 %v1775_v60, %v1695_v15  ;;  %v9768_v62 = vadd.f32 %v1772_v63, %v9352_v47  ;;  %15651 = vst [vmem:[#allocation40_spill] sm:$0xff] %v9772_v24 }
 0x3ed   : > { %v1777_v49 = vpop.f32.mrf.mxu0 }
 0x3ee   : > { %v1778_v3 = vadd.f32 %v1777_v49, %v1695_v15  ;;  %v9765_v50 = vadd.f32 %v1776_v12, %v9330_v42  ;;  %15650 = vst [vmem:[#allocation44_spill] sm:$0xff] %v9768_v62  ;;  %v2013_v12 = vpop.permute.xlu1 %2012 }
 0x3f0   : > { %v9762_v5 = vadd.f32 %v1778_v3, %v9327_v41  ;;  %15649 = vst [vmem:[#allocation41_spill] sm:$0xff] %v9765_v50 }
 0x3f2   : > { %15648 = vst [vmem:[#allocation43_spill] sm:$0xff] %v9762_v5  ;;  %1819 = vmatprep.subr.mxu0 %v9762_v5 }
 0x3f3   : > { %1820 = vmatpush1.msra.mxu0 %v9765_v50 }
 0x3f4   : > { %1821 = vmatprep.subr.mxu0 %v9768_v62 }
 0x3f5   : > { %1822 = vmatpush1.msra.mxu0 %v9772_v24 }
 0x3f6   : > { %8060 = vmatmul.mubr.msk.f32.vlgmr.msra.gmra.mxu0 %vm1466_vm0, %v15652_v31 }
 0x3f7   : > { %1944 = vmatprep.mubr.f32.mxu0 %v15647_v51 }
 0x4b6   : > { %v1857_v41 = vpop.f32.mrf.mxu0 }
 0x4b7   : > { %v1862_v42 = vmul.f32 0.0625, %v1857_v41 }
 0x4b8   : > { %v1859_v47 = vpop.f32.mrf.mxu0 }
 0x4b9   : > { %v1867_v56 = vrot.slane %v1862_v42, %v9527_v23  ;;  %v1863_v10 = vmul.f32 0.0625, %v1859_v47 }
 0x4bb   : > { %v1871_v45 = vrot.slane %v1863_v10, %v9527_v23  ;;  %v1874_v6 = vsub.f32 %v9765_v50, %v1867_v56  ;;  %v1872_v19 = vsub.f32 %v9772_v24, %v1867_v56 }
 0x4bd   : > { %v1873_v9 = vsub.f32 %v9768_v62, %v1871_v45  ;;  %v1875_v36 = vsub.f32 %v9762_v5, %v1871_v45  ;;  %v1878_v20 = vmul.f32 %v1874_v6, %v1874_v6  ;;  %v1876_v27 = vmul.f32 %v1872_v19, %v1872_v19 }
 0x4bf   : > { %v1879_v61 = vmul.f32 %v1875_v36, %v1875_v36  ;;  %v1877_v43 = vmul.f32 %v1873_v9, %v1873_v9 }
 0x4c1   : > { %1908 = vmatprep.subr.mxu0 %v1879_v61 }
 0x4c2   : > { %1909 = vmatpush1.msra.mxu0 %v1878_v20 }
 0x4c3   : > { %1910 = vmatprep.subr.mxu0 %v1877_v43 }
 0x4c4   : > { %1911 = vmatpush1.msra.mxu0 %v1876_v27 }
 0x4c5   : > { %8061 = vmatmul.mubr.msk.f32.vlgmr.msra.gmra.mxu0 %vm1466_vm0, %v15652_v31 }
 0x4c6   : > { %2101 = vmatprep.mubr.f32.mxu0 %v15647_v51 }
 0x585   : > { %v1946_v44 = vpop.f32.mrf.mxu0 }
 0x586   : > { %v1951_v30 = vmul.f32 0.0625, %v1946_v44 }
 0x587   : > { %v1948_v2 = vpop.f32.mrf.mxu0 }
 0x588   : > { %v1953_v18 = vadd.f32 1e-06, %v1951_v30  ;;  %v1952_v58 = vmul.f32 0.0625, %v1948_v2 }
 0x58a   : > { %8955 = vrsqrt.f32 %v1953_v18  ;;  %v1954_v32 = vadd.f32 1e-06, %v1952_v58 }
 0x58c   : > { %8957 = vrsqrt.f32 %v1954_v32  ;;  %v9958_v32 = vpop.permute.xlu0 %2017 }
 0x597   : > { %v8956_v40 = vpop.eup %8955 }
 0x598   : > { %v1960_v26 = vrot.slane %v8956_v40, %v9527_v23  ;;  %v9964_v40 = vpop.permute.xlu1 %2022 }
 0x599   : > { %v8958_v59 = vpop.eup %8957 }
 0x59a   : > { %v1964_v7 = vrot.slane %v8958_v59, %v9527_v23  ;;  %v1967_v13 = vmul.f32 %v1960_v26, %v1874_v6  ;;  %v1965_v35 = vmul.f32 %v1960_v26, %v1872_v19 }
 0x59c   : > { %v1968_v1 = vmul.f32 %v1964_v7, %v1875_v36  ;;  %v1966_v29 = vmul.f32 %v1964_v7, %v1873_v9  ;;  %v1981_v11 = vmul.f32 %v1977_v4, %v1967_v13  ;;  %v1979_v37 = vmul.f32 %v1972_v17, %v1965_v35 }
 0x59e   : > { %v1982_v46 = vmul.f32 %v1977_v4, %v1968_v1  ;;  %v1980_v25 = vmul.f32 %v1972_v17, %v1966_v29  ;;  %v1995_v53 = vadd.f32 %v1991_v34, %v1981_v11  ;;  %v1993_v39 = vadd.f32 %v1986_v33, %v1979_v37 }
 0x5a0   : > { %v1996_v16 = vadd.f32 %v1991_v34, %v1982_v46  ;;  %v1994_v52 = vadd.f32 %v1986_v33, %v1980_v25 }
 0x5a2   : > { %2065 = vmatprep.subr.mxu0 %v1996_v16 }
 0x5a3   : > { %2066 = vmatpush1.msra.mxu0 %v1995_v53 }
 0x5a4   : > { %2067 = vmatprep.subr.mxu0 %v1994_v52 }
 0x5a5   : > { %2068 = vmatpush1.msra.mxu0 %v1993_v39 }
 0x5a6   : > { %8062 = vmatmul.mubr.msk.f32.vlgmr.msra.gmra.mxu0 %vm1466_vm0, %v1997_v48  ;;  %8346 = vmatprep.subr.mxu0 %v15652_v31 }
 0x5a7   : > { %2107 = vmatprep.mubr.f32.mxu0 %v15647_v51  ;;  %8347 = vmatpush3.msra.mxu0 %v15652_v31 }
 0x5a8   : > { %8348 = vmatprep.subr.mxu0 %v15652_v31 }
 0x5a9   : > { %8349 = vmatpush3.msra.mxu0 %v15652_v31 }
 0x5aa   : > { %8063 = vmatmul.mubr.msk.f32.gmra.mxu0 %vm1466_vm0, %v1998_v22  ;;  %8350 = vmatprep.subr.mxu0 %v15652_v31 }
 0x5ab   : > { %2113 = vmatprep.mubr.f32.mxu0 %v15647_v51  ;;  %8351 = vmatpush3.msra.mxu0 %v15652_v31 }
 0x5ac   : > { %8352 = vmatprep.subr.mxu0 %v15652_v31 }
 0x5ad   : > { %8353 = vmatpush3.msra.mxu0 %v15652_v31 }
 0x5ae   : > { %8064 = vmatmul.mubr.msk.f32.gmra.mxu0 %vm1466_vm0, %v1999_v38  ;;  %8354 = vmatprep.subr.mxu0 %v15652_v31 }
 0x5af   : > { %2119 = vmatprep.mubr.f32.mxu0 %v15647_v51  ;;  %8355 = vmatpush3.msra.mxu0 %v15652_v31 }
 0x5b0   : > { %8356 = vmatprep.subr.mxu0 %v15652_v31 }
 0x5b1   : > { %8357 = vmatpush3.msra.mxu0 %v15652_v31 }
 0x5b2   : > { %8065 = vmatmul.mubr.msk.f32.gmra.mxu0 %vm1466_vm0, %v2000_v21  ;;  %8358 = vmatprep.subr.mxu0 %v15652_v31 }
 0x5b3   : > { %8359 = vmatpush3.msra.mxu0 %v15652_v31 }
 0x5b4   : > { %8360 = vmatprep.subr.mxu0 %v15652_v31 }
 0x5b5   : > { %8361 = vmatpush3.msra.mxu0 %v15652_v31 }
 0x5b6   : > { %8362 = vmatprep.subr.mxu0 %v15652_v31 }
 0x5b7   : > { %8363 = vmatpush3.msra.mxu0 %v15652_v31 }
 0x5b8   : > { %8364 = vmatprep.subr.mxu0 %v15652_v31 }
 0x5b9   : > { %8365 = vmatpush3.msra.mxu0 %v15652_v31 }
 0x5ba   : > { %8366 = vmatprep.subr.mxu0 %v15652_v31 }
 0x5bb   : > { %8367 = vmatpush3.msra.mxu0 %v15652_v31 }
 0x5bc   : > { %8368 = vmatprep.subr.mxu0 %v15652_v31 }
 0x5bd   : > { %8369 = vmatpush3.msra.mxu0 %v15652_v31 }
 0x5be   : > { %8370 = vmatprep.subr.mxu0 %v15652_v31 }
 0x5bf   : > { %8371 = vmatpush3.msra.mxu0 %v15652_v31 }
 0x5c0   : > { %8372 = vmatprep.subr.mxu0 %v15652_v31 }
 0x5c1   : > { %8373 = vmatpush3.msra.mxu0 %v15652_v31 }
 0x5c2   : > { %8374 = vmatprep.subr.mxu0 %v15652_v31 }
 0x5c3   : > { %8375 = vmatpush3.msra.mxu0 %v15652_v31 }
 0x5c4   : > { %8376 = vmatprep.subr.mxu0 %v15652_v31 }
 0x5c5   : > { %8377 = vmatpush3.msra.mxu0 %v15652_v31 }
 0x666   : > { %v2103_v57 = vpop.f32.mrf.mxu0 }
 0x667   : > { %v2104_v8 = vadd.f32 %v2103_v57, %v2008_v55 }
 0x668   : > { %v2105_v60 = vpop.f32.mrf.mxu0 }
 0x669   : > { %v2134_v15 = vmul.f32 0.70710677, %v2104_v8  ;;  %v2106_v54 = vadd.f32 %v2105_v60, %v2008_v55  ;;  %v2126_v10 = vmul.f32 0.5, %v2104_v8 }
 0x66a   : > { %v2109_v49 = vpop.f32.mrf.mxu0 }
 0x66b   : > { %8959 = verf.f32 %v2134_v15  ;;  %v2135_v63 = vmul.f32 0.70710677, %v2106_v54  ;;  %v2110_v3 = vadd.f32 %v2109_v49, %v2013_v12  ;;  %v2127_v36 = vmul.f32 0.5, %v2106_v54 }
 0x66c   : > { %v2111_v0 = vpop.f32.mrf.mxu0 }
 0x66d   : > { %8961 = verf.f32 %v2135_v63  ;;  %v2136_v41 = vmul.f32 0.70710677, %v2110_v3  ;;  %v2112_v42 = vadd.f32 %v2111_v0, %v2013_v12  ;;  %v2128_v43 = vmul.f32 0.5, %v2110_v3 }
 0x66e   : > { %v2115_v55 = vpop.f32.mrf.mxu0 }
 0x66f   : > { %8963 = verf.f32 %v2136_v41  ;;  %v2137_v47 = vmul.f32 0.70710677, %v2112_v42  ;;  %v2129_v2 = vmul.f32 0.5, %v2112_v42  ;;  %v2116_v57 = vadd.f32 %v2115_v55, %v9958_v32 }
 0x671   : > { %8965 = verf.f32 %v2137_v47  ;;  %v2138_v15 = vmul.f32 0.70710677, %v2116_v57 }
 0x673   : > { %8967 = verf.f32 %v2138_v15 }
 0x678   : > { %v8960_v56 = vpop.eup %8959 }
 0x679   : > { %v2150_v45 = vadd.f32 1.0, %v8960_v56 }
 0x67a   : > { %v8962_v6 = vpop.eup %8961 }
 0x67b   : > { %v9834_v9 = vmul.f32 %v2150_v45, %v2126_v10  ;;  %v2151_v19 = vadd.f32 1.0, %v8962_v6  ;;  %v10109_v45 = vpop.f32.mrf.mxu0 }
 0x67c   : > { %v8964_v61 = vpop.eup %8963 }
 0x67d   : > { %15654 = vst [vmem:[#allocation42_spill] sm:$0xff] %v9834_v9  ;;  %v9836_v20 = vmul.f32 %v2151_v19, %v2127_v36  ;;  %v2152_v27 = vadd.f32 1.0, %v8964_v61  ;;  %3012 = vrot.lane.b32.xlu0 %v9834_v9, %s14959_s28  ;;  %v2130_v61 = vmul.f32 0.5, %v2116_v57 }
 0x67e   : > { %v8966_v44 = vpop.eup %8965 }
 0x67f   : > { %15655 = vst [vmem:[#allocation47_spill] sm:$0xff] %v9836_v20  ;;  %v9840_v30 = vmul.f32 %v2152_v27, %v2128_v43  ;;  %v2153_v18 = vadd.f32 1.0, %v8966_v44  ;;  %2286 = vmatprep.mubr.f32.mxu0 %v9836_v20  ;;  %v10119_v43 = vpop.f32.mrf.mxu0 }
 0x680   : > { %2287 = vmatmul.mubr.f32.vlgmr.msra.gmra.mxu0 %v9834_v9  ;;  %v8968_v10 = vpop.eup %8967 }
 0x681   : > { %15656 = vst [vmem:[#allocation38_spill] sm:$0xff] %v9840_v30  ;;  %v9844_v58 = vmul.f32 %v2153_v18, %v2129_v2  ;;  %3014 = vrot.lane.b32.xlu1 %v9840_v30, %s14959_s28  ;;  %3055 = vrot.lane.b32.xlu0 %v9834_v9, %s14961_s1  ;;  %s14963_s28 = smov 30   ;;  %v2154_v6 = vadd.f32 1.0, %v8968_v10  ;;  %v10131_v18 = vpop.f32.mrf.mxu0 }
 0x683   : > { %15657 = vst [vmem:[#allocation39_spill] sm:$0xff] %v9844_v58  ;;  %2291 = vmatprep.mubr.f32.mxu0 %v9844_v58  ;;  %v10121_v27 = vmul.f32 %v2154_v6, %v2130_v61 }
 0x684   : > { %2292 = vmatmul.mubr.f32.gmra.mxu0 %v9840_v30 }
 0x685   : > { %3057 = vrot.lane.b32.xlu1 %v9840_v30, %s14961_s1  ;;  %3103 = vrot.lane.b32.xlu0 %v9834_v9, %s14997_s23  ;;  %s14995_s1 = smov 18   ;;  %15701 = vst [vmem:[#allocation69_spill] sm:$0xff] %v10121_v27 }
 0x689   : > { %3105 = vrot.lane.b32.xlu1 %v9840_v30, %s14997_s23  ;;  %3151 = vrot.lane.b32.xlu0 %v9834_v9, %s14993_s18 }
 0x68d   : > { %3153 = vrot.lane.b32.xlu1 %v9840_v30, %s14993_s18  ;;  %3199 = vrot.lane.b32.xlu0 %v9834_v9, %s14963_s28 }
 0x691   : > { %3201 = vrot.lane.b32.xlu1 %v9840_v30, %s14963_s28  ;;  %3247 = vrot.lane.b32.xlu0 %v9834_v9, %s14995_s1  ;;  %s14967_s28 = smov 14  }
 0x695   : > { %3249 = vrot.lane.b32.xlu1 %v9840_v30, %s14995_s1  ;;  %3295 = vrot.lane.b32.xlu0 %v9834_v9, %s14965_s2 }
 0x699   : > { %3297 = vrot.lane.b32.xlu1 %v9840_v30, %s14965_s2  ;;  %3342 = vrot.lane.b32.xlu0 %v9834_v9, %s14999_s7  ;;  %s14969_s2 = smov 2  }
 0x69d   : > { %3344 = vrot.lane.b32.xlu1 %v9840_v30, %s14999_s7  ;;  %3389 = vrot.lane.b32.xlu0 %v9834_v9, %s14981_s10 }
 0x6a1   : > { %3391 = vrot.lane.b32.xlu1 %v9840_v30, %s14981_s10  ;;  %3436 = vrot.lane.b32.xlu0 %v9834_v9, %s14967_s28  ;;  %s14989_s10 = smov 96  }
 0x6a5   : > { %3438 = vrot.lane.b32.xlu1 %v9840_v30, %s14967_s28  ;;  %3484 = vrot.lane.b32.xlu0 %v9834_v9, %s14969_s2  ;;  %s14973_s28 = smov 126  }
 0x6a9   : > { %3486 = vrot.lane.b32.xlu1 %v9840_v30, %s14969_s2  ;;  %3532 = vrot.lane.b32.xlu0 %v9834_v9, %s14975_s11  ;;  %s14979_s2 = smov 114  }
 0x6ad   : > { %3534 = vrot.lane.b32.xlu1 %v9840_v30, %s14975_s11  ;;  %3597 = vrot.lane.b32.xlu0 %v9834_v9, %s14971_s15  ;;  %s14983_s11 = smov 110  }
 0x6b1   : > { %3599 = vrot.lane.b32.xlu1 %v9840_v30, %s14971_s15  ;;  %3644 = vrot.lane.b32.xlu0 %v9834_v9, %s14973_s28  ;;  %s15658_s15 = smov 112  }
 0x6b5   : > { %3646 = vrot.lane.b32.xlu1 %v9840_v30, %s14973_s28  ;;  %3692 = vrot.lane.b32.xlu0 %v9834_v9, %s14979_s2  ;;  %s15659_s28 = smov 111  }
 0x6b9   : > { %3694 = vrot.lane.b32.xlu1 %v9840_v30, %s14979_s2  ;;  %3740 = vrot.lane.b32.xlu0 %v9834_v9, %s14977_s16  ;;  %s14987_s2 = smov 97  }
 0x6bd   : > { %3742 = vrot.lane.b32.xlu1 %v9840_v30, %s14977_s16  ;;  %3787 = vrot.lane.b32.xlu0 %v9834_v9, %s15658_s15  ;;  %s14985_s16 = smov 98  }
 0x6c1   : > { %3789 = vrot.lane.b32.xlu1 %v9840_v30, %s15658_s15  ;;  %3834 = vrot.lane.b32.xlu0 %v9834_v9, %s15659_s28 }
 0x6c5   : > { %3836 = vrot.lane.b32.xlu1 %v9840_v30, %s15659_s28  ;;  %3881 = vrot.lane.b32.xlu0 %v9834_v9, %s14983_s11 }
 0x6c9   : > { %3883 = vrot.lane.b32.xlu1 %v9840_v30, %s14983_s11  ;;  %3929 = vrot.lane.b32.xlu0 %v9834_v9, %s14985_s16  ;;  %s15001_s11 = smov 95  }
 0x6cd   : > { %3931 = vrot.lane.b32.xlu1 %v9840_v30, %s14985_s16  ;;  %3977 = vrot.lane.b32.xlu0 %v9834_v9, %s14987_s2  ;;  %s14991_s16 = smov 94  }
 0x6d1   : > { %3979 = vrot.lane.b32.xlu1 %v9840_v30, %s14987_s2  ;;  %4025 = vrot.lane.b32.xlu0 %v9834_v9, %s14989_s10  ;;  %s15660_s2 = smov 34  }
 0x6d5   : > { %4027 = vrot.lane.b32.xlu1 %v9840_v30, %s14989_s10  ;;  %4073 = vrot.lane.b32.xlu0 %v9834_v9, %s15001_s11  ;;  %s15661_s10 = smov 33  }
 0x6d9   : > { %4075 = vrot.lane.b32.xlu1 %v9840_v30, %s15001_s11  ;;  %4121 = vrot.lane.b32.xlu0 %v9834_v9, %s14991_s16  ;;  %s15667_s11 = smov 1  }
 0x6dd   : > { %4123 = vrot.lane.b32.xlu1 %v9840_v30, %s14991_s16  ;;  %3016 = vrot.lane.b32.xlu0 %v9836_v20, %s15660_s2  ;;  %s15662_s16 = smov 30  }
 0x6e1   : > { %3018 = vrot.lane.b32.xlu1 %v9844_v58, %s15660_s2  ;;  %3059 = vrot.lane.b32.xlu0 %v9836_v20, %s15661_s10 }
 0x6e5   : > { %3061 = vrot.lane.b32.xlu1 %v9844_v58, %s15661_s10  ;;  %3107 = vrot.lane.b32.xlu0 %v9836_v20, %s14997_s23 }
 0x6e9   : > { %3109 = vrot.lane.b32.xlu1 %v9844_v58, %s14997_s23  ;;  %3155 = vrot.lane.b32.xlu0 %v9836_v20, %s14993_s18  ;;  %s15665_s23 = smov 14  }
 0x6ed   : > { %3157 = vrot.lane.b32.xlu1 %v9844_v58, %s14993_s18  ;;  %3203 = vrot.lane.b32.xlu0 %v9836_v20, %s15662_s16  ;;  %s15663_s18 = smov 17  }
 0x6ef   : > { %v9966_v26 = vpop.permute.xlu0 %3012 }
 0x6f1   : > { %3205 = vrot.lane.b32.xlu1 %v9844_v58, %s15662_s16  ;;  %3251 = vrot.lane.b32.xlu0 %v9836_v20, %s14995_s1 }
 0x6f3   : > { %v9972_v59 = vpop.permute.xlu1 %3014  ;;  %v9974_v4 = vpop.permute.xlu0 %3055 }
 0x6f5   : > { %3253 = vrot.lane.b32.xlu1 %v9844_v58, %s14995_s1  ;;  %3299 = vrot.lane.b32.xlu0 %v9836_v20, %s15663_s18  ;;  %s15664_s1 = smov 15  }
 0x6f7   : > { %v9980_v7 = vpop.permute.xlu1 %3057  ;;  %v9982_v13 = vpop.permute.xlu0 %3103 }
 0x6f9   : > { %3301 = vrot.lane.b32.xlu1 %v9844_v58, %s15663_s18  ;;  %3346 = vrot.lane.b32.xlu0 %v9836_v20, %s14999_s7 }
 0x6fb   : > { %v9988_v17 = vpop.permute.xlu1 %3105  ;;  %v9990_v35 = vpop.permute.xlu0 %3151 }
 0x6fd   : > { %3348 = vrot.lane.b32.xlu1 %v9844_v58, %s14999_s7  ;;  %3393 = vrot.lane.b32.xlu0 %v9836_v20, %s15664_s1  ;;  %s15666_s7 = smov 2  }
 0x6ff   : > { %v9996_v1 = vpop.permute.xlu1 %3153  ;;  %v9998_v29 = vpop.permute.xlu0 %3199 }
 0x701   : > { %3395 = vrot.lane.b32.xlu1 %v9844_v58, %s15664_s1  ;;  %3440 = vrot.lane.b32.xlu0 %v9836_v20, %s15665_s23 }
 0x703   : > { %v10004_v11 = vpop.permute.xlu1 %3201  ;;  %v10006_v46 = vpop.permute.xlu0 %3247 }
 0x705   : > { %3442 = vrot.lane.b32.xlu1 %v9844_v58, %s15665_s23  ;;  %3488 = vrot.lane.b32.xlu0 %v9836_v20, %s15666_s7 }
 0x707   : > { %v10012_v25 = vpop.permute.xlu1 %3249  ;;  %v10014_v34 = vpop.permute.xlu0 %3295 }
 0x709   : > { %3490 = vrot.lane.b32.xlu1 %v9844_v58, %s15666_s7  ;;  %3536 = vrot.lane.b32.xlu0 %v9836_v20, %s15667_s11 }
 0x70b   : > { %v10020_v37 = vpop.permute.xlu1 %3297  ;;  %v10022_v16 = vpop.permute.xlu0 %3342 }
 0x70c   : > { %15668 = vst [vmem:[#allocation36_spill] sm:$0xff] %v10022_v16 }
 0x70d   : > { %3538 = vrot.lane.b32.xlu1 %v9844_v58, %s15667_s11  ;;  %3601 = vrot.lane.b32.xlu0 %v9836_v20, %s15669_s3 }
 0x70f   : > { %v10028_v33 = vpop.permute.xlu1 %3344  ;;  %v10030_v53 = vpop.permute.xlu0 %3389 }
 0x710   : > { %15670 = vst [vmem:[#allocation37_spill] sm:$0xff] %v10028_v33  ;;  %15671 = vst [vmem:[#allocation48_spill] sm:$0xff] %v10030_v53 }
 0x711   : > { %3603 = vrot.lane.b32.xlu1 %v9844_v58, %s15669_s3  ;;  %3648 = vrot.lane.b32.xlu0 %v9836_v20, %s15672_s5 }
 0x713   : > { %v10036_v52 = vpop.permute.xlu1 %3391  ;;  %v10038_v39 = vpop.permute.xlu0 %3436 }
 0x714   : > { %15673 = vst [vmem:[#allocation49_spill] sm:$0xff] %v10036_v52  ;;  %15674 = vst [vmem:[#allocation50_spill] sm:$0xff] %v10038_v39 }
 0x715   : > { %3650 = vrot.lane.b32.xlu1 %v9844_v58, %s15672_s5  ;;  %3696 = vrot.lane.b32.xlu0 %v9836_v20, %s15675_s6 }
 0x717   : > { %v10044_v48 = vpop.permute.xlu1 %3438  ;;  %v10046_v22 = vpop.permute.xlu0 %3484 }
 0x718   : > { %15676 = vst [vmem:[#allocation51_spill] sm:$0xff] %v10044_v48  ;;  %15677 = vst [vmem:[#allocation52_spill] sm:$0xff] %v10046_v22 }
 0x719   : > { %3698 = vrot.lane.b32.xlu1 %v9844_v58, %s15675_s6  ;;  %3744 = vrot.lane.b32.xlu0 %v9836_v20, %s15678_s8 }
 0x71b   : > { %v10052_v38 = vpop.permute.xlu1 %3486  ;;  %v10054_v21 = vpop.permute.xlu0 %3532 }
 0x71c   : > { %15679 = vst [vmem:[#allocation53_spill] sm:$0xff] %v10052_v38  ;;  %15680 = vst [vmem:[#allocation54_spill] sm:$0xff] %v10054_v21 }
 0x71d   : > { %3746 = vrot.lane.b32.xlu1 %v9844_v58, %s15678_s8  ;;  %3791 = vrot.lane.b32.xlu0 %v9836_v20, %s15658_s15 }
 0x71f   : > { %v10061_v8 = vpop.permute.xlu1 %3534  ;;  %v10063_v60 = vpop.permute.xlu0 %3597 }
 0x720   : > { %15681 = vst [vmem:[#allocation55_spill] sm:$0xff] %v10061_v8  ;;  %15682 = vst [vmem:[#allocation56_spill] sm:$0xff] %v10063_v60 }
 0x721   : > { %3793 = vrot.lane.b32.xlu1 %v9844_v58, %s15658_s15  ;;  %3838 = vrot.lane.b32.xlu0 %v9836_v20, %s15659_s28 }
 0x723   : > { %v10069_v54 = vpop.permute.xlu1 %3599  ;;  %v10071_v12 = vpop.permute.xlu0 %3644 }
 0x724   : > { %15683 = vst [vmem:[#allocation57_spill] sm:$0xff] %v10069_v54  ;;  %15684 = vst [vmem:[#allocation58_spill] sm:$0xff] %v10071_v12 }
 0x725   : > { %3840 = vrot.lane.b32.xlu1 %v9844_v58, %s15659_s28  ;;  %3885 = vrot.lane.b32.xlu0 %v9836_v20, %s15685_s9 }
 0x727   : > { %v10077_v49 = vpop.permute.xlu1 %3646  ;;  %v10079_v63 = vpop.permute.xlu0 %3692 }
 0x728   : > { %15686 = vst [vmem:[#allocation59_spill] sm:$0xff] %v10077_v49  ;;  %15687 = vst [vmem:[#allocation60_spill] sm:$0xff] %v10079_v63 }
 0x729   : > { %3887 = vrot.lane.b32.xlu1 %v9844_v58, %s15685_s9  ;;  %3933 = vrot.lane.b32.xlu0 %v9836_v20, %s15688_s12 }
 0x72b   : > { %v10085_v3 = vpop.permute.xlu1 %3694  ;;  %v10087_v0 = vpop.permute.xlu0 %3740 }
 0x72c   : > { %15689 = vst [vmem:[#allocation61_spill] sm:$0xff] %v10085_v3  ;;  %15690 = vst [vmem:[#allocation62_spill] sm:$0xff] %v10087_v0 }
 0x72d   : > { %3935 = vrot.lane.b32.xlu1 %v9844_v58, %s15688_s12  ;;  %3981 = vrot.lane.b32.xlu0 %v9836_v20, %s15691_s13 }
 0x72f   : > { %v10093_v41 = vpop.permute.xlu1 %3742  ;;  %v10095_v42 = vpop.permute.xlu0 %3787 }
 0x730   : > { %15692 = vst [vmem:[#allocation63_spill] sm:$0xff] %v10093_v41  ;;  %15693 = vst [vmem:[#allocation64_spill] sm:$0xff] %v10095_v42 }
 0x731   : > { %3983 = vrot.lane.b32.xlu1 %v9844_v58, %s15691_s13  ;;  %4029 = vrot.lane.b32.xlu0 %v9836_v20, %s15694_s14 }
 0x733   : > { %v10101_v47 = vpop.permute.xlu1 %3789  ;;  %v10103_v56 = vpop.permute.xlu0 %3834 }
 0x734   : > { %15695 = vst [vmem:[#allocation65_spill] sm:$0xff] %v10101_v47  ;;  %15696 = vst [vmem:[#allocation66_spill] sm:$0xff] %v10103_v56 }
 0x735   : > { %4031 = vrot.lane.b32.xlu1 %v9844_v58, %s15694_s14  ;;  %4077 = vrot.lane.b32.xlu0 %v9836_v20, %s15697_s17 }
 0x737   : > { %v10111_v36 = vpop.permute.xlu1 %3836  ;;  %v10113_v19 = vpop.permute.xlu0 %3881 }
 0x738   : > { %15698 = vst [vmem:[#allocation67_spill] sm:$0xff] %v10111_v36  ;;  %15699 = vst [vmem:[#allocation68_spill] sm:$0xff] %v10113_v19 }
 0x739   : > { %4079 = vrot.lane.b32.xlu1 %v9844_v58, %s15697_s17  ;;  %4125 = vrot.lane.b32.xlu0 %v9836_v20, %s15700_s19 }
 0x73b   : > { %v10123_v44 = vpop.permute.xlu1 %3883  ;;  %v10125_v2 = vpop.permute.xlu0 %3929 }
 0x73c   : > { %15702 = vst [vmem:[#allocation70_spill] sm:$0xff] %v10123_v44  ;;  %15703 = vst [vmem:[#allocation71_spill] sm:$0xff] %v10125_v2 }
 0x73d   : > { %4127 = vrot.lane.b32.xlu1 %v9844_v58, %s15700_s19  ;;  %5477 = vrot.lane.b32.xlu0 %v10121_v27, %s15013_s24  ;;  %s15708_s24 = sld [smem:[#allocation19_spill]] }
 0x73f   : > { %v10133_v55 = vpop.permute.xlu1 %3931  ;;  %v10135_v57 = vpop.permute.xlu0 %3977 }
 0x740   : > { %15704 = vst [vmem:[#allocation72_spill] sm:$0xff] %v10133_v55  ;;  %15705 = vst [vmem:[#allocation73_spill] sm:$0xff] %v10135_v57  ;;  %v8378_v15 = vpop.f32.mrf.mxu0 }
 0x741   : > { %6820 = vrot.lane.b32.xlu1 %v10121_v27, %s15675_s6  ;;  %5520 = vrot.lane.b32.xlu0 %v10121_v27, %s15022_s26  ;;  %s15031_s26 = smov 48  }
 0x742   : > { %v8379_v10 = vpop.f32.mrf.mxu0 }
 0x743   : > { %v10141_v6 = vpop.permute.xlu1 %3979  ;;  %v10143_v61 = vpop.permute.xlu0 %4025  ;;  %v8380_v62 = vadd.f32 %v8379_v10, %v8378_v15  ;;  %v2166_v15 = vld [vmem:[%s15708_s24] sm:$0x3]  ;;  %s15034_s24 = smov 46  }
 0x744   : > { %15706 = vst [vmem:[#allocation74_spill] sm:$0xff] %v10141_v6  ;;  %15707 = vst [vmem:[#allocation75_spill] sm:$0xff] %v10143_v61  ;;  %v8381_v5 = vpop.f32.mrf.mxu0 }
 0x745   : > { %6867 = vrot.lane.b32.xlu1 %v10121_v27, %s15678_s8  ;;  %5568 = vrot.lane.b32.xlu0 %v10121_v27, %s15027_s27  ;;  %v2297_v30 = vmul.f32 0.00390625, %v8380_v62  ;;  %s15029_s27 = smov 47  }
 0x746   : > { %v8382_v50 = vpop.f32.mrf.mxu0 }
 0x747   : > { %v8383_v24 = vadd.f32 %v8382_v50, %v8381_v5  ;;  %v10149_v9 = vpop.permute.xlu1 %4027  ;;  %v10151_v20 = vpop.permute.xlu0 %4073 }
 0x748   : > { %15709 = vst [vmem:[#allocation76_spill] sm:$0xff] %v10149_v9  ;;  %15710 = vst [vmem:[#allocation77_spill] sm:$0xff] %v10151_v20  ;;  %v2122_v9 = vadd.f32 %v10119_v43, %v9964_v40 }
 0x749   : > { %v2298_v58 = vmul.f32 0.00390625, %v8383_v24  ;;  %6914 = vrot.lane.b32.xlu1 %v10121_v27, %s15658_s15  ;;  %5616 = vrot.lane.b32.xlu0 %v10121_v27, %s15031_s26  ;;  %s15053_s26 = smov 45  }
 0x74a   : > { %v2140_v2 = vmul.f32 0.70710677, %v2122_v9  ;;  %v2132_v54 = vmul.f32 0.5, %v2122_v9 }
 0x74b   : > { %v10157_v61 = vpop.permute.xlu1 %4075  ;;  %8589 = vmatpush3.msra.mxu1 %v2298_v58  ;;  %v10159_v6 = vpop.permute.xlu0 %4121 }
 0x74c   : > { %15711 = vst [vmem:[#allocation78_spill] sm:$0xff] %v10157_v61  ;;  %15712 = vst [vmem:[#allocation79_spill] sm:$0xff] %v10159_v6  ;;  %8590 = vmatprep.subr.mxu1 %v15647_v51  ;;  %8969 = verf.f32 %v2140_v2 }
 0x74d   : > { %8591 = vmatpush3.msra.mxu1 %v2297_v30  ;;  %6961 = vrot.lane.b32.xlu1 %v10121_v27, %s15659_s28 }
 0x74e   : > { %5664 = vrot.lane.b32.xlu0 %v10121_v27, %s15029_s27  ;;  %8593 = vmatmul.mubr.msk.f32.vlgmr.msra.gmra.mxu1 %vm1466_vm0, %v2166_v15  ;;  %s15045_s27 = smov 109  }
 0x74f   : > { %v10168_v5 = vpop.permute.xlu1 %4123  ;;  %v10170_v50 = vpop.permute.xlu0 %3016  ;;  %8595 = vmatprep.subr.mxu1 %v15647_v51  ;;  %8597 = vmatprep.mubr.msk.f32.mxu1 %vm9066_vm9, %v15647_v51 }
 0x750   : > { %15713 = vst [vmem:[#allocation80_spill] sm:$0xff] %v10168_v5 }
 0x751   : > { %7008 = vrot.lane.b32.xlu1 %v10121_v27, %s15685_s9 }
 0x752   : > { %5712 = vrot.lane.b32.xlu0 %v10121_v27, %s15034_s24  ;;  %s15051_s24 = smov 35  }
 0x753   : > { %v10179_v62 = vpop.permute.xlu1 %3018  ;;  %v10181_v24 = vpop.permute.xlu0 %3059 }
 0x755   : > { %7055 = vrot.lane.b32.xlu1 %v10121_v27, %s15045_s27  ;;  %s15715_s27 = smov 31  }
 0x756   : > { %5760 = vrot.lane.b32.xlu0 %v10121_v27, %s15053_s26  ;;  %s15062_s26 = smov 29  }
 0x757   : > { %v10187_v30 = vpop.permute.xlu1 %3061  ;;  %v10189_v58 = vpop.permute.xlu0 %3107 }
 0x759   : > { %7103 = vrot.lane.b32.xlu1 %v10121_v27, %s15040_s29  ;;  %s15714_s29 = smov 32   ;;  %v8970_v3 = vpop.eup %8969 }
 0x75a   : > { %5808 = vrot.lane.b32.xlu0 %v10121_v27, %s15051_s24  ;;  %s15060_s24 = smov 93   ;;  %v2156_v63 = vadd.f32 1.0, %v8970_v3 }
 0x75b   : > { %v10195_v10 = vpop.permute.xlu1 %3109  ;;  %v10197_v15 = vpop.permute.xlu0 %3155 }
 0x75c   : > { %v10277_v60 = vmul.f32 %v2156_v63, %v2132_v54 }
 0x75d   : > { %7151 = vrot.lane.b32.xlu1 %v10121_v27, %s15688_s12 }
 0x75e   : > { %5856 = vrot.lane.b32.xlu0 %v10121_v27, %s15660_s2  ;;  %15728 = vst [vmem:[#allocation91_spill] sm:$0xff] %v10277_v60 }
 0x75f   : > { %v10203_v5 = vpop.permute.xlu1 %3157  ;;  %v10205_v6 = vpop.permute.xlu0 %3203 }
 0x761   : > { %7198 = vrot.lane.b32.xlu1 %v10121_v27, %s15691_s13 }
 0x762   : > { %5903 = vrot.lane.b32.xlu0 %v10121_v27, %s15661_s10 }
 0x763   : > { %v10211_v61 = vpop.permute.xlu1 %3205  ;;  %v10213_v20 = vpop.permute.xlu0 %3251 }
 0x765   : > { %7245 = vrot.lane.b32.xlu1 %v10121_v27, %s15694_s14  ;;  %s15114_s14 = smov 115  }
 0x766   : > { %5950 = vrot.lane.b32.xlu0 %v10121_v27, %s15714_s29 }
 0x767   : > { %v10221_v57 = vpop.permute.xlu1 %3253  ;;  %v10223_v55 = vpop.permute.xlu0 %3299 }
 0x769   : > { %7292 = vrot.lane.b32.xlu1 %v10121_v27, %s15697_s17  ;;  %s15117_s17 = smov 125  }
 0x76a   : > { %5997 = vrot.lane.b32.xlu0 %v10121_v27, %s15715_s27 }
 0x76b   : > { %v10229_v44 = vpop.permute.xlu1 %3301  ;;  %v10231_v19 = vpop.permute.xlu0 %3346 }
 0x76d   : > { %7339 = vrot.lane.b32.xlu1 %v10121_v27, %s15700_s19  ;;  %s15752_s19 = smov 35  }
 0x76e   : > { %6044 = vrot.lane.b32.xlu0 %v10121_v27, %s15662_s16 }
 0x76f   : > { %v10237_v43 = vpop.permute.xlu1 %3348  ;;  %v10239_v36 = vpop.permute.xlu0 %3393 }
 0x770   : > { %15716 = vst [vmem:[#allocation81_spill] sm:$0xff] %v10237_v43  ;;  %15717 = vst [vmem:[#allocation82_spill] sm:$0xff] %v10239_v36 }
 0x771   : > { %7386 = vrot.lane.b32.xlu1 %v10121_v27, %s15060_s24  ;;  %s15073_s24 = smov 82  }
 0x772   : > { %6091 = vrot.lane.b32.xlu0 %v10121_v27, %s15062_s26  ;;  %s15722_s26 = smov 18  }
 0x773   : > { %v10245_v56 = vpop.permute.xlu1 %3395  ;;  %v10247_v47 = vpop.permute.xlu0 %3440 }
 0x774   : > { %15718 = vst [vmem:[#allocation83_spill] sm:$0xff] %v10245_v56  ;;  %15719 = vst [vmem:[#allocation84_spill] sm:$0xff] %v10247_v47 }
 0x775   : > { %7434 = vrot.lane.b32.xlu1 %v10121_v27, %s15067_s30  ;;  %s15080_s30 = smov 81  }
 0x776   : > { %6139 = vrot.lane.b32.xlu0 %v10121_v27, %s15075_s22  ;;  %s15727_s22 = smov 16  }
 0x777   : > { %v10253_v2 = vpop.permute.xlu1 %3442  ;;  %v10255_v42 = vpop.permute.xlu0 %3488 }
 0x778   : > { %15720 = vst [vmem:[#allocation85_spill] sm:$0xff] %v10253_v2  ;;  %15721 = vst [vmem:[#allocation86_spill] sm:$0xff] %v10255_v42 }
 0x779   : > { %7482 = vrot.lane.b32.xlu1 %v10121_v27, %s15073_s24  ;;  %s15082_s24 = smov 80  }
 0x77a   : > { %6187 = vrot.lane.b32.xlu0 %v10121_v27, %s15722_s26 }
 0x77b   : > { %v10261_v41 = vpop.permute.xlu1 %3490  ;;  %v10263_v0 = vpop.permute.xlu0 %3536 }
 0x77c   : > { %15723 = vst [vmem:[#allocation87_spill] sm:$0xff] %v10261_v41  ;;  %15724 = vst [vmem:[#allocation88_spill] sm:$0xff] %v10263_v0 }
 0x77d   : > { %7530 = vrot.lane.b32.xlu1 %v10121_v27, %s15080_s30  ;;  %s15731_s30 = smov 51  }
 0x77e   : > { %6234 = vrot.lane.b32.xlu0 %v10121_v27, %s15663_s18 }
 0x77f   : > { %v10269_v49 = vpop.permute.xlu1 %3538  ;;  %v10271_v12 = vpop.permute.xlu0 %3601 }
 0x780   : > { %15725 = vst [vmem:[#allocation89_spill] sm:$0xff] %v10269_v49  ;;  %15726 = vst [vmem:[#allocation90_spill] sm:$0xff] %v10271_v12 }
 0x781   : > { %7578 = vrot.lane.b32.xlu1 %v10121_v27, %s15082_s24  ;;  %s15734_s24 = smov 50  }
 0x782   : > { %6281 = vrot.lane.b32.xlu0 %v10121_v27, %s15727_s22 }
 0x783   : > { %v10279_v8 = vpop.permute.xlu1 %3603  ;;  %v10281_v21 = vpop.permute.xlu0 %3648 }
 0x784   : > { %15729 = vst [vmem:[#allocation92_spill] sm:$0xff] %v10279_v8  ;;  %15730 = vst [vmem:[#allocation93_spill] sm:$0xff] %v10281_v21  ;;  %v2118_v21 = vadd.f32 %v10109_v45, %v9958_v32 }
 0x785   : > { %5479 = vrot.lane.b32.xlu1 %v10277_v60, %s15731_s30 }
 0x786   : > { %6328 = vrot.lane.b32.xlu0 %v10121_v27, %s15664_s1  ;;  %v2139_v8 = vmul.f32 0.70710677, %v2118_v21 }
 0x787   : > { %v10287_v9 = vpop.permute.xlu1 %3650  ;;  %v10289_v3 = vpop.permute.xlu0 %3696 }
 0x788   : > { %15732 = vst [vmem:[#allocation94_spill] sm:$0xff] %v10287_v9  ;;  %15733 = vst [vmem:[#allocation95_spill] sm:$0xff] %v10289_v3  ;;  %8971 = verf.f32 %v2139_v8 }
 0x789   : > { %5522 = vrot.lane.b32.xlu1 %v10277_v60, %s15734_s24 }
 0x78a   : > { %6375 = vrot.lane.b32.xlu0 %v10121_v27, %s15665_s23 }
 0x78b   : > { %v10295_v54 = vpop.permute.xlu1 %3698  ;;  %v10297_v63 = vpop.permute.xlu0 %3744 }
 0x78c   : > { %15735 = vst [vmem:[#allocation96_spill] sm:$0xff] %v10295_v54  ;;  %15736 = vst [vmem:[#allocation97_spill] sm:$0xff] %v10297_v63 }
 0x78d   : > { %5570 = vrot.lane.b32.xlu1 %v10277_v60, %s15737_s21 }
 0x78e   : > { %6422 = vrot.lane.b32.xlu0 %v10121_v27, %s15093_s0  ;;  %s15743_s0 = smov 47  }
 0x78f   : > { %v10303_v9 = vpop.permute.xlu1 %3746  ;;  %v10305_v3 = vpop.permute.xlu0 %3791 }
 0x790   : > { %15738 = vst [vmem:[#allocation98_spill] sm:$0xff] %v10303_v9  ;;  %15739 = vst [vmem:[#allocation99_spill] sm:$0xff] %v10305_v3  ;;  %v2131_v9 = vmul.f32 0.5, %v2118_v21 }
 0x791   : > { %5618 = vrot.lane.b32.xlu1 %v10277_v60, %s15740_s4 }
 0x792   : > { %6470 = vrot.lane.b32.xlu0 %v10121_v27, %s15098_s25  ;;  %s15749_s25 = smov 45  }
 0x793   : > { %v10313_v63 = vpop.permute.xlu1 %3793  ;;  %v10315_v54 = vpop.permute.xlu0 %3838 }
 0x794   : > { %15741 = vst [vmem:[#allocation100_spill] sm:$0xff] %v10313_v63  ;;  %15742 = vst [vmem:[#allocation101_spill] sm:$0xff] %v10315_v54 }
 0x795   : > { %5666 = vrot.lane.b32.xlu1 %v10277_v60, %s15743_s0 }
 0x796   : > { %6518 = vrot.lane.b32.xlu0 %v10121_v27, %s15666_s7 }
 0x797   : > { %v10321_v3 = vpop.permute.xlu1 %3840  ;;  %v10323_v32 = vpop.permute.xlu0 %3885 }
 0x798   : > { %15744 = vst [vmem:[#allocation102_spill] sm:$0xff] %v10321_v3  ;;  %15745 = vst [vmem:[#allocation103_spill] sm:$0xff] %v10323_v32 }
 0x799   : > { %5714 = vrot.lane.b32.xlu1 %v10277_v60, %s15746_s20 }
 0x79a   : > { %6565 = vrot.lane.b32.xlu0 %v10121_v27, %s15667_s11 }
 0x79b   : > { %v10329_v45 = vpop.permute.xlu1 %3887  ;;  %v10331_v54 = vpop.permute.xlu0 %3933 }
 0x79c   : > { %15747 = vst [vmem:[#allocation104_spill] sm:$0xff] %v10329_v45  ;;  %15748 = vst [vmem:[#allocation105_spill] sm:$0xff] %v10331_v54  ;;  %v8972_v54 = vpop.eup %8971 }
 0x79d   : > { %5762 = vrot.lane.b32.xlu1 %v10277_v60, %s15749_s25 }
 0x79e   : > { %6630 = vrot.lane.b32.xlu0 %v10121_v27, %s15669_s3 }
 0x79f   : > { %v10337_v3 = vpop.permute.xlu1 %3935  ;;  %v10339_v32 = vpop.permute.xlu0 %3981 }
 0x7a0   : > { %15750 = vst [vmem:[#allocation106_spill] sm:$0xff] %v10337_v3  ;;  %15751 = vst [vmem:[#allocation107_spill] sm:$0xff] %v10339_v32  ;;  %v2155_v32 = vadd.f32 1.0, %v8972_v54 }
 0x7a1   : > { %5810 = vrot.lane.b32.xlu1 %v10277_v60, %s15752_s19 }
 0x7a2   : > { %6677 = vrot.lane.b32.xlu0 %v10121_v27, %s15672_s5 }
 0x7a3   : > { %v10345_v8 = vpop.permute.xlu1 %3983  ;;  %v10347_v45 = vpop.permute.xlu0 %4029 }
 0x7a4   : > { %15753 = vst [vmem:[#allocation108_spill] sm:$0xff] %v10345_v8  ;;  %15754 = vst [vmem:[#allocation109_spill] sm:$0xff] %v10347_v45  ;;  %v10363_v8 = vmul.f32 %v2155_v32, %v2131_v9 }
 0x7a5   : > { %5858 = vrot.lane.b32.xlu1 %v10277_v60, %s15660_s2 }
 0x7a6   : > { %6724 = vrot.lane.b32.xlu0 %v10121_v27, %s15117_s17  ;;  %15758 = vst [vmem:[#allocation113_spill] sm:$0xff] %v10363_v8  ;;  %s15766_s17 = smov 19  }
 0x7a7   : > { %v10353_v3 = vpop.permute.xlu1 %4031  ;;  %v10355_v63 = vpop.permute.xlu0 %4077 }
 0x7a8   : > { %15755 = vst [vmem:[#allocation110_spill] sm:$0xff] %v10353_v3  ;;  %15756 = vst [vmem:[#allocation111_spill] sm:$0xff] %v10355_v63 }
 0x7a9   : > { %5905 = vrot.lane.b32.xlu1 %v10277_v60, %s15661_s10 }
 0x7aa   : > { %6772 = vrot.lane.b32.xlu0 %v10121_v27, %s15114_s14  ;;  %s15763_s14 = smov 29  }
 0x7ab   : > { %v10361_v45 = vpop.permute.xlu1 %4079  ;;  %v10367_v12 = vpop.permute.xlu0 %4125 }
 0x7ac   : > { %15757 = vst [vmem:[#allocation112_spill] sm:$0xff] %v10361_v45  ;;  %15759 = vst [vmem:[#allocation114_spill] sm:$0xff] %v10367_v12 }
 0x7ad   : > { %5952 = vrot.lane.b32.xlu1 %v10277_v60, %s15714_s29 }
 0x7ae   : > { %5481 = vrot.lane.b32.xlu0 %v10363_v8, %s15731_s30 }
 0x7af   : > { %v10371_v54 = vpop.permute.xlu1 %4127  ;;  %v10377_v21 = vpop.permute.xlu0 %5477 }
 0x7b0   : > { %15760 = vst [vmem:[#allocation115_spill] sm:$0xff] %v10371_v54  ;;  %15761 = vst [vmem:[#allocation116_spill] sm:$0xff] %v10377_v21 }
 0x7b1   : > { %5999 = vrot.lane.b32.xlu1 %v10277_v60, %s15715_s27 }
 0x7b2   : > { %5524 = vrot.lane.b32.xlu0 %v10363_v8, %s15734_s24 }
 0x7b3   : > { %v10379_v9 = vpop.permute.xlu1 %6820  ;;  %v10387_v32 = vpop.permute.xlu0 %5520 }
 0x7b4   : > { %15762 = vst [vmem:[#allocation117_spill] sm:$0xff] %v10379_v9  ;;  %15764 = vst [vmem:[#allocation118_spill] sm:$0xff] %v10387_v32 }
 0x7b5   : > { %6046 = vrot.lane.b32.xlu1 %v10277_v60, %s15662_s16 }
 0x7b6   : > { %5572 = vrot.lane.b32.xlu0 %v10363_v8, %s15737_s21 }
 0x7b7   : > { %v10391_v54 = vpop.permute.xlu1 %6867  ;;  %v10397_v9 = vpop.permute.xlu0 %5568 }
 0x7b8   : > { %15765 = vst [vmem:[#allocation119_spill] sm:$0xff] %v10391_v54  ;;  %15767 = vst [vmem:[#allocation120_spill] sm:$0xff] %v10397_v9 }
 0x7b9   : > { %6093 = vrot.lane.b32.xlu1 %v10277_v60, %s15763_s14 }
 0x7ba   : > { %5620 = vrot.lane.b32.xlu0 %v10363_v8, %s15740_s4 }
 0x7bb   : > { %v10399_v21 = vpop.permute.xlu1 %6914  ;;  %v10407_v54 = vpop.permute.xlu0 %5616 }
 0x7bc   : > { %15768 = vst [vmem:[#allocation121_spill] sm:$0xff] %v10399_v21  ;;  %15769 = vst [vmem:[#allocation122_spill] sm:$0xff] %v10407_v54 }
 0x7bd   : > { %6141 = vrot.lane.b32.xlu1 %v10277_v60, %s15766_s17 }
 0x7be   : > { %5668 = vrot.lane.b32.xlu0 %v10363_v8, %s15743_s0 }
 0x7bf   : > { %v10411_v32 = vpop.permute.xlu1 %6961 }
 0x7c0   : > { %15770 = vst [vmem:[#allocation123_spill] sm:$0xff] %v10411_v32  ;;  %v10417_v21 = vpop.permute.xlu0 %5664 }
 0x7c1   : > { %6189 = vrot.lane.b32.xlu1 %v10277_v60, %s15722_s26  ;;  %15771 = vst [vmem:[#allocation124_spill] sm:$0xff] %v10417_v21 }
 0x7c2   : > { %5716 = vrot.lane.b32.xlu0 %v10363_v8, %s15746_s20 }
 0x7c3   : > { %v10419_v9 = vpop.permute.xlu1 %7008 }
 0x7c4   : > { %15772 = vst [vmem:[#allocation125_spill] sm:$0xff] %v10419_v9  ;;  %v10427_v32 = vpop.permute.xlu0 %5712 }
 0x7c5   : > { %6236 = vrot.lane.b32.xlu1 %v10277_v60, %s15663_s18  ;;  %15773 = vst [vmem:[#allocation126_spill] sm:$0xff] %v10427_v32 }
 0x7c6   : > { %5764 = vrot.lane.b32.xlu0 %v10363_v8, %s15749_s25 }
 0x7c7   : > { %v10431_v54 = vpop.permute.xlu1 %7055 }
 0x7c8   : > { %15774 = vst [vmem:[#allocation127_spill] sm:$0xff] %v10431_v54  ;;  %v10437_v9 = vpop.permute.xlu0 %5760 }
 0x7c9   : > { %6283 = vrot.lane.b32.xlu1 %v10277_v60, %s15727_s22  ;;  %15776 = vst [vmem:[#allocation128_spill] sm:$0xff] %v10437_v9 }
 0x7ca   : > { %5812 = vrot.lane.b32.xlu0 %v10363_v8, %s15752_s19  ;;  %s15775_s19 = smov 13  }
 0x7cb   : > { %v10439_v21 = vpop.permute.xlu1 %7103 }
 0x7cc   : > { %15777 = vst [vmem:[#allocation129_spill] sm:$0xff] %v10439_v21  ;;  %v10447_v54 = vpop.permute.xlu0 %5808 }
 0x7cd   : > { %6330 = vrot.lane.b32.xlu1 %v10277_v60, %s15664_s1  ;;  %15779 = vst [vmem:[#allocation130_spill] sm:$0xff] %v10447_v54 }
 0x7ce   : > { %5860 = vrot.lane.b32.xlu0 %v10363_v8, %s15660_s2  ;;  %s15778_s2 = smov 3  }
 0x7cf   : > { %v10451_v32 = vpop.permute.xlu1 %7151 }
 0x7d0   : > { %15780 = vst [vmem:[#allocation131_spill] sm:$0xff] %v10451_v32  ;;  %v10457_v21 = vpop.permute.xlu0 %5856 }
 0x7d1   : > { %6377 = vrot.lane.b32.xlu1 %v10277_v60, %s15665_s23  ;;  %15781 = vst [vmem:[#allocation132_spill] sm:$0xff] %v10457_v21 }
 0x7d2   : > { %5907 = vrot.lane.b32.xlu0 %v10363_v8, %s15661_s10 }
 0x7d3   : > { %v10459_v9 = vpop.permute.xlu1 %7198 }
 0x7d4   : > { %15782 = vst [vmem:[#allocation133_spill] sm:$0xff] %v10459_v9  ;;  %v10467_v32 = vpop.permute.xlu0 %5903 }
 0x7d5   : > { %6424 = vrot.lane.b32.xlu1 %v10277_v60, %s15775_s19  ;;  %15783 = vst [vmem:[#allocation134_spill] sm:$0xff] %v10467_v32 }
 0x7d6   : > { %5954 = vrot.lane.b32.xlu0 %v10363_v8, %s15714_s29 }
 0x7d7   : > { %v10471_v54 = vpop.permute.xlu1 %7245 }
 0x7d8   : > { %15784 = vst [vmem:[#allocation135_spill] sm:$0xff] %v10471_v54  ;;  %v10477_v9 = vpop.permute.xlu0 %5950 }
 0x7d9   : > { %6472 = vrot.lane.b32.xlu1 %v10277_v60, %s15778_s2  ;;  %15786 = vst [vmem:[#allocation136_spill] sm:$0xff] %v10477_v9 }
 0x7da   : > { %6001 = vrot.lane.b32.xlu0 %v10363_v8, %s15715_s27 }
 0x7db   : > { %v10479_v21 = vpop.permute.xlu1 %7292 }
 0x7dc   : > { %15787 = vst [vmem:[#allocation137_spill] sm:$0xff] %v10479_v21  ;;  %v10487_v54 = vpop.permute.xlu0 %5997 }
 0x7dd   : > { %6520 = vrot.lane.b32.xlu1 %v10277_v60, %s15666_s7  ;;  %15789 = vst [vmem:[#allocation138_spill] sm:$0xff] %v10487_v54 }
 0x7de   : > { %6048 = vrot.lane.b32.xlu0 %v10363_v8, %s15662_s16 }
 0x7df   : > { %v10491_v32 = vpop.permute.xlu1 %7339 }
 0x7e0   : > { %15790 = vst [vmem:[#allocation139_spill] sm:$0xff] %v10491_v32  ;;  %v10497_v21 = vpop.permute.xlu0 %6044 }
 0x7e1   : > { %6567 = vrot.lane.b32.xlu1 %v10277_v60, %s15667_s11  ;;  %15792 = vst [vmem:[#allocation140_spill] sm:$0xff] %v10497_v21 }
 0x7e2   : > { %6095 = vrot.lane.b32.xlu0 %v10363_v8, %s15763_s14  ;;  %s15785_s14 = smov 125  }
 0x7e3   : > { %v10499_v9 = vpop.permute.xlu1 %7386 }
 0x7e4   : > { %15793 = vst [vmem:[#allocation141_spill] sm:$0xff] %v10499_v9  ;;  %v10507_v32 = vpop.permute.xlu0 %6091 }
 0x7e5   : > { %6632 = vrot.lane.b32.xlu1 %v10277_v60, %s15669_s3  ;;  %15794 = vst [vmem:[#allocation142_spill] sm:$0xff] %v10507_v32 }
 0x7e6   : > { %6143 = vrot.lane.b32.xlu0 %v10363_v8, %s15766_s17  ;;  %s15788_s17 = smov 115  }
 0x7e7   : > { %v10511_v54 = vpop.permute.xlu1 %7434 }
 0x7e8   : > { %15795 = vst [vmem:[#allocation143_spill] sm:$0xff] %v10511_v54  ;;  %v10517_v9 = vpop.permute.xlu0 %6139 }
 0x7e9   : > { %6679 = vrot.lane.b32.xlu1 %v10277_v60, %s15672_s5  ;;  %15796 = vst [vmem:[#allocation144_spill] sm:$0xff] %v10517_v9 }
 0x7ea   : > { %6191 = vrot.lane.b32.xlu0 %v10363_v8, %s15722_s26 }
 0x7eb   : > { %v10519_v21 = vpop.permute.xlu1 %7482 }
 0x7ec   : > { %15797 = vst [vmem:[#allocation145_spill] sm:$0xff] %v10519_v21  ;;  %v10528_v54 = vpop.permute.xlu0 %6187 }
 0x7ed   : > { %6726 = vrot.lane.b32.xlu1 %v10277_v60, %s15785_s14  ;;  %15800 = vst [vmem:[#allocation146_spill] sm:$0xff] %v10528_v54 }
 0x7ee   : > { %6238 = vrot.lane.b32.xlu0 %v10363_v8, %s15663_s18  ;;  %s15791_s18 = sld [smem:[#allocation20_spill]] }
 0x7ef   : > { %v10532_v45 = vpop.permute.xlu1 %7530 }
 0x7f0   : > { %15801 = vst [vmem:[#allocation147_spill] sm:$0xff] %v10532_v45  ;;  %v10538_v3 = vpop.permute.xlu0 %6234 }
 0x7f1   : > { %6774 = vrot.lane.b32.xlu1 %v10277_v60, %s15788_s17  ;;  %15802 = vst [vmem:[#allocation148_spill] sm:$0xff] %v10538_v3 }
 0x7f2   : > { %6285 = vrot.lane.b32.xlu0 %v10363_v8, %s15727_s22 }
 0x7f3   : > { %v10540_v49 = vpop.permute.xlu1 %7578 }
 0x7f4   : > { %v2167_v32 = vld [vmem:[%s15791_s18] sm:$0x3]  ;;  %15803 = vst [vmem:[#allocation149_spill] sm:$0xff] %v10540_v49  ;;  %s15804_s18 = smov 96  }
 0x7f5   : > { %6822 = vrot.lane.b32.xlu1 %v10277_v60, %s15675_s6 }
 0x7f6   : > { %6332 = vrot.lane.b32.xlu0 %v10363_v8, %s15664_s1 }
 0x7f9   : > { %6869 = vrot.lane.b32.xlu1 %v10277_v60, %s15678_s8 }
 0x7fa   : > { %6379 = vrot.lane.b32.xlu0 %v10363_v8, %s15665_s23  ;;  %s15822_s23 = smov 80  }
 0x7fd   : > { %6916 = vrot.lane.b32.xlu1 %v10277_v60, %s15658_s15 }
 0x7fe   : > { %6426 = vrot.lane.b32.xlu0 %v10363_v8, %s15775_s19  ;;  %s15798_s19 = smov 109  }
 0x801   : > { %6963 = vrot.lane.b32.xlu1 %v10277_v60, %s15659_s28 }
 0x802   : > { %6474 = vrot.lane.b32.xlu0 %v10363_v8, %s15778_s2  ;;  %s15799_s2 = smov 99  }
 0x805   : > { %7010 = vrot.lane.b32.xlu1 %v10277_v60, %s15685_s9 }
 0x806   : > { %6522 = vrot.lane.b32.xlu0 %v10363_v8, %s15666_s7  ;;  %s15819_s7 = smov 81  }
 0x809   : > { %7057 = vrot.lane.b32.xlu1 %v10277_v60, %s15798_s19 }
 0x80a   : > { %6569 = vrot.lane.b32.xlu0 %v10363_v8, %s15667_s11  ;;  %s15815_s11 = smov 83  }
 0x80d   : > { %7105 = vrot.lane.b32.xlu1 %v10277_v60, %s15799_s2 }
 0x80e   : > { %6634 = vrot.lane.b32.xlu0 %v10363_v8, %s15669_s3  ;;  %v2368_v12 = vpop.f32.mrf.mxu1  ;;  %s15808_s3 = smov 95  }
 0x80f   : > { %v2369_v9 = vadd.f32 %v2368_v12, %v2167_v32  ;;  %v10548_v12 = vpop.permute.xlu0 %6281 }
 0x810   : > { %v8594_v21 = vpop.f32.mrf.mxu1  ;;  %15805 = vst [vmem:[#allocation150_spill] sm:$0xff] %v10548_v12 }
 0x811   : > { %v2373_v63 = vmul.f32 0.70710677, %v2369_v9  ;;  %7153 = vrot.lane.b32.xlu1 %v10277_v60, %s15688_s12  ;;  %v10554_v21 = vpop.permute.xlu1 %5479  ;;  %v2372_v3 = vmul.f32 0.5, %v2369_v9 }
 0x812   : > { %6681 = vrot.lane.b32.xlu0 %v10363_v8, %s15672_s5  ;;  %s15806_s5 = sld [smem:[#allocation21_spill]]  ;;  %15807 = vst [vmem:[#allocation151_spill] sm:$0xff] %v10554_v21 }
 0x813   : > { %8973 = verf.f32 %v2373_v63  ;;  %v2124_v63 = vadd.f32 %v10131_v18, %v9964_v40  ;;  %v10560_v45 = vpop.permute.xlu0 %6328 }
 0x814   : > { %15809 = vst [vmem:[#allocation152_spill] sm:$0xff] %v10560_v45 }
 0x815   : > { %7200 = vrot.lane.b32.xlu1 %v10277_v60, %s15691_s13  ;;  %v2141_v32 = vmul.f32 0.70710677, %v2124_v63  ;;  %v10562_v12 = vpop.permute.xlu1 %5522 }
 0x816   : > { %6728 = vrot.lane.b32.xlu0 %v10363_v8, %s15785_s14  ;;  %15810 = vst [vmem:[#allocation153_spill] sm:$0xff] %v10562_v12  ;;  %s15812_s14 = smov 93  }
 0x817   : > { %8975 = verf.f32 %v2141_v32  ;;  %v10572_v21 = vpop.permute.xlu0 %6375 }
 0x818   : > { %v2168_v18 = vld [vmem:[%s15806_s5] sm:$0xf]  ;;  %15813 = vst [vmem:[#allocation154_spill] sm:$0xff] %v10572_v21  ;;  %s15818_s5 = smov 82  }
 0x819   : > { %7247 = vrot.lane.b32.xlu1 %v10277_v60, %s15804_s18 }
 0x81a   : > { %6776 = vrot.lane.b32.xlu0 %v10363_v8, %s15788_s17  ;;  %s15811_s17 = smov 94  }
 0x81d   : > { %7294 = vrot.lane.b32.xlu1 %v10277_v60, %s15808_s3 }
 0x81e   : > { %6824 = vrot.lane.b32.xlu0 %v10363_v8, %s15675_s6 }
 0x820   : > { %v8974_v49 = vpop.eup %8973 }
 0x821   : > { %v2375_v54 = vadd.f32 1.0, %v8974_v49  ;;  %7341 = vrot.lane.b32.xlu1 %v10277_v60, %s15811_s17  ;;  %v10577_v49 = vpop.permute.xlu1 %5570 }
 0x822   : > { %6871 = vrot.lane.b32.xlu0 %v10363_v8, %s15678_s8  ;;  %15814 = vst [vmem:[#allocation155_spill] sm:$0xff] %v10577_v49  ;;  %v2133_v49 = vmul.f32 0.5, %v2124_v63 }
 0x823   : > { %v2376_v40 = vmul.f32 %v2375_v54, %v2372_v3  ;;  %v10583_v3 = vpop.permute.xlu0 %6422 }
 0x824   : > { %15816 = vst [vmem:[#allocation156_spill] sm:$0xff] %v10583_v3  ;;  %v8976_v9 = vpop.eup %8975 }
 0x825   : > { %8596 = vmatpush3.msk.msra.mxu1 %vm2381_vm10, %v2376_v40  ;;  %7388 = vrot.lane.b32.xlu1 %v10277_v60, %s15812_s14  ;;  %v10585_v54 = vpop.permute.xlu1 %5618  ;;  %v2157_v40 = vadd.f32 1.0, %v8976_v9 }
 0x826   : > { %6918 = vrot.lane.b32.xlu0 %v10363_v8, %s15658_s15  ;;  %8598 = vmatmul.mubr.msk.f32.vlgmr.msra.gmra.mxu1 %vm2377_vm11, %v2168_v18  ;;  %15817 = vst [vmem:[#allocation157_spill] sm:$0xff] %v10585_v54 }
 0x827   : > { %v10593_v32 = vpop.permute.xlu0 %6470  ;;  %v10603_v54 = vmul.f32 %v2157_v40, %v2133_v49 }
 0x828   : > { %15820 = vst [vmem:[#allocation158_spill] sm:$0xff] %v10593_v32 }
 0x829   : > { %7436 = vrot.lane.b32.xlu1 %v10277_v60, %s15815_s11  ;;  %v10597_v18 = vpop.permute.xlu1 %5666  ;;  %15823 = vst [vmem:[#allocation160_spill] sm:$0xff] %v10603_v54 }
 0x82a   : > { %6965 = vrot.lane.b32.xlu0 %v10363_v8, %s15659_s28  ;;  %15821 = vst [vmem:[#allocation159_spill] sm:$0xff] %v10597_v18 }
 0x82b   : > { %v10605_v12 = vpop.permute.xlu0 %6518 }
 0x82c   : > { %15824 = vst [vmem:[#allocation161_spill] sm:$0xff] %v10605_v12 }
 0x82d   : > { %7484 = vrot.lane.b32.xlu1 %v10277_v60, %s15818_s5  ;;  %v10607_v3 = vpop.permute.xlu1 %5714 }
 0x82e   : > { %7012 = vrot.lane.b32.xlu0 %v10363_v8, %s15685_s9  ;;  %15825 = vst [vmem:[#allocation162_spill] sm:$0xff] %v10607_v3 }
 0x82f   : > { %v10615_v63 = vpop.permute.xlu0 %6565 }
 0x830   : > { %15826 = vst [vmem:[#allocation163_spill] sm:$0xff] %v10615_v63 }
 0x831   : > { %7532 = vrot.lane.b32.xlu1 %v10277_v60, %s15819_s7  ;;  %v10619_v49 = vpop.permute.xlu1 %5762 }
 0x832   : > { %7059 = vrot.lane.b32.xlu0 %v10363_v8, %s15798_s19  ;;  %15827 = vst [vmem:[#allocation164_spill] sm:$0xff] %v10619_v49 }
 0x833   : > { %v10625_v9 = vpop.permute.xlu0 %6630 }
 0x834   : > { %15828 = vst [vmem:[#allocation165_spill] sm:$0xff] %v10625_v9 }
 0x835   : > { %7580 = vrot.lane.b32.xlu1 %v10277_v60, %s15822_s23  ;;  %v10627_v40 = vpop.permute.xlu1 %5810 }
 0x836   : > { %7107 = vrot.lane.b32.xlu0 %v10363_v8, %s15799_s2  ;;  %15829 = vst [vmem:[#allocation166_spill] sm:$0xff] %v10627_v40 }
 0x837   : > { %v10635_v49 = vpop.permute.xlu0 %6677 }
 0x838   : > { %15830 = vst [vmem:[#allocation167_spill] sm:$0xff] %v10635_v49 }
 0x839   : > { %5483 = vrot.lane.b32.xlu1 %v10603_v54, %s15731_s30  ;;  %v10639_v3 = vpop.permute.xlu1 %5858  ;;  %s15837_s30 = smov 34  }
 0x83a   : > { %7155 = vrot.lane.b32.xlu0 %v10363_v8, %s15688_s12  ;;  %15831 = vst [vmem:[#allocation168_spill] sm:$0xff] %v10639_v3 }
 0x83b   : > { %v10645_v40 = vpop.permute.xlu0 %6724 }
 0x83c   : > { %15832 = vst [vmem:[#allocation169_spill] sm:$0xff] %v10645_v40 }
 0x83d   : > { %5526 = vrot.lane.b32.xlu1 %v10603_v54, %s15734_s24  ;;  %v10647_v18 = vpop.permute.xlu1 %5905  ;;  %s16934_s24 = sld [smem:[#allocation32_spill]] }
 0x83e   : > { %7202 = vrot.lane.b32.xlu0 %v10363_v8, %s15691_s13  ;;  %15833 = vst [vmem:[#allocation170_spill] sm:$0xff] %v10647_v18 }
 0x83f   : > { %v10655_v3 = vpop.permute.xlu0 %6772 }
 0x840   : > { %15835 = vst [vmem:[#allocation171_spill] sm:$0xff] %v10655_v3 }
 0x841   : > { %5574 = vrot.lane.b32.xlu1 %v10603_v54, %s15737_s21  ;;  %s15834_s21 = smov 35   ;;  %v10659_v49 = vpop.permute.xlu1 %5952 }
 0x842   : > { %7249 = vrot.lane.b32.xlu0 %v10363_v8, %s15804_s18  ;;  %15836 = vst [vmem:[#allocation172_spill] sm:$0xff] %v10659_v49 }
 0x843   : > { %v10665_v18 = vpop.permute.xlu0 %5481 }
 0x844   : > { %15838 = vst [vmem:[#allocation173_spill] sm:$0xff] %v10665_v18 }
 0x845   : > { %5622 = vrot.lane.b32.xlu1 %v10603_v54, %s15740_s4  ;;  %v10667_v40 = vpop.permute.xlu1 %5999  ;;  %s15875_s4 = smov 125  }
 0x846   : > { %7296 = vrot.lane.b32.xlu0 %v10363_v8, %s15808_s3  ;;  %15839 = vst [vmem:[#allocation174_spill] sm:$0xff] %v10667_v40 }
 0x847   : > { %v10675_v49 = vpop.permute.xlu0 %5524 }
 0x848   : > { %15840 = vst [vmem:[#allocation175_spill] sm:$0xff] %v10675_v49 }
 0x849   : > { %5670 = vrot.lane.b32.xlu1 %v10603_v54, %s15743_s0  ;;  %v10679_v3 = vpop.permute.xlu1 %6046  ;;  %s15908_s0 = sld [smem:[#allocation25_spill]] }
 0x84a   : > { %7343 = vrot.lane.b32.xlu0 %v10363_v8, %s15811_s17  ;;  %15841 = vst [vmem:[#allocation176_spill] sm:$0xff] %v10679_v3 }
 0x84b   : > { %v10685_v40 = vpop.permute.xlu0 %5572 }
 0x84c   : > { %15842 = vst [vmem:[#allocation177_spill] sm:$0xff] %v10685_v40 }
 0x84d   : > { %5718 = vrot.lane.b32.xlu1 %v10603_v54, %s15746_s20  ;;  %v10687_v9 = vpop.permute.xlu1 %6093  ;;  %s15868_s20 = smov 1  }
 0x84e   : > { %7390 = vrot.lane.b32.xlu0 %v10363_v8, %s15812_s14  ;;  %15843 = vst [vmem:[#allocation178_spill] sm:$0xff] %v10687_v9 }
 0x84f   : > { %v10695_v3 = vpop.permute.xlu0 %5620 }
 0x850   : > { %15845 = vst [vmem:[#allocation179_spill] sm:$0xff] %v10695_v3 }
 0x851   : > { %5766 = vrot.lane.b32.xlu1 %v10603_v54, %s15749_s25  ;;  %s15844_s25 = smov 29   ;;  %v10699_v63 = vpop.permute.xlu1 %6141 }
 0x852   : > { %7438 = vrot.lane.b32.xlu0 %v10363_v8, %s15815_s11  ;;  %15846 = vst [vmem:[#allocation180_spill] sm:$0xff] %v10699_v63 }
 0x853   : > { %v10705_v9 = vpop.permute.xlu0 %5668 }
 0x854   : > { %15848 = vst [vmem:[#allocation181_spill] sm:$0xff] %v10705_v9 }
 0x855   : > { %5814 = vrot.lane.b32.xlu1 %v10603_v54, %s15834_s21  ;;  %v10707_v12 = vpop.permute.xlu1 %6189  ;;  %s17251_s21 = sld [smem:[#allocation33_spill]] }
 0x856   : > { %7486 = vrot.lane.b32.xlu0 %v10363_v8, %s15818_s5  ;;  %15849 = vst [vmem:[#allocation182_spill] sm:$0xff] %v10707_v12 }
 0x857   : > { %v10715_v63 = vpop.permute.xlu0 %5716 }
 0x858   : > { %15852 = vst [vmem:[#allocation183_spill] sm:$0xff] %v10715_v63 }
 0x859   : > { %5862 = vrot.lane.b32.xlu1 %v10603_v54, %s15837_s30  ;;  %v10719_v32 = vpop.permute.xlu1 %6236 }
 0x85a   : > { %7534 = vrot.lane.b32.xlu0 %v10363_v8, %s15819_s7  ;;  %15854 = vst [vmem:[#allocation184_spill] sm:$0xff] %v10719_v32 }
 0x85b   : > { %v10725_v12 = vpop.permute.xlu0 %5764 }
 0x85c   : > { %15855 = vst [vmem:[#allocation185_spill] sm:$0xff] %v10725_v12 }
 0x85d   : > { %5909 = vrot.lane.b32.xlu1 %v10603_v54, %s15661_s10  ;;  %v10727_v21 = vpop.permute.xlu1 %6283  ;;  %s15932_s10 = sld [smem:[#allocation29_spill]] }
 0x85e   : > { %6826 = vrot.lane.b32.xlu0 %v10603_v54, %s15675_s6  ;;  %15856 = vst [vmem:[#allocation186_spill] sm:$0xff] %v10727_v21  ;;  %s15857_s6 = smov 14  }
 0x85f   : > { %v10735_v32 = vpop.permute.xlu0 %5812 }
 0x860   : > { %15858 = vst [vmem:[#allocation187_spill] sm:$0xff] %v10735_v32 }
 0x861   : > { %5956 = vrot.lane.b32.xlu1 %v10603_v54, %s15714_s29  ;;  %s15847_s29 = smov 19   ;;  %v10739_v45 = vpop.permute.xlu1 %6330 }
 0x862   : > { %6873 = vrot.lane.b32.xlu0 %v10603_v54, %s15678_s8  ;;  %s15850_s8 = smov 17   ;;  %15859 = vst [vmem:[#allocation188_spill] sm:$0xff] %v10739_v45 }
 0x863   : > { %v10749_v63 = vpop.permute.xlu0 %5860 }
 0x864   : > { %15861 = vst [vmem:[#allocation189_spill] sm:$0xff] %v10749_v63 }
 0x865   : > { %6003 = vrot.lane.b32.xlu1 %v10603_v54, %s15715_s27  ;;  %v10751_v32 = vpop.permute.xlu1 %6377  ;;  %s15872_s27 = smov 126  }
 0x866   : > { %6920 = vrot.lane.b32.xlu0 %v10603_v54, %s15658_s15  ;;  %15862 = vst [vmem:[#allocation190_spill] sm:$0xff] %v10751_v32  ;;  %s15953_s15 = sld [smem:[#allocation30_spill]] }
 0x867   : > { %v10759_v45 = vpop.permute.xlu0 %5907 }
 0x868   : > { %15865 = vst [vmem:[#allocation191_spill] sm:$0xff] %v10759_v45 }
 0x869   : > { %6050 = vrot.lane.b32.xlu1 %v10603_v54, %s15662_s16  ;;  %s15994_s16 = sld [smem:[#allocation6_spill]] }
 0x86a   : > { %6967 = vrot.lane.b32.xlu0 %v10603_v54, %s15659_s28  ;;  %s9091_s28 = smov 79  }
 0x86d   : > { %6097 = vrot.lane.b32.xlu1 %v10603_v54, %s15844_s25 }
 0x86e   : > { %7014 = vrot.lane.b32.xlu0 %v10603_v54, %s15685_s9  ;;  %s15851_s9 = sld [smem:[#allocation23_spill]] }
 0x86f   : > { %v8132_v39 = vld [vmem:[%s15994_s16 + $0x12] sm:$0x3]  ;;  %v8134_v56 = vld [vmem:[%s15994_s16 + $0x16] sm:$0x3]  ;;  %v8136_v43 = vld [vmem:[%s15994_s16 + $0x1c] sm:$0x3] }
 0x871   : > { %6145 = vrot.lane.b32.xlu1 %v10603_v54, %s15847_s29 }
 0x872   : > { %7061 = vrot.lane.b32.xlu0 %v10603_v54, %s15798_s19  ;;  %s15853_s19 = sld [smem:[#allocation24_spill]] }
 0x874   : > { %v2170_v21 = vld [vmem:[%s15851_s9] sm:$0xff]  ;;  %v2171_v18 = vld [vmem:[%s15851_s9 + $0x8] sm:$0xff] }
 0x875   : > { %6193 = vrot.lane.b32.xlu1 %v10603_v54, %s15722_s26  ;;  %8602 = vmatprep.mubr.msk.f32.mxu1 %vm2461_vm12, %v2170_v21  ;;  %v10769_v21 = vpop.permute.xlu0 %5954  ;;  %s16196_s26 = sld [smem:[#allocation7_spill]] }
 0x876   : > { %7109 = vrot.lane.b32.xlu0 %v10603_v54, %s15799_s2  ;;  %15869 = vst [vmem:[#allocation193_spill] sm:$0xff] %v10769_v21  ;;  %s15927_s2 = sld [smem:[#allocation26_spill]] }
 0x878   : > { %v2220_v12 = vld [vmem:[%s15853_s19] sm:$0xff]  ;;  %v2221_v0 = vld [vmem:[%s15853_s19 + $0x8] sm:$0xff] }
 0x879   : > { %6240 = vrot.lane.b32.xlu1 %v10603_v54, %s15850_s8  ;;  %8679 = vmatprep.mubr.msk.f32.mxu0 %vm2461_vm12, %v2220_v12  ;;  %v10763_v12 = vpop.permute.xlu1 %6424 }
 0x87a   : > { %7157 = vrot.lane.b32.xlu0 %v10603_v54, %s15688_s12  ;;  %s15864_s12 = smov 2   ;;  %15867 = vst [vmem:[#allocation192_spill] sm:$0xff] %v10763_v12  ;;  %v10779_v12 = vpop.permute.xlu0 %6001 }
 0x87b   : > { %15873 = vst [vmem:[#allocation195_spill] sm:$0xff] %v10779_v12 }
 0x87d   : > { %6287 = vrot.lane.b32.xlu1 %v10603_v54, %s15727_s22  ;;  %v10771_v32 = vpop.permute.xlu1 %6472  ;;  %s15877_s22 = smov 115  }
 0x87e   : > { %7204 = vrot.lane.b32.xlu0 %v10603_v54, %s15691_s13  ;;  %s15860_s13 = smov 13   ;;  %15870 = vst [vmem:[#allocation194_spill] sm:$0xff] %v10771_v32 }
 0x881   : > { %6334 = vrot.lane.b32.xlu1 %v10603_v54, %s15664_s1  ;;  %v10783_v45 = vpop.permute.xlu1 %6520  ;;  %s9093_s1 = smov 77  }
 0x882   : > { %7251 = vrot.lane.b32.xlu0 %v10603_v54, %s15804_s18  ;;  %15874 = vst [vmem:[#allocation196_spill] sm:$0xff] %v10783_v45  ;;  %s17249_s18 = sld [smem:[#allocation31_spill]] }
 0x885   : > { %6381 = vrot.lane.b32.xlu1 %v10603_v54, %s15857_s6  ;;  %v10787_v32 = vpop.permute.xlu1 %6567 }
 0x886   : > { %7298 = vrot.lane.b32.xlu0 %v10603_v54, %s15808_s3  ;;  %s15863_s3 = smov 3   ;;  %15876 = vst [vmem:[#allocation197_spill] sm:$0xff] %v10787_v32 }
 0x889   : > { %6428 = vrot.lane.b32.xlu1 %v10603_v54, %s15860_s13 }
 0x88a   : > { %7345 = vrot.lane.b32.xlu0 %v10603_v54, %s15811_s17  ;;  %s15866_s17 = sld [smem:[#allocation22_spill]] }
 0x88d   : > { %6476 = vrot.lane.b32.xlu1 %v10603_v54, %s15863_s3 }
 0x88e   : > { %7392 = vrot.lane.b32.xlu0 %v10603_v54, %s15812_s14  ;;  %s15871_s14 = smov 127  }
 0x890   : > { %v2169_v21 = vld [vmem:[%s15866_s17] sm:$0xf] }
 0x891   : > { %6524 = vrot.lane.b32.xlu1 %v10603_v54, %s15864_s12 }
 0x892   : > { %7440 = vrot.lane.b32.xlu0 %v10603_v54, %s15815_s11  ;;  %s15934_s11 = sld [smem:[#allocation28_spill]] }
 0x895   : > { %6571 = vrot.lane.b32.xlu1 %v10603_v54, %s15868_s20 }
 0x896   : > { %7488 = vrot.lane.b32.xlu0 %v10603_v54, %s15818_s5  ;;  %s17250_s5 = sld [smem:[#allocation35_spill]] }
 0x899   : > { %6636 = vrot.lane.b32.xlu1 %v10603_v54, %s15871_s14 }
 0x89a   : > { %7536 = vrot.lane.b32.xlu0 %v10603_v54, %s15819_s7  ;;  %s15930_s7 = sld [smem:[#allocation27_spill]] }
 0x89c   : > { %s998_s30 = scalar_lea.vmem %s17251_s21, %s17250_s5 }
 0x89d   : > { %6683 = vrot.lane.b32.xlu1 %v10603_v54, %s15872_s27 }
 0x89e   : > { %7584 = vrot.lane.b32.xlu0 %v10603_v54, %s15822_s23 }
 0x8a1   : > { %6730 = vrot.lane.b32.xlu1 %v10603_v54, %s15875_s4 }
 0x8a5   : > { %6778 = vrot.lane.b32.xlu1 %v10603_v54, %s15877_s22 }
 0x8e6   : > { %v2451_v63 = vpop.f32.mrf.mxu1 }
 0x8e7   : > { %v2452_v9 = vadd.f32 %v2451_v63, %v2169_v21  ;;  %v2172_v63 = vld [vmem:[%s15851_s9 + $0x10] sm:$0xff]  ;;  %v2181_v21 = vld [vmem:[%s15851_s9 + $0x58] sm:$0xff] }
 0x8e8   : > { %v8599_v12 = vpop.f32.mrf.mxu1 }
 0x8e9   : > { %v8069_v3 = vmul.f32 -1.442695, %v2452_v9  ;;  %v2178_v9 = vld [vmem:[%s15851_s9 + $0x40] sm:$0xff]  ;;  %v2180_v12 = vld [vmem:[%s15851_s9 + $0x50] sm:$0xff] }
 0x8eb   : > { %8977 = vpow2.f32 %v8069_v3  ;;  %v2173_v3 = vld [vmem:[%s15851_s9 + $0x18] sm:$0xff] }
 0x8f8   : > { %v8978_v40 = vpop.eup %8977 }
 0x8f9   : > { %v2458_v49 = vadd.f32 1.0, %v8978_v40  ;;  %v2179_v40 = vld [vmem:[%s15851_s9 + $0x48] sm:$0xff] }
 0x8fb   : > { %8979 = vrcp.f32 %v2458_v49  ;;  %v2174_v49 = vld [vmem:[%s15851_s9 + $0x20] sm:$0xff] }
 0x908   : > { %v8980_v45 = vpop.eup %8979 }
 0x909   : > { %8600 = vmatprep.subr.msk.mxu1 %vm2612_vm13, %v8980_v45  ;;  %8677 = vmatprep.subr.msk.mxu0 %vm2612_vm13, %v8980_v45 }
 0x90a   : > { %8601 = vmatpush3.msk.msra.mxu1 %vm2612_vm13, %v8980_v45  ;;  %8678 = vmatpush3.msk.msra.mxu0 %vm2612_vm13, %v8980_v45  ;;  %v2176_v45 = vld [vmem:[%s15851_s9 + $0x30] sm:$0xff] }
 0x90b   : > { %8603 = vmatmul.mubr.msk.f32.vlgmr.msra.gmra.mxu1 %vm2461_vm12, %v2171_v18  ;;  %8680 = vmatmul.mubr.msk.f32.vlgmr.msra.gmra.mxu0 %vm2461_vm12, %v2221_v0  ;;  %v2175_v0 = vld [vmem:[%s15851_s9 + $0x28] sm:$0xff]  ;;  %v2177_v18 = vld [vmem:[%s15851_s9 + $0x38] sm:$0xff] }
 0x90c   : > { %8443 = vmatprep.subr.mxu0 %v15652_v31  ;;  %4371 = vmatprep.mubr.f32.mxu0 %v10363_v8 }
 0x90d   : > { %8444 = vmatpush3.msra.mxu0 %v15652_v31  ;;  %8605 = vmatprep.mubr.msk.f32.mxu1 %vm2461_vm12, %v2172_v63  ;;  %v2182_v63 = vld [vmem:[%s15851_s9 + $0x60] sm:$0xff] }
 0x90e   : > { %8445 = vmatprep.subr.mxu0 %v15652_v31 }
 0x90f   : > { %8446 = vmatpush3.msra.mxu0 %v15652_v31  ;;  %8606 = vmatmul.mubr.msk.f32.gmra.mxu1 %vm2461_vm12, %v2173_v3  ;;  %v2183_v3 = vld [vmem:[%s15851_s9 + $0x68] sm:$0xff] }
 0x910   : > { %8447 = vmatprep.subr.mxu0 %v15652_v31  ;;  %8608 = vmatprep.mubr.msk.f32.mxu1 %vm2461_vm12, %v2174_v49  ;;  %v2184_v49 = vld [vmem:[%s15851_s9 + $0x70] sm:$0xff] }
 0x911   : > { %8448 = vmatpush3.msra.mxu0 %v15652_v31 }
 0x912   : > { %8449 = vmatprep.subr.mxu0 %v15652_v31 }
 0x913   : > { %8450 = vmatpush3.msra.mxu0 %v15652_v31  ;;  %8609 = vmatmul.mubr.msk.f32.gmra.mxu1 %vm2461_vm12, %v2175_v0  ;;  %v2185_v0 = vld [vmem:[%s15851_s9 + $0x78] sm:$0xff] }
 0x914   : > { %8451 = vmatprep.subr.mxu0 %v15652_v31  ;;  %8611 = vmatprep.mubr.msk.f32.mxu1 %vm2461_vm12, %v2176_v45  ;;  %v2186_v45 = vld [vmem:[%s15851_s9 + $0x80] sm:$0xff] }
 0x915   : > { %8452 = vmatpush3.msra.mxu0 %v15652_v31 }
 0x916   : > { %8453 = vmatprep.subr.mxu0 %v15652_v31 }
 0x917   : > { %8454 = vmatpush3.msra.mxu0 %v15652_v31  ;;  %8612 = vmatmul.mubr.msk.f32.gmra.mxu1 %vm2461_vm12, %v2177_v18  ;;  %v2187_v18 = vld [vmem:[%s15851_s9 + $0x88] sm:$0xff] }
 0x918   : > { %8455 = vmatprep.subr.mxu0 %v15652_v31  ;;  %8614 = vmatprep.mubr.msk.f32.mxu1 %vm2461_vm12, %v2178_v9  ;;  %v2188_v9 = vld [vmem:[%s15851_s9 + $0x90] sm:$0xff] }
 0x919   : > { %8456 = vmatpush3.msra.mxu0 %v15652_v31 }
 0x91a   : > { %8457 = vmatprep.subr.mxu0 %v15652_v31 }
 0x91b   : > { %8458 = vmatpush3.msra.mxu0 %v15652_v31  ;;  %8615 = vmatmul.mubr.msk.f32.gmra.mxu1 %vm2461_vm12, %v2179_v40  ;;  %v2189_v40 = vld [vmem:[%s15851_s9 + $0x98] sm:$0xff] }
 0x91c   : > { %8459 = vmatprep.subr.mxu0 %v15652_v31  ;;  %8617 = vmatprep.mubr.msk.f32.mxu1 %vm2461_vm12, %v2180_v12  ;;  %v2190_v12 = vld [vmem:[%s15851_s9 + $0xa0] sm:$0xff] }
 0x91d   : > { %8460 = vmatpush3.msra.mxu0 %v15652_v31 }
 0x91e   : > { %8461 = vmatprep.subr.mxu0 %v15652_v31 }
 0x91f   : > { %8462 = vmatpush3.msra.mxu0 %v15652_v31  ;;  %8618 = vmatmul.mubr.msk.f32.gmra.mxu1 %vm2461_vm12, %v2181_v21  ;;  %v2192_v21 = vld [vmem:[%s15851_s9 + $0xb0] sm:$0xff] }
 0x920   : > { %8463 = vmatprep.subr.mxu0 %v15652_v31  ;;  %8620 = vmatprep.mubr.msk.f32.mxu1 %vm2461_vm12, %v2182_v63  ;;  %v2193_v63 = vld [vmem:[%s15851_s9 + $0xb8] sm:$0xff] }
 0x921   : > { %8464 = vmatpush3.msra.mxu0 %v15652_v31 }
 0x922   : > { %8465 = vmatprep.subr.mxu0 %v15652_v31 }
 0x923   : > { %8466 = vmatpush3.msra.mxu0 %v15652_v31  ;;  %8621 = vmatmul.mubr.msk.f32.gmra.mxu1 %vm2461_vm12, %v2183_v3  ;;  %v2194_v3 = vld [vmem:[%s15851_s9 + $0xc0] sm:$0xff] }
 0x924   : > { %8467 = vmatprep.subr.mxu0 %v15652_v31  ;;  %8623 = vmatprep.mubr.msk.f32.mxu1 %vm2461_vm12, %v2184_v49  ;;  %v2195_v49 = vld [vmem:[%s15851_s9 + $0xc8] sm:$0xff] }
 0x925   : > { %8468 = vmatpush3.msra.mxu0 %v15652_v31 }
 0x926   : > { %8469 = vmatprep.subr.mxu0 %v15652_v31 }
 0x927   : > { %8470 = vmatpush3.msra.mxu0 %v15652_v31  ;;  %8624 = vmatmul.mubr.msk.f32.gmra.mxu1 %vm2461_vm12, %v2185_v0  ;;  %v2196_v0 = vld [vmem:[%s15851_s9 + $0xd0] sm:$0xff] }
 0x928   : > { %8471 = vmatprep.subr.mxu0 %v15652_v31  ;;  %8626 = vmatprep.mubr.msk.f32.mxu1 %vm2461_vm12, %v2186_v45  ;;  %v2197_v45 = vld [vmem:[%s15851_s9 + $0xd8] sm:$0xff] }
 0x929   : > { %8472 = vmatpush3.msra.mxu0 %v15652_v31 }
 0x92a   : > { %8473 = vmatprep.subr.mxu0 %v15652_v31 }
 0x92b   : > { %8474 = vmatpush3.msra.mxu0 %v15652_v31  ;;  %8627 = vmatmul.mubr.msk.f32.gmra.mxu1 %vm2461_vm12, %v2187_v18  ;;  %v2191_v31 = vld [vmem:[%s15851_s9 + $0xa8] sm:$0xff]  ;;  %v2198_v18 = vld [vmem:[%s15851_s9 + $0xe0] sm:$0xff] }
 0x92c   : > { %4372 = vmatmul.mubr.f32.vlgmr.msra.gmra.mxu0 %v10121_v27  ;;  %8629 = vmatprep.mubr.msk.f32.mxu1 %vm2461_vm12, %v2188_v9  ;;  %v2199_v9 = vld [vmem:[%s15851_s9 + $0xe8] sm:$0xff] }
 0x92d   : > { %4376 = vmatprep.mubr.f32.mxu0 %v10603_v54  ;;  %8682 = vmatprep.subr.mxu0 %v15647_v51 }
 0x92f   : > { %8630 = vmatmul.mubr.msk.f32.gmra.mxu1 %vm2461_vm12, %v2189_v40  ;;  %v2200_v40 = vld [vmem:[%s15851_s9 + $0xf0] sm:$0xff] }
 0x930   : > { %4377 = vmatmul.mubr.f32.gmra.mxu0 %v10277_v60  ;;  %8632 = vmatprep.mubr.msk.f32.mxu1 %vm2461_vm12, %v2190_v12  ;;  %v2201_v12 = vld [vmem:[%s15851_s9 + $0xf8] sm:$0xff] }
 0x931   : > { %8686 = vmatprep.mubr.msk.f32.mxu0 %vm9066_vm9, %v15647_v51 }
 0x933   : > { %8633 = vmatmul.mubr.msk.f32.gmra.mxu1 %vm2461_vm12, %v2191_v31  ;;  %v2202_v31 = vld [vmem:[%s15851_s9 + $0x100] sm:$0xff] }
 0x934   : > { %8635 = vmatprep.mubr.msk.f32.mxu1 %vm2461_vm12, %v2192_v21  ;;  %v2203_v21 = vld [vmem:[%s15851_s9 + $0x108] sm:$0xff] }
 0x937   : > { %8636 = vmatmul.mubr.msk.f32.gmra.mxu1 %vm2461_vm12, %v2193_v63  ;;  %v2204_v63 = vld [vmem:[%s15851_s9 + $0x110] sm:$0xff] }
 0x938   : > { %8638 = vmatprep.mubr.msk.f32.mxu1 %vm2461_vm12, %v2194_v3  ;;  %v2205_v3 = vld [vmem:[%s15851_s9 + $0x118] sm:$0xff] }
 0x93b   : > { %8639 = vmatmul.mubr.msk.f32.gmra.mxu1 %vm2461_vm12, %v2195_v49  ;;  %v2206_v49 = vld [vmem:[%s15851_s9 + $0x120] sm:$0xff] }
 0x93c   : > { %8641 = vmatprep.mubr.msk.f32.mxu1 %vm2461_vm12, %v2196_v0  ;;  %v2207_v0 = vld [vmem:[%s15851_s9 + $0x128] sm:$0xff] }
 0x93f   : > { %8642 = vmatmul.mubr.msk.f32.gmra.mxu1 %vm2461_vm12, %v2197_v45  ;;  %v2208_v45 = vld [vmem:[%s15851_s9 + $0x130] sm:$0xff] }
 0x940   : > { %8644 = vmatprep.mubr.msk.f32.mxu1 %vm2461_vm12, %v2198_v18  ;;  %v2209_v18 = vld [vmem:[%s15851_s9 + $0x138] sm:$0xff] }
 0x943   : > { %8645 = vmatmul.mubr.msk.f32.gmra.mxu1 %vm2461_vm12, %v2199_v9  ;;  %v2210_v9 = vld [vmem:[%s15851_s9 + $0x140] sm:$0xff] }
 0x944   : > { %8647 = vmatprep.mubr.msk.f32.mxu1 %vm2461_vm12, %v2200_v40  ;;  %v2211_v40 = vld [vmem:[%s15851_s9 + $0x148] sm:$0xff] }
 0x947   : > { %8648 = vmatmul.mubr.msk.f32.gmra.mxu1 %vm2461_vm12, %v2201_v12  ;;  %v2212_v12 = vld [vmem:[%s15851_s9 + $0x150] sm:$0xff] }
 0x948   : > { %8650 = vmatprep.mubr.msk.f32.mxu1 %vm2461_vm12, %v2202_v31  ;;  %v2213_v31 = vld [vmem:[%s15851_s9 + $0x158] sm:$0xff] }
 0x94b   : > { %8651 = vmatmul.mubr.msk.f32.gmra.mxu1 %vm2461_vm12, %v2203_v21  ;;  %v2214_v21 = vld [vmem:[%s15851_s9 + $0x160] sm:$0xff] }
 0x94c   : > { %8653 = vmatprep.mubr.msk.f32.mxu1 %vm2461_vm12, %v2204_v63  ;;  %v2215_v63 = vld [vmem:[%s15851_s9 + $0x168] sm:$0xff] }
 0x94f   : > { %8654 = vmatmul.mubr.msk.f32.gmra.mxu1 %vm2461_vm12, %v2205_v3  ;;  %v2216_v3 = vld [vmem:[%s15851_s9 + $0x170] sm:$0xff] }
 0x950   : > { %8656 = vmatprep.mubr.msk.f32.mxu1 %vm2461_vm12, %v2206_v49  ;;  %v2217_v49 = vld [vmem:[%s15851_s9 + $0x178] sm:$0xff] }
 0x953   : > { %8657 = vmatmul.mubr.msk.f32.gmra.mxu1 %vm2461_vm12, %v2207_v0  ;;  %v2218_v0 = vld [vmem:[%s15851_s9 + $0x180] sm:$0xff] }
 0x954   : > { %8659 = vmatprep.mubr.msk.f32.mxu1 %vm2461_vm12, %v2208_v45  ;;  %v2219_v45 = vld [vmem:[%s15851_s9 + $0x188] sm:$0xff] }
 0x957   : > { %8660 = vmatmul.mubr.msk.f32.gmra.mxu1 %vm2461_vm12, %v2209_v18  ;;  %v10935_v18 = vpop.permute.xlu1 %6632 }
 0x958   : > { %8662 = vmatprep.mubr.msk.f32.mxu1 %vm2461_vm12, %v2210_v9  ;;  %15878 = vst [vmem:[#allocation198_spill] sm:$0xff] %v10935_v18  ;;  %v10937_v9 = vpop.permute.xlu0 %6048 }
 0x959   : > { %15879 = vst [vmem:[#allocation199_spill] sm:$0xff] %v10937_v9 }
 0x95b   : > { %8663 = vmatmul.mubr.msk.f32.gmra.mxu1 %vm2461_vm12, %v2211_v40  ;;  %v10939_v40 = vpop.permute.xlu1 %6679 }
 0x95c   : > { %8665 = vmatprep.mubr.msk.f32.mxu1 %vm2461_vm12, %v2212_v12  ;;  %15880 = vst [vmem:[#allocation200_spill] sm:$0xff] %v10939_v40  ;;  %v10941_v12 = vpop.permute.xlu0 %6095 }
 0x95d   : > { %15881 = vst [vmem:[#allocation201_spill] sm:$0xff] %v10941_v12 }
 0x95f   : > { %8666 = vmatmul.mubr.msk.f32.gmra.mxu1 %vm2461_vm12, %v2213_v31  ;;  %v10943_v31 = vpop.permute.xlu1 %6726 }
 0x960   : > { %8668 = vmatprep.mubr.msk.f32.mxu1 %vm2461_vm12, %v2214_v21  ;;  %15882 = vst [vmem:[#allocation202_spill] sm:$0xff] %v10943_v31  ;;  %v10945_v21 = vpop.permute.xlu0 %6143 }
 0x961   : > { %15883 = vst [vmem:[#allocation203_spill] sm:$0xff] %v10945_v21 }
 0x963   : > { %8669 = vmatmul.mubr.msk.f32.gmra.mxu1 %vm2461_vm12, %v2215_v63  ;;  %v10947_v63 = vpop.permute.xlu1 %6774 }
 0x964   : > { %8671 = vmatprep.mubr.msk.f32.mxu1 %vm2461_vm12, %v2216_v3  ;;  %15884 = vst [vmem:[#allocation204_spill] sm:$0xff] %v10947_v63  ;;  %v10949_v3 = vpop.permute.xlu0 %6191 }
 0x965   : > { %15885 = vst [vmem:[#allocation205_spill] sm:$0xff] %v10949_v3 }
 0x967   : > { %8672 = vmatmul.mubr.msk.f32.gmra.mxu1 %vm2461_vm12, %v2217_v49  ;;  %v10951_v49 = vpop.permute.xlu1 %6822 }
 0x968   : > { %8674 = vmatprep.mubr.msk.f32.mxu1 %vm2461_vm12, %v2218_v0  ;;  %15886 = vst [vmem:[#allocation206_spill] sm:$0xff] %v10951_v49  ;;  %v10953_v0 = vpop.permute.xlu0 %6238 }
 0x969   : > { %15887 = vst [vmem:[#allocation207_spill] sm:$0xff] %v10953_v0 }
 0x96b   : > { %8675 = vmatmul.mubr.msk.f32.gmra.mxu1 %vm2461_vm12, %v2219_v45  ;;  %v10955_v45 = vpop.permute.xlu1 %6869 }
 0x96c   : > { %15888 = vst [vmem:[#allocation208_spill] sm:$0xff] %v10955_v45  ;;  %v10957_v18 = vpop.permute.xlu0 %6285 }
 0x96d   : > { %15889 = vst [vmem:[#allocation209_spill] sm:$0xff] %v10957_v18 }
 0x96f   : > { %v10959_v32 = vpop.permute.xlu1 %6916 }
 0x970   : > { %15890 = vst [vmem:[#allocation210_spill] sm:$0xff] %v10959_v32  ;;  %v10961_v40 = vpop.permute.xlu0 %6332 }
 0x971   : > { %15891 = vst [vmem:[#allocation211_spill] sm:$0xff] %v10961_v40 }
 0x973   : > { %v10963_v54 = vpop.permute.xlu1 %6963 }
 0x974   : > { %15892 = vst [vmem:[#allocation212_spill] sm:$0xff] %v10963_v54  ;;  %v10965_v31 = vpop.permute.xlu0 %6379 }
 0x975   : > { %15893 = vst [vmem:[#allocation213_spill] sm:$0xff] %v10965_v31 }
 0x977   : > { %v10967_v27 = vpop.permute.xlu1 %7010 }
 0x978   : > { %15894 = vst [vmem:[#allocation214_spill] sm:$0xff] %v10967_v27  ;;  %v10969_v8 = vpop.permute.xlu0 %6426 }
 0x979   : > { %15895 = vst [vmem:[#allocation215_spill] sm:$0xff] %v10969_v8 }
 0x97b   : > { %v10971_v0 = vpop.permute.xlu1 %7057 }
 0x97c   : > { %15896 = vst [vmem:[#allocation216_spill] sm:$0xff] %v10971_v0  ;;  %v10973_v40 = vpop.permute.xlu0 %6474 }
 0x97d   : > { %15897 = vst [vmem:[#allocation217_spill] sm:$0xff] %v10973_v40 }
 0x97f   : > { %v10975_v27 = vpop.permute.xlu1 %7105 }
 0x980   : > { %15898 = vst [vmem:[#allocation218_spill] sm:$0xff] %v10975_v27 }
 0x983   : > { %v10979_v0 = vpop.permute.xlu1 %7153 }
 0x984   : > { %15900 = vst [vmem:[#allocation220_spill] sm:$0xff] %v10979_v0 }
 0x987   : > { %v10983_v40 = vpop.permute.xlu1 %7200 }
 0x988   : > { %15902 = vst [vmem:[#allocation222_spill] sm:$0xff] %v10983_v40 }
 0x9cb   : > { %v8604_v63 = vpop.f32.mrf.mxu1  ;;  %v8681_v60 = vpop.f32.mrf.mxu0 }
 0x9cc   : > { %3048 = vperm.xlu1 %8942, %v8604_v63   ;;  %v10977_v63 = vpop.permute.xlu0 %6522 }
 0x9cd   : > { %v2682_v49 = vpop.f32.mrf.mxu1  ;;  %v3003_v32 = vpop.f32.mrf.mxu0  ;;  %15899 = vst [vmem:[#allocation219_spill] sm:$0xff] %v10977_v63 }
 0x9ce   : > { %3043 = vperm.xlu0 %8941, %v2682_v49   ;;  %v10987_v63 = vpop.permute.xlu1 %7247 }
 0x9cf   : > { %v8607_v45 = vpop.f32.mrf.mxu1  ;;  %15904 = vst [vmem:[#allocation224_spill] sm:$0xff] %v10987_v63 }
 0x9d0   : > { %4176 = vperm.xlu1 %8942, %v8681_v60   ;;  %v10981_v21 = vpop.permute.xlu0 %6569 }
 0x9d1   : > { %v2692_v18 = vpop.f32.mrf.mxu1  ;;  %15901 = vst [vmem:[#allocation221_spill] sm:$0xff] %v10981_v21 }
 0x9d2   : > { %4171 = vperm.xlu0 %8941, %v3003_v32   ;;  %v10991_v40 = vpop.permute.xlu1 %7294 }
 0x9d3   : > { %v8610_v54 = vpop.f32.mrf.mxu1  ;;  %15906 = vst [vmem:[#allocation226_spill] sm:$0xff] %v10991_v40 }
 0x9d4   : > { %3092 = vperm.xlu1 %8942, %v8607_v45   ;;  %v10985_v27 = vpop.permute.xlu0 %6634 }
 0x9d5   : > { %v2702_v31 = vpop.f32.mrf.mxu1  ;;  %15903 = vst [vmem:[#allocation223_spill] sm:$0xff] %v10985_v27 }
 0x9d6   : > { %3087 = vperm.xlu0 %8941, %v2692_v18   ;;  %v10995_v9 = vpop.permute.xlu1 %7341 }
 0x9d7   : > { %v8613_v8 = vpop.f32.mrf.mxu1  ;;  %15909 = vst [vmem:[#allocation228_spill] sm:$0xff] %v10995_v9 }
 0x9d8   : > { %3140 = vperm.xlu1 %8942, %v8610_v54   ;;  %v10989_v0 = vpop.permute.xlu0 %6681 }
 0x9d9   : > { %v2712_v49 = vpop.f32.mrf.mxu1  ;;  %15905 = vst [vmem:[#allocation225_spill] sm:$0xff] %v10989_v0 }
 0x9da   : > { %3135 = vperm.xlu0 %8941, %v2702_v31  }
 0x9db   : > { %v8616_v3 = vpop.f32.mrf.mxu1 }
 0x9dc   : > { %3188 = vperm.xlu1 %8942, %v8613_v8  }
 0x9dd   : > { %v2722_v60 = vpop.f32.mrf.mxu1 }
 0x9de   : > { %3183 = vperm.xlu0 %8941, %v2712_v49  }
 0x9df   : > { %v8619_v32 = vpop.f32.mrf.mxu1 }
 0x9e0   : > { %3236 = vperm.xlu1 %8942, %v8616_v3  }
 0x9e1   : > { %v2732_v45 = vpop.f32.mrf.mxu1 }
 0x9e2   : > { %3231 = vperm.xlu0 %8941, %v2722_v60  }
 0x9e3   : > { %v8622_v18 = vpop.f32.mrf.mxu1 }
 0x9e4   : > { %3284 = vperm.xlu1 %8942, %v8619_v32   ;;  %v10993_v32 = vpop.permute.xlu0 %6728 }
 0x9e5   : > { %v2742_v54 = vpop.f32.mrf.mxu1  ;;  %15907 = vst [vmem:[#allocation227_spill] sm:$0xff] %v10993_v32  ;;  %v4203_v32 = vld [vmem:[%s15908_s0] sm:$0x3] }
 0x9e6   : > { %3279 = vperm.xlu0 %8941, %v2732_v45  }
 0x9e7   : > { %v8625_v31 = vpop.f32.mrf.mxu1 }
 0x9e8   : > { %3331 = vperm.xlu1 %8942, %v8622_v18   ;;  %v10997_v40 = vpop.permute.xlu0 %6776 }
 0x9e9   : > { %v2752_v8 = vpop.f32.mrf.mxu1  ;;  %15910 = vst [vmem:[#allocation229_spill] sm:$0xff] %v10997_v40  ;;  %v8130_v40 = vld [vmem:[%s15994_s16 + $0xe] sm:$0x3] }
 0x9ea   : > { %3326 = vperm.xlu0 %8941, %v2742_v54   ;;  %v11450_v53 = vrot.slane %v8130_v40, %v9527_v23 }
 0x9eb   : > { %v8628_v49 = vpop.f32.mrf.mxu1 }
 0x9ec   : > { %v8475_v3 = vpop.f32.mrf.mxu0  ;;  %3378 = vperm.xlu1 %8942, %v8625_v31   ;;  %16003 = vst [vmem:[#allocation316_spill] sm:$0xff] %v11450_v53  ;;  %v11467_v53 = vrot.slane %v8132_v39, %v9527_v23 }
 0x9ed   : > { %v2762_v21 = vpop.f32.mrf.mxu1 }
 0x9ee   : > { %v8476_v60 = vpop.f32.mrf.mxu0  ;;  %3373 = vperm.xlu0 %8941, %v2752_v8   ;;  %16007 = vst [vmem:[#allocation320_spill] sm:$0xff] %v11467_v53  ;;  %v11484_v53 = vrot.slane %v8134_v56, %v9530_v28 }
 0x9ef   : > { %v8631_v27 = vpop.f32.mrf.mxu1  ;;  %v8477_v12 = vadd.f32 %v8476_v60, %v8475_v3 }
 0x9f0   : > { %v8478_v45 = vpop.f32.mrf.mxu0  ;;  %3425 = vperm.xlu1 %8942, %v8628_v49   ;;  %v11001_v49 = vpop.permute.xlu1 %7388  ;;  %16012 = vst [vmem:[#allocation325_spill] sm:$0xff] %v11484_v53  ;;  %v8142_v53 = vld [vmem:[%s15994_s16 + $0x28] sm:$0x3] }
 0x9f1   : > { %v2772_v63 = vpop.f32.mrf.mxu1  ;;  %v4382_v8 = vmul.f32 0.00390625, %v8477_v12  ;;  %15911 = vst [vmem:[#allocation230_spill] sm:$0xff] %v11001_v49  ;;  %v11007_v12 = vpop.permute.xlu0 %6824 }
 0x9f2   : > { %v8479_v18 = vpop.f32.mrf.mxu0  ;;  %3420 = vperm.xlu0 %8941, %v2762_v21   ;;  %15912 = vst [vmem:[#allocation231_spill] sm:$0xff] %v11007_v12 }
 0x9f3   : > { %v8480_v0 = vadd.f32 %v8479_v18, %v8478_v45  ;;  %v8634_v54 = vpop.f32.mrf.mxu1 }
 0x9f4   : > { %3473 = vperm.xlu1 %8942, %v8631_v27   ;;  %v11009_v3 = vpop.permute.xlu1 %7436 }
 0x9f5   : > { %v4383_v31 = vmul.f32 0.00390625, %v8480_v0  ;;  %v2782_v38 = vpop.f32.mrf.mxu1  ;;  %15913 = vst [vmem:[#allocation232_spill] sm:$0xff] %v11009_v3  ;;  %v11011_v45 = vpop.permute.xlu0 %6871 }
 0x9f6   : > { %3468 = vperm.xlu0 %8941, %v2772_v63   ;;  %15914 = vst [vmem:[#allocation233_spill] sm:$0xff] %v11011_v45 }
 0x9f7   : > { %8683 = vmatpush3.msra.mxu0 %v4383_v31  ;;  %v8637_v41 = vpop.f32.mrf.mxu1 }
 0x9f8   : > { %8684 = vmatprep.subr.mxu0 %v15647_v51  ;;  %3521 = vperm.xlu1 %8942, %v8634_v54   ;;  %v11013_v18 = vpop.permute.xlu1 %7484 }
 0x9f9   : > { %8685 = vmatpush3.msra.mxu0 %v4382_v8  ;;  %v2792_v21 = vpop.f32.mrf.mxu1  ;;  %15915 = vst [vmem:[#allocation234_spill] sm:$0xff] %v11013_v18  ;;  %v11015_v31 = vpop.permute.xlu0 %6918 }
 0x9fa   : > { %8687 = vmatmul.mubr.msk.f32.vlgmr.msra.gmra.mxu0 %vm1466_vm0, %v4203_v32  ;;  %3516 = vperm.xlu0 %8941, %v2782_v38   ;;  %15916 = vst [vmem:[#allocation235_spill] sm:$0xff] %v11015_v31  ;;  %vm3111_vm0 = vcmp.lt.s32.totalorder %v9525_v14, 32 }
 0x9fb   : > { %v8640_v27 = vpop.f32.mrf.mxu1  ;;  %8689 = vmatprep.subr.mxu0 %v15647_v51  ;;  %8691 = vmatprep.mubr.msk.f32.mxu0 %vm9066_vm9, %v15647_v51  ;;  %vm3159_vm9 = vcmp.lt.s32.totalorder %v9525_v14, 31 }
 0x9fc   : > { %3568 = vperm.xlu1 %8942, %v8637_v41  }
 0x9fd   : > { %v2802_v0 = vpop.f32.mrf.mxu1  ;;  %v11019_v3 = vpop.permute.xlu0 %6965 }
 0x9fe   : > { %3563 = vperm.xlu0 %8941, %v2792_v21   ;;  %v11017_v21 = vpop.permute.xlu1 %7532  ;;  %15918 = vst [vmem:[#allocation237_spill] sm:$0xff] %v11019_v3 }
 0x9ff   : > { %v8643_v63 = vpop.f32.mrf.mxu1  ;;  %15917 = vst [vmem:[#allocation236_spill] sm:$0xff] %v11017_v21 }
 0xa00   : > { %3586 = vperm.xlu1 %8942, %v8640_v27  }
 0xa01   : > { %v2812_v60 = vpop.f32.mrf.mxu1  ;;  %v11023_v18 = vpop.permute.xlu0 %7012 }
 0xa02   : > { %3581 = vperm.xlu0 %8941, %v2802_v0   ;;  %v11021_v49 = vpop.permute.xlu1 %7580  ;;  %15920 = vst [vmem:[#allocation239_spill] sm:$0xff] %v11023_v18 }
 0xa03   : > { %v8646_v38 = vpop.f32.mrf.mxu1  ;;  %15919 = vst [vmem:[#allocation238_spill] sm:$0xff] %v11021_v49 }
 0xa04   : > { %3633 = vperm.xlu1 %8942, %v8643_v63  }
 0xa05   : > { %v2822_v32 = vpop.f32.mrf.mxu1  ;;  %v11027_v21 = vpop.permute.xlu0 %7059 }
 0xa06   : > { %3628 = vperm.xlu0 %8941, %v2812_v60   ;;  %v11025_v9 = vpop.permute.xlu1 %5483  ;;  %15922 = vst [vmem:[#allocation241_spill] sm:$0xff] %v11027_v21  ;;  %v4205_v21 = vld [vmem:[%s15930_s7] sm:$0xf] }
 0xa07   : > { %v8649_v54 = vpop.f32.mrf.mxu1  ;;  %15921 = vst [vmem:[#allocation240_spill] sm:$0xff] %v11025_v9 }
 0xa08   : > { %3681 = vperm.xlu1 %8942, %v8646_v38  }
 0xa09   : > { %v2832_v41 = vpop.f32.mrf.mxu1  ;;  %v11031_v49 = vpop.permute.xlu0 %7107 }
 0xa0a   : > { %3676 = vperm.xlu0 %8941, %v2822_v32   ;;  %v11029_v3 = vpop.permute.xlu1 %5526  ;;  %15924 = vst [vmem:[#allocation243_spill] sm:$0xff] %v11031_v49 }
 0xa0b   : > { %v8652_v8 = vpop.f32.mrf.mxu1  ;;  %15923 = vst [vmem:[#allocation242_spill] sm:$0xff] %v11029_v3 }
 0xa0c   : > { %3729 = vperm.xlu1 %8942, %v8649_v54  }
 0xa0d   : > { %v2842_v27 = vpop.f32.mrf.mxu1  ;;  %v11035_v9 = vpop.permute.xlu0 %7155 }
 0xa0e   : > { %3724 = vperm.xlu0 %8941, %v2832_v41   ;;  %v11033_v18 = vpop.permute.xlu1 %5574  ;;  %15926 = vst [vmem:[#allocation245_spill] sm:$0xff] %v11035_v9 }
 0xa0f   : > { %v8655_v0 = vpop.f32.mrf.mxu1  ;;  %15925 = vst [vmem:[#allocation244_spill] sm:$0xff] %v11033_v18 }
 0xa10   : > { %3776 = vperm.xlu1 %8942, %v8652_v8  }
 0xa11   : > { %v2852_v63 = vpop.f32.mrf.mxu1  ;;  %v11039_v49 = vpop.permute.xlu0 %7202 }
 0xa12   : > { %3771 = vperm.xlu0 %8941, %v2842_v27   ;;  %v11037_v3 = vpop.permute.xlu1 %5622  ;;  %15929 = vst [vmem:[#allocation247_spill] sm:$0xff] %v11039_v49 }
 0xa13   : > { %v8658_v60 = vpop.f32.mrf.mxu1  ;;  %15928 = vst [vmem:[#allocation246_spill] sm:$0xff] %v11037_v3 }
 0xa14   : > { %3823 = vperm.xlu1 %8942, %v8655_v0  }
 0xa15   : > { %v2862_v38 = vpop.f32.mrf.mxu1 }
 0xa16   : > { %3818 = vperm.xlu0 %8941, %v2852_v63  }
 0xa17   : > { %v8661_v32 = vpop.f32.mrf.mxu1 }
 0xa18   : > { %3870 = vperm.xlu1 %8942, %v8658_v60  }
 0xa19   : > { %v2872_v54 = vpop.f32.mrf.mxu1 }
 0xa1a   : > { %3865 = vperm.xlu0 %8941, %v2862_v38  }
 0xa1b   : > { %v8664_v41 = vpop.f32.mrf.mxu1 }
 0xa1c   : > { %3918 = vperm.xlu1 %8942, %v8661_v32  }
 0xa1d   : > { %v2882_v8 = vpop.f32.mrf.mxu1 }
 0xa1e   : > { %3913 = vperm.xlu0 %8941, %v2872_v54  }
 0xa1f   : > { %v8667_v27 = vpop.f32.mrf.mxu1 }
 0xa20   : > { %3966 = vperm.xlu1 %8942, %v8664_v41  }
 0xa21   : > { %v2892_v0 = vpop.f32.mrf.mxu1 }
 0xa22   : > { %3961 = vperm.xlu0 %8941, %v2882_v8   ;;  %v11041_v8 = vpop.permute.xlu1 %5670 }
 0xa23   : > { %v8670_v63 = vpop.f32.mrf.mxu1  ;;  %15931 = vst [vmem:[#allocation248_spill] sm:$0xff] %v11041_v8 }
 0xa24   : > { %4014 = vperm.xlu1 %8942, %v8667_v27   ;;  %v11043_v27 = vpop.permute.xlu0 %7249 }
 0xa25   : > { %v2902_v60 = vpop.f32.mrf.mxu1  ;;  %15933 = vst [vmem:[#allocation249_spill] sm:$0xff] %v11043_v27  ;;  %v8129_v27 = vld [vmem:[%s15994_s16 + $0xc] sm:$0x3] }
 0xa26   : > { %4009 = vperm.xlu0 %8941, %v2892_v0   ;;  %v4204_v0 = vld [vmem:[%s15927_s2] sm:$0x3]  ;;  %v11442_v47 = vrot.slane %v8129_v27, %v9527_v23  ;;  %v11447_v52 = vrot.slane %v8129_v27, %v9530_v28 }
 0xa27   : > { %v8673_v38 = vpop.f32.mrf.mxu1 }
 0xa28   : > { %4062 = vperm.xlu1 %8942, %v8670_v63   ;;  %16001 = vst [vmem:[#allocation314_spill] sm:$0xff] %v11442_v47  ;;  %16002 = vst [vmem:[#allocation315_spill] sm:$0xff] %v11447_v52 }
 0xa29   : > { %v2912_v32 = vpop.f32.mrf.mxu1 }
 0xa2a   : > { %4057 = vperm.xlu0 %8941, %v2902_v60  }
 0xa2b   : > { %v8676_v54 = vpop.f32.mrf.mxu1 }
 0xa2c   : > { %4110 = vperm.xlu1 %8942, %v8673_v38  }
 0xa2d   : > { %v2922_v41 = vpop.f32.mrf.mxu1 }
 0xa2e   : > { %4105 = vperm.xlu0 %8941, %v2912_v32  }
 0xa30   : > { %4158 = vperm.xlu1 %8942, %v8676_v54   ;;  %v4207_v54 = vld [vmem:[%s15932_s10] sm:$0xff] }
 0xa32   : > { %4153 = vperm.xlu0 %8941, %v2922_v41   ;;  %v4269_v41 = vld [vmem:[%s15932_s10 + $0x1f0] sm:$0xff] }
 0xa33   : > { %8789 = vmatprep.mubr.msk.f32.mxu1 %vm2461_vm12, %v4269_v41  ;;  %v4271_v41 = vld [vmem:[%s15932_s10 + $0x200] sm:$0xff] }
 0xaba   : > { %v4453_v63 = vpop.f32.mrf.mxu0 }
 0xabb   : > { %v4454_v3 = vadd.f32 %v4453_v63, %v4204_v0  ;;  %v4206_v0 = vld [vmem:[%s15934_s11] sm:$0xf] }
 0xabc   : > { %v8688_v60 = vpop.f32.mrf.mxu0 }
 0xabd   : > { %v4458_v18 = vmul.f32 0.70710677, %v4454_v3  ;;  %v4457_v38 = vmul.f32 0.5, %v4454_v3 }
 0xabf   : > { %8981 = verf.f32 %v4458_v18 }
 0xacc   : > { %v8982_v49 = vpop.eup %8981 }
 0xacd   : > { %v4460_v32 = vadd.f32 1.0, %v8982_v49 }
 0xacf   : > { %v4461_v9 = vmul.f32 %v4460_v32, %v4457_v38  ;;  %v4208_v38 = vld [vmem:[%s15932_s10 + $0x8] sm:$0xff]  ;;  %v4270_v32 = vld [vmem:[%s15932_s10 + $0x1f8] sm:$0xff] }
 0xad1   : > { %8690 = vmatpush3.msk.msra.mxu0 %vm2381_vm10, %v4461_v9  ;;  %vm15492_vm10 = vcmp.lt.s32.totalorder %v9525_v14, 30 }
 0xad2   : > { %8692 = vmatmul.mubr.msk.f32.vlgmr.msra.gmra.mxu0 %vm2377_vm11, %v4205_v21  ;;  %vm15496_vm11 = vcmp.lt.s32.totalorder %v9525_v14, 18 }
 0xad3   : > { %8696 = vmatprep.mubr.msk.f32.mxu0 %vm2461_vm12, %v4207_v54  ;;  %v4209_v54 = vld [vmem:[%s15932_s10 + $0x10] sm:$0xff] }
 0xb92   : > { %v4534_v18 = vpop.f32.mrf.mxu0 }
 0xb93   : > { %v4535_v3 = vadd.f32 %v4534_v18, %v4206_v0  ;;  %v4210_v0 = vld [vmem:[%s15932_s10 + $0x18] sm:$0xff]  ;;  %v4272_v18 = vld [vmem:[%s15932_s10 + $0x208] sm:$0xff] }
 0xb94   : > { %v8693_v49 = vpop.f32.mrf.mxu0 }
 0xb95   : > { %v8150_v63 = vmul.f32 -1.442695, %v4535_v3  ;;  %v4211_v3 = vld [vmem:[%s15932_s10 + $0x20] sm:$0xff]  ;;  %v4273_v49 = vld [vmem:[%s15932_s10 + $0x210] sm:$0xff] }
 0xb97   : > { %8983 = vpow2.f32 %v8150_v63  ;;  %v4212_v63 = vld [vmem:[%s15932_s10 + $0x28] sm:$0xff] }
 0xba4   : > { %v8984_v60 = vpop.eup %8983 }
 0xba5   : > { %v4541_v9 = vadd.f32 1.0, %v8984_v60  ;;  %v4274_v60 = vld [vmem:[%s15932_s10 + $0x218] sm:$0xff] }
 0xba7   : > { %8985 = vrcp.f32 %v4541_v9  ;;  %v4213_v9 = vld [vmem:[%s15932_s10 + $0x30] sm:$0xff] }
 0xbb4   : > { %v8986_v21 = vpop.eup %8985 }
 0xbb5   : > { %8694 = vmatprep.subr.msk.mxu0 %vm2612_vm13, %v8986_v21  ;;  %8848 = vmatprep.subr.msk.mxu1 %vm2612_vm13, %v8986_v21 }
 0xbb6   : > { %8695 = vmatpush3.msk.msra.mxu0 %vm2612_vm13, %v8986_v21  ;;  %8849 = vmatpush3.msk.msra.mxu1 %vm2612_vm13, %v8986_v21 }
 0xbb7   : > { %8697 = vmatmul.mubr.msk.f32.vlgmr.msra.gmra.mxu0 %vm2461_vm12, %v4208_v38  ;;  %8790 = vmatmul.mubr.msk.f32.vlgmr.msra.gmra.mxu1 %vm2461_vm12, %v4270_v32  ;;  %v4214_v38 = vld [vmem:[%s15932_s10 + $0x38] sm:$0xff]  ;;  %v4276_v32 = vld [vmem:[%s15932_s10 + $0x228] sm:$0xff] }
 0xbb8   : > { %8843 = vmatprep.subr.msk.mxu1 %vm2612_vm13, %v8986_v21  ;;  %8699 = vmatprep.mubr.msk.f32.mxu0 %vm2461_vm12, %v4209_v54  ;;  %v4215_v54 = vld [vmem:[%s15932_s10 + $0x40] sm:$0xff] }
 0xbb9   : > { %8844 = vmatpush3.msk.msra.mxu1 %vm2612_vm13, %v8986_v21  ;;  %8792 = vmatprep.mubr.msk.f32.mxu1 %vm2461_vm12, %v4271_v41  ;;  %v4275_v21 = vld [vmem:[%s15932_s10 + $0x220] sm:$0xff]  ;;  %v4277_v41 = vld [vmem:[%s15932_s10 + $0x230] sm:$0xff]  ;;  %vm15402_vm13 = vcmp.lt.s32.totalorder %v9525_v14, 2 }
 0xbbb   : > { %8700 = vmatmul.mubr.msk.f32.gmra.mxu0 %vm2461_vm12, %v4210_v0  ;;  %8793 = vmatmul.mubr.msk.f32.gmra.mxu1 %vm2461_vm12, %v4272_v18  ;;  %v4216_v0 = vld [vmem:[%s15932_s10 + $0x48] sm:$0xff]  ;;  %v4278_v18 = vld [vmem:[%s15932_s10 + $0x238] sm:$0xff] }
 0xbbc   : > { %8702 = vmatprep.mubr.msk.f32.mxu0 %vm2461_vm12, %v4211_v3  ;;  %8795 = vmatprep.mubr.msk.f32.mxu1 %vm2461_vm12, %v4273_v49  ;;  %v4217_v3 = vld [vmem:[%s15932_s10 + $0x50] sm:$0xff]  ;;  %v4279_v49 = vld [vmem:[%s15932_s10 + $0x240] sm:$0xff] }
 0xbbf   : > { %8703 = vmatmul.mubr.msk.f32.gmra.mxu0 %vm2461_vm12, %v4212_v63  ;;  %8796 = vmatmul.mubr.msk.f32.gmra.mxu1 %vm2461_vm12, %v4274_v60  ;;  %v4218_v63 = vld [vmem:[%s15932_s10 + $0x58] sm:$0xff]  ;;  %v4280_v60 = vld [vmem:[%s15932_s10 + $0x248] sm:$0xff] }
 0xbc0   : > { %8705 = vmatprep.mubr.msk.f32.mxu0 %vm2461_vm12, %v4213_v9  ;;  %8798 = vmatprep.mubr.msk.f32.mxu1 %vm2461_vm12, %v4275_v21  ;;  %v4219_v9 = vld [vmem:[%s15932_s10 + $0x60] sm:$0xff]  ;;  %v4281_v21 = vld [vmem:[%s15932_s10 + $0x250] sm:$0xff] }
 0xbc3   : > { %8706 = vmatmul.mubr.msk.f32.gmra.mxu0 %vm2461_vm12, %v4214_v38  ;;  %8799 = vmatmul.mubr.msk.f32.gmra.mxu1 %vm2461_vm12, %v4276_v32  ;;  %v4220_v38 = vld [vmem:[%s15932_s10 + $0x68] sm:$0xff]  ;;  %v4282_v32 = vld [vmem:[%s15932_s10 + $0x258] sm:$0xff] }
 0xbc4   : > { %8708 = vmatprep.mubr.msk.f32.mxu0 %vm2461_vm12, %v4215_v54  ;;  %8801 = vmatprep.mubr.msk.f32.mxu1 %vm2461_vm12, %v4277_v41  ;;  %v4221_v54 = vld [vmem:[%s15932_s10 + $0x70] sm:$0xff]  ;;  %v4283_v41 = vld [vmem:[%s15932_s10 + $0x260] sm:$0xff] }
 0xbc7   : > { %8709 = vmatmul.mubr.msk.f32.gmra.mxu0 %vm2461_vm12, %v4216_v0  ;;  %8802 = vmatmul.mubr.msk.f32.gmra.mxu1 %vm2461_vm12, %v4278_v18  ;;  %v11114_v0 = vpop.permute.xlu0 %7296  ;;  %v11116_v18 = vpop.permute.xlu1 %5718 }
 0xbc8   : > { %8711 = vmatprep.mubr.msk.f32.mxu0 %vm2461_vm12, %v4217_v3  ;;  %8804 = vmatprep.mubr.msk.f32.mxu1 %vm2461_vm12, %v4279_v49  ;;  %15935 = vst [vmem:[#allocation250_spill] sm:$0xff] %v11114_v0  ;;  %15936 = vst [vmem:[#allocation251_spill] sm:$0xff] %v11116_v18  ;;  %v4222_v3 = vld [vmem:[%s15932_s10 + $0x78] sm:$0xff]  ;;  %v4284_v49 = vld [vmem:[%s15932_s10 + $0x268] sm:$0xff] }
 0xbc9   : > { %v4291_v18 = vld [vmem:[%s15932_s10 + $0x2a0] sm:$0xff] }
 0xbcb   : > { %8712 = vmatmul.mubr.msk.f32.gmra.mxu0 %vm2461_vm12, %v4218_v63  ;;  %8805 = vmatmul.mubr.msk.f32.gmra.mxu1 %vm2461_vm12, %v4280_v60  ;;  %v4223_v63 = vld [vmem:[%s15932_s10 + $0x80] sm:$0xff]  ;;  %v4285_v60 = vld [vmem:[%s15932_s10 + $0x270] sm:$0xff] }
 0xbcc   : > { %8714 = vmatprep.mubr.msk.f32.mxu0 %vm2461_vm12, %v4219_v9  ;;  %8807 = vmatprep.mubr.msk.f32.mxu1 %vm2461_vm12, %v4281_v21  ;;  %v4224_v9 = vld [vmem:[%s15932_s10 + $0x88] sm:$0xff]  ;;  %v4286_v21 = vld [vmem:[%s15932_s10 + $0x278] sm:$0xff] }
 0xbcf   : > { %8715 = vmatmul.mubr.msk.f32.gmra.mxu0 %vm2461_vm12, %v4220_v38  ;;  %8808 = vmatmul.mubr.msk.f32.gmra.mxu1 %vm2461_vm12, %v4282_v32  ;;  %v4225_v38 = vld [vmem:[%s15932_s10 + $0x90] sm:$0xff]  ;;  %v4287_v32 = vld [vmem:[%s15932_s10 + $0x280] sm:$0xff] }
 0xbd0   : > { %8717 = vmatprep.mubr.msk.f32.mxu0 %vm2461_vm12, %v4221_v54  ;;  %8810 = vmatprep.mubr.msk.f32.mxu1 %vm2461_vm12, %v4283_v41  ;;  %v11132_v54 = vpop.permute.xlu0 %7343  ;;  %v11134_v41 = vpop.permute.xlu1 %5766 }
 0xbd1   : > { %15937 = vst [vmem:[#allocation252_spill] sm:$0xff] %v11132_v54  ;;  %15938 = vst [vmem:[#allocation253_spill] sm:$0xff] %v11134_v41  ;;  %v4229_v41 = vld [vmem:[%s15932_s10 + $0xb0] sm:$0xff] }
 0xbd3   : > { %8718 = vmatmul.mubr.msk.f32.gmra.mxu0 %vm2461_vm12, %v4222_v3  ;;  %8811 = vmatmul.mubr.msk.f32.gmra.mxu1 %vm2461_vm12, %v4284_v49  ;;  %v4226_v3 = vld [vmem:[%s15932_s10 + $0x98] sm:$0xff]  ;;  %v4288_v49 = vld [vmem:[%s15932_s10 + $0x288] sm:$0xff] }
 0xbd4   : > { %8720 = vmatprep.mubr.msk.f32.mxu0 %vm2461_vm12, %v4223_v63  ;;  %8813 = vmatprep.mubr.msk.f32.mxu1 %vm2461_vm12, %v4285_v60  ;;  %v4227_v63 = vld [vmem:[%s15932_s10 + $0xa0] sm:$0xff]  ;;  %v4289_v60 = vld [vmem:[%s15932_s10 + $0x290] sm:$0xff] }
 0xbd7   : > { %8721 = vmatmul.mubr.msk.f32.gmra.mxu0 %vm2461_vm12, %v4224_v9  ;;  %8814 = vmatmul.mubr.msk.f32.gmra.mxu1 %vm2461_vm12, %v4286_v21  ;;  %v11146_v9 = vpop.permute.xlu0 %7390  ;;  %v11148_v21 = vpop.permute.xlu1 %5814 }
 0xbd8   : > { %8723 = vmatprep.mubr.msk.f32.mxu0 %vm2461_vm12, %v4225_v38  ;;  %8816 = vmatprep.mubr.msk.f32.mxu1 %vm2461_vm12, %v4287_v32  ;;  %15939 = vst [vmem:[#allocation254_spill] sm:$0xff] %v11146_v9  ;;  %15940 = vst [vmem:[#allocation255_spill] sm:$0xff] %v11148_v21  ;;  %v4228_v38 = vld [vmem:[%s15932_s10 + $0xa8] sm:$0xff]  ;;  %v4290_v32 = vld [vmem:[%s15932_s10 + $0x298] sm:$0xff] }
 0xbdb   : > { %8724 = vmatmul.mubr.msk.f32.gmra.mxu0 %vm2461_vm12, %v4226_v3  ;;  %8817 = vmatmul.mubr.msk.f32.gmra.mxu1 %vm2461_vm12, %v4288_v49  ;;  %v4230_v3 = vld [vmem:[%s15932_s10 + $0xb8] sm:$0xff]  ;;  %v4292_v49 = vld [vmem:[%s15932_s10 + $0x2a8] sm:$0xff]  ;;  %v11164_v21 = vpop.permute.xlu0 %7438  ;;  %v11166_v9 = vpop.permute.xlu1 %5862 }
 0xbdc   : > { %8726 = vmatprep.mubr.msk.f32.mxu0 %vm2461_vm12, %v4227_v63  ;;  %8819 = vmatprep.mubr.msk.f32.mxu1 %vm2461_vm12, %v4289_v60  ;;  %v4231_v63 = vld [vmem:[%s15932_s10 + $0xc0] sm:$0xff]  ;;  %v4293_v60 = vld [vmem:[%s15932_s10 + $0x2b0] sm:$0xff]  ;;  %15941 = vst [vmem:[#allocation256_spill] sm:$0xff] %v11164_v21  ;;  %15942 = vst [vmem:[#allocation257_spill] sm:$0xff] %v11166_v9 }
 0xbdd   : > { %v4235_v9 = vld [vmem:[%s15932_s10 + $0xe0] sm:$0xff]  ;;  %v4297_v21 = vld [vmem:[%s15932_s10 + $0x2d0] sm:$0xff] }
 0xbdf   : > { %8727 = vmatmul.mubr.msk.f32.gmra.mxu0 %vm2461_vm12, %v4228_v38  ;;  %8820 = vmatmul.mubr.msk.f32.gmra.mxu1 %vm2461_vm12, %v4290_v32  ;;  %v4233_v38 = vld [vmem:[%s15932_s10 + $0xd0] sm:$0xff]  ;;  %v4295_v32 = vld [vmem:[%s15932_s10 + $0x2c0] sm:$0xff] }
 0xbe0   : > { %8729 = vmatprep.mubr.msk.f32.mxu0 %vm2461_vm12, %v4229_v41  ;;  %8822 = vmatprep.mubr.msk.f32.mxu1 %vm2461_vm12, %v4291_v18  ;;  %v4232_v18 = vld [vmem:[%s15932_s10 + $0xc8] sm:$0xff]  ;;  %v4294_v41 = vld [vmem:[%s15932_s10 + $0x2b8] sm:$0xff] }
 0xbe3   : > { %8730 = vmatmul.mubr.msk.f32.gmra.mxu0 %vm2461_vm12, %v4230_v3  ;;  %8823 = vmatmul.mubr.msk.f32.gmra.mxu1 %vm2461_vm12, %v4292_v49  ;;  %v11178_v3 = vpop.permute.xlu0 %7486  ;;  %v11180_v49 = vpop.permute.xlu1 %5909 }
 0xbe4   : > { %8732 = vmatprep.mubr.msk.f32.mxu0 %vm2461_vm12, %v4231_v63  ;;  %8825 = vmatprep.mubr.msk.f32.mxu1 %vm2461_vm12, %v4293_v60  ;;  %15943 = vst [vmem:[#allocation258_spill] sm:$0xff] %v11178_v3  ;;  %15944 = vst [vmem:[#allocation259_spill] sm:$0xff] %v11180_v49  ;;  %v4234_v63 = vld [vmem:[%s15932_s10 + $0xd8] sm:$0xff]  ;;  %v4296_v60 = vld [vmem:[%s15932_s10 + $0x2c8] sm:$0xff] }
 0xbe7   : > { %8733 = vmatmul.mubr.msk.f32.gmra.mxu0 %vm2461_vm12, %v4232_v18  ;;  %8826 = vmatmul.mubr.msk.f32.gmra.mxu1 %vm2461_vm12, %v4294_v41  ;;  %v4236_v18 = vld [vmem:[%s15932_s10 + $0xe8] sm:$0xff]  ;;  %v4298_v41 = vld [vmem:[%s15932_s10 + $0x2d8] sm:$0xff]  ;;  %v11196_v49 = vpop.permute.xlu0 %7534  ;;  %v11198_v3 = vpop.permute.xlu1 %5956 }
 0xbe8   : > { %8735 = vmatprep.mubr.msk.f32.mxu0 %vm2461_vm12, %v4233_v38  ;;  %8828 = vmatprep.mubr.msk.f32.mxu1 %vm2461_vm12, %v4295_v32  ;;  %v4237_v38 = vld [vmem:[%s15932_s10 + $0xf0] sm:$0xff]  ;;  %v4299_v32 = vld [vmem:[%s15932_s10 + $0x2e0] sm:$0xff]  ;;  %15945 = vst [vmem:[#allocation260_spill] sm:$0xff] %v11196_v49  ;;  %15946 = vst [vmem:[#allocation261_spill] sm:$0xff] %v11198_v3 }
 0xbe9   : > { %v4301_v3 = vld [vmem:[%s15932_s10 + $0x2f0] sm:$0xff] }
 0xbeb   : > { %8736 = vmatmul.mubr.msk.f32.gmra.mxu0 %vm2461_vm12, %v4234_v63  ;;  %8829 = vmatmul.mubr.msk.f32.gmra.mxu1 %vm2461_vm12, %v4296_v60  ;;  %v4239_v63 = vld [vmem:[%s15932_s10 + $0x100] sm:$0xff]  ;;  %v11209_v60 = vpop.permute.xlu0 %6826 }
 0xbec   : > { %8738 = vmatprep.mubr.msk.f32.mxu0 %vm2461_vm12, %v4235_v9  ;;  %8831 = vmatprep.mubr.msk.f32.mxu1 %vm2461_vm12, %v4297_v21  ;;  %v4238_v9 = vld [vmem:[%s15932_s10 + $0xf8] sm:$0xff]  ;;  %v4300_v21 = vld [vmem:[%s15932_s10 + $0x2e8] sm:$0xff]  ;;  %15947 = vst [vmem:[#allocation262_spill] sm:$0xff] %v11209_v60 }
 0xbef   : > { %8739 = vmatmul.mubr.msk.f32.gmra.mxu0 %vm2461_vm12, %v4236_v18  ;;  %8832 = vmatmul.mubr.msk.f32.gmra.mxu1 %vm2461_vm12, %v4298_v41  ;;  %v11211_v18 = vpop.permute.xlu1 %6003  ;;  %v4240_v41 = vld [vmem:[%s15932_s10 + $0x108] sm:$0xff] }
 0xbf0   : > { %8741 = vmatprep.mubr.msk.f32.mxu0 %vm2461_vm12, %v4237_v38  ;;  %8834 = vmatprep.mubr.msk.f32.mxu1 %vm2461_vm12, %v4299_v32  ;;  %15948 = vst [vmem:[#allocation263_spill] sm:$0xff] %v11211_v18  ;;  %v4241_v38 = vld [vmem:[%s15932_s10 + $0x110] sm:$0xff]  ;;  %v4242_v32 = vld [vmem:[%s15932_s10 + $0x118] sm:$0xff]  ;;  %v11223_v18 = vpop.permute.xlu0 %6873 }
 0xbf1   : > { %15949 = vst [vmem:[#allocation264_spill] sm:$0xff] %v11223_v18  ;;  %v4247_v18 = vld [vmem:[%s15932_s10 + $0x140] sm:$0xff] }
 0xbf3   : > { %8742 = vmatmul.mubr.msk.f32.gmra.mxu0 %vm2461_vm12, %v4238_v9  ;;  %8835 = vmatmul.mubr.msk.f32.gmra.mxu1 %vm2461_vm12, %v4300_v21  ;;  %v4243_v9 = vld [vmem:[%s15932_s10 + $0x120] sm:$0xff]  ;;  %v4302_v21 = vld [vmem:[%s15932_s10 + $0x2f8] sm:$0xff] }
 0xbf4   : > { %8744 = vmatprep.mubr.msk.f32.mxu0 %vm2461_vm12, %v4239_v63  ;;  %8837 = vmatprep.mubr.msk.f32.mxu1 %vm2461_vm12, %v4301_v3  ;;  %v11225_v63 = vpop.permute.xlu1 %6050  ;;  %v11233_v3 = vpop.permute.xlu0 %6920 }
 0xbf5   : > { %15950 = vst [vmem:[#allocation265_spill] sm:$0xff] %v11225_v63  ;;  %15951 = vst [vmem:[#allocation266_spill] sm:$0xff] %v11233_v3  ;;  %v4246_v63 = vld [vmem:[%s15932_s10 + $0x138] sm:$0xff] }
 0xbf7   : > { %8745 = vmatmul.mubr.msk.f32.gmra.mxu0 %vm2461_vm12, %v4240_v41  ;;  %8838 = vmatmul.mubr.msk.f32.gmra.mxu1 %vm2461_vm12, %v4302_v21  ;;  %v4244_v41 = vld [vmem:[%s15932_s10 + $0x128] sm:$0xff] }
 0xbf8   : > { %8747 = vmatprep.mubr.msk.f32.mxu0 %vm2461_vm12, %v4241_v38  ;;  %v4245_v38 = vld [vmem:[%s15932_s10 + $0x130] sm:$0xff]  ;;  %v11235_v60 = vpop.permute.xlu1 %6097  ;;  %v4304_v21 = vld [vmem:[%s15932_s10 + $0x308] sm:$0xff] }
 0xbf9   : > { %15952 = vst [vmem:[#allocation267_spill] sm:$0xff] %v11235_v60  ;;  %v11247_v60 = vpop.permute.xlu0 %6967 }
 0xbfa   : > { %15954 = vst [vmem:[#allocation268_spill] sm:$0xff] %v11247_v60  ;;  %v4253_v60 = vld [vmem:[%s15932_s10 + $0x170] sm:$0xff] }
 0xbfb   : > { %8748 = vmatmul.mubr.msk.f32.gmra.mxu0 %vm2461_vm12, %v4242_v32  ;;  %v4248_v32 = vld [vmem:[%s15932_s10 + $0x148] sm:$0xff] }
 0xbfc   : > { %8750 = vmatprep.mubr.msk.f32.mxu0 %vm2461_vm12, %v4243_v9  ;;  %v4303_v9 = vld [vmem:[%s15932_s10 + $0x300] sm:$0xff]  ;;  %v11249_v3 = vpop.permute.xlu1 %6145 }
 0xbfd   : > { %8840 = vmatprep.mubr.msk.f32.mxu1 %vm2461_vm12, %v4303_v9  ;;  %15955 = vst [vmem:[#allocation269_spill] sm:$0xff] %v11249_v3  ;;  %v4252_v3 = vld [vmem:[%s15932_s10 + $0x168] sm:$0xff] }
 0xbfe   : > { %8841 = vmatmul.mubr.msk.f32.gmra.mxu1 %vm2461_vm12, %v4304_v21  ;;  %v4305_v21 = vld [vmem:[%s15953_s15] sm:$0xff] }
 0xbff   : > { %8751 = vmatmul.mubr.msk.f32.gmra.mxu0 %vm2461_vm12, %v4244_v41  ;;  %v4249_v41 = vld [vmem:[%s15932_s10 + $0x150] sm:$0xff]  ;;  %8845 = vmatprep.mubr.msk.f32.mxu1 %vm2461_vm12, %v4305_v21 }
 0xc00   : > { %8753 = vmatprep.mubr.msk.f32.mxu0 %vm2461_vm12, %v4245_v38  ;;  %v11257_v38 = vpop.permute.xlu0 %7014  ;;  %v11259_v9 = vpop.permute.xlu1 %6193 }
 0xc01   : > { %15956 = vst [vmem:[#allocation270_spill] sm:$0xff] %v11257_v38  ;;  %15957 = vst [vmem:[#allocation271_spill] sm:$0xff] %v11259_v9  ;;  %v4265_v38 = vld [vmem:[%s15932_s10 + $0x1d0] sm:$0xff] }
 0xc03   : > { %8754 = vmatmul.mubr.msk.f32.gmra.mxu0 %vm2461_vm12, %v4246_v63  ;;  %v4251_v63 = vld [vmem:[%s15932_s10 + $0x160] sm:$0xff] }
 0xc04   : > { %8756 = vmatprep.mubr.msk.f32.mxu0 %vm2461_vm12, %v4247_v18  ;;  %v4250_v18 = vld [vmem:[%s15932_s10 + $0x158] sm:$0xff]  ;;  %v11274_v9 = vpop.permute.xlu1 %6240 }
 0xc05   : > { %15959 = vst [vmem:[#allocation273_spill] sm:$0xff] %v11274_v9  ;;  %v4259_v9 = vld [vmem:[%s15932_s10 + $0x1a0] sm:$0xff] }
 0xc07   : > { %8757 = vmatmul.mubr.msk.f32.gmra.mxu0 %vm2461_vm12, %v4248_v32  ;;  %v4254_v32 = vld [vmem:[%s15932_s10 + $0x178] sm:$0xff] }
 0xc08   : > { %8759 = vmatprep.mubr.msk.f32.mxu0 %vm2461_vm12, %v4249_v41  ;;  %v4306_v41 = vld [vmem:[%s15953_s15 + $0x8] sm:$0xff] }
 0xc09   : > { %8846 = vmatmul.mubr.msk.f32.vlgmr.msra.gmra.mxu1 %vm2461_vm12, %v4306_v41  ;;  %v11284_v41 = vpop.permute.xlu1 %6287 }
 0xc0a   : > { %7889 = vmatprep.mubr.f32.mxu1 %v15647_v51  ;;  %15961 = vst [vmem:[#allocation275_spill] sm:$0xff] %v11284_v41  ;;  %v4263_v41 = vld [vmem:[%s15932_s10 + $0x1c0] sm:$0xff] }
 0xc0b   : > { %8760 = vmatmul.mubr.msk.f32.gmra.mxu0 %vm2461_vm12, %v4250_v18  ;;  %v4255_v18 = vld [vmem:[%s15932_s10 + $0x180] sm:$0xff] }
 0xc0c   : > { %8762 = vmatprep.mubr.msk.f32.mxu0 %vm2461_vm12, %v4251_v63  ;;  %v11272_v63 = vpop.permute.xlu0 %7061 }
 0xc0d   : > { %15958 = vst [vmem:[#allocation272_spill] sm:$0xff] %v11272_v63  ;;  %v4258_v63 = vld [vmem:[%s15932_s10 + $0x198] sm:$0xff] }
 0xc0f   : > { %8763 = vmatmul.mubr.msk.f32.gmra.mxu0 %vm2461_vm12, %v4252_v3  ;;  %v4257_v3 = vld [vmem:[%s15932_s10 + $0x190] sm:$0xff] }
 0xc10   : > { %8765 = vmatprep.mubr.msk.f32.mxu0 %vm2461_vm12, %v4253_v60  ;;  %v4256_v60 = vld [vmem:[%s15932_s10 + $0x188] sm:$0xff]  ;;  %v11282_v21 = vpop.permute.xlu0 %7109 }
 0xc11   : > { %15960 = vst [vmem:[#allocation274_spill] sm:$0xff] %v11282_v21  ;;  %v4264_v21 = vld [vmem:[%s15932_s10 + $0x1c8] sm:$0xff] }
 0xc13   : > { %8766 = vmatmul.mubr.msk.f32.gmra.mxu0 %vm2461_vm12, %v4254_v32  ;;  %v4260_v32 = vld [vmem:[%s15932_s10 + $0x1a8] sm:$0xff] }
 0xc14   : > { %8768 = vmatprep.mubr.msk.f32.mxu0 %vm2461_vm12, %v4255_v18  ;;  %v4261_v18 = vld [vmem:[%s15932_s10 + $0x1b0] sm:$0xff]  ;;  %v11293_v51 = vpop.permute.xlu0 %7157 }
 0xc15   : > { %15962 = vst [vmem:[#allocation276_spill] sm:$0xff] %v11293_v51 }
 0xc17   : > { %8769 = vmatmul.mubr.msk.f32.gmra.mxu0 %vm2461_vm12, %v4256_v60  ;;  %v11295_v60 = vpop.permute.xlu1 %6334 }
 0xc18   : > { %8771 = vmatprep.mubr.msk.f32.mxu0 %vm2461_vm12, %v4257_v3  ;;  %15963 = vst [vmem:[#allocation277_spill] sm:$0xff] %v11295_v60  ;;  %v4262_v3 = vld [vmem:[%s15932_s10 + $0x1b8] sm:$0xff]  ;;  %v4267_v60 = vld [vmem:[%s15932_s10 + $0x1e0] sm:$0xff] }
 0xc1b   : > { %8772 = vmatmul.mubr.msk.f32.gmra.mxu0 %vm2461_vm12, %v4258_v63  ;;  %v11302_v63 = vpop.permute.xlu0 %7204 }
 0xc1c   : > { %8774 = vmatprep.mubr.msk.f32.mxu0 %vm2461_vm12, %v4259_v9  ;;  %15964 = vst [vmem:[#allocation278_spill] sm:$0xff] %v11302_v63  ;;  %v11304_v9 = vpop.permute.xlu1 %6381 }
 0xc1d   : > { %15965 = vst [vmem:[#allocation279_spill] sm:$0xff] %v11304_v9 }
 0xc1f   : > { %8775 = vmatmul.mubr.msk.f32.gmra.mxu0 %vm2461_vm12, %v4260_v32  ;;  %v4266_v32 = vld [vmem:[%s15932_s10 + $0x1d8] sm:$0xff] }
 0xc20   : > { %8777 = vmatprep.mubr.msk.f32.mxu0 %vm2461_vm12, %v4261_v18  ;;  %v11313_v18 = vpop.permute.xlu0 %7251  ;;  %v11315_v51 = vpop.permute.xlu1 %6428 }
 0xc21   : > { %15966 = vst [vmem:[#allocation280_spill] sm:$0xff] %v11313_v18  ;;  %15967 = vst [vmem:[#allocation281_spill] sm:$0xff] %v11315_v51 }
 0xc23   : > { %8778 = vmatmul.mubr.msk.f32.gmra.mxu0 %vm2461_vm12, %v4262_v3  ;;  %v4268_v3 = vld [vmem:[%s15932_s10 + $0x1e8] sm:$0xff] }
 0xc24   : > { %8780 = vmatprep.mubr.msk.f32.mxu0 %vm2461_vm12, %v4263_v41  ;;  %v11321_v41 = vpop.permute.xlu0 %7298  ;;  %v11323_v9 = vpop.permute.xlu1 %6476 }
 0xc25   : > { %15968 = vst [vmem:[#allocation282_spill] sm:$0xff] %v11321_v41  ;;  %15969 = vst [vmem:[#allocation283_spill] sm:$0xff] %v11323_v9 }
 0xc27   : > { %8781 = vmatmul.mubr.msk.f32.gmra.mxu0 %vm2461_vm12, %v4264_v21 }
 0xc28   : > { %8783 = vmatprep.mubr.msk.f32.mxu0 %vm2461_vm12, %v4265_v38  ;;  %v11325_v21 = vpop.permute.xlu0 %7345  ;;  %v11327_v38 = vpop.permute.xlu1 %6524 }
 0xc29   : > { %15970 = vst [vmem:[#allocation284_spill] sm:$0xff] %v11325_v21  ;;  %15971 = vst [vmem:[#allocation285_spill] sm:$0xff] %v11327_v38 }
 0xc2b   : > { %8784 = vmatmul.mubr.msk.f32.gmra.mxu0 %vm2461_vm12, %v4266_v32 }
 0xc2c   : > { %8786 = vmatprep.mubr.msk.f32.mxu0 %vm2461_vm12, %v4267_v60  ;;  %v11329_v63 = vpop.permute.xlu0 %7392  ;;  %v11331_v18 = vpop.permute.xlu1 %6571 }
 0xc2d   : > { %15972 = vst [vmem:[#allocation286_spill] sm:$0xff] %v11329_v63  ;;  %15973 = vst [vmem:[#allocation287_spill] sm:$0xff] %v11331_v18 }
 0xc2f   : > { %8787 = vmatmul.mubr.msk.f32.gmra.mxu0 %vm2461_vm12, %v4268_v3  ;;  %vm15506_vm12 = vcmp.lt.s32.totalorder %v9525_v14, 14 }
 0xc30   : > { %v11333_v51 = vpop.permute.xlu0 %7440  ;;  %v11335_v32 = vpop.permute.xlu1 %6636 }
 0xc31   : > { %15974 = vst [vmem:[#allocation288_spill] sm:$0xff] %v11333_v51  ;;  %15975 = vst [vmem:[#allocation289_spill] sm:$0xff] %v11335_v32 }
 0xc34   : > { %v11337_v60 = vpop.permute.xlu0 %7488  ;;  %v11339_v49 = vpop.permute.xlu1 %6683 }
 0xc35   : > { %15976 = vst [vmem:[#allocation290_spill] sm:$0xff] %v11337_v60  ;;  %15977 = vst [vmem:[#allocation291_spill] sm:$0xff] %v11339_v49 }
 0xc38   : > { %v11341_v3 = vpop.permute.xlu0 %7536  ;;  %v11343_v41 = vpop.permute.xlu1 %6730 }
 0xc39   : > { %15978 = vst [vmem:[#allocation292_spill] sm:$0xff] %v11341_v3  ;;  %15979 = vst [vmem:[#allocation293_spill] sm:$0xff] %v11343_v41 }
 0xc3c   : > { %v11345_v9 = vpop.permute.xlu0 %7584  ;;  %v11347_v21 = vpop.permute.xlu1 %6778 }
 0xc3d   : > { %15980 = vst [vmem:[#allocation294_spill] sm:$0xff] %v11345_v9  ;;  %15981 = vst [vmem:[#allocation295_spill] sm:$0xff] %v11347_v21 }
 0xc40   : > { %v11349_v38 = vpop.permute.xlu1 %3048  ;;  %v11351_v63 = vpop.permute.xlu0 %3043 }
 0xc41   : > { %15982 = vst [vmem:[#allocation296_spill] sm:$0xff] %v11349_v38  ;;  %15983 = vst [vmem:[#allocation297_spill] sm:$0xff] %v11351_v63 }
 0xc44   : > { %v11353_v18 = vpop.permute.xlu1 %4176  ;;  %v11355_v51 = vpop.permute.xlu0 %4171 }
 0xc45   : > { %15984 = vst [vmem:[#allocation298_spill] sm:$0xff] %v11353_v18  ;;  %15985 = vst [vmem:[#allocation299_spill] sm:$0xff] %v11355_v51 }
 0xc48   : > { %v11357_v32 = vpop.permute.xlu1 %3092  ;;  %v11359_v60 = vpop.permute.xlu0 %3087 }
 0xc49   : > { %15986 = vst [vmem:[#allocation300_spill] sm:$0xff] %v11357_v32  ;;  %15987 = vst [vmem:[#allocation301_spill] sm:$0xff] %v11359_v60 }
 0xc4c   : > { %v11361_v49 = vpop.permute.xlu1 %3140  ;;  %v11363_v3 = vpop.permute.xlu0 %3135 }
 0xc4d   : > { %15988 = vst [vmem:[#allocation302_spill] sm:$0xff] %v11361_v49  ;;  %15989 = vst [vmem:[#allocation303_spill] sm:$0xff] %v11363_v3 }
 0xc50   : > { %v11365_v41 = vpop.permute.xlu1 %3188  ;;  %v11367_v9 = vpop.permute.xlu0 %3183 }
 0xc51   : > { %15990 = vst [vmem:[#allocation304_spill] sm:$0xff] %v11365_v41  ;;  %15991 = vst [vmem:[#allocation305_spill] sm:$0xff] %v11367_v9  ;;  %v8125_v41 = vld [vmem:[%s15994_s16 + $0x4] sm:$0x3] }
 0xc52   : > { %v11408_v12 = vrot.slane %v8125_v41, %v9527_v23  ;;  %v11418_v2 = vrot.slane %v8125_v41, %v9530_v28 }
 0xc54   : > { %v11369_v21 = vpop.permute.xlu1 %3236  ;;  %v11371_v38 = vpop.permute.xlu0 %3231 }
 0xc55   : > { %15992 = vst [vmem:[#allocation306_spill] sm:$0xff] %v11369_v21  ;;  %15993 = vst [vmem:[#allocation307_spill] sm:$0xff] %v11371_v38 }
 0xc58   : > { %v11373_v54 = vpop.permute.xlu1 %3284  ;;  %v11375_v49 = vpop.permute.xlu0 %3279 }
 0xc59   : > { %15995 = vst [vmem:[#allocation308_spill] sm:$0xff] %v11373_v54  ;;  %15996 = vst [vmem:[#allocation309_spill] sm:$0xff] %v11375_v49 }
 0xc5c   : > { %v11379_v21 = vpop.permute.xlu0 %3326 }
 0xc5d   : > { %15998 = vst [vmem:[#allocation311_spill] sm:$0xff] %v11379_v21  ;;  %v8128_v21 = vld [vmem:[%s15994_s16 + $0xa] sm:$0x3] }
 0xc5e   : > { %v11436_v41 = vrot.slane %v8128_v21, %v9527_v23 }
 0xc60   : > { %v11414_v42 = vpop.permute.xlu0 %3373 }
 0xc61   : > { %16000 = vst [vmem:[#allocation313_spill] sm:$0xff] %v11414_v42 }
 0xc77   : > { %v8698_v63 = vpop.f32.mrf.mxu0  ;;  %v8791_v18 = vpop.f32.mrf.mxu1 }
 0xc78   : > { %5513 = vperm.xlu1 %8942, %v8698_v63   ;;  %6950 = vperm.xlu0 %8941, %v8791_v18   ;;  %v11377_v18 = vpop.permute.xlu1 %3331 }
 0xc79   : > { %v4907_v51 = vpop.f32.mrf.mxu0  ;;  %v5217_v32 = vpop.f32.mrf.mxu1  ;;  %15997 = vst [vmem:[#allocation310_spill] sm:$0xff] %v11377_v18 }
 0xc7b   : > { %v8701_v60 = vpop.f32.mrf.mxu0  ;;  %v8794_v3 = vpop.f32.mrf.mxu1 }
 0xc7c   : > { %6945 = vperm.xlu1 %8942, %v5217_v32   ;;  %5508 = vperm.xlu0 %8941, %v4907_v51   ;;  %v3025_v32 = vld [vmem:[%s15994_s16] sm:$0x3]  ;;  %v8124_v51 = vld [vmem:[%s15994_s16 + $0x2] sm:$0x3]  ;;  %v11412_v22 = vpop.permute.xlu1 %3378 }
 0xc7d   : > { %v4917_v9 = vpop.f32.mrf.mxu0  ;;  %v5227_v54 = vpop.f32.mrf.mxu1  ;;  %v11391_v0 = vrot.slane %v3025_v32, %v9527_v23  ;;  %v11394_v18 = vrot.slane %v3025_v32, %v9530_v28  ;;  %v8131_v32 = vld [vmem:[%s15994_s16 + $0x10] sm:$0x3]  ;;  %15999 = vst [vmem:[#allocation312_spill] sm:$0xff] %v11412_v22 }
 0xc7e   : > { %v11456_v36 = vrot.slane %v8131_v32, %v9527_v23  ;;  %v11464_v27 = vrot.slane %v8131_v32, %v9530_v28  ;;  %v11481_v32 = vrot.slane %v8134_v56, %v9527_v23  ;;  %v8141_v56 = vld [vmem:[%s15994_s16 + $0x26] sm:$0x3] }
 0xc7f   : > { %v8704_v38 = vpop.f32.mrf.mxu0  ;;  %v8797_v31 = vpop.f32.mrf.mxu1 }
 0xc80   : > { %5557 = vperm.xlu1 %8942, %v8701_v60   ;;  %6997 = vperm.xlu0 %8941, %v8794_v3   ;;  %v8126_v60 = vld [vmem:[%s15994_s16 + $0x6] sm:$0x3]  ;;  %v8127_v3 = vld [vmem:[%s15994_s16 + $0x8] sm:$0x3]  ;;  %16005 = vst [vmem:[#allocation318_spill] sm:$0xff] %v11456_v36  ;;  %16006 = vst [vmem:[#allocation319_spill] sm:$0xff] %v11464_v27 }
 0xc81   : > { %v4927_v63 = vpop.f32.mrf.mxu0  ;;  %v11424_v48 = vrot.slane %v8126_v60, %v9530_v28  ;;  %v11427_v22 = vrot.slane %v8127_v3, %v9527_v23  ;;  %v5237_v47 = vpop.f32.mrf.mxu1  ;;  %v8137_v36 = vld [vmem:[%s15994_s16 + $0x1e] sm:$0x3]  ;;  %16011 = vst [vmem:[#allocation324_spill] sm:$0xff] %v11481_v32 }
 0xc82   : > { %v11504_v32 = vpop.permute.xlu1 %3425 }
 0xc83   : > { %v11381_v49 = vpop.f32.mrf.mxu0  ;;  %16018 = vst [vmem:[#allocation331_spill] sm:$0xff] %v11504_v32 }
 0xc84   : > { %6992 = vperm.xlu1 %8942, %v5227_v54   ;;  %5552 = vperm.xlu0 %8941, %v4917_v9   ;;  %v11402_v54 = vrot.slane %v8124_v51, %v9527_v23  ;;  %v11405_v9 = vrot.slane %v8124_v51, %v9530_v28  ;;  %v11421_v51 = vrot.slane %v8126_v60, %v9527_v23  ;;  %v8133_v60 = vld [vmem:[%s15994_s16 + $0x14] sm:$0x3] }
 0xc85   : > { %v11386_v8 = vpop.f32.mrf.mxu0  ;;  %v11475_v52 = vrot.slane %v8133_v60, %v9527_v23  ;;  %v11478_v16 = vrot.slane %v8133_v60, %v9530_v28  ;;  %v11497_v60 = vrot.slane %v8136_v43, %v9527_v23 }
 0xc87   : > { %v11398_v45 = vpop.f32.mrf.mxu0  ;;  %16009 = vst [vmem:[#allocation322_spill] sm:$0xff] %v11475_v52  ;;  %16010 = vst [vmem:[#allocation323_spill] sm:$0xff] %v11478_v16  ;;  %v11500_v16 = vrot.slane %v8136_v43, %v9530_v28  ;;  %v11506_v52 = vpop.permute.xlu0 %3420 }
 0xc88   : > { %5605 = vperm.xlu1 %8942, %v8704_v38   ;;  %7044 = vperm.xlu0 %8941, %v8797_v31   ;;  %v11433_v31 = vrot.slane %v8127_v3, %v9530_v28  ;;  %v11439_v38 = vrot.slane %v8128_v21, %v9530_v28  ;;  %v11453_v3 = vrot.slane %v8130_v40, %v9530_v28  ;;  %v8135_v21 = vld [vmem:[%s15994_s16 + $0x1a] sm:$0x3] }
 0xc89   : > { %v11430_v42 = vpop.f32.mrf.mxu0  ;;  %v11470_v40 = vrot.slane %v8132_v39, %v9530_v28  ;;  %v8139_v39 = vld [vmem:[%s15994_s16 + $0x22] sm:$0x3]  ;;  %16016 = vst [vmem:[#allocation329_spill] sm:$0xff] %v11497_v60  ;;  %16017 = vst [vmem:[#allocation330_spill] sm:$0xff] %v11500_v16  ;;  %v8143_v16 = vld [vmem:[%s15994_s16 + $0x2a] sm:$0x3]  ;;  %v8800_v60 = vpop.f32.mrf.mxu1 }
 0xc8a   : > { %16004 = vst [vmem:[#allocation317_spill] sm:$0xff] %v11453_v3  ;;  %v8138_v3 = vld [vmem:[%s15994_s16 + $0x20] sm:$0x3]  ;;  %16019 = vst [vmem:[#allocation332_spill] sm:$0xff] %v11506_v52  ;;  %v11525_v52 = vrot.slane %v8139_v39, %v9527_v23  ;;  %v11528_v32 = vrot.slane %v8139_v39, %v9530_v28  ;;  %v11546_v39 = vrot.slane %v8142_v53, %v9527_v23 }
 0xc8b   : > { %v11460_v33 = vpop.f32.mrf.mxu0  ;;  %16008 = vst [vmem:[#allocation321_spill] sm:$0xff] %v11470_v40  ;;  %v8140_v40 = vld [vmem:[%s15994_s16 + $0x24] sm:$0x3]  ;;  %v11518_v43 = vrot.slane %v8138_v3, %v9530_v28 }
 0xc8c   : > { %7039 = vperm.xlu1 %8942, %v5237_v47   ;;  %5600 = vperm.xlu0 %8941, %v4927_v63   ;;  %v11491_v47 = vrot.slane %v8135_v21, %v9527_v23  ;;  %v11494_v63 = vrot.slane %v8135_v21, %v9530_v28  ;;  %v11512_v21 = vrot.slane %v8137_v36, %v9530_v28 }
 0xc8d   : > { %v11488_v27 = vpop.f32.mrf.mxu0  ;;  %16022 = vst [vmem:[#allocation335_spill] sm:$0xff] %v11518_v43  ;;  %16023 = vst [vmem:[#allocation336_spill] sm:$0xff] %v11525_v52  ;;  %v11540_v43 = vrot.slane %v8141_v56, %v9527_v23  ;;  %v11543_v52 = vrot.slane %v8141_v56, %v9530_v28  ;;  %v8146_v56 = vld [vmem:[%s15994_s16 + $0x30] sm:$0x3] }
 0xc8e   : > { %16013 = vst [vmem:[#allocation326_spill] sm:$0xff] %v11488_v27  ;;  %16014 = vst [vmem:[#allocation327_spill] sm:$0xff] %v11491_v47  ;;  %v11509_v27 = vrot.slane %v8137_v36, %v9527_v23  ;;  %v11531_v36 = vrot.slane %v8140_v40, %v9527_v23 }
 0xc8f   : > { %16015 = vst [vmem:[#allocation328_spill] sm:$0xff] %v11494_v63  ;;  %16020 = vst [vmem:[#allocation333_spill] sm:$0xff] %v11512_v21  ;;  %v11515_v63 = vrot.slane %v8138_v3, %v9527_v23  ;;  %v11521_v47 = vpop.f32.mrf.mxu0  ;;  %v8145_v21 = vld [vmem:[%s15994_s16 + $0x2e] sm:$0x3]  ;;  %v11537_v3 = vrot.slane %v8140_v40, %v9530_v28  ;;  %v11558_v40 = vrot.slane %v8143_v16, %v9527_v23 }
 0xc90   : > { %16024 = vst [vmem:[#allocation337_spill] sm:$0xff] %v11528_v32  ;;  %5653 = vperm.xlu1 %8942, %v11381_v49   ;;  %7092 = vperm.xlu0 %8941, %v8800_v60   ;;  %16026 = vst [vmem:[#allocation339_spill] sm:$0xff] %v11540_v43  ;;  %v3023_v49 = vsel %vm3020_vm14, %v10170_v50, %v9966_v26  ;;  %v11555_v60 = vrot.slane %v8142_v53, %v9530_v28 }
 0xc91   : > { %16021 = vst [vmem:[#allocation334_spill] sm:$0xff] %v11515_v63  ;;  %v8144_v63 = vld [vmem:[%s15994_s16 + $0x2c] sm:$0x3]  ;;  %16025 = vst [vmem:[#allocation338_spill] sm:$0xff] %v11537_v3  ;;  %v11548_v32 = vpop.f32.mrf.mxu0  ;;  %v11561_v43 = vrot.slane %v8143_v16, %v9530_v28  ;;  %v11575_v53 = vrot.slane %v8145_v21, %v9527_v23  ;;  %v3022_v16 = vsel %vm3020_vm14, %v9972_v59, %v10179_v62 }
 0xc92   : > { %16027 = vst [vmem:[#allocation340_spill] sm:$0xff] %v11543_v52  ;;  %16028 = vst [vmem:[#allocation341_spill] sm:$0xff] %v11546_v39  ;;  %v3021_v39 = vsel %vm3020_vm14, %v9966_v26, %v10170_v50  ;;  %v11569_v52 = vrot.slane %v8144_v63, %v9527_v23  ;;  %v11572_v3 = vrot.slane %v8144_v63, %v9530_v28  ;;  %v11592_v63 = vpop.permute.xlu1 %3473 }
 0xc93   : > { %16029 = vst [vmem:[#allocation342_spill] sm:$0xff] %v11555_v60  ;;  %16030 = vst [vmem:[#allocation343_spill] sm:$0xff] %v11558_v40  ;;  %v5247_v60 = vpop.f32.mrf.mxu1  ;;  %v11577_v40 = vpop.f32.mrf.mxu0  ;;  %v3024_v26 = vsel %vm3020_vm14, %v10179_v62, %v9972_v59  ;;  %v3066_v50 = vsel %vm15482_vm15, %v10181_v24, %v9974_v4  ;;  %v11604_v59 = vrot.slane %v8146_v56, %v9527_v23 }
 0xc94   : > { %16031 = vst [vmem:[#allocation344_spill] sm:$0xff] %v11561_v43  ;;  %16032 = vst [vmem:[#allocation345_spill] sm:$0xff] %v11569_v52  ;;  %7087 = vperm.xlu1 %8942, %v5247_v60   ;;  %5648 = vperm.xlu0 %8941, %v11386_v8   ;;  %v11601_v52 = vrot.slane %v8145_v21, %v9530_v28  ;;  %v11607_v62 = vrot.slane %v8146_v56, %v9530_v28 }
 0xc95   : > { %16033 = vst [vmem:[#allocation346_spill] sm:$0xff] %v11572_v3  ;;  %16034 = vst [vmem:[#allocation347_spill] sm:$0xff] %v11575_v53  ;;  %v11594_v53 = vpop.permute.xlu0 %3468  ;;  %v11598_v3 = vmul.f32 %v11391_v0, %v3023_v49  ;;  %v11609_v43 = vpop.f32.mrf.mxu0  ;;  %v3064_v60 = vsel %vm15482_vm15, %v9974_v4, %v10181_v24  ;;  %v3065_v8 = vsel %vm15482_vm15, %v9980_v7, %v10187_v30 }
 0xc96   : > { %16035 = vst [vmem:[#allocation348_spill] sm:$0xff] %v11592_v63  ;;  %16036 = vst [vmem:[#allocation349_spill] sm:$0xff] %v11594_v53  ;;  %v3067_v21 = vsel %vm15482_vm15, %v10187_v30, %v9980_v7  ;;  %v3114_v49 = vsel %vm3111_vm0, %v10189_v58, %v9982_v13  ;;  %v11628_v56 = vmul.f32 %v11394_v18, %v3021_v39  ;;  %v8803_v63 = vpop.f32.mrf.mxu1 }
 0xc97   : > { %16037 = vst [vmem:[#allocation350_spill] sm:$0xff] %v11598_v3  ;;  %v11631_v4 = vmul.f32 %v11391_v0, %v3024_v26  ;;  %v11634_v24 = vmul.f32 %v11394_v18, %v3022_v16  ;;  %v11637_v53 = vmul.f32 %v11402_v54, %v3066_v50  ;;  %v11639_v3 = vpop.f32.mrf.mxu0  ;;  %v3112_v7 = vsel %vm3111_vm0, %v9982_v13, %v10189_v58 }
 0xc98   : > { %16038 = vst [vmem:[#allocation351_spill] sm:$0xff] %v11628_v56  ;;  %v3113_v30 = vsel %vm3111_vm0, %v9988_v17, %v10195_v10  ;;  %v3115_v0 = vsel %vm3111_vm0, %v10195_v10, %v9988_v17  ;;  %5701 = vperm.xlu1 %8942, %v11398_v45   ;;  %7140 = vperm.xlu0 %8941, %v8803_v63  }
 0xc99   : > { %16039 = vst [vmem:[#allocation352_spill] sm:$0xff] %v11631_v4  ;;  %16040 = vst [vmem:[#allocation353_spill] sm:$0xff] %v11634_v24  ;;  %v11656_v18 = vmul.f32 %v11405_v9, %v3064_v60  ;;  %v11659_v13 = vmul.f32 %v11402_v54, %v3067_v21  ;;  %v11662_v58 = vmul.f32 %v11405_v9, %v3065_v8  ;;  %v11667_v16 = vpop.f32.mrf.mxu0  ;;  %v11685_v9 = vpop.permute.xlu1 %3521 }
 0xc9a   : > { %16041 = vst [vmem:[#allocation354_spill] sm:$0xff] %v11637_v53  ;;  %v11665_v39 = vmul.f32 %v11408_v12, %v3114_v49  ;;  %v3160_v17 = vsel %vm3159_vm9, %v9990_v35, %v10197_v15  ;;  %v3162_v10 = vsel %vm3159_vm9, %v10197_v15, %v9990_v35  ;;  %v3161_v45 = vsel %vm3159_vm9, %v9996_v1, %v10203_v5  ;;  %v11687_v26 = vpop.permute.xlu0 %3516  ;;  %v5257_v60 = vpop.f32.mrf.mxu1 }
 0xc9b   : > { %16042 = vst [vmem:[#allocation355_spill] sm:$0xff] %v11656_v18  ;;  %16043 = vst [vmem:[#allocation356_spill] sm:$0xff] %v11659_v13  ;;  %v3163_v54 = vsel %vm3159_vm9, %v10203_v5, %v9996_v1  ;;  %v11690_v50 = vmul.f32 %v11418_v2, %v3112_v7  ;;  %v11693_v63 = vmul.f32 %v11408_v12, %v3115_v0  ;;  %v11702_v1 = vpop.f32.mrf.mxu0  ;;  %v8271_v18 = vld [vmem:[%s16196_s26 + $0x26] sm:$0x3]  ;;  %v8274_v13 = vld [vmem:[%s16196_s26 + $0x2c] sm:$0x3] }
 0xc9c   : > { %16044 = vst [vmem:[#allocation357_spill] sm:$0xff] %v11662_v58  ;;  %16045 = vst [vmem:[#allocation358_spill] sm:$0xff] %v11665_v39  ;;  %v11696_v35 = vmul.f32 %v11418_v2, %v3113_v30  ;;  %v3208_v15 = vsel %vm15492_vm10, %v9998_v29, %v10205_v6  ;;  %v3210_v5 = vsel %vm15492_vm10, %v10205_v6, %v9998_v29  ;;  %7135 = vperm.xlu1 %8942, %v5257_v60  }
 0xc9d   : > { %16046 = vst [vmem:[#allocation359_spill] sm:$0xff] %v11685_v9  ;;  %16047 = vst [vmem:[#allocation360_spill] sm:$0xff] %v11687_v26  ;;  %v3209_v12 = vsel %vm15492_vm10, %v10004_v11, %v10211_v61  ;;  %v3211_v2 = vsel %vm15492_vm10, %v10211_v61, %v10004_v11  ;;  %5696 = vperm.xlu0 %8941, %v11430_v42   ;;  %v11718_v8 = vmul.f32 %v11421_v51, %v3162_v10  ;;  %v11729_v49 = vpop.f32.mrf.mxu0  ;;  %v16079_v26 = vld [vmem:[#allocation316_spill] sm:$0xff]  ;;  %v16081_v9 = vld [vmem:[#allocation317_spill] sm:$0xff] }
 0xc9e   : > { %16048 = vst [vmem:[#allocation361_spill] sm:$0xff] %v11690_v50  ;;  %16049 = vst [vmem:[#allocation362_spill] sm:$0xff] %v11693_v63  ;;  %v11721_v21 = vmul.f32 %v11424_v48, %v3160_v17  ;;  %v11724_v29 = vmul.f32 %v11421_v51, %v3163_v54  ;;  %v11727_v6 = vmul.f32 %v11424_v48, %v3161_v45  ;;  %v11776_v17 = vpop.permute.xlu0 %3563  ;;  %v8269_v50 = vld [vmem:[%s16196_s26 + $0x22] sm:$0x3]  ;;  %v8272_v63 = vld [vmem:[%s16196_s26 + $0x28] sm:$0x3] }
 0xc9f   : > { %16050 = vst [vmem:[#allocation363_spill] sm:$0xff] %v11696_v35  ;;  %16051 = vst [vmem:[#allocation364_spill] sm:$0xff] %v11718_v8  ;;  %v3256_v11 = vsel %vm15496_vm11, %v10006_v46, %v10213_v20  ;;  %v3258_v42 = vsel %vm15496_vm11, %v10213_v20, %v10006_v46  ;;  %v3257_v61 = vsel %vm15496_vm11, %v10012_v25, %v10221_v57  ;;  %v8806_v46 = vpop.f32.mrf.mxu1  ;;  %v11759_v0 = vpop.f32.mrf.mxu0  ;;  %v8258_v8 = vld [vmem:[%s16196_s26 + $0xc] sm:$0x3] }
 0xca0   : > { %16052 = vst [vmem:[#allocation365_spill] sm:$0xff] %v11721_v21  ;;  %16053 = vst [vmem:[#allocation366_spill] sm:$0xff] %v11724_v29  ;;  %v3259_v48 = vsel %vm15496_vm11, %v10221_v57, %v10012_v25  ;;  %v11748_v51 = vmul.f32 %v11427_v22, %v3210_v5  ;;  %v11751_v7 = vmul.f32 %v11433_v31, %v3208_v15  ;;  %5749 = vperm.xlu1 %8942, %v11460_v33   ;;  %v16065_v15 = vld [vmem:[#allocation36_spill] sm:$0xff]  ;;  %v16066_v5 = vld [vmem:[#allocation37_spill] sm:$0xff] }
 0xca1   : > { %16054 = vst [vmem:[#allocation367_spill] sm:$0xff] %v11727_v6  ;;  %v11754_v30 = vmul.f32 %v11427_v22, %v3211_v2  ;;  %v11757_v20 = vmul.f32 %v11433_v31, %v3209_v12  ;;  %v3303_v25 = vsel %vm15498_vm1, %v10014_v34, %v10223_v55  ;;  %v3305_v57 = vsel %vm15498_vm1, %v10223_v55, %v10014_v34  ;;  %v11774_v31 = vpop.permute.xlu1 %3568  ;;  %v11791_v54 = vpop.f32.mrf.mxu0  ;;  %v16068_v2 = vld [vmem:[#allocation314_spill] sm:$0xff]  ;;  %v8266_v21 = vld [vmem:[%s16196_s26 + $0x1c] sm:$0x3]  ;;  %v8270_v6 = vld [vmem:[%s16196_s26 + $0x24] sm:$0x3] }
 0xca2   : > { %16055 = vst [vmem:[#allocation368_spill] sm:$0xff] %v11748_v51  ;;  %16056 = vst [vmem:[#allocation369_spill] sm:$0xff] %v11751_v7  ;;  %v3306_v22 = vsel %vm15498_vm1, %v10229_v44, %v10020_v37  ;;  %7187 = vperm.xlu0 %8941, %v8806_v46   ;;  %v11780_v10 = vmul.f32 %v11436_v41, %v3258_v42  ;;  %v11783_v45 = vmul.f32 %v11439_v38, %v3256_v11  ;;  %v16070_v42 = vld [vmem:[#allocation315_spill] sm:$0xff]  ;;  %v16073_v46 = vld [vmem:[#allocation82_spill] sm:$0xff] }
 0xca3   : > { %16057 = vst [vmem:[#allocation370_spill] sm:$0xff] %v11754_v30  ;;  %16058 = vst [vmem:[#allocation371_spill] sm:$0xff] %v11757_v20  ;;  %v11786_v34 = vmul.f32 %v11436_v41, %v3259_v48  ;;  %v11789_v55 = vmul.f32 %v11439_v38, %v3257_v61  ;;  %v3304_v33 = vsel %vm15498_vm1, %v10020_v37, %v10229_v44  ;;  %v16067_v38 = vld [vmem:[#allocation81_spill] sm:$0xff]  ;;  %v11822_v48 = vpop.f32.mrf.mxu0  ;;  %v16241_v7 = vld [vmem:[#allocation114_spill] sm:$0xff] }
 0xca4   : > { %16059 = vst [vmem:[#allocation372_spill] sm:$0xff] %v11774_v31  ;;  %16060 = vst [vmem:[#allocation373_spill] sm:$0xff] %v11776_v17  ;;  %v3350_v60 = vsel %vm15507_vm2, %v16065_v15, %v10231_v19  ;;  %v3352_v41 = vsel %vm15507_vm2, %v10231_v19, %v16065_v15  ;;  %v3353_v12 = vsel %vm15507_vm2, %v16067_v38, %v16066_v5  ;;  %v5267_v19 = vpop.f32.mrf.mxu1  ;;  %v16074_v15 = vld [vmem:[#allocation48_spill] sm:$0xff]  ;;  %v16123_v51 = vld [vmem:[#allocation325_spill] sm:$0xff] }
 0xca5   : > { %16061 = vst [vmem:[#allocation374_spill] sm:$0xff] %v11780_v10  ;;  %16062 = vst [vmem:[#allocation375_spill] sm:$0xff] %v11783_v45  ;;  %v11810_v11 = vmul.f32 %v16068_v2, %v3305_v57  ;;  %v11813_v37 = vmul.f32 %v16070_v42, %v3303_v25  ;;  %v11816_v44 = vmul.f32 %v16068_v2, %v3306_v22  ;;  %v16075_v22 = vld [vmem:[#allocation49_spill] sm:$0xff]  ;;  %v16076_v2 = vld [vmem:[#allocation83_spill] sm:$0xff]  ;;  %7182 = vperm.xlu1 %8942, %v5267_v19  }
 0xca6   : > { %16063 = vst [vmem:[#allocation376_spill] sm:$0xff] %v11786_v34  ;;  %16064 = vst [vmem:[#allocation377_spill] sm:$0xff] %v11789_v55  ;;  %v3351_v61 = vsel %vm15507_vm2, %v16066_v5, %v16067_v38  ;;  %v3397_v57 = vsel %vm15401_vm3, %v16074_v15, %v16073_v46  ;;  %v3399_v25 = vsel %vm15401_vm3, %v16073_v46, %v16074_v15  ;;  %v16077_v5 = vld [vmem:[#allocation326_spill] sm:$0xff]  ;;  %v11850_v15 = vpop.f32.mrf.mxu0  ;;  %v16093_v10 = vld [vmem:[#allocation319_spill] sm:$0xff] }
 0xca7   : > { %16069 = vst [vmem:[#allocation36_spill] sm:$0xff] %v11810_v11  ;;  %16071 = vst [vmem:[#allocation37_spill] sm:$0xff] %v11813_v37  ;;  %v3400_v17 = vsel %vm15401_vm3, %v16076_v2, %v16075_v22  ;;  %5744 = vperm.xlu0 %8941, %v16077_v5   ;;  %v11839_v38 = vmul.f32 %v16070_v42, %v3304_v33  ;;  %v11842_v31 = vmul.f32 %v16079_v26, %v3352_v41  ;;  %v16084_v5 = vld [vmem:[#allocation84_spill] sm:$0xff]  ;;  %v16085_v37 = vld [vmem:[#allocation50_spill] sm:$0xff]  ;;  %v11868_v42 = vpop.permute.xlu1 %3586 }
 0xca8   : > { %16072 = vst [vmem:[#allocation81_spill] sm:$0xff] %v11816_v44  ;;  %v11845_v11 = vmul.f32 %v16081_v9, %v3350_v60  ;;  %v11848_v46 = vmul.f32 %v16079_v26, %v3353_v12  ;;  %v3398_v19 = vsel %vm15401_vm3, %v16075_v22, %v16076_v2  ;;  %v3445_v33 = vsel %vm15506_vm12, %v16085_v37, %v16084_v5  ;;  %v16086_v41 = vld [vmem:[#allocation51_spill] sm:$0xff]  ;;  %v16087_v26 = vld [vmem:[#allocation85_spill] sm:$0xff]  ;;  %v16091_v2 = vld [vmem:[#allocation318_spill] sm:$0xff] }
 0xca9   : > { %16078 = vst [vmem:[#allocation314_spill] sm:$0xff] %v11839_v38  ;;  %16080 = vst [vmem:[#allocation315_spill] sm:$0xff] %v11842_v31  ;;  %v3447_v60 = vsel %vm15506_vm12, %v16084_v5, %v16085_v37  ;;  %v3448_v12 = vsel %vm15506_vm12, %v16087_v26, %v16086_v41  ;;  %v11870_v31 = vpop.permute.xlu0 %3581  ;;  %v11873_v22 = vmul.f32 %v16081_v9, %v3351_v61  ;;  %v8809_v5 = vpop.f32.mrf.mxu1  ;;  %v16097_v9 = vld [vmem:[#allocation52_spill] sm:$0xff]  ;;  %vm15451_vm3 = vcmp.lt.s32.totalorder %v9525_v14, 126  ;;  %v16242_v44 = vld [vmem:[#allocation79_spill] sm:$0xff] }
 0xcaa   : > { %16082 = vst [vmem:[#allocation82_spill] sm:$0xff] %v11845_v11  ;;  %16083 = vst [vmem:[#allocation48_spill] sm:$0xff] %v11848_v46  ;;  %v11876_v11 = vmul.f32 %v16091_v2, %v3399_v25  ;;  %v11879_v45 = vmul.f32 %v16093_v10, %v3397_v57  ;;  %v11882_v37 = vmul.f32 %v16091_v2, %v3400_v17  ;;  %v11884_v46 = vpop.f32.mrf.mxu0  ;;  %5797 = vperm.xlu1 %8942, %v11521_v47   ;;  %v16099_v25 = vld [vmem:[#allocation320_spill] sm:$0xff]  ;;  %v8267_v34 = vld [vmem:[%s16196_s26 + $0x1e] sm:$0x3] }
 0xcab   : > { %16088 = vst [vmem:[#allocation49_spill] sm:$0xff] %v11868_v42  ;;  %16089 = vst [vmem:[#allocation83_spill] sm:$0xff] %v11870_v31  ;;  %v3446_v31 = vsel %vm15506_vm12, %v16086_v41, %v16087_v26  ;;  %v16096_v42 = vld [vmem:[#allocation86_spill] sm:$0xff]  ;;  %7234 = vperm.xlu0 %8941, %v8809_v5   ;;  %v11901_v17 = vmul.f32 %v16093_v10, %v3398_v19  ;;  %v11904_v41 = vmul.f32 %v16099_v25, %v3447_v60  ;;  %v16101_v26 = vld [vmem:[#allocation321_spill] sm:$0xff] }
 0xcac   : > { %16090 = vst [vmem:[#allocation326_spill] sm:$0xff] %v11873_v22  ;;  %16092 = vst [vmem:[#allocation316_spill] sm:$0xff] %v11876_v11  ;;  %v3493_v61 = vsel %vm15402_vm13, %v16097_v9, %v16096_v42  ;;  %v3495_v57 = vsel %vm15402_vm13, %v16096_v42, %v16097_v9  ;;  %v11907_v2 = vmul.f32 %v16101_v26, %v3445_v33  ;;  %v16104_v42 = vld [vmem:[#allocation87_spill] sm:$0xff]  ;;  %v16105_v9 = vld [vmem:[#allocation53_spill] sm:$0xff] }
 0xcad   : > { %16094 = vst [vmem:[#allocation317_spill] sm:$0xff] %v11879_v45  ;;  %16095 = vst [vmem:[#allocation84_spill] sm:$0xff] %v11882_v37  ;;  %v11910_v11 = vmul.f32 %v16099_v25, %v3448_v12  ;;  %v11912_v45 = vpop.f32.mrf.mxu0  ;;  %v3494_v47 = vsel %vm15402_vm13, %v16105_v9, %v16104_v42  ;;  %v3496_v10 = vsel %vm15402_vm13, %v16104_v42, %v16105_v9  ;;  %v16106_v19 = vld [vmem:[#allocation88_spill] sm:$0xff]  ;;  %v16107_v60 = vld [vmem:[#allocation54_spill] sm:$0xff]  ;;  %v5277_v37 = vpop.f32.mrf.mxu1  ;;  %vm15409_vm13 = vcmp.lt.s32.totalorder %v9525_v14, 114 }
 0xcae   : > { %16098 = vst [vmem:[#allocation50_spill] sm:$0xff] %v11901_v17  ;;  %16100 = vst [vmem:[#allocation51_spill] sm:$0xff] %v11904_v41  ;;  %v3540_v33 = vsel %vm15405_vm4, %v16107_v60, %v16106_v19  ;;  %v3542_v12 = vsel %vm15405_vm4, %v16106_v19, %v16107_v60  ;;  %v11931_v5 = vmul.f32 %v16101_v26, %v3446_v31  ;;  %v16109_v25 = vld [vmem:[#allocation322_spill] sm:$0xff]  ;;  %v16113_v42 = vld [vmem:[#allocation55_spill] sm:$0xff]  ;;  %v11958_v60 = vpop.permute.xlu1 %3633  ;;  %7229 = vperm.xlu1 %8942, %v5277_v37  }
 0xcaf   : > { %16102 = vst [vmem:[#allocation85_spill] sm:$0xff] %v11907_v2  ;;  %16103 = vst [vmem:[#allocation318_spill] sm:$0xff] %v11910_v11  ;;  %v11934_v41 = vmul.f32 %v16109_v25, %v3495_v57  ;;  %v16111_v2 = vld [vmem:[#allocation323_spill] sm:$0xff]  ;;  %v16114_v9 = vld [vmem:[#allocation89_spill] sm:$0xff]  ;;  %v11943_v22 = vpop.f32.mrf.mxu0  ;;  %5792 = vperm.xlu0 %8941, %v11548_v32   ;;  %v12474_v29 = vrot.slane %v8266_v21, %v9527_v23  ;;  %v12477_v35 = vrot.slane %v8266_v21, %v9530_v28 }
 0xcb0   : > { %16108 = vst [vmem:[#allocation319_spill] sm:$0xff] %v11931_v5  ;;  %v11937_v11 = vmul.f32 %v16111_v2, %v3493_v61  ;;  %v3543_v17 = vsel %vm15405_vm4, %v16114_v9, %v16113_v42  ;;  %v3541_v31 = vsel %vm15405_vm4, %v16113_v42, %v16114_v9  ;;  %v16115_v26 = vld [vmem:[#allocation90_spill] sm:$0xff]  ;;  %v16116_v19 = vld [vmem:[#allocation56_spill] sm:$0xff]  ;;  %16117 = vst [vmem:[#allocation320_spill] sm:$0xff] %v11958_v60  ;;  %vm15413_vm4 = vcmp.lt.s32.totalorder %v9525_v14, 110 }
 0xcb1   : > { %16110 = vst [vmem:[#allocation86_spill] sm:$0xff] %v11934_v41  ;;  %v3605_v57 = vsel %vm15406_vm5, %v16116_v19, %v16115_v26  ;;  %v3607_v61 = vsel %vm15406_vm5, %v16115_v26, %v16116_v19  ;;  %v11960_v41 = vpop.permute.xlu0 %3628  ;;  %v11964_v42 = vmul.f32 %v16109_v25, %v3496_v10  ;;  %v11967_v9 = vmul.f32 %v16111_v2, %v3494_v47  ;;  %v11975_v19 = vpop.f32.mrf.mxu0  ;;  %v16126_v37 = vld [vmem:[#allocation92_spill] sm:$0xff]  ;;  %v16128_v47 = vld [vmem:[#allocation93_spill] sm:$0xff]  ;;  %v16129_v10 = vld [vmem:[#allocation58_spill] sm:$0xff] }
 0xcb2   : > { %16112 = vst [vmem:[#allocation52_spill] sm:$0xff] %v11937_v11  ;;  %16118 = vst [vmem:[#allocation321_spill] sm:$0xff] %v11960_v41  ;;  %v16121_v11 = vld [vmem:[#allocation324_spill] sm:$0xff]  ;;  %v11973_v26 = vmul.f32 %v16123_v51, %v3540_v33  ;;  %v16127_v41 = vld [vmem:[#allocation57_spill] sm:$0xff]  ;;  %v3653_v33 = vsel %vm15451_vm3, %v16129_v10, %v16128_v47  ;;  %5845 = vperm.xlu1 %8942, %v11577_v40   ;;  %v12483_v24 = vrot.slane %v8267_v34, %v9530_v28 }
 0xcb3   : > { %16119 = vst [vmem:[#allocation87_spill] sm:$0xff] %v11964_v42  ;;  %16120 = vst [vmem:[#allocation53_spill] sm:$0xff] %v11967_v9  ;;  %v11970_v5 = vmul.f32 %v16121_v11, %v3542_v12  ;;  %v11978_v60 = vmul.f32 %v16121_v11, %v3543_v17  ;;  %v3606_v32 = vsel %vm15406_vm5, %v16127_v41, %v16126_v37  ;;  %v16131_v17 = vld [vmem:[#allocation327_spill] sm:$0xff]  ;;  %v16133_v25 = vld [vmem:[#allocation328_spill] sm:$0xff] }
 0xcb4   : > { %16124 = vst [vmem:[#allocation54_spill] sm:$0xff] %v11973_v26  ;;  %v3608_v2 = vsel %vm15406_vm5, %v16126_v37, %v16127_v41  ;;  %v11994_v11 = vmul.f32 %v16123_v51, %v3541_v31  ;;  %v11997_v12 = vmul.f32 %v16131_v17, %v3605_v57  ;;  %v3655_v41 = vsel %vm15451_vm3, %v16128_v47, %v16129_v10  ;;  %v8812_v37 = vpop.f32.mrf.mxu1  ;;  %v12006_v26 = vpop.f32.mrf.mxu0  ;;  %v16136_v9 = vld [vmem:[#allocation59_spill] sm:$0xff]  ;;  %v16143_v42 = vld [vmem:[#allocation330_spill] sm:$0xff]  ;;  %v16145_v40 = vld [vmem:[#allocation96_spill] sm:$0xff] }
 0xcb5   : > { %16122 = vst [vmem:[#allocation88_spill] sm:$0xff] %v11970_v5  ;;  %16125 = vst [vmem:[#allocation322_spill] sm:$0xff] %v11978_v60  ;;  %v12000_v5 = vmul.f32 %v16133_v25, %v3607_v61  ;;  %v16135_v60 = vld [vmem:[#allocation94_spill] sm:$0xff]  ;;  %v16137_v57 = vld [vmem:[#allocation95_spill] sm:$0xff]  ;;  %vm15424_vm5 = vcmp.lt.s32.totalorder %v9525_v14, 98  ;;  %7281 = vperm.xlu0 %8941, %v8812_v37   ;;  %v12023_v47 = vmul.f32 %v16131_v17, %v3606_v32 }
 0xcb6   : > { %16130 = vst [vmem:[#allocation323_spill] sm:$0xff] %v11994_v11  ;;  %16132 = vst [vmem:[#allocation55_spill] sm:$0xff] %v11997_v12  ;;  %v3654_v51 = vsel %vm15451_vm3, %v16136_v9, %v16135_v60  ;;  %v3656_v31 = vsel %vm15451_vm3, %v16135_v60, %v16136_v9  ;;  %v16138_v61 = vld [vmem:[#allocation60_spill] sm:$0xff]  ;;  %v12026_v10 = vmul.f32 %v16133_v25, %v3608_v2  ;;  %v12035_v9 = vpop.f32.mrf.mxu0  ;;  %v16146_v37 = vld [vmem:[#allocation61_spill] sm:$0xff]  ;;  %vm5768_vm3 = vcmp.lt.s32.totalorder %v9525_v14, 45 }
 0xcb7   : > { %16134 = vst [vmem:[#allocation89_spill] sm:$0xff] %v12000_v5  ;;  %v3701_v12 = vsel %vm15409_vm13, %v16138_v61, %v16137_v57  ;;  %16139 = vst [vmem:[#allocation90_spill] sm:$0xff] %v12023_v47  ;;  %v16141_v5 = vld [vmem:[#allocation329_spill] sm:$0xff]  ;;  %v3703_v60 = vsel %vm15409_vm13, %v16137_v57, %v16138_v61  ;;  %v12038_v38 = vmul.f32 %v16143_v42, %v3655_v41  ;;  %v16148_v17 = vld [vmem:[#allocation62_spill] sm:$0xff]  ;;  %v12052_v57 = vpop.permute.xlu1 %3681  ;;  %v12054_v61 = vpop.permute.xlu0 %3676 }
 0xcb8   : > { %16140 = vst [vmem:[#allocation56_spill] sm:$0xff] %v12026_v10  ;;  %v12029_v11 = vmul.f32 %v16141_v5, %v3653_v33  ;;  %v3702_v32 = vsel %vm15409_vm13, %v16146_v37, %v16145_v40  ;;  %v3704_v2 = vsel %vm15409_vm13, %v16145_v40, %v16146_v37  ;;  %v16147_v33 = vld [vmem:[#allocation97_spill] sm:$0xff]  ;;  %16149 = vst [vmem:[#allocation92_spill] sm:$0xff] %v12052_v57  ;;  %v5287_v37 = vpop.f32.mrf.mxu1  ;;  %v12069_v10 = vpop.f32.mrf.mxu0  ;;  %vm15415_vm13 = vcmp.lt.s32.totalorder %v9525_v14, 97  ;;  %v8268_v20 = vld [vmem:[%s16196_s26 + $0x20] sm:$0x3] }
 0xcb9   : > { %16144 = vst [vmem:[#allocation325_spill] sm:$0xff] %v12038_v38  ;;  %v3748_v25 = vsel %vm15432_vm6, %v16148_v17, %v16147_v33  ;;  %16150 = vst [vmem:[#allocation57_spill] sm:$0xff] %v12054_v61  ;;  %v12057_v41 = vmul.f32 %v16141_v5, %v3654_v51  ;;  %v12063_v38 = vmul.f32 %v11509_v27, %v3701_v12  ;;  %v16154_v57 = vld [vmem:[#allocation333_spill] sm:$0xff]  ;;  %v16156_v61 = vld [vmem:[#allocation98_spill] sm:$0xff]  ;;  %7276 = vperm.xlu1 %8942, %v5287_v37  }
 0xcba   : > { %16142 = vst [vmem:[#allocation324_spill] sm:$0xff] %v12029_v11  ;;  %v12060_v11 = vmul.f32 %v16143_v42, %v3656_v31  ;;  %v3750_v40 = vsel %vm15432_vm6, %v16147_v33, %v16148_v17  ;;  %v12072_v47 = vmul.f32 %v16154_v57, %v3703_v60  ;;  %v16157_v5 = vld [vmem:[#allocation63_spill] sm:$0xff]  ;;  %5840 = vperm.xlu0 %8941, %v11609_v43   ;;  %v16160_v60 = vld [vmem:[#allocation334_spill] sm:$0xff]  ;;  %v16167_v43 = vld [vmem:[#allocation100_spill] sm:$0xff] }
 0xcbb   : > { %16151 = vst [vmem:[#allocation93_spill] sm:$0xff] %v12057_v41  ;;  %16153 = vst [vmem:[#allocation327_spill] sm:$0xff] %v12063_v38  ;;  %v3749_v42 = vsel %vm15432_vm6, %v16157_v5, %v16156_v61  ;;  %v3751_v12 = vsel %vm15432_vm6, %v16156_v61, %v16157_v5  ;;  %v12085_v51 = vmul.f32 %v11509_v27, %v3702_v32  ;;  %v16162_v17 = vld [vmem:[#allocation99_spill] sm:$0xff]  ;;  %v16163_v38 = vld [vmem:[#allocation64_spill] sm:$0xff]  ;;  %v12097_v61 = vpop.f32.mrf.mxu0  ;;  %vm5720_vm6 = vcmp.lt.s32.totalorder %v9525_v14, 46 }
 0xcbc   : > { %16152 = vst [vmem:[#allocation58_spill] sm:$0xff] %v12060_v11  ;;  %16155 = vst [vmem:[#allocation328_spill] sm:$0xff] %v12072_v47  ;;  %v12088_v31 = vmul.f32 %v16154_v57, %v3704_v2  ;;  %v12091_v33 = vmul.f32 %v16160_v60, %v3748_v25  ;;  %v3795_v47 = vsel %vm15410_vm7, %v16163_v38, %v16162_v17  ;;  %v16165_v5 = vld [vmem:[#allocation335_spill] sm:$0xff]  ;;  %v16168_v32 = vld [vmem:[#allocation65_spill] sm:$0xff] }
 0xcbd   : > { %16158 = vst [vmem:[#allocation94_spill] sm:$0xff] %v12085_v51  ;;  %16164 = vst [vmem:[#allocation60_spill] sm:$0xff] %v12097_v61  ;;  %v12100_v37 = vmul.f32 %v16165_v5, %v3750_v40  ;;  %v3797_v27 = vsel %vm15410_vm7, %v16162_v17, %v16163_v38  ;;  %v3796_v2 = vsel %vm15410_vm7, %v16168_v32, %v16167_v43  ;;  %v12128_v51 = vpop.f32.mrf.mxu0  ;;  %5892 = vperm.xlu1 %8942, %v11639_v3   ;;  %v16183_v11 = vld [vmem:[#allocation68_spill] sm:$0xff] }
 0xcbe   : > { %16159 = vst [vmem:[#allocation59_spill] sm:$0xff] %v12088_v31  ;;  %16161 = vst [vmem:[#allocation95_spill] sm:$0xff] %v12091_v33  ;;  %v3798_v25 = vsel %vm15410_vm7, %v16167_v43, %v16168_v32  ;;  %v12115_v57 = vmul.f32 %v16160_v60, %v3749_v42  ;;  %v12118_v40 = vmul.f32 %v16165_v5, %v3751_v12  ;;  %v16171_v33 = vld [vmem:[#allocation101_spill] sm:$0xff]  ;;  %v8815_v31 = vpop.f32.mrf.mxu1  ;;  %v16173_v43 = vld [vmem:[#allocation336_spill] sm:$0xff]  ;;  %vm15423_vm7 = vcmp.lt.s32.totalorder %v9525_v14, 96 }
 0xcbf   : > { %16166 = vst [vmem:[#allocation329_spill] sm:$0xff] %v12100_v37  ;;  %v16172_v37 = vld [vmem:[#allocation66_spill] sm:$0xff]  ;;  %v12131_v32 = vmul.f32 %v16173_v43, %v3795_v47  ;;  %v16176_v60 = vld [vmem:[#allocation67_spill] sm:$0xff]  ;;  %7328 = vperm.xlu0 %8941, %v8815_v31   ;;  %16280 = vst [vmem:[#allocation394_spill] sm:$0xff] %v12474_v29  ;;  %v12492_v58 = vrot.slane %v8268_v20, %v9527_v23  ;;  %v12495_v21 = vrot.slane %v8268_v20, %v9530_v28 }
 0xcc0   : > { %16169 = vst [vmem:[#allocation330_spill] sm:$0xff] %v12115_v57  ;;  %16170 = vst [vmem:[#allocation96_spill] sm:$0xff] %v12118_v40  ;;  %v3842_v38 = vsel %vm15427_vm8, %v16172_v37, %v16171_v33  ;;  %v3844_v17 = vsel %vm15427_vm8, %v16171_v33, %v16172_v37  ;;  %v16175_v42 = vld [vmem:[#allocation102_spill] sm:$0xff]  ;;  %v12142_v40 = vpop.permute.xlu1 %3729  ;;  %v16178_v33 = vld [vmem:[#allocation337_spill] sm:$0xff]  ;;  %v12149_v37 = vmul.f32 %v16173_v43, %v3796_v2 }
 0xcc1   : > { %16174 = vst [vmem:[#allocation61_spill] sm:$0xff] %v12131_v32  ;;  %v3843_v12 = vsel %vm15427_vm8, %v16176_v60, %v16175_v42  ;;  %v3845_v5 = vsel %vm15427_vm8, %v16175_v42, %v16176_v60  ;;  %16177 = vst [vmem:[#allocation97_spill] sm:$0xff] %v12142_v40  ;;  %v12146_v47 = vmul.f32 %v16178_v33, %v3797_v27  ;;  %v16182_v57 = vld [vmem:[#allocation103_spill] sm:$0xff]  ;;  %v12158_v60 = vpop.permute.xlu0 %3724  ;;  %v12160_v40 = vpop.f32.mrf.mxu0  ;;  %v16187_v31 = vld [vmem:[#allocation338_spill] sm:$0xff]  ;;  %vm15467_vm8 = vcmp.lt.s32.totalorder %v9525_v14, 47 }
 0xcc2   : > { %16180 = vst [vmem:[#allocation333_spill] sm:$0xff] %v12149_v37  ;;  %v12152_v32 = vmul.f32 %v16178_v33, %v3798_v25  ;;  %v3890_v42 = vsel %vm15413_vm4, %v16183_v11, %v16182_v57  ;;  %16184 = vst [vmem:[#allocation63_spill] sm:$0xff] %v12158_v60  ;;  %v12163_v3 = vmul.f32 %v11531_v36, %v3842_v38  ;;  %v16189_v25 = vld [vmem:[#allocation104_spill] sm:$0xff]  ;;  %v16190_v43 = vld [vmem:[#allocation70_spill] sm:$0xff] }
 0xcc3   : > { %16179 = vst [vmem:[#allocation62_spill] sm:$0xff] %v12146_v47  ;;  %16185 = vst [vmem:[#allocation334_spill] sm:$0xff] %v12160_v40  ;;  %v12166_v27 = vmul.f32 %v16187_v31, %v3844_v17  ;;  %v3892_v2 = vsel %vm15413_vm4, %v16182_v57, %v16183_v11  ;;  %v3891_v33 = vsel %vm15413_vm4, %v16190_v43, %v16189_v25  ;;  %v16193_v17 = vld [vmem:[#allocation105_spill] sm:$0xff]  ;;  %v5297_v57 = vpop.f32.mrf.mxu1  ;;  %5887 = vperm.xlu0 %8941, %v11667_v16   ;;  %v16212_v37 = vld [vmem:[#allocation342_spill] sm:$0xff] }
 0xcc4   : > { %16181 = vst [vmem:[#allocation98_spill] sm:$0xff] %v12152_v32  ;;  %16186 = vst [vmem:[#allocation99_spill] sm:$0xff] %v12163_v3  ;;  %v12177_v47 = vmul.f32 %v11531_v36, %v3843_v12  ;;  %v12180_v32 = vmul.f32 %v16187_v31, %v3845_v5  ;;  %v3893_v38 = vsel %vm15413_vm4, %v16189_v25, %v16190_v43  ;;  %v16194_v3 = vld [vmem:[#allocation71_spill] sm:$0xff]  ;;  %v16198_v12 = vld [vmem:[#allocation106_spill] sm:$0xff]  ;;  %vm15422_vm4 = vcmp.lt.s32.totalorder %v9525_v14, 95 }
 0xcc5   : > { %16188 = vst [vmem:[#allocation64_spill] sm:$0xff] %v12166_v27  ;;  %v3938_v11 = vsel %vm15424_vm5, %v16194_v3, %v16193_v17  ;;  %v16195_v27 = vld [vmem:[#allocation339_spill] sm:$0xff]  ;;  %v3940_v36 = vsel %vm15424_vm5, %v16193_v17, %v16194_v3  ;;  %v16199_v5 = vld [vmem:[#allocation72_spill] sm:$0xff]  ;;  %7323 = vperm.xlu1 %8942, %v5297_v57   ;;  %v8818_v41 = vpop.f32.mrf.mxu1  ;;  %16281 = vst [vmem:[#allocation395_spill] sm:$0xff] %v12477_v35  ;;  %v12514_v20 = vrot.slane %v8270_v6, %v9530_v28 }
 0xcc6   : > { %16191 = vst [vmem:[#allocation335_spill] sm:$0xff] %v12177_v47  ;;  %16192 = vst [vmem:[#allocation100_spill] sm:$0xff] %v12180_v32  ;;  %v12191_v60 = vmul.f32 %v16195_v27, %v3890_v42  ;;  %v3939_v31 = vsel %vm15424_vm5, %v16199_v5, %v16198_v12  ;;  %v16200_v25 = vld [vmem:[#allocation340_spill] sm:$0xff]  ;;  %v12207_v42 = vmul.f32 %v16195_v27, %v3891_v33  ;;  %v16203_v17 = vld [vmem:[#allocation107_spill] sm:$0xff]  ;;  %v12217_v47 = vpop.f32.mrf.mxu0 }
 0xcc7   : > { %v12204_v43 = vmul.f32 %v16200_v25, %v3892_v2  ;;  %v3941_v3 = vsel %vm15424_vm5, %v16198_v12, %v16199_v5  ;;  %16205 = vst [vmem:[#allocation336_spill] sm:$0xff] %v12217_v47  ;;  %v12220_v16 = vmul.f32 %v16200_v25, %v3893_v38  ;;  %v16207_v2 = vld [vmem:[#allocation341_spill] sm:$0xff]  ;;  %v16209_v33 = vld [vmem:[#allocation108_spill] sm:$0xff]  ;;  %v16210_v12 = vld [vmem:[#allocation74_spill] sm:$0xff]  ;;  %v12237_v38 = vmul.f32 %v16212_v37, %v3940_v36 }
 0xcc8   : > { %16197 = vst [vmem:[#allocation65_spill] sm:$0xff] %v12191_v60  ;;  %16202 = vst [vmem:[#allocation66_spill] sm:$0xff] %v12207_v42  ;;  %v16204_v60 = vld [vmem:[#allocation73_spill] sm:$0xff]  ;;  %v12223_v57 = vmul.f32 %v16207_v2, %v3938_v11  ;;  %v3987_v5 = vsel %vm15415_vm13, %v16210_v12, %v16209_v33  ;;  %v12234_v42 = vpop.permute.xlu1 %3776  ;;  %v12240_v25 = vmul.f32 %v16207_v2, %v3939_v31  ;;  %v16219_v36 = vld [vmem:[#allocation343_spill] sm:$0xff]  ;;  %7375 = vperm.xlu0 %8941, %v8818_v41  }
 0xcc9   : > { %16201 = vst [vmem:[#allocation101_spill] sm:$0xff] %v12204_v43  ;;  %v3986_v32 = vsel %vm15415_vm13, %v16204_v60, %v16203_v17  ;;  %16206 = vst [vmem:[#allocation102_spill] sm:$0xff] %v12220_v16  ;;  %v3988_v27 = vsel %vm15415_vm13, %v16203_v17, %v16204_v60  ;;  %v5490_v43 = vld [vmem:[%s16196_s26] sm:$0x3]  ;;  %v3989_v11 = vsel %vm15415_vm13, %v16209_v33, %v16210_v12  ;;  %v16215_v60 = vld [vmem:[#allocation109_spill] sm:$0xff]  ;;  %v12250_v16 = vpop.permute.xlu0 %3771  ;;  %vm15420_vm13 = vcmp.lt.s32.totalorder %v9525_v14, 94 }
 0xcca   : > { %16208 = vst [vmem:[#allocation67_spill] sm:$0xff] %v12223_v57  ;;  %16211 = vst [vmem:[#allocation337_spill] sm:$0xff] %v12234_v42  ;;  %v16216_v17 = vld [vmem:[#allocation75_spill] sm:$0xff]  ;;  %v12253_v42 = vmul.f32 %v16212_v37, %v3941_v3  ;;  %v8253_v2 = vld [vmem:[%s16196_s26 + $0x2] sm:$0x3]  ;;  %5939 = vperm.xlu1 %8942, %v11702_v1   ;;  %v12269_v37 = vmul.f32 %v16219_v36, %v3987_v5  ;;  %v12275_v3 = vrot.slane %v5490_v43, %v9530_v28 }
 0xccb   : > { %16213 = vst [vmem:[#allocation103_spill] sm:$0xff] %v12237_v38  ;;  %16214 = vst [vmem:[#allocation68_spill] sm:$0xff] %v12240_v25  ;;  %v4034_v57 = vsel %vm15423_vm7, %v16216_v17, %v16215_v60  ;;  %v12256_v38 = vmul.f32 %v16219_v36, %v3986_v32  ;;  %v4036_v31 = vsel %vm15423_vm7, %v16215_v60, %v16216_v17  ;;  %v16221_v33 = vld [vmem:[#allocation344_spill] sm:$0xff]  ;;  %v12277_v60 = vpop.f32.mrf.mxu0  ;;  %v16227_v1 = vld [vmem:[#allocation345_spill] sm:$0xff]  ;;  %vm5624_vm5 = vcmp.lt.s32.totalorder %v9525_v14, 48 }
 0xccc   : > { %16217 = vst [vmem:[#allocation338_spill] sm:$0xff] %v12250_v16  ;;  %16218 = vst [vmem:[#allocation104_spill] sm:$0xff] %v12253_v42  ;;  %v12266_v12 = vmul.f32 %v16221_v33, %v3988_v27  ;;  %v12272_v32 = vrot.slane %v5490_v43, %v9527_v23  ;;  %v12280_v17 = vmul.f32 %v16221_v33, %v3989_v11  ;;  %v16229_v27 = vld [vmem:[#allocation110_spill] sm:$0xff]  ;;  %v16234_v42 = vld [vmem:[#allocation77_spill] sm:$0xff]  ;;  %5934 = vperm.xlu0 %8941, %v11729_v49  }
 0xccd   : > { %16220 = vst [vmem:[#allocation70_spill] sm:$0xff] %v12256_v38  ;;  %16223 = vst [vmem:[#allocation71_spill] sm:$0xff] %v12269_v37  ;;  %v12283_v41 = vmul.f32 %v16227_v1, %v4034_v57  ;;  %v16230_v38 = vld [vmem:[#allocation76_spill] sm:$0xff]  ;;  %v16231_v43 = vld [vmem:[#allocation346_spill] sm:$0xff]  ;;  %v12305_v33 = vrot.slane %v8253_v2, %v9527_v23  ;;  %v12337_v49 = vpop.permute.xlu0 %3818 }
 0xcce   : > { %16222 = vst [vmem:[#allocation105_spill] sm:$0xff] %v12266_v12  ;;  %16224 = vst [vmem:[#allocation339_spill] sm:$0xff] %v12272_v32  ;;  %v4035_v5 = vsel %vm15423_vm7, %v16230_v38, %v16229_v27  ;;  %v4037_v36 = vsel %vm15423_vm7, %v16229_v27, %v16230_v38  ;;  %v12294_v12 = vmul.f32 %v16231_v43, %v4036_v31  ;;  %v16233_v37 = vld [vmem:[#allocation111_spill] sm:$0xff]  ;;  %v16236_v38 = vld [vmem:[#allocation78_spill] sm:$0xff]  ;;  %vm15460_vm7 = vcmp.lt.s32.totalorder %v9525_v14, 49 }
 0xccf   : > { %16225 = vst [vmem:[#allocation106_spill] sm:$0xff] %v12277_v60  ;;  %16226 = vst [vmem:[#allocation72_spill] sm:$0xff] %v12280_v17  ;;  %v4082_v57 = vsel %vm15422_vm4, %v16234_v42, %v16233_v37  ;;  %v4084_v11 = vsel %vm15422_vm4, %v16233_v37, %v16234_v42  ;;  %v16235_v17 = vld [vmem:[#allocation112_spill] sm:$0xff]  ;;  %v12319_v42 = vpop.permute.xlu1 %3823  ;;  %v12323_v37 = vmul.f32 %v16227_v1, %v4035_v5  ;;  %v12339_v1 = vpop.f32.mrf.mxu0  ;;  %v16245_v5 = vld [vmem:[#allocation347_spill] sm:$0xff] }
 0xcd0   : > { %16228 = vst [vmem:[#allocation340_spill] sm:$0xff] %v12283_v41  ;;  %16232 = vst [vmem:[#allocation107_spill] sm:$0xff] %v12294_v12  ;;  %v5307_v41 = vpop.f32.mrf.mxu1  ;;  %v4083_v31 = vsel %vm15422_vm4, %v16236_v38, %v16235_v17  ;;  %v4085_v27 = vsel %vm15422_vm4, %v16235_v17, %v16236_v38  ;;  %v12316_v12 = vrot.slane %v8253_v2, %v9530_v28  ;;  %v8254_v25 = vld [vmem:[%s16196_s26 + $0x4] sm:$0x3]  ;;  %v16248_v38 = vld [vmem:[#allocation115_spill] sm:$0xff]  ;;  %vm5528_vm4 = vcmp.lt.s32.totalorder %v9525_v14, 50 }
 0xcd1   : > { %16238 = vst [vmem:[#allocation341_spill] sm:$0xff] %v12319_v42  ;;  %7370 = vperm.xlu1 %8942, %v5307_v41   ;;  %16239 = vst [vmem:[#allocation108_spill] sm:$0xff] %v12323_v37  ;;  %v12326_v16 = vmul.f32 %v16231_v43, %v4037_v36  ;;  %v4130_v2 = vsel %vm15420_vm13, %v16242_v44, %v16241_v7  ;;  %v4132_v17 = vsel %vm15420_vm13, %v16241_v7, %v16242_v44  ;;  %v8255_v41 = vld [vmem:[%s16196_s26 + $0x6] sm:$0x3]  ;;  %v8256_v44 = vld [vmem:[%s16196_s26 + $0x8] sm:$0x3] }
 0xcd2   : > { %16237 = vst [vmem:[#allocation73_spill] sm:$0xff] %v12316_v12  ;;  %16243 = vst [vmem:[#allocation342_spill] sm:$0xff] %v12337_v49  ;;  %v12342_v36 = vmul.f32 %v16245_v5, %v4082_v57  ;;  %v12345_v43 = vmul.f32 %v11601_v52, %v4084_v11  ;;  %v12357_v49 = vmul.f32 %v16245_v5, %v4083_v31  ;;  %v8257_v42 = vld [vmem:[%s16196_s26 + $0xa] sm:$0x3]  ;;  %v8278_v47 = vld [vmem:[%s16196_s26 + $0x36] sm:$0x3] }
 0xcd3   : > { %16240 = vst [vmem:[#allocation74_spill] sm:$0xff] %v12326_v16  ;;  %16244 = vst [vmem:[#allocation109_spill] sm:$0xff] %v12339_v1  ;;  %v16249_v16 = vld [vmem:[#allocation80_spill] sm:$0xff]  ;;  %v12360_v57 = vmul.f32 %v11601_v52, %v4085_v27  ;;  %v12363_v11 = vrot.slane %v8254_v25, %v9527_v23  ;;  %v12371_v55 = vmul.f32 %v11604_v59, %v4130_v2  ;;  %v8259_v52 = vld [vmem:[%s16196_s26 + $0xe] sm:$0x3] }
 0xcd4   : > { %16246 = vst [vmem:[#allocation75_spill] sm:$0xff] %v12342_v36  ;;  %16247 = vst [vmem:[#allocation343_spill] sm:$0xff] %v12345_v43  ;;  %v4131_v37 = vsel %vm15420_vm13, %v16249_v16, %v16248_v38  ;;  %v4133_v7 = vsel %vm15420_vm13, %v16248_v38, %v16249_v16  ;;  %v12366_v36 = vrot.slane %v8254_v25, %v9530_v28  ;;  %v8821_v43 = vpop.f32.mrf.mxu1  ;;  %v8260_v25 = vld [vmem:[%s16196_s26 + $0x10] sm:$0x3]  ;;  %vm5485_vm13 = vcmp.lt.s32.totalorder %v9525_v14, 51 }
 0xcd5   : > { %16250 = vst [vmem:[#allocation344_spill] sm:$0xff] %v12357_v49  ;;  %16251 = vst [vmem:[#allocation345_spill] sm:$0xff] %v12360_v57  ;;  %v12374_v16 = vmul.f32 %v11607_v62, %v4132_v17  ;;  %v12377_v31 = vrot.slane %v8255_v41, %v9527_v23  ;;  %5986 = vperm.xlu1 %8942, %v11759_v0   ;;  %7423 = vperm.xlu0 %8941, %v8821_v43   ;;  %v12391_v17 = vpop.f32.mrf.mxu0  ;;  %v8261_v0 = vld [vmem:[%s16196_s26 + $0x12] sm:$0x3]  ;;  %v12397_v43 = vpop.permute.xlu1 %3870  ;;  %v8264_v49 = vld [vmem:[%s16196_s26 + $0x18] sm:$0x3] }
 0xcd6   : > { %16252 = vst [vmem:[#allocation110_spill] sm:$0xff] %v12363_v11  ;;  %16253 = vst [vmem:[#allocation76_spill] sm:$0xff] %v12366_v36  ;;  %v12383_v27 = vmul.f32 %v11604_v59, %v4131_v37  ;;  %v12386_v5 = vmul.f32 %v11607_v62, %v4133_v7  ;;  %v12389_v2 = vrot.slane %v8255_v41, %v9530_v28  ;;  %v8262_v41 = vld [vmem:[%s16196_s26 + $0x14] sm:$0x3]  ;;  %v8263_v7 = vld [vmem:[%s16196_s26 + $0x16] sm:$0x3] }
 0xcd7   : > { %16254 = vst [vmem:[#allocation346_spill] sm:$0xff] %v12371_v55  ;;  %16255 = vst [vmem:[#allocation111_spill] sm:$0xff] %v12374_v16  ;;  %v12394_v38 = vrot.slane %v8256_v44, %v9527_v23  ;;  %v12400_v55 = vrot.slane %v8256_v44, %v9530_v28  ;;  %v12403_v59 = vrot.slane %v8257_v42, %v9527_v23  ;;  %v12413_v16 = vpop.permute.xlu0 %3865  ;;  %v12443_v39 = vpop.f32.mrf.mxu0  ;;  %v8276_v1 = vld [vmem:[%s16196_s26 + $0x32] sm:$0x3] }
 0xcd8   : > { %16256 = vst [vmem:[#allocation77_spill] sm:$0xff] %v12377_v31  ;;  %16257 = vst [vmem:[#allocation112_spill] sm:$0xff] %v12383_v27  ;;  %v12406_v62 = vrot.slane %v8257_v42, %v9530_v28  ;;  %v12409_v37 = vrot.slane %v8258_v8, %v9527_v23  ;;  %v12416_v27 = vrot.slane %v8258_v8, %v9530_v28 }
 0xcd9   : > { %16258 = vst [vmem:[#allocation78_spill] sm:$0xff] %v12386_v5  ;;  %16259 = vst [vmem:[#allocation114_spill] sm:$0xff] %v12389_v2  ;;  %v5317_v5 = vpop.f32.mrf.mxu1  ;;  %v12419_v44 = vrot.slane %v8259_v52, %v9527_v23  ;;  %v12422_v57 = vrot.slane %v8259_v52, %v9530_v28  ;;  %v12425_v42 = vrot.slane %v8260_v25, %v9527_v23  ;;  %5981 = vperm.xlu0 %8941, %v11791_v54   ;;  %v12488_v4 = vpop.permute.xlu1 %3918 }
 0xcda   : > { %16260 = vst [vmem:[#allocation79_spill] sm:$0xff] %v12391_v17  ;;  %16261 = vst [vmem:[#allocation347_spill] sm:$0xff] %v12397_v43  ;;  %v8265_v43 = vld [vmem:[%s16196_s26 + $0x1a] sm:$0x3]  ;;  %7418 = vperm.xlu1 %8942, %v5317_v5   ;;  %v12432_v8 = vrot.slane %v8260_v25, %v9530_v28  ;;  %v12438_v52 = vrot.slane %v8261_v0, %v9530_v28  ;;  %v12446_v5 = vrot.slane %v8262_v41, %v9527_v23  ;;  %v8275_v17 = vld [vmem:[%s16196_s26 + $0x2e] sm:$0x3] }
 0xcdb   : > { %16262 = vst [vmem:[#allocation115_spill] sm:$0xff] %v12400_v55  ;;  %16263 = vst [vmem:[#allocation80_spill] sm:$0xff] %v12403_v59  ;;  %v12449_v54 = vrot.slane %v8262_v41, %v9530_v28  ;;  %v12452_v25 = vrot.slane %v8263_v7, %v9527_v23  ;;  %v12460_v56 = vrot.slane %v8264_v49, %v9527_v23 }
 0xcdc   : > { %16264 = vst [vmem:[#allocation378_spill] sm:$0xff] %v12406_v62  ;;  %16265 = vst [vmem:[#allocation379_spill] sm:$0xff] %v12409_v37  ;;  %v12463_v30 = vrot.slane %v8264_v49, %v9530_v28  ;;  %v12466_v53 = vrot.slane %v8265_v43, %v9527_v23  ;;  %v12469_v41 = vrot.slane %v8265_v43, %v9530_v28  ;;  %v8273_v43 = vld [vmem:[%s16196_s26 + $0x2a] sm:$0x3] }
 0xcdd   : > { %16266 = vst [vmem:[#allocation380_spill] sm:$0xff] %v12413_v16  ;;  %16267 = vst [vmem:[#allocation381_spill] sm:$0xff] %v12416_v27  ;;  %v12435_v16 = vrot.slane %v8261_v0, %v9527_v23  ;;  %v12455_v0 = vrot.slane %v8263_v7, %v9530_v28  ;;  %v8824_v7 = vpop.f32.mrf.mxu1  ;;  %v12480_v49 = vrot.slane %v8267_v34, %v9527_v23 }
 0xcde   : > { %16268 = vst [vmem:[#allocation382_spill] sm:$0xff] %v12419_v44  ;;  %16269 = vst [vmem:[#allocation383_spill] sm:$0xff] %v12425_v42  ;;  %6033 = vperm.xlu1 %8942, %v11822_v48   ;;  %7471 = vperm.xlu0 %8941, %v8824_v7   ;;  %v12498_v34 = vrot.slane %v8269_v50, %v9527_v23  ;;  %v12508_v48 = vrot.slane %v8269_v50, %v9530_v28 }
 0xcdf   : > { %16270 = vst [vmem:[#allocation384_spill] sm:$0xff] %v12432_v8  ;;  %16271 = vst [vmem:[#allocation385_spill] sm:$0xff] %v12435_v16  ;;  %v12511_v7 = vrot.slane %v8270_v6, %v9527_v23  ;;  %v12517_v60 = vrot.slane %v8271_v18, %v9527_v23  ;;  %v12527_v50 = vrot.slane %v8272_v63, %v9530_v28  ;;  %v8277_v6 = vld [vmem:[%s16196_s26 + $0x34] sm:$0x3] }
 0xce0   : > { %16272 = vst [vmem:[#allocation386_spill] sm:$0xff] %v12438_v52  ;;  %16273 = vst [vmem:[#allocation387_spill] sm:$0xff] %v12443_v39  ;;  %v12503_v39 = vpop.permute.xlu0 %3913  ;;  %v12530_v40 = vrot.slane %v8273_v43, %v9527_v23  ;;  %v12536_v61 = vrot.slane %v8273_v43, %v9530_v28  ;;  %v12553_v43 = vrot.slane %v8275_v17, %v9530_v28 }
 0xce1   : > { %16274 = vst [vmem:[#allocation388_spill] sm:$0xff] %v12446_v5  ;;  %16275 = vst [vmem:[#allocation389_spill] sm:$0xff] %v12449_v54 }
 0xce2   : > { %16276 = vst [vmem:[#allocation390_spill] sm:$0xff] %v12460_v56  ;;  %16277 = vst [vmem:[#allocation391_spill] sm:$0xff] %v12463_v30  ;;  %6028 = vperm.xlu0 %8941, %v11850_v15   ;;  %v12571_v15 = vrot.slane %v8278_v47, %v9527_v23 }
 0xce3   : > { %16278 = vst [vmem:[#allocation392_spill] sm:$0xff] %v12466_v53  ;;  %16279 = vst [vmem:[#allocation393_spill] sm:$0xff] %v12469_v41 }
 0xce4   : > { %16282 = vst [vmem:[#allocation396_spill] sm:$0xff] %v12480_v49  ;;  %16283 = vst [vmem:[#allocation397_spill] sm:$0xff] %v12483_v24 }
 0xce5   : > { %16284 = vst [vmem:[#allocation398_spill] sm:$0xff] %v12488_v4  ;;  %16285 = vst [vmem:[#allocation399_spill] sm:$0xff] %v12492_v58  ;;  %v12505_v4 = vpop.f32.mrf.mxu0 }
 0xce6   : > { %16286 = vst [vmem:[#allocation400_spill] sm:$0xff] %v12495_v21  ;;  %16287 = vst [vmem:[#allocation401_spill] sm:$0xff] %v12498_v34 }
 0xce7   : > { %16288 = vst [vmem:[#allocation402_spill] sm:$0xff] %v12503_v39  ;;  %16289 = vst [vmem:[#allocation403_spill] sm:$0xff] %v12505_v4  ;;  %v12521_v39 = vrot.slane %v8271_v18, %v9530_v28  ;;  %v12524_v4 = vrot.slane %v8272_v63, %v9527_v23  ;;  %v12539_v18 = vrot.slane %v8274_v13, %v9527_v23 }
 0xce8   : > { %16290 = vst [vmem:[#allocation404_spill] sm:$0xff] %v12508_v48  ;;  %16291 = vst [vmem:[#allocation405_spill] sm:$0xff] %v12511_v7  ;;  %v12545_v63 = vrot.slane %v8275_v17, %v9527_v23  ;;  %v8283_v17 = vld [vmem:[%s16196_s26 + $0x40] sm:$0x3] }
 0xce9   : > { %16292 = vst [vmem:[#allocation406_spill] sm:$0xff] %v12514_v20  ;;  %16293 = vst [vmem:[#allocation407_spill] sm:$0xff] %v12517_v60  ;;  %v5327_v60 = vpop.f32.mrf.mxu1  ;;  %v12568_v20 = vrot.slane %v8277_v6, %v9530_v28 }
 0xcea   : > { %16294 = vst [vmem:[#allocation408_spill] sm:$0xff] %v12521_v39  ;;  %16295 = vst [vmem:[#allocation409_spill] sm:$0xff] %v12524_v4  ;;  %v12542_v4 = vrot.slane %v8274_v13, %v9530_v28  ;;  %v8282_v39 = vld [vmem:[%s16196_s26 + $0x3e] sm:$0x3]  ;;  %7466 = vperm.xlu1 %8942, %v5327_v60   ;;  %v12559_v13 = vrot.slane %v8276_v1, %v9530_v28  ;;  %v12574_v60 = vrot.slane %v8278_v47, %v9530_v28  ;;  %v16316_v47 = vld [vmem:[#allocation173_spill] sm:$0xff] }
 0xceb   : > { %16296 = vst [vmem:[#allocation410_spill] sm:$0xff] %v12527_v50  ;;  %16297 = vst [vmem:[#allocation411_spill] sm:$0xff] %v12530_v40  ;;  %v8279_v40 = vld [vmem:[%s16196_s26 + $0x38] sm:$0x3]  ;;  %v8280_v50 = vld [vmem:[%s16196_s26 + $0x3a] sm:$0x3] }
 0xcec   : > { %16298 = vst [vmem:[#allocation412_spill] sm:$0xff] %v12536_v61  ;;  %16299 = vst [vmem:[#allocation413_spill] sm:$0xff] %v12539_v18  ;;  %v12556_v18 = vrot.slane %v8276_v1, %v9527_v23  ;;  %v12565_v61 = vrot.slane %v8277_v6, %v9527_v23  ;;  %v12578_v1 = vpop.permute.xlu1 %3966  ;;  %v12587_v6 = vrot.slane %v8280_v50, %v9527_v23 }
 0xced   : > { %16300 = vst [vmem:[#allocation414_spill] sm:$0xff] %v12542_v4  ;;  %16301 = vst [vmem:[#allocation415_spill] sm:$0xff] %v12545_v63  ;;  %v8281_v63 = vld [vmem:[%s16196_s26 + $0x3c] sm:$0x3]  ;;  %v12562_v4 = vpop.f32.mrf.mxu0 }
 0xcee   : > { %16302 = vst [vmem:[#allocation416_spill] sm:$0xff] %v12553_v43  ;;  %16303 = vst [vmem:[#allocation417_spill] sm:$0xff] %v12556_v18  ;;  %v8284_v18 = vld [vmem:[%s16196_s26 + $0x42] sm:$0x3]  ;;  %6080 = vperm.xlu1 %8942, %v11884_v46  }
 0xcef   : > { %16304 = vst [vmem:[#allocation418_spill] sm:$0xff] %v12559_v13  ;;  %16305 = vst [vmem:[#allocation419_spill] sm:$0xff] %v12562_v4  ;;  %v12581_v13 = vrot.slane %v8279_v40, %v9527_v23  ;;  %v12584_v4 = vrot.slane %v8279_v40, %v9530_v28  ;;  %v12602_v40 = vrot.slane %v8281_v63, %v9527_v23 }
 0xcf0   : > { %16306 = vst [vmem:[#allocation420_spill] sm:$0xff] %v12565_v61  ;;  %16307 = vst [vmem:[#allocation421_spill] sm:$0xff] %v12568_v20  ;;  %v12590_v20 = vrot.slane %v8280_v50, %v9530_v28  ;;  %v12597_v61 = vrot.slane %v8282_v39, %v9527_v23 }
 0xcf1   : > { %16308 = vst [vmem:[#allocation422_spill] sm:$0xff] %v12571_v15  ;;  %16309 = vst [vmem:[#allocation423_spill] sm:$0xff] %v12574_v60  ;;  %v16315_v15 = vld [vmem:[#allocation116_spill] sm:$0xff] }
 0xcf2   : > { %16310 = vst [vmem:[#allocation424_spill] sm:$0xff] %v12578_v1  ;;  %16311 = vst [vmem:[#allocation425_spill] sm:$0xff] %v12581_v13  ;;  %v5488_v60 = vsel %vm5485_vm13, %v16316_v47, %v16315_v15  ;;  %v12599_v1 = vpop.permute.xlu0 %3961  ;;  %v8827_v13 = vpop.f32.mrf.mxu1  ;;  %v5486_v50 = vsel %vm5485_vm13, %v16315_v15, %v16316_v47  ;;  %v12626_v15 = vrot.slane %v8283_v17, %v9527_v23 }
 0xcf3   : > { %16312 = vst [vmem:[#allocation426_spill] sm:$0xff] %v12584_v4  ;;  %16313 = vst [vmem:[#allocation427_spill] sm:$0xff] %v12587_v6  ;;  %v12605_v4 = vrot.slane %v8281_v63, %v9530_v28  ;;  %v16322_v6 = vld [vmem:[#allocation175_spill] sm:$0xff]  ;;  %7519 = vperm.xlu0 %8941, %v8827_v13   ;;  %v12629_v47 = vrot.slane %v8283_v17, %v9530_v28  ;;  %v12637_v46 = vmul.f32 %v12272_v32, %v5488_v60  ;;  %v16329_v13 = vld [vmem:[#allocation177_spill] sm:$0xff] }
 0xcf4   : > { %16314 = vst [vmem:[#allocation428_spill] sm:$0xff] %v12590_v20  ;;  %16317 = vst [vmem:[#allocation116_spill] sm:$0xff] %v12597_v61  ;;  %v16321_v20 = vld [vmem:[#allocation118_spill] sm:$0xff]  ;;  %v12648_v17 = vrot.slane %v8284_v18, %v9530_v28  ;;  %v5337_v32 = vpop.f32.mrf.mxu1 }
 0xcf5   : > { %16318 = vst [vmem:[#allocation173_spill] sm:$0xff] %v12599_v1  ;;  %16319 = vst [vmem:[#allocation429_spill] sm:$0xff] %v12602_v40  ;;  %v5531_v61 = vsel %vm5528_vm4, %v16322_v6, %v16321_v20  ;;  %v12617_v1 = vrot.slane %v8282_v39, %v9530_v28  ;;  %v8285_v40 = vld [vmem:[%s16196_s26 + $0x44] sm:$0x3]  ;;  %v5529_v63 = vsel %vm5528_vm4, %v16321_v20, %v16322_v6  ;;  %v12634_v39 = vpop.f32.mrf.mxu0  ;;  %v8286_v6 = vld [vmem:[%s16196_s26 + $0x46] sm:$0x3]  ;;  %7514 = vperm.xlu1 %8942, %v5337_v32  }
 0xcf6   : > { %16320 = vst [vmem:[#allocation430_spill] sm:$0xff] %v12605_v4  ;;  %16324 = vst [vmem:[#allocation175_spill] sm:$0xff] %v12626_v15  ;;  %v12632_v4 = vrot.slane %v8284_v18, %v9527_v23  ;;  %v12655_v60 = vmul.f32 %v12305_v33, %v5531_v61  ;;  %v16337_v18 = vld [vmem:[#allocation179_spill] sm:$0xff]  ;;  %v16346_v32 = vld [vmem:[#allocation181_spill] sm:$0xff] }
 0xcf7   : > { %16323 = vst [vmem:[#allocation118_spill] sm:$0xff] %v12617_v1  ;;  %16325 = vst [vmem:[#allocation431_spill] sm:$0xff] %v12629_v47  ;;  %v16330_v1 = vld [vmem:[#allocation120_spill] sm:$0xff]  ;;  %v8287_v47 = vld [vmem:[%s16196_s26 + $0x48] sm:$0x3]  ;;  %6075 = vperm.xlu0 %8941, %v11912_v45  }
 0xcf8   : > { %16326 = vst [vmem:[#allocation432_spill] sm:$0xff] %v12632_v4  ;;  %16327 = vst [vmem:[#allocation433_spill] sm:$0xff] %v12634_v39  ;;  %v5577_v43 = vsel %vm15460_vm7, %v16330_v1, %v16329_v13  ;;  %v5579_v20 = vsel %vm15460_vm7, %v16329_v13, %v16330_v1  ;;  %v12652_v4 = vmul.f32 %v12275_v3, %v5486_v50  ;;  %v16338_v13 = vld [vmem:[#allocation122_spill] sm:$0xff]  ;;  %vm15475_vm7 = vcmp.lt.s32.totalorder %v9525_v14, 35 }
 0xcf9   : > { %16328 = vst [vmem:[#allocation434_spill] sm:$0xff] %v12637_v46  ;;  %16331 = vst [vmem:[#allocation177_spill] sm:$0xff] %v12648_v17  ;;  %v12658_v46 = vrot.slane %v8285_v40, %v9527_v23  ;;  %v12661_v39 = vrot.slane %v8285_v40, %v9530_v28  ;;  %v12665_v1 = vmul.f32 %v12316_v12, %v5529_v63  ;;  %v12676_v40 = vpop.permute.xlu1 %4014  ;;  %v16347_v12 = vld [vmem:[#allocation124_spill] sm:$0xff]  ;;  %6128 = vperm.xlu1 %8942, %v11943_v22  }
 0xcfa   : > { %16332 = vst [vmem:[#allocation120_spill] sm:$0xff] %v12652_v4  ;;  %16333 = vst [vmem:[#allocation435_spill] sm:$0xff] %v12655_v60  ;;  %v5625_v50 = vsel %vm5624_vm5, %v16338_v13, %v16337_v18  ;;  %v5627_v61 = vsel %vm5624_vm5, %v16337_v18, %v16338_v13  ;;  %v12680_v63 = vmul.f32 %v12363_v11, %v5579_v20  ;;  %v12691_v18 = vpop.permute.xlu0 %4009  ;;  %v12693_v13 = vpop.f32.mrf.mxu0  ;;  %v16353_v11 = vld [vmem:[#allocation126_spill] sm:$0xff] }
 0xcfb   : > { %16334 = vst [vmem:[#allocation436_spill] sm:$0xff] %v12658_v46  ;;  %16335 = vst [vmem:[#allocation437_spill] sm:$0xff] %v12661_v39  ;;  %v12683_v4 = vmul.f32 %v12366_v36, %v5577_v43  ;;  %v12689_v60 = vrot.slane %v8286_v6, %v9530_v28  ;;  %v5673_v45 = vsel %vm15467_vm8, %v16347_v12, %v16346_v32  ;;  %v16352_v36 = vld [vmem:[#allocation183_spill] sm:$0xff] }
 0xcfc   : > { %16336 = vst [vmem:[#allocation438_spill] sm:$0xff] %v12665_v1  ;;  %16339 = vst [vmem:[#allocation179_spill] sm:$0xff] %v12676_v40  ;;  %v12686_v1 = vrot.slane %v8286_v6, %v9527_v23  ;;  %v8288_v40 = vld [vmem:[%s16196_s26 + $0x4a] sm:$0x3]  ;;  %v5675_v43 = vsel %vm15467_vm8, %v16346_v32, %v16347_v12  ;;  %v12705_v20 = vrot.slane %v8287_v47, %v9527_v23  ;;  %v8830_v32 = vpop.f32.mrf.mxu1  ;;  %vm15491_vm8 = vcmp.lt.s32.totalorder %v9525_v14, 29 }
 0xcfd   : > { %16340 = vst [vmem:[#allocation122_spill] sm:$0xff] %v12680_v63  ;;  %16341 = vst [vmem:[#allocation439_spill] sm:$0xff] %v12683_v4  ;;  %v12708_v6 = vrot.slane %v8287_v47, %v9530_v28  ;;  %v12712_v4 = vmul.f32 %v12377_v31, %v5627_v61  ;;  %v12715_v63 = vmul.f32 %v12389_v2, %v5625_v50  ;;  %v16354_v47 = vld [vmem:[#allocation128_spill] sm:$0xff]  ;;  %7567 = vperm.xlu0 %8941, %v8830_v32   ;;  %v16362_v31 = vld [vmem:[#allocation187_spill] sm:$0xff] }
 0xcfe   : > { %16342 = vst [vmem:[#allocation440_spill] sm:$0xff] %v12686_v1  ;;  %16343 = vst [vmem:[#allocation441_spill] sm:$0xff] %v12689_v60  ;;  %v5723_v12 = vsel %vm5720_vm6, %v16352_v36, %v16353_v11  ;;  %v12732_v50 = vrot.slane %v8288_v40, %v9527_v23  ;;  %v12745_v2 = vmul.f32 %v12394_v38, %v5675_v43 }
 0xcff   : > { %16344 = vst [vmem:[#allocation442_spill] sm:$0xff] %v12691_v18  ;;  %16345 = vst [vmem:[#allocation443_spill] sm:$0xff] %v12693_v13  ;;  %v8289_v18 = vld [vmem:[%s16196_s26 + $0x4c] sm:$0x3]  ;;  %v5721_v13 = vsel %vm5720_vm6, %v16353_v11, %v16352_v36  ;;  %v12742_v11 = vpop.f32.mrf.mxu0  ;;  %v12748_v22 = vmul.f32 %v12400_v55, %v5673_v45  ;;  %v8291_v45 = vld [vmem:[%s16196_s26 + $0x50] sm:$0x3]  ;;  %v5347_v55 = vpop.f32.mrf.mxu1 }
 0xd00   : > { %16348 = vst [vmem:[#allocation181_spill] sm:$0xff] %v12705_v20  ;;  %16349 = vst [vmem:[#allocation124_spill] sm:$0xff] %v12708_v6  ;;  %v16355_v6 = vld [vmem:[#allocation185_spill] sm:$0xff]  ;;  %v12751_v32 = vrot.slane %v8289_v18, %v9527_v23  ;;  %v12766_v43 = vrot.slane %v8289_v18, %v9530_v28  ;;  %v8292_v18 = vld [vmem:[%s16196_s26 + $0x52] sm:$0x3]  ;;  %7562 = vperm.xlu1 %8942, %v5347_v55   ;;  %v12811_v55 = vrot.slane %v8291_v45, %v9530_v28 }
 0xd01   : > { %16350 = vst [vmem:[#allocation444_spill] sm:$0xff] %v12712_v4  ;;  %16351 = vst [vmem:[#allocation445_spill] sm:$0xff] %v12715_v63  ;;  %v5771_v61 = vsel %vm5768_vm3, %v16355_v6, %v16354_v47  ;;  %v12735_v63 = vrot.slane %v8288_v40, %v9530_v28  ;;  %v8290_v4 = vld [vmem:[%s16196_s26 + $0x4e] sm:$0x3]  ;;  %v5769_v36 = vsel %vm5768_vm3, %v16354_v47, %v16355_v6  ;;  %v16361_v40 = vld [vmem:[#allocation130_spill] sm:$0xff]  ;;  %6123 = vperm.xlu0 %8941, %v11975_v19  }
 0xd02   : > { %16356 = vst [vmem:[#allocation183_spill] sm:$0xff] %v12732_v50  ;;  %16358 = vst [vmem:[#allocation128_spill] sm:$0xff] %v12745_v2  ;;  %v12757_v50 = vpop.permute.xlu1 %4062  ;;  %v12760_v6 = vmul.f32 %v12403_v59, %v5723_v12  ;;  %v12763_v47 = vmul.f32 %v12406_v62, %v5721_v13  ;;  %v12773_v2 = vpop.permute.xlu0 %4057  ;;  %v12779_v12 = vrot.slane %v8290_v4, %v9527_v23  ;;  %v8293_v19 = vld [vmem:[%s16196_s26 + $0x54] sm:$0x3] }
 0xd03   : > { %16357 = vst [vmem:[#allocation126_spill] sm:$0xff] %v12735_v63  ;;  %16359 = vst [vmem:[#allocation185_spill] sm:$0xff] %v12748_v22  ;;  %v5819_v63 = vsel %vm15475_vm7, %v16362_v31, %v16361_v40  ;;  %v5817_v22 = vsel %vm15475_vm7, %v16361_v40, %v16362_v31  ;;  %v12782_v13 = vrot.slane %v8290_v4, %v9530_v28  ;;  %vm15497_vm7 = vcmp.lt.s32.totalorder %v9525_v14, 19  ;;  %v16374_v40 = vld [vmem:[#allocation191_spill] sm:$0xff] }
 0xd04   : > { %16360 = vst [vmem:[#allocation446_spill] sm:$0xff] %v12751_v32  ;;  %16363 = vst [vmem:[#allocation130_spill] sm:$0xff] %v12757_v50  ;;  %v12776_v50 = vmul.f32 %v12409_v37, %v5771_v61  ;;  %v12796_v4 = vmul.f32 %v12416_v27, %v5769_v36  ;;  %v16373_v61 = vld [vmem:[#allocation134_spill] sm:$0xff]  ;;  %v12805_v37 = vmul.f32 %v12419_v44, %v5819_v63  ;;  %6176 = vperm.xlu1 %8942, %v12006_v26  }
 0xd05   : > { %16364 = vst [vmem:[#allocation187_spill] sm:$0xff] %v12760_v6  ;;  %16365 = vst [vmem:[#allocation447_spill] sm:$0xff] %v12763_v47  ;;  %v16370_v47 = vld [vmem:[#allocation189_spill] sm:$0xff]  ;;  %v16371_v6 = vld [vmem:[#allocation132_spill] sm:$0xff]  ;;  %v5911_v36 = vsel %vm15482_vm15, %v16373_v61, %v16374_v40  ;;  %v12823_v63 = vmul.f32 %v12422_v57, %v5817_v22  ;;  %v12840_v59 = vrot.slane %v8292_v18, %v9530_v28 }
 0xd06   : > { %16366 = vst [vmem:[#allocation448_spill] sm:$0xff] %v12766_v43  ;;  %16367 = vst [vmem:[#allocation449_spill] sm:$0xff] %v12773_v2  ;;  %v5864_v62 = vsel %vm3020_vm14, %v16371_v6, %v16370_v47  ;;  %v5866_v31 = vsel %vm3020_vm14, %v16370_v47, %v16371_v6  ;;  %v5913_v2 = vsel %vm15482_vm15, %v16374_v40, %v16373_v61  ;;  %v16377_v47 = vld [vmem:[#allocation136_spill] sm:$0xff]  ;;  %vm15503_vm15 = vcmp.lt.s32.totalorder %v9525_v14, 13  ;;  %v12843_v22 = vpop.permute.xlu1 %4110 }
 0xd07   : > { %16368 = vst [vmem:[#allocation450_spill] sm:$0xff] %v12776_v50  ;;  %16369 = vst [vmem:[#allocation451_spill] sm:$0xff] %v12782_v13  ;;  %v12802_v50 = vpop.f32.mrf.mxu0  ;;  %v12808_v6 = vrot.slane %v8291_v45, %v9527_v23  ;;  %v8294_v45 = vld [vmem:[%s16196_s26 + $0x56] sm:$0x3]  ;;  %v12834_v61 = vmul.f32 %v12425_v42, %v5866_v31  ;;  %v12837_v40 = vmul.f32 %v12432_v8, %v5864_v62  ;;  %v8295_v62 = vld [vmem:[%s16196_s26 + $0x58] sm:$0x3] }
 0xd08   : > { %16372 = vst [vmem:[#allocation189_spill] sm:$0xff] %v12796_v4  ;;  %16375 = vst [vmem:[#allocation132_spill] sm:$0xff] %v12805_v37  ;;  %v16378_v4 = vld [vmem:[#allocation193_spill] sm:$0xff]  ;;  %v12826_v37 = vrot.slane %v8292_v18, %v9527_v23  ;;  %v12853_v31 = vrot.slane %v8293_v19, %v9530_v28 }
 0xd09   : > { %16376 = vst [vmem:[#allocation134_spill] sm:$0xff] %v12811_v55  ;;  %v5960_v27 = vsel %vm3111_vm0, %v16378_v4, %v16377_v47  ;;  %16379 = vst [vmem:[#allocation191_spill] sm:$0xff] %v12823_v63  ;;  %v5958_v44 = vsel %vm3111_vm0, %v16377_v47, %v16378_v4  ;;  %v8833_v55 = vpop.f32.mrf.mxu1  ;;  %v12847_v63 = vmul.f32 %v12435_v16, %v5913_v2  ;;  %v12856_v47 = vpop.permute.xlu0 %4105  ;;  %v16399_v8 = vld [vmem:[#allocation205_spill] sm:$0xff] }
 0xd0a   : > { %16380 = vst [vmem:[#allocation136_spill] sm:$0xff] %v12834_v61  ;;  %16381 = vst [vmem:[#allocation193_spill] sm:$0xff] %v12837_v40  ;;  %7615 = vperm.xlu0 %8941, %v8833_v55   ;;  %v12850_v4 = vrot.slane %v8293_v19, %v9527_v23  ;;  %v12858_v18 = vpop.f32.mrf.mxu0  ;;  %v12861_v40 = vmul.f32 %v12438_v52, %v5911_v36  ;;  %v12864_v26 = vmul.f32 %v12446_v5, %v5960_v27  ;;  %v16389_v19 = vld [vmem:[#allocation138_spill] sm:$0xff]  ;;  %v16393_v61 = vld [vmem:[#allocation201_spill] sm:$0xff] }
 0xd0b   : > { %16382 = vst [vmem:[#allocation452_spill] sm:$0xff] %v12843_v22  ;;  %16383 = vst [vmem:[#allocation453_spill] sm:$0xff] %v12847_v63  ;;  %v12867_v2 = vrot.slane %v8294_v45, %v9527_v23  ;;  %v12870_v55 = vrot.slane %v8294_v45, %v9530_v28  ;;  %v16388_v22 = vld [vmem:[#allocation195_spill] sm:$0xff]  ;;  %v16394_v5 = vld [vmem:[#allocation142_spill] sm:$0xff]  ;;  %v12900_v16 = vrot.slane %v8295_v62, %v9527_v23 }
 0xd0c   : > { %16384 = vst [vmem:[#allocation454_spill] sm:$0xff] %v12856_v47  ;;  %16385 = vst [vmem:[#allocation455_spill] sm:$0xff] %v12861_v40  ;;  %v6005_v63 = vsel %vm3159_vm9, %v16389_v19, %v16388_v22  ;;  %v6007_v36 = vsel %vm3159_vm9, %v16388_v22, %v16389_v19  ;;  %v16390_v47 = vld [vmem:[#allocation140_spill] sm:$0xff]  ;;  %v16391_v40 = vld [vmem:[#allocation199_spill] sm:$0xff]  ;;  %v6100_v52 = vsel %vm15491_vm8, %v16394_v5, %v16393_v61  ;;  %v5357_v19 = vpop.f32.mrf.mxu1 }
 0xd0d   : > { %16386 = vst [vmem:[#allocation456_spill] sm:$0xff] %v12864_v26  ;;  %16387 = vst [vmem:[#allocation457_spill] sm:$0xff] %v12870_v55  ;;  %v6054_v27 = vsel %vm15492_vm10, %v16391_v40, %v16390_v47  ;;  %v12885_v26 = vmul.f32 %v12449_v54, %v5958_v44  ;;  %v6052_v45 = vsel %vm15492_vm10, %v16390_v47, %v16391_v40  ;;  %v16396_v44 = vld [vmem:[#allocation203_spill] sm:$0xff]  ;;  %v16398_v47 = vld [vmem:[#allocation146_spill] sm:$0xff]  ;;  %7610 = vperm.xlu1 %8942, %v5357_v19  }
 0xd0e   : > { %v6102_v22 = vsel %vm15491_vm8, %v16393_v61, %v16394_v5  ;;  %16395 = vst [vmem:[#allocation138_spill] sm:$0xff] %v12900_v16  ;;  %v6197_v42 = vsel %vm15496_vm11, %v16399_v8, %v16398_v47  ;;  %vm15505_vm8 = vcmp.lt.s32.totalorder %v9525_v14, 3  ;;  %6171 = vperm.xlu0 %8941, %v12035_v9   ;;  %vm6732_vm10 = vcmp.lt.s32.totalorder %v9525_v14, 125  ;;  %v12917_v5 = vpop.f32.mrf.mxu0  ;;  %v16403_v19 = vld [vmem:[#allocation148_spill] sm:$0xff]  ;;  %v16404_v55 = vld [vmem:[#allocation207_spill] sm:$0xff] }
 0xd0f   : > { %16392 = vst [vmem:[#allocation195_spill] sm:$0xff] %v12885_v26  ;;  %v16397_v26 = vld [vmem:[#allocation144_spill] sm:$0xff]  ;;  %v12920_v61 = vmul.f32 %v12452_v25, %v6007_v36  ;;  %v12923_v16 = vmul.f32 %v12455_v0, %v6005_v63  ;;  %v6195_v9 = vsel %vm15496_vm11, %v16398_v47, %v16399_v8  ;;  %v6244_v36 = vsel %vm15498_vm1, %v16404_v55, %v16403_v19 }
 0xd10   : > { %v6148_v54 = vsel %vm15497_vm7, %v16397_v26, %v16396_v44  ;;  %v6150_v40 = vsel %vm15497_vm7, %v16396_v44, %v16397_v26  ;;  %v12926_v26 = vmul.f32 %v12460_v56, %v6054_v27  ;;  %v12929_v44 = vrot.slane %v8295_v62, %v9530_v28  ;;  %v12947_v62 = vpop.permute.xlu0 %4153  ;;  %v16588_v56 = vld [vmem:[#allocation137_spill] sm:$0xff] }
 0xd11   : > { %16400 = vst [vmem:[#allocation140_spill] sm:$0xff] %v12920_v61  ;;  %16401 = vst [vmem:[#allocation199_spill] sm:$0xff] %v12923_v16  ;;  %v12939_v61 = vpop.permute.xlu1 %4158  ;;  %v12942_v63 = vmul.f32 %v12463_v30, %v6052_v45  ;;  %v12945_v27 = vmul.f32 %v12466_v53, %v6102_v22  ;;  %v12950_v16 = vmul.f32 %v12469_v41, %v6100_v52  ;;  %v16413_v22 = vld [vmem:[#allocation209_spill] sm:$0xff]  ;;  %vm15522_vm11 = vcmp.lt.s32.totalorder %v9525_v14, 115  ;;  %v16491_v41 = vld [vmem:[#allocation423_spill] sm:$0xff] }
 0xd12   : > { %16402 = vst [vmem:[#allocation201_spill] sm:$0xff] %v12926_v26  ;;  %16405 = vst [vmem:[#allocation142_spill] sm:$0xff] %v12939_v61  ;;  %v8836_v26 = vpop.f32.mrf.mxu1  ;;  %v12953_v8 = vmul.f32 %v12474_v29, %v6150_v40  ;;  %v12956_v47 = vmul.f32 %v12477_v35, %v6148_v54  ;;  %v12959_v61 = vmul.f32 %v12480_v49, %v6197_v42  ;;  %6223 = vperm.xlu1 %8942, %v12069_v10   ;;  %v16415_v42 = vld [vmem:[#allocation211_spill] sm:$0xff]  ;;  %v16416_v54 = vld [vmem:[#allocation152_spill] sm:$0xff] }
 0xd13   : > { %16406 = vst [vmem:[#allocation203_spill] sm:$0xff] %v12942_v63  ;;  %16407 = vst [vmem:[#allocation144_spill] sm:$0xff] %v12945_v27  ;;  %v6242_v45 = vsel %vm15498_vm1, %v16403_v19, %v16404_v55  ;;  %v16414_v27 = vld [vmem:[#allocation150_spill] sm:$0xff]  ;;  %7663 = vperm.xlu0 %8941, %v8836_v26   ;;  %vm16417_vm7 = vcmp.lt.s32.totalorder %v9525_v14, 15  ;;  %v16421_v10 = vld [vmem:[#allocation213_spill] sm:$0xff] }
 0xd14   : > { %16408 = vst [vmem:[#allocation146_spill] sm:$0xff] %v12947_v62  ;;  %16409 = vst [vmem:[#allocation205_spill] sm:$0xff] %v12950_v16  ;;  %v6289_v52 = vsel %vm15507_vm2, %v16414_v27, %v16413_v22  ;;  %v6291_v40 = vsel %vm15507_vm2, %v16413_v22, %v16414_v27  ;;  %v6336_v55 = vsel %vm16417_vm7, %v16416_v54, %v16415_v42  ;;  %v16422_v26 = vld [vmem:[#allocation154_spill] sm:$0xff]  ;;  %v16423_v16 = vld [vmem:[#allocation215_spill] sm:$0xff]  ;;  %v13013_v62 = vpop.permute.xlu0 %6950  ;;  %vm16454_vm2 = vcmp.lt.s32.totalorder %v9525_v14, 127 }
 0xd15   : > { %16410 = vst [vmem:[#allocation148_spill] sm:$0xff] %v12953_v8  ;;  %16411 = vst [vmem:[#allocation207_spill] sm:$0xff] %v12956_v47  ;;  %v12986_v47 = vmul.f32 %v12483_v24, %v6195_v9  ;;  %v12989_v27 = vmul.f32 %v12492_v58, %v6244_v36  ;;  %v6383_v22 = vsel %vm15506_vm12, %v16422_v26, %v16421_v10  ;;  %v16425_v36 = vld [vmem:[#allocation158_spill] sm:$0xff]  ;;  %v13011_v63 = vpop.permute.xlu1 %5513  ;;  %v16432_v24 = vld [vmem:[#allocation219_spill] sm:$0xff] }
 0xd16   : > { %16412 = vst [vmem:[#allocation458_spill] sm:$0xff] %v12959_v61  ;;  %vm16418_vm1 = vmmov %vm16417_vm7  ;;  %v12983_v61 = vpop.f32.mrf.mxu0  ;;  %v6385_v8 = vsel %vm15506_vm12, %v16421_v10, %v16422_v26  ;;  %v13016_v10 = vmul.f32 %v12495_v21, %v6242_v45  ;;  %v13019_v26 = vmul.f32 %v12498_v34, %v6291_v40  ;;  %v13022_v58 = vmul.f32 %v12508_v48, %v6289_v52  ;;  %v16435_v40 = vld [vmem:[#allocation406_spill] sm:$0xff]  ;;  %v16437_v52 = vld [vmem:[#allocation60_spill] sm:$0xff] }
 0xd17   : > { %v6338_v19 = vsel %vm16418_vm1, %v16415_v42, %v16416_v54  ;;  %16419 = vst [vmem:[#allocation209_spill] sm:$0xff] %v12986_v47  ;;  %16420 = vst [vmem:[#allocation150_spill] sm:$0xff] %v12989_v27  ;;  %v16424_v42 = vld [vmem:[#allocation156_spill] sm:$0xff]  ;;  %v16426_v27 = vld [vmem:[#allocation217_spill] sm:$0xff]  ;;  %vm16433_vm1 = vcmp.lt.s32.totalorder %v9525_v14, 2  ;;  %6270 = vperm.xlu1 %8942, %v12128_v51   ;;  %vm7063_vm7 = vcmp.lt.s32.totalorder %v9525_v14, 109  ;;  %6218 = vperm.xlu0 %8941, %v16437_v52  }
 0xd18   : > { %v6431_v54 = vsel %vm15503_vm15, %v16424_v42, %v16423_v16  ;;  %v6433_v9 = vsel %vm15503_vm15, %v16423_v16, %v16424_v42  ;;  %v6481_v47 = vsel %vm15505_vm8, %v16426_v27, %v16425_v36  ;;  %16427 = vst [vmem:[#allocation211_spill] sm:$0xff] %v13013_v62  ;;  %16428 = vst [vmem:[#allocation152_spill] sm:$0xff] %v13016_v10  ;;  %v16431_v42 = vld [vmem:[#allocation161_spill] sm:$0xff]  ;;  %vm7111_vm15 = vcmp.lt.s32.totalorder %v9525_v14, 99  ;;  %v16440_v10 = vld [vmem:[#allocation408_spill] sm:$0xff] }
 0xd19   : > { %16429 = vst [vmem:[#allocation213_spill] sm:$0xff] %v13019_v26  ;;  %16430 = vst [vmem:[#allocation154_spill] sm:$0xff] %v13022_v58  ;;  %v6479_v16 = vsel %vm15505_vm8, %v16425_v36, %v16426_v27  ;;  %v6528_v49 = vsel %vm16433_vm1, %v16432_v24, %v16431_v42  ;;  %v13034_v45 = vmul.f32 %v12511_v7, %v6338_v19  ;;  %v13042_v27 = vpop.f32.mrf.mxu0  ;;  %v16438_v36 = vld [vmem:[#allocation407_spill] sm:$0xff]  ;;  %v16442_v51 = vld [vmem:[#allocation409_spill] sm:$0xff]  ;;  %vm16448_vm8 = vcmp.lt.s32.totalorder %v9525_v14, 1 }
 0xd1a   : > { %v13037_v26 = vmul.f32 %v16435_v40, %v6336_v55  ;;  %v13045_v58 = vmul.f32 %v16438_v36, %v6385_v8  ;;  %v13048_v62 = vmul.f32 %v16440_v10, %v6383_v22  ;;  %v13051_v19 = vmul.f32 %v16442_v51, %v6433_v9  ;;  %v16446_v52 = vld [vmem:[#allocation221_spill] sm:$0xff]  ;;  %v16447_v40 = vld [vmem:[#allocation163_spill] sm:$0xff]  ;;  %vm16449_vm12 = vmmov %vm16448_vm8 }
 0xd1b   : > { %16434 = vst [vmem:[#allocation215_spill] sm:$0xff] %v13034_v45  ;;  %v16444_v45 = vld [vmem:[#allocation410_spill] sm:$0xff]  ;;  %v6573_v8 = vsel %vm16448_vm8, %v16447_v40, %v16446_v52  ;;  %v6575_v22 = vsel %vm16449_vm12, %v16446_v52, %v16447_v40  ;;  %v16450_v9 = vld [vmem:[#allocation411_spill] sm:$0xff]  ;;  %v16475_v34 = vld [vmem:[#allocation416_spill] sm:$0xff]  ;;  %vm16479_vm12 = vcmp.lt.s32.totalorder %v9525_v14, 114 }
 0xd1c   : > { %16436 = vst [vmem:[#allocation156_spill] sm:$0xff] %v13037_v26  ;;  %16439 = vst [vmem:[#allocation158_spill] sm:$0xff] %v13045_v58  ;;  %v13054_v55 = vmul.f32 %v16444_v45, %v6431_v54  ;;  %v6526_v26 = vsel %vm16433_vm1, %v16431_v42, %v16432_v24  ;;  %v16452_v54 = vld [vmem:[#allocation223_spill] sm:$0xff]  ;;  %v13079_v42 = vpop.permute.xlu1 %6945  ;;  %v13081_v58 = vpop.permute.xlu0 %5508  ;;  %v16457_v45 = vld [vmem:[#allocation412_spill] sm:$0xff]  ;;  %v13120_v21 = vmul.f32 %v16475_v34, %v6573_v8 }
 0xd1d   : > { %16441 = vst [vmem:[#allocation217_spill] sm:$0xff] %v13048_v62  ;;  %16443 = vst [vmem:[#allocation161_spill] sm:$0xff] %v13051_v19  ;;  %v13069_v19 = vmul.f32 %v16450_v9, %v6481_v47  ;;  %v13084_v40 = vmul.f32 %v16457_v45, %v6479_v16  ;;  %v16459_v47 = vld [vmem:[#allocation413_spill] sm:$0xff]  ;;  %v16462_v9 = vld [vmem:[#allocation167_spill] sm:$0xff] }
 0xd1e   : > { %16445 = vst [vmem:[#allocation219_spill] sm:$0xff] %v13054_v55  ;;  %v16453_v55 = vld [vmem:[#allocation165_spill] sm:$0xff]  ;;  %vm16455_vm1 = vmmov %vm16454_vm2  ;;  %v13087_v52 = vmul.f32 %v16459_v47, %v6528_v49  ;;  %v16467_v16 = vld [vmem:[#allocation336_spill] sm:$0xff] }
 0xd1f   : > { %16451 = vst [vmem:[#allocation60_spill] sm:$0xff] %v13069_v19  ;;  %v6638_v62 = vsel %vm16454_vm2, %v16453_v55, %v16452_v54  ;;  %v6640_v24 = vsel %vm16455_vm1, %v16452_v54, %v16453_v55  ;;  %16456 = vst [vmem:[#allocation221_spill] sm:$0xff] %v13079_v42  ;;  %v16461_v19 = vld [vmem:[#allocation225_spill] sm:$0xff]  ;;  %vm16463_vm2 = vcmp.lt.s32.totalorder %v9525_v14, 126  ;;  %v16465_v54 = vld [vmem:[#allocation227_spill] sm:$0xff]  ;;  %6317 = vperm.xlu1 %8942, %v16467_v16  }
 0xd20   : > { %16458 = vst [vmem:[#allocation163_spill] sm:$0xff] %v13084_v40  ;;  %16460 = vst [vmem:[#allocation223_spill] sm:$0xff] %v13087_v52  ;;  %v6685_v51 = vsel %vm16463_vm2, %v16462_v9, %v16461_v19  ;;  %v16466_v42 = vld [vmem:[#allocation169_spill] sm:$0xff]  ;;  %v16469_v40 = vld [vmem:[#allocation171_spill] sm:$0xff]  ;;  %v13139_v8 = vpop.permute.xlu0 %6997 }
 0xd21   : > { %vm16464_vm8 = vmmov %vm16463_vm2  ;;  %v6733_v10 = vsel %vm6732_vm10, %v16466_v42, %v16465_v54  ;;  %v6735_v49 = vsel %vm6732_vm10, %v16465_v54, %v16466_v42  ;;  %v16468_v52 = vld [vmem:[#allocation229_spill] sm:$0xff]  ;;  %v16470_v45 = vld [vmem:[#allocation334_spill] sm:$0xff]  ;;  %16476 = vst [vmem:[#allocation167_spill] sm:$0xff] %v13120_v21  ;;  %vm16496_vm2 = vcmp.lt.s32.totalorder %v9525_v14, 113 }
 0xd22   : > { %v6687_v55 = vsel %vm16464_vm8, %v16461_v19, %v16462_v9  ;;  %v6781_v47 = vsel %vm15522_vm11, %v16469_v40, %v16468_v52  ;;  %6265 = vperm.xlu0 %8941, %v16470_v45   ;;  %v13111_v19 = vpop.f32.mrf.mxu0  ;;  %v16471_v9 = vld [vmem:[#allocation414_spill] sm:$0xff]  ;;  %v16473_v7 = vld [vmem:[#allocation415_spill] sm:$0xff]  ;;  %v6783_v42 = vsel %vm15522_vm11, %v16468_v52, %v16469_v40  ;;  %v16478_v16 = vld [vmem:[#allocation117_spill] sm:$0xff]  ;;  %16484 = vst [vmem:[#allocation336_spill] sm:$0xff] %v13139_v8  ;;  %vm16518_vm11 = vcmp.lt.s32.totalorder %v9525_v14, 110 }
 0xd23   : > { %v13114_v36 = vmul.f32 %v16471_v9, %v6526_v26  ;;  %v13117_v48 = vmul.f32 %v16473_v7, %v6575_v22  ;;  %v16477_v54 = vld [vmem:[#allocation231_spill] sm:$0xff]  ;;  %v16480_v29 = vld [vmem:[#allocation417_spill] sm:$0xff]  ;;  %v16485_v21 = vld [vmem:[#allocation420_spill] sm:$0xff]  ;;  %v13151_v53 = vmul.f32 %v16491_v41, %v6735_v49 }
 0xd24   : > { %v6828_v45 = vsel %vm16479_vm12, %v16478_v16, %v16477_v54  ;;  %v8296_v35 = vld [vmem:[%s16196_s26 + $0x5a] sm:$0x3]  ;;  %v13132_v26 = vmul.f32 %v16480_v29, %v6638_v62  ;;  %v13142_v34 = vmul.f32 %v16485_v21, %v6685_v51  ;;  %v16487_v40 = vld [vmem:[#allocation421_spill] sm:$0xff]  ;;  %v16489_v7 = vld [vmem:[#allocation422_spill] sm:$0xff] }
 0xd25   : > { %16472 = vst [vmem:[#allocation165_spill] sm:$0xff] %v13114_v36  ;;  %16474 = vst [vmem:[#allocation225_spill] sm:$0xff] %v13117_v48  ;;  %v16482_v36 = vld [vmem:[#allocation418_spill] sm:$0xff]  ;;  %v13137_v48 = vpop.permute.xlu1 %5557  ;;  %v13145_v52 = vmul.f32 %v16487_v40, %v6687_v55  ;;  %v13148_v9 = vmul.f32 %v16489_v7, %v6733_v10  ;;  %v16498_v10 = vld [vmem:[#allocation109_spill] sm:$0xff] }
 0xd26   : > { %16481 = vst [vmem:[#allocation227_spill] sm:$0xff] %v13132_v26  ;;  %v13135_v22 = vmul.f32 %v16482_v36, %v6640_v24  ;;  %16486 = vst [vmem:[#allocation229_spill] sm:$0xff] %v13142_v34  ;;  %v16494_v24 = vld [vmem:[#allocation233_spill] sm:$0xff]  ;;  %6364 = vperm.xlu1 %8942, %v16498_v10   ;;  %v16504_v34 = vld [vmem:[#allocation427_spill] sm:$0xff] }
 0xd27   : > { %16488 = vst [vmem:[#allocation171_spill] sm:$0xff] %v13145_v52  ;;  %16490 = vst [vmem:[#allocation334_spill] sm:$0xff] %v13148_v9  ;;  %v16499_v9 = vld [vmem:[#allocation425_spill] sm:$0xff]  ;;  %v13170_v52 = vpop.f32.mrf.mxu0  ;;  %v13179_v26 = vmul.f32 %v16504_v34, %v6828_v45  ;;  %v16506_v8 = vld [vmem:[#allocation426_spill] sm:$0xff] }
 0xd28   : > { %16483 = vst [vmem:[#allocation169_spill] sm:$0xff] %v13135_v22  ;;  %16492 = vst [vmem:[#allocation231_spill] sm:$0xff] %v13151_v53  ;;  %v16495_v22 = vld [vmem:[#allocation119_spill] sm:$0xff]  ;;  %v13167_v49 = vmul.f32 %v16499_v9, %v6781_v47  ;;  %v16501_v53 = vld [vmem:[#allocation106_spill] sm:$0xff] }
 0xd29   : > { %vm16493_vm1 = vmmov %vm16479_vm12  ;;  %v6875_v51 = vsel %vm16496_vm2, %v16495_v22, %v16494_v24  ;;  %6312 = vperm.xlu0 %8941, %v16501_v53   ;;  %16505 = vst [vmem:[#allocation109_spill] sm:$0xff] %v13179_v26  ;;  %v16509_v10 = vld [vmem:[#allocation121_spill] sm:$0xff]  ;;  %vm16510_vm12 = vcmp.lt.s32.totalorder %v9525_v14, 112  ;;  %v16516_v45 = vld [vmem:[#allocation239_spill] sm:$0xff] }
 0xd2a   : > { %v6830_v62 = vsel %vm16493_vm1, %v16477_v54, %v16478_v16  ;;  %vm16497_vm8 = vmmov %vm16496_vm2  ;;  %16500 = vst [vmem:[#allocation117_spill] sm:$0xff] %v13167_v49  ;;  %v13173_v54 = vrot.slane %v8296_v35, %v9527_v23  ;;  %v13176_v16 = vrot.slane %v8296_v35, %v9530_v28  ;;  %v16512_v23 = vld [vmem:[#allocation237_spill] sm:$0xff]  ;;  %v16513_v49 = vld [vmem:[#allocation123_spill] sm:$0xff]  ;;  %vm16514_vm2 = vcmp.lt.s32.totalorder %v9525_v14, 111 }
 0xd2b   : > { %v6877_v55 = vsel %vm16497_vm8, %v16494_v24, %v16495_v22  ;;  %v13182_v22 = vmul.f32 %v16506_v8, %v6783_v42  ;;  %v16508_v24 = vld [vmem:[#allocation235_spill] sm:$0xff]  ;;  %vm16511_vm1 = vmmov %vm16510_vm12  ;;  %v6969_v35 = vsel %vm16514_vm2, %v16513_v49, %v16512_v23  ;;  %v16517_v28 = vld [vmem:[#allocation125_spill] sm:$0xff]  ;;  %v13206_v8 = vpop.permute.xlu0 %5552 }
 0xd2c   : > { %16502 = vst [vmem:[#allocation233_spill] sm:$0xff] %v13173_v54  ;;  %16503 = vst [vmem:[#allocation119_spill] sm:$0xff] %v13176_v16  ;;  %v6922_v47 = vsel %vm16510_vm12, %v16509_v10, %v16508_v24  ;;  %v6924_v53 = vsel %vm16511_vm1, %v16508_v24, %v16509_v10  ;;  %v7016_v26 = vsel %vm16518_vm11, %v16517_v28, %v16516_v45  ;;  %v16520_v24 = vld [vmem:[#allocation428_spill] sm:$0xff]  ;;  %v16522_v9 = vld [vmem:[#allocation429_spill] sm:$0xff] }
 0xd2d   : > { %16507 = vst [vmem:[#allocation106_spill] sm:$0xff] %v13182_v22  ;;  %vm16515_vm8 = vmmov %vm16514_vm2  ;;  %v13204_v22 = vpop.permute.xlu1 %6992  ;;  %v13209_v10 = vmul.f32 %v16520_v24, %v6830_v62  ;;  %v13212_v41 = vmul.f32 %v16522_v9, %v6875_v51  ;;  %v16524_v7 = vld [vmem:[#allocation430_spill] sm:$0xff]  ;;  %v16528_v16 = vld [vmem:[#allocation127_spill] sm:$0xff]  ;;  %v13241_v21 = vmul.f32 %v12626_v15, %v6969_v35  ;;  %vm16559_vm2 = vcmp.lt.s32.totalorder %v9525_v14, 97 }
 0xd2e   : > { %v6971_v42 = vsel %vm16515_vm8, %v16512_v23, %v16513_v49  ;;  %16519 = vst [vmem:[#allocation427_spill] sm:$0xff] %v13204_v22  ;;  %v13215_v40 = vmul.f32 %v16524_v7, %v6877_v55  ;;  %vm16526_vm12 = vmmov %vm16518_vm11  ;;  %v16527_v49 = vld [vmem:[#allocation241_spill] sm:$0xff]  ;;  %v16529_v51 = vld [vmem:[#allocation243_spill] sm:$0xff]  ;;  %vm7394_vm11 = vcmp.lt.s32.totalorder %v9525_v14, 93  ;;  %vm7442_vm8 = vcmp.lt.s32.totalorder %v9525_v14, 83 }
 0xd2f   : > { %16521 = vst [vmem:[#allocation235_spill] sm:$0xff] %v13209_v10  ;;  %16523 = vst [vmem:[#allocation121_spill] sm:$0xff] %v13212_v41  ;;  %v7018_v23 = vsel %vm16526_vm12, %v16516_v45, %v16517_v28  ;;  %v7064_v22 = vsel %vm7063_vm7, %v16528_v16, %v16527_v49  ;;  %v7066_v62 = vsel %vm7063_vm7, %v16527_v49, %v16528_v16  ;;  %v16530_v41 = vld [vmem:[#allocation129_spill] sm:$0xff]  ;;  %v16532_v10 = vld [vmem:[#allocation116_spill] sm:$0xff]  ;;  %v13248_v49 = vpop.f32.mrf.mxu0  ;;  %vm16565_vm12 = vcmp.lt.s32.totalorder %v9525_v14, 49 }
 0xd30   : > { %16525 = vst [vmem:[#allocation237_spill] sm:$0xff] %v13215_v40  ;;  %v7112_v55 = vsel %vm7111_vm15, %v16530_v41, %v16529_v51  ;;  %v16531_v40 = vld [vmem:[#allocation387_spill] sm:$0xff]  ;;  %v13235_v54 = vmul.f32 %v16532_v10, %v6922_v47  ;;  %v16534_v28 = vld [vmem:[#allocation118_spill] sm:$0xff]  ;;  %16536 = vst [vmem:[#allocation125_spill] sm:$0xff] %v13241_v21  ;;  %v7114_v47 = vsel %vm7111_vm15, %v16529_v51, %v16530_v41  ;;  %v13276_v51 = vpop.permute.xlu0 %7044 }
 0xd31   : > { %6411 = vperm.xlu1 %8942, %v16531_v40   ;;  %v13238_v45 = vmul.f32 %v16534_v28, %v6924_v53  ;;  %v16537_v36 = vld [vmem:[#allocation431_spill] sm:$0xff]  ;;  %v16540_v30 = vld [vmem:[#allocation432_spill] sm:$0xff]  ;;  %v13274_v41 = vpop.permute.xlu1 %5605  ;;  %16547 = vst [vmem:[#allocation243_spill] sm:$0xff] %v13276_v51  ;;  %v13279_v21 = vmul.f32 %v12686_v1, %v7112_v55  ;;  %v16577_v15 = vld [vmem:[#allocation157_spill] sm:$0xff] }
 0xd32   : > { %16533 = vst [vmem:[#allocation123_spill] sm:$0xff] %v13235_v54  ;;  %v13244_v29 = vmul.f32 %v16537_v36, %v6971_v42  ;;  %v16539_v16 = vld [vmem:[#allocation79_spill] sm:$0xff]  ;;  %v13251_v40 = vmul.f32 %v16540_v30, %v7016_v26  ;;  %v16542_v53 = vld [vmem:[#allocation240_spill] sm:$0xff]  ;;  %v13269_v26 = vmul.f32 %v12658_v46, %v7064_v22 }
 0xd33   : > { %16535 = vst [vmem:[#allocation239_spill] sm:$0xff] %v13238_v45  ;;  %6359 = vperm.xlu0 %8941, %v16539_v16   ;;  %v16543_v35 = vld [vmem:[#allocation151_spill] sm:$0xff]  ;;  %16548 = vst [vmem:[#allocation129_spill] sm:$0xff] %v13279_v21  ;;  %v16549_v45 = vld [vmem:[#allocation245_spill] sm:$0xff] }
 0xd34   : > { %16538 = vst [vmem:[#allocation428_spill] sm:$0xff] %v13244_v29  ;;  %16541 = vst [vmem:[#allocation429_spill] sm:$0xff] %v13251_v40  ;;  %v5487_v42 = vsel %vm5485_vm13, %v16543_v35, %v16542_v53  ;;  %v5489_v16 = vsel %vm5485_vm13, %v16542_v53, %v16543_v35  ;;  %v13266_v29 = vmul.f32 %v12648_v17, %v7018_v23  ;;  %v16550_v54 = vld [vmem:[#allocation131_spill] sm:$0xff]  ;;  %vm16551_vm13 = vcmp.lt.s32.totalorder %v9525_v14, 98  ;;  %v16553_v23 = vld [vmem:[#allocation242_spill] sm:$0xff] }
 0xd35   : > { %16545 = vst [vmem:[#allocation241_spill] sm:$0xff] %v13269_v26  ;;  %v13272_v40 = vmul.f32 %v12661_v39, %v7066_v62  ;;  %v7159_v53 = vsel %vm16551_vm13, %v16550_v54, %v16549_v45  ;;  %vm16552_vm1 = vmmov %vm16551_vm13  ;;  %v16554_v62 = vld [vmem:[#allocation153_spill] sm:$0xff]  ;;  %v16555_v21 = vld [vmem:[#allocation419_spill] sm:$0xff]  ;;  %v13311_v39 = vmul.f32 %v12689_v60, %v7114_v47 }
 0xd36   : > { %16544 = vst [vmem:[#allocation430_spill] sm:$0xff] %v13266_v29  ;;  %v7161_v22 = vsel %vm16552_vm1, %v16549_v45, %v16550_v54  ;;  %v5530_v35 = vsel %vm5528_vm4, %v16554_v62, %v16553_v23  ;;  %v5532_v55 = vsel %vm5528_vm4, %v16553_v23, %v16554_v62  ;;  %6459 = vperm.xlu1 %8942, %v16555_v21   ;;  %v16557_v51 = vld [vmem:[#allocation247_spill] sm:$0xff]  ;;  %v16558_v54 = vld [vmem:[#allocation133_spill] sm:$0xff]  ;;  %v13313_v23 = vpop.f32.mrf.mxu0  ;;  %vm16562_vm4 = vmmov %vm16559_vm2  ;;  %vm16569_vm1 = vcmp.lt.s32.totalorder %v9525_v14, 96 }
 0xd37   : > { %16546 = vst [vmem:[#allocation127_spill] sm:$0xff] %v13272_v40  ;;  %v16556_v40 = vld [vmem:[#allocation339_spill] sm:$0xff]  ;;  %v13302_v29 = vmul.f32 %v12275_v3, %v5487_v42  ;;  %v7206_v45 = vsel %vm16559_vm2, %v16558_v54, %v16557_v51  ;;  %16561 = vst [vmem:[#allocation387_spill] sm:$0xff] %v13311_v39  ;;  %v7208_v3 = vsel %vm16562_vm4, %v16557_v51, %v16558_v54  ;;  %v16563_v21 = vld [vmem:[#allocation244_spill] sm:$0xff]  ;;  %v13333_v51 = vpop.permute.xlu1 %7039  ;;  %v13335_v54 = vpop.permute.xlu0 %5600  ;;  %vm7490_vm4 = vcmp.lt.s32.totalorder %v9525_v14, 82 }
 0xd38   : > { %v13299_v26 = vmul.f32 %v16556_v40, %v5489_v16  ;;  %v16560_v1 = vld [vmem:[#allocation403_spill] sm:$0xff]  ;;  %vm16566_vm13 = vmmov %vm16565_vm12  ;;  %v16567_v16 = vld [vmem:[#allocation249_spill] sm:$0xff]  ;;  %v5548_v39 = vmul.f32 %v12305_v33, %v5532_v55  ;;  %16571 = vst [vmem:[#allocation116_spill] sm:$0xff] %v13333_v51  ;;  %v13338_v17 = vmul.f32 %v12705_v20, %v7159_v53  ;;  %v13363_v51 = vpop.f32.mrf.mxu0 }
 0xd39   : > { %6406 = vperm.xlu0 %8941, %v16560_v1   ;;  %v16564_v40 = vld [vmem:[#allocation155_spill] sm:$0xff]  ;;  %v16570_v60 = vld [vmem:[#allocation73_spill] sm:$0xff]  ;;  %v16573_v30 = vld [vmem:[#allocation124_spill] sm:$0xff] }
 0xd3a   : > { %v5578_v42 = vsel %vm16565_vm12, %v16564_v40, %v16563_v21  ;;  %v5580_v1 = vsel %vm16566_vm13, %v16563_v21, %v16564_v40  ;;  %v16568_v47 = vld [vmem:[#allocation135_spill] sm:$0xff]  ;;  %v5549_v46 = vmul.f32 %v16570_v60, %v5530_v35  ;;  %16572 = vst [vmem:[#allocation79_spill] sm:$0xff] %v13338_v17  ;;  %v13341_v36 = vmul.f32 %v16573_v30, %v7161_v22  ;;  %vm16575_vm2 = vmmov %vm16569_vm1  ;;  %v16576_v40 = vld [vmem:[#allocation246_spill] sm:$0xff] }
 0xd3b   : > { %v7253_v62 = vsel %vm16569_vm1, %v16568_v47, %v16567_v16  ;;  %v7255_v21 = vsel %vm16575_vm2, %v16567_v16, %v16568_v47  ;;  %v5626_v33 = vsel %vm5624_vm5, %v16577_v15, %v16576_v40  ;;  %v5628_v60 = vsel %vm5624_vm5, %v16576_v40, %v16577_v15  ;;  %v16578_v53 = vld [vmem:[#allocation443_spill] sm:$0xff]  ;;  %v16581_v55 = vld [vmem:[#allocation110_spill] sm:$0xff]  ;;  %v16582_v16 = vld [vmem:[#allocation76_spill] sm:$0xff] }
 0xd3c   : > { %16574 = vst [vmem:[#allocation240_spill] sm:$0xff] %v13341_v36  ;;  %6507 = vperm.xlu1 %8942, %v16578_v53   ;;  %v16579_v22 = vld [vmem:[#allocation183_spill] sm:$0xff]  ;;  %v5596_v36 = vmul.f32 %v16581_v55, %v5580_v1  ;;  %v5597_v47 = vmul.f32 %v16582_v16, %v5578_v42  ;;  %v16583_v17 = vld [vmem:[#allocation433_spill] sm:$0xff]  ;;  %v16584_v30 = vld [vmem:[#allocation126_spill] sm:$0xff]  ;;  %v13369_v15 = vmul.f32 %v12751_v32, %v7253_v62  ;;  %vm16589_vm5 = vcmp.lt.s32.totalorder %v9525_v14, 95 }
 0xd3d   : > { %v13358_v35 = vmul.f32 %v16579_v22, %v7206_v45  ;;  %6454 = vperm.xlu0 %8941, %v16583_v17   ;;  %v13366_v20 = vmul.f32 %v16584_v30, %v7208_v3  ;;  %v16587_v40 = vld [vmem:[#allocation250_spill] sm:$0xff]  ;;  %vm16590_vm12 = vmmov %vm16589_vm5  ;;  %v16591_v1 = vld [vmem:[#allocation248_spill] sm:$0xff]  ;;  %vm16593_vm13 = vcmp.lt.s32.totalorder %v9525_v14, 47  ;;  %vm16599_vm2 = vcmp.lt.s32.totalorder %v9525_v14, 94 }
 0xd3e   : > { %16586 = vst [vmem:[#allocation131_spill] sm:$0xff] %v13369_v15  ;;  %v7300_v45 = vsel %vm16589_vm5, %v16588_v56, %v16587_v40  ;;  %v7302_v42 = vsel %vm16590_vm12, %v16587_v40, %v16588_v56  ;;  %v16592_v17 = vld [vmem:[#allocation159_spill] sm:$0xff]  ;;  %vm16594_vm1 = vmmov %vm16593_vm13  ;;  %v16595_v62 = vld [vmem:[#allocation77_spill] sm:$0xff]  ;;  %v5654_v56 = vpop.permute.xlu1 %5653  ;;  %v13393_v40 = vpop.permute.xlu0 %7092  ;;  %v13396_v30 = vmul.f32 %v12766_v43, %v7255_v21 }
 0xd3f   : > { %16580 = vst [vmem:[#allocation151_spill] sm:$0xff] %v13358_v35  ;;  %16585 = vst [vmem:[#allocation245_spill] sm:$0xff] %v13366_v20  ;;  %v5674_v53 = vsel %vm16593_vm13, %v16592_v17, %v16591_v1  ;;  %v5676_v3 = vsel %vm16594_vm1, %v16591_v1, %v16592_v17  ;;  %v5644_v55 = vmul.f32 %v16595_v62, %v5628_v60  ;;  %v16596_v16 = vld [vmem:[#allocation114_spill] sm:$0xff]  ;;  %v16597_v20 = vld [vmem:[#allocation252_spill] sm:$0xff]  ;;  %v13418_v43 = vpop.f32.mrf.mxu0  ;;  %vm16660_vm1 = vcmp.lt.s32.totalorder %v9525_v14, 114 }
 0xd40   : > { %v5645_v15 = vmul.f32 %v16596_v16, %v5626_v33  ;;  %v16598_v35 = vld [vmem:[#allocation139_spill] sm:$0xff]  ;;  %16600 = vst [vmem:[#allocation242_spill] sm:$0xff] %v13393_v40  ;;  %16601 = vst [vmem:[#allocation153_spill] sm:$0xff] %v13396_v30  ;;  %v16604_v60 = vld [vmem:[#allocation162_spill] sm:$0xff]  ;;  %6554 = vperm.xlu1 %8942, %v12802_v50   ;;  %v13421_v22 = vmul.f32 %v12779_v12, %v7300_v45 }
 0xd41   : > { %v7347_v32 = vsel %vm16599_vm2, %v16598_v35, %v16597_v20  ;;  %vm16602_vm5 = vmmov %vm16599_vm2  ;;  %v16603_v17 = vld [vmem:[#allocation251_spill] sm:$0xff]  ;;  %v16605_v16 = vld [vmem:[#allocation254_spill] sm:$0xff]  ;;  %6502 = vperm.xlu0 %8941, %v12742_v11  }
 0xd42   : > { %v7349_v1 = vsel %vm16602_vm5, %v16597_v20, %v16598_v35  ;;  %v5722_v33 = vsel %vm5720_vm6, %v16604_v60, %v16603_v17  ;;  %v5724_v62 = vsel %vm5720_vm6, %v16603_v17, %v16604_v60  ;;  %v16606_v40 = vld [vmem:[#allocation141_spill] sm:$0xff]  ;;  %v5692_v20 = vmul.f32 %v12394_v38, %v5676_v3  ;;  %v16607_v35 = vld [vmem:[#allocation115_spill] sm:$0xff]  ;;  %16608 = vst [vmem:[#allocation419_spill] sm:$0xff] %v13421_v22  ;;  %v16611_v28 = vld [vmem:[#allocation164_spill] sm:$0xff] }
 0xd43   : > { %v7395_v21 = vsel %vm7394_vm11, %v16606_v40, %v16605_v16  ;;  %v5693_v30 = vmul.f32 %v16607_v35, %v5674_v53  ;;  %v13424_v17 = vmul.f32 %v12782_v13, %v7302_v42  ;;  %v7397_v60 = vsel %vm7394_vm11, %v16605_v16, %v16606_v40  ;;  %v16610_v50 = vld [vmem:[#allocation253_spill] sm:$0xff]  ;;  %v13442_v42 = vpop.permute.xlu1 %7087  ;;  %v5649_v53 = vpop.permute.xlu0 %5648  ;;  %v16614_v3 = vld [vmem:[#allocation80_spill] sm:$0xff]  ;;  %v16615_v16 = vld [vmem:[#allocation378_spill] sm:$0xff] }
 0xd44   : > { %v5770_v38 = vsel %vm5768_vm3, %v16611_v28, %v16610_v50  ;;  %v5772_v11 = vsel %vm5768_vm3, %v16610_v50, %v16611_v28  ;;  %v13439_v45 = vmul.f32 %v12808_v6, %v7347_v32  ;;  %vm7538_vm6 = vcmp.lt.s32.totalorder %v9525_v14, 81  ;;  %16613 = vst [vmem:[#allocation133_spill] sm:$0xff] %v13442_v42  ;;  %v16619_v28 = vld [vmem:[#allocation256_spill] sm:$0xff]  ;;  %v16620_v32 = vld [vmem:[#allocation143_spill] sm:$0xff]  ;;  %6601 = vperm.xlu1 %8942, %v12917_v5   ;;  %v16625_v42 = vld [vmem:[#allocation381_spill] sm:$0xff] }
 0xd45   : > { %16609 = vst [vmem:[#allocation339_spill] sm:$0xff] %v13424_v17  ;;  %v13445_v40 = vmul.f32 %v16614_v3, %v5724_v62  ;;  %v13448_v35 = vmul.f32 %v16615_v16, %v5722_v33  ;;  %v16616_v17 = vld [vmem:[#allocation134_spill] sm:$0xff]  ;;  %v13454_v13 = vmul.f32 %v12826_v37, %v7395_v21  ;;  %v7443_v50 = vsel %vm7442_vm8, %v16620_v32, %v16619_v28  ;;  %v16622_v16 = vld [vmem:[#allocation255_spill] sm:$0xff]  ;;  %vm16661_vm2 = vmmov %vm16660_vm1 }
 0xd46   : > { %16612 = vst [vmem:[#allocation247_spill] sm:$0xff] %v13439_v45  ;;  %v13451_v22 = vmul.f32 %v16616_v17, %v7349_v1  ;;  %v7445_v62 = vsel %vm7442_vm8, %v16619_v28, %v16620_v32  ;;  %v5562_v3 = vmul.f32 %v13137_v48, %v5548_v39  ;;  %v5563_v33 = vmul.f32 %v13137_v48, %v5549_v46  ;;  %v16621_v1 = vld [vmem:[#allocation166_spill] sm:$0xff] }
 0xd47   : > { %16618 = vst [vmem:[#allocation244_spill] sm:$0xff] %v13454_v13  ;;  %vm16623_vm3 = vcmp.lt.s32.totalorder %v9525_v14, 35  ;;  %6549 = vperm.xlu0 %8941, %v12858_v18   ;;  %v13472_v13 = vpop.f32.mrf.mxu0  ;;  %v13478_v28 = vmul.f32 %v16625_v42, %v5770_v38  ;;  %v13481_v39 = vmul.f32 %v12840_v59, %v7397_v60  ;;  %v5518_v48 = vmul.f32 %v13011_v63, %v13299_v26  ;;  %v16628_v38 = vld [vmem:[#allocation258_spill] sm:$0xff]  ;;  %v5702_v42 = vpop.permute.xlu1 %5701 }
 0xd48   : > { %16617 = vst [vmem:[#allocation403_spill] sm:$0xff] %v13451_v22  ;;  %v5820_v21 = vsel %vm16623_vm3, %v16622_v16, %v16621_v1  ;;  %v16624_v22 = vld [vmem:[#allocation379_spill] sm:$0xff]  ;;  %v5519_v46 = vmul.f32 %v13011_v63, %v13302_v29  ;;  %v5610_v5 = vmul.f32 %v13274_v41, %v5596_v36  ;;  %v5611_v18 = vmul.f32 %v13274_v41, %v5597_v47  ;;  %vm16627_vm12 = vmmov %vm16623_vm3  ;;  %v13497_v32 = vpop.permute.xlu0 %7140  ;;  %v16633_v47 = vld [vmem:[#allocation382_spill] sm:$0xff] }
 0xd49   : > { %v13475_v45 = vmul.f32 %v16624_v22, %v5772_v11  ;;  %16626 = vst [vmem:[#allocation155_spill] sm:$0xff] %v13481_v39  ;;  %v5818_v22 = vsel %vm16627_vm12, %v16621_v1, %v16622_v16  ;;  %v16629_v11 = vld [vmem:[#allocation145_spill] sm:$0xff]  ;;  %16630 = vst [vmem:[#allocation249_spill] sm:$0xff] %v13497_v32  ;;  %v13500_v26 = vmul.f32 %v12850_v4, %v7443_v50  ;;  %6619 = vperm.xlu1 %8942, %v13042_v27   ;;  %v16634_v16 = vld [vmem:[#allocation435_spill] sm:$0xff]  ;;  %v13518_v32 = vpop.f32.mrf.mxu0 }
 0xd4a   : > { %v7491_v60 = vsel %vm7490_vm4, %v16629_v11, %v16628_v38  ;;  %v13503_v29 = vmul.f32 %v12853_v31, %v7445_v62  ;;  %v7493_v63 = vsel %vm7490_vm4, %v16628_v38, %v16629_v11  ;;  %v5566_v36 = vadd.f32 %v5562_v3, %v5518_v48  ;;  %v16635_v50 = vld [vmem:[#allocation438_spill] sm:$0xff] }
 0xd4b   : > { %16631 = vst [vmem:[#allocation135_spill] sm:$0xff] %v13500_v26  ;;  %v5567_v41 = vadd.f32 %v5563_v33, %v5519_v46  ;;  %v13511_v1 = vmul.f32 %v16633_v47, %v5820_v21  ;;  %v5560_v39 = vmul.f32 %v13206_v8, %v16634_v16  ;;  %v5561_v26 = vmul.f32 %v13206_v8, %v16635_v50  ;;  %v16636_v38 = vld [vmem:[#allocation434_spill] sm:$0xff]  ;;  %v16637_v33 = vld [vmem:[#allocation120_spill] sm:$0xff]  ;;  %v16639_v47 = vld [vmem:[#allocation439_spill] sm:$0xff] }
 0xd4c   : > { %16632 = vst [vmem:[#allocation73_spill] sm:$0xff] %v13503_v29  ;;  %v5658_v62 = vmul.f32 %v5654_v56, %v5644_v55  ;;  %v5659_v29 = vmul.f32 %v5654_v56, %v5645_v15  ;;  %6596 = vperm.xlu0 %8941, %v12983_v61   ;;  %v5516_v3 = vmul.f32 %v13081_v58, %v16636_v38  ;;  %v16638_v46 = vld [vmem:[#allocation122_spill] sm:$0xff]  ;;  %v13528_v56 = vpop.permute.xlu1 %7135  ;;  %v5697_v61 = vpop.permute.xlu0 %5696  ;;  %v16641_v16 = vld [vmem:[#allocation257_spill] sm:$0xff]  ;;  %v16642_v50 = vld [vmem:[#allocation168_spill] sm:$0xff]  ;;  %vm16675_vm5 = vcmp.lt.s32.totalorder %v9525_v14, 113 }
 0xd4d   : > { %v5517_v27 = vmul.f32 %v13081_v58, %v16637_v33  ;;  %v5614_v21 = vadd.f32 %v5610_v5, %v5566_v36  ;;  %v5615_v48 = vadd.f32 %v5611_v18, %v5567_v41  ;;  %v5608_v11 = vmul.f32 %v13335_v54, %v16638_v46  ;;  %16640 = vst [vmem:[#allocation246_spill] sm:$0xff] %v13528_v56  ;;  %v16644_v18 = vld [vmem:[#allocation457_spill] sm:$0xff]  ;;  %v13545_v41 = vpop.f32.mrf.mxu0  ;;  %vm16676_vm3 = vmmov %vm16675_vm5 }
 0xd4e   : > { %v5609_v8 = vmul.f32 %v13335_v54, %v16639_v47  ;;  %v5706_v55 = vmul.f32 %v5702_v42, %v5692_v20  ;;  %v5707_v15 = vmul.f32 %v5702_v42, %v5693_v30  ;;  %v5865_v38 = vsel %vm3020_vm14, %v16642_v50, %v16641_v16  ;;  %6666 = vperm.xlu1 %8942, %v13170_v52   ;;  %v16646_v52 = vld [vmem:[#allocation260_spill] sm:$0xff]  ;;  %v16652_v47 = vld [vmem:[#allocation185_spill] sm:$0xff] }
 0xd4f   : > { %v13536_v58 = vmul.f32 %v12422_v57, %v5818_v22  ;;  %v13539_v5 = vmul.f32 %v12867_v2, %v7491_v60  ;;  %v13542_v54 = vmul.f32 %v16644_v18, %v7493_v63  ;;  %v5564_v30 = vadd.f32 %v5560_v39, %v5516_v3  ;;  %v16647_v22 = vld [vmem:[#allocation147_spill] sm:$0xff]  ;;  %v16648_v63 = vld [vmem:[#allocation444_spill] sm:$0xff]  ;;  %v16649_v39 = vld [vmem:[#allocation445_spill] sm:$0xff] }
 0xd50   : > { %v5565_v20 = vadd.f32 %v5561_v26, %v5517_v27  ;;  %v5662_v42 = vadd.f32 %v5658_v62, %v5614_v21  ;;  %v5663_v36 = vadd.f32 %v5659_v29, %v5615_v48  ;;  %6614 = vperm.xlu0 %8941, %v13111_v19   ;;  %v5867_v57 = vsel %vm3020_vm14, %v16641_v16, %v16642_v50  ;;  %v5750_v27 = vpop.permute.xlu1 %5749  ;;  %v13557_v21 = vpop.permute.xlu0 %7187  ;;  %v16651_v48 = vld [vmem:[#allocation128_spill] sm:$0xff]  ;;  %v16759_v56 = vld [vmem:[#allocation397_spill] sm:$0xff] }
 0xd51   : > { %16643 = vst [vmem:[#allocation157_spill] sm:$0xff] %v13539_v5  ;;  %16645 = vst [vmem:[#allocation443_spill] sm:$0xff] %v13542_v54  ;;  %v7539_v60 = vsel %vm7538_vm6, %v16647_v22, %v16646_v52  ;;  %v5656_v33 = vmul.f32 %v5649_v53, %v16648_v63  ;;  %v5657_v26 = vmul.f32 %v5649_v53, %v16649_v39  ;;  %vm16655_vm14 = vcmp.lt.s32.totalorder %v9525_v14, 33 }
 0xd52   : > { %v5612_v62 = vadd.f32 %v5608_v11, %v5564_v30  ;;  %v5613_v29 = vadd.f32 %v5609_v8, %v5565_v20  ;;  %v5710_v3 = vadd.f32 %v5706_v55, %v5662_v42  ;;  %v5711_v19 = vadd.f32 %v5707_v15, %v5663_v36  ;;  %16650 = vst [vmem:[#allocation110_spill] sm:$0xff] %v13557_v21  ;;  %v16653_v11 = vld [vmem:[#allocation259_spill] sm:$0xff]  ;;  %v16654_v8 = vld [vmem:[#allocation170_spill] sm:$0xff]  ;;  %vm16656_vm13 = vmmov %vm16655_vm14 }
 0xd53   : > { %v5704_v46 = vmul.f32 %v5697_v61, %v16651_v48  ;;  %v5705_v16 = vmul.f32 %v5697_v61, %v16652_v47  ;;  %v5754_v50 = vmul.f32 %v5750_v27, %v13445_v40  ;;  %v5755_v54 = vmul.f32 %v5750_v27, %v13448_v35  ;;  %6713 = vperm.xlu1 %8942, %v13313_v23   ;;  %v13577_v40 = vpop.f32.mrf.mxu0  ;;  %v16657_v23 = vld [vmem:[#allocation383_spill] sm:$0xff]  ;;  %v16658_v36 = vld [vmem:[#allocation262_spill] sm:$0xff]  ;;  %v16663_v27 = vld [vmem:[#allocation384_spill] sm:$0xff] }
 0xd54   : > { %v7541_v53 = vsel %vm7538_vm6, %v16646_v52, %v16647_v22  ;;  %v5912_v55 = vsel %vm16655_vm14, %v16654_v8, %v16653_v11  ;;  %v5914_v15 = vsel %vm16656_vm13, %v16653_v11, %v16654_v8  ;;  %6661 = vperm.xlu0 %8941, %v13248_v49   ;;  %v13580_v35 = vmul.f32 %v16657_v23, %v5867_v57  ;;  %v16659_v52 = vld [vmem:[#allocation206_spill] sm:$0xff]  ;;  %v13590_v49 = vpop.permute.xlu1 %7182  ;;  %v5745_v39 = vpop.permute.xlu0 %5744  ;;  %v16668_v47 = vld [vmem:[#allocation261_spill] sm:$0xff] }
 0xd55   : > { %v5660_v61 = vadd.f32 %v5656_v33, %v5612_v62  ;;  %v5661_v30 = vadd.f32 %v5657_v26, %v5613_v29  ;;  %v5758_v20 = vadd.f32 %v5754_v50, %v5710_v3  ;;  %v5759_v42 = vadd.f32 %v5755_v54, %v5711_v19  ;;  %16662 = vst [vmem:[#allocation76_spill] sm:$0xff] %v13590_v49  ;;  %v16664_v33 = vld [vmem:[#allocation138_spill] sm:$0xff]  ;;  %v16666_v29 = vld [vmem:[#allocation187_spill] sm:$0xff]  ;;  %v16669_v50 = vld [vmem:[#allocation172_spill] sm:$0xff] }
 0xd56   : > { %v6829_v22 = vsel %vm16660_vm1, %v16659_v52, %v16658_v36  ;;  %v6831_v63 = vsel %vm16661_vm2, %v16658_v36, %v16659_v52  ;;  %v13593_v57 = vmul.f32 %v16663_v27, %v5865_v38  ;;  %v13596_v26 = vmul.f32 %v16664_v33, %v7539_v60  ;;  %v16667_v19 = vld [vmem:[#allocation447_spill] sm:$0xff]  ;;  %v5197_v38 = vpop.f32.mrf.mxu0  ;;  %v16670_v8 = vld [vmem:[#allocation385_spill] sm:$0xff]  ;;  %v16671_v60 = vld [vmem:[#allocation386_spill] sm:$0xff] }
 0xd57   : > { %v5708_v54 = vadd.f32 %v5704_v46, %v5660_v61  ;;  %v5709_v62 = vadd.f32 %v5705_v16, %v5661_v30  ;;  %v5752_v3 = vmul.f32 %v5745_v39, %v16666_v29  ;;  %v5753_v48 = vmul.f32 %v5745_v39, %v16667_v19  ;;  %6761 = vperm.xlu1 %8942, %v13418_v43   ;;  %v16673_v61 = vld [vmem:[#allocation264_spill] sm:$0xff] }
 0xd58   : > { %16665 = vst [vmem:[#allocation433_spill] sm:$0xff] %v13596_v26  ;;  %v5959_v11 = vsel %vm3111_vm0, %v16669_v50, %v16668_v47  ;;  %6708 = vperm.xlu0 %8941, %v13363_v51   ;;  %v13607_v23 = vmul.f32 %v16670_v8, %v5914_v15  ;;  %v13610_v46 = vmul.f32 %v16671_v60, %v5912_v55  ;;  %v16674_v30 = vld [vmem:[#allocation208_spill] sm:$0xff]  ;;  %v16677_v15 = vld [vmem:[#allocation263_spill] sm:$0xff]  ;;  %v5798_v27 = vpop.permute.xlu1 %5797  ;;  %v13631_v29 = vpop.permute.xlu0 %7234  ;;  %v16687_v60 = vld [vmem:[#allocation389_spill] sm:$0xff]  ;;  %vm16697_vm13 = vcmp.lt.s32.totalorder %v9525_v14, 111 }
 0xd59   : > { %v13613_v16 = vmul.f32 %v12929_v44, %v7541_v53  ;;  %v5961_v43 = vsel %vm3111_vm0, %v16668_v47, %v16669_v50  ;;  %v6876_v51 = vsel %vm16675_vm5, %v16674_v30, %v16673_v61  ;;  %v5756_v36 = vadd.f32 %v5752_v3, %v5708_v54  ;;  %v16678_v53 = vld [vmem:[#allocation174_spill] sm:$0xff]  ;;  %16679 = vst [vmem:[#allocation137_spill] sm:$0xff] %v13631_v29  ;;  %vm16698_vm1 = vmmov %vm16697_vm13 }
 0xd5a   : > { %v5757_v52 = vadd.f32 %v5753_v48, %v5709_v62  ;;  %v6878_v55 = vsel %vm16676_vm3, %v16673_v61, %v16674_v30  ;;  %v6006_v39 = vsel %vm3159_vm9, %v16678_v53, %v16677_v15  ;;  %v13634_v19 = vmul.f32 %v16504_v34, %v6829_v22  ;;  %v16682_v62 = vld [vmem:[#allocation266_spill] sm:$0xff]  ;;  %v16686_v22 = vld [vmem:[#allocation388_spill] sm:$0xff] }
 0xd5b   : > { %16672 = vst [vmem:[#allocation250_spill] sm:$0xff] %v13613_v16  ;;  %v13637_v47 = vmul.f32 %v16520_v24, %v6831_v63  ;;  %v6008_v54 = vsel %vm3159_vm9, %v16677_v15, %v16678_v53  ;;  %v16683_v3 = vld [vmem:[#allocation210_spill] sm:$0xff]  ;;  %vm16684_vm0 = vcmp.lt.s32.totalorder %v9525_v14, 112  ;;  %v5802_v50 = vmul.f32 %v5798_v27, %v13475_v45  ;;  %6809 = vperm.xlu1 %8942, %v13518_v32   ;;  %v13655_v24 = vpop.f32.mrf.mxu0  ;;  %v16690_v32 = vld [vmem:[#allocation176_spill] sm:$0xff] }
 0xd5c   : > { %16680 = vst [vmem:[#allocation248_spill] sm:$0xff] %v13634_v19  ;;  %v6923_v48 = vsel %vm16684_vm0, %v16683_v3, %v16682_v62  ;;  %v5803_v8 = vmul.f32 %v5798_v27, %v13478_v28  ;;  %vm16685_vm12 = vmmov %vm16684_vm0  ;;  %6756 = vperm.xlu0 %8941, %v13472_v13   ;;  %v13658_v63 = vmul.f32 %v16686_v22, %v5961_v43  ;;  %v16689_v28 = vld [vmem:[#allocation265_spill] sm:$0xff]  ;;  %vm16691_vm9 = vcmp.lt.s32.totalorder %v9525_v14, 30  ;;  %v5793_v27 = vpop.permute.xlu0 %5792  ;;  %v16696_v22 = vld [vmem:[#allocation212_spill] sm:$0xff] }
 0xd5d   : > { %16681 = vst [vmem:[#allocation159_spill] sm:$0xff] %v13637_v47  ;;  %v6925_v34 = vsel %vm16685_vm12, %v16682_v62, %v16683_v3  ;;  %v13661_v61 = vmul.f32 %v16687_v60, %v5959_v11  ;;  %v13664_v45 = vmul.f32 %v16522_v9, %v6876_v51  ;;  %v6053_v30 = vsel %vm16691_vm9, %v16690_v32, %v16689_v28  ;;  %vm16692_vm14 = vmmov %vm16691_vm9  ;;  %v13677_v11 = vpop.permute.xlu1 %7229  ;;  %v16695_v3 = vld [vmem:[#allocation268_spill] sm:$0xff]  ;;  %v16705_v60 = vld [vmem:[#allocation390_spill] sm:$0xff] }
 0xd5e   : > { %v6055_v13 = vsel %vm16692_vm14, %v16689_v28, %v16690_v32  ;;  %v5806_v15 = vadd.f32 %v5802_v50, %v5758_v20  ;;  %v5807_v53 = vadd.f32 %v5803_v8, %v5759_v42  ;;  %v13675_v43 = vmul.f32 %v16532_v10, %v6923_v48  ;;  %16693 = vst [vmem:[#allocation114_spill] sm:$0xff] %v13677_v11  ;;  %v16699_v42 = vld [vmem:[#allocation450_spill] sm:$0xff]  ;;  %v5207_v8 = vpop.f32.mrf.mxu0  ;;  %v16706_v32 = vld [vmem:[#allocation391_spill] sm:$0xff]  ;;  %v16771_v47 = vld [vmem:[#allocation400_spill] sm:$0xff] }
 0xd5f   : > { %16688 = vst [vmem:[#allocation77_spill] sm:$0xff] %v13664_v45  ;;  %v13680_v9 = vmul.f32 %v12452_v25, %v6008_v54  ;;  %v13683_v51 = vmul.f32 %v12455_v0, %v6006_v39  ;;  %v13686_v62 = vmul.f32 %v16524_v7, %v6878_v55  ;;  %v6970_v20 = vsel %vm16697_vm13, %v16696_v22, %v16695_v3  ;;  %v16700_v25 = vld [vmem:[#allocation189_spill] sm:$0xff]  ;;  %v16701_v0 = vld [vmem:[#allocation118_spill] sm:$0xff]  ;;  %v16702_v7 = vld [vmem:[#allocation267_spill] sm:$0xff] }
 0xd60   : > { %v6972_v10 = vsel %vm16698_vm1, %v16695_v3, %v16696_v22  ;;  %v5800_v48 = vmul.f32 %v5793_v27, %v16699_v42  ;;  %v5801_v54 = vmul.f32 %v5793_v27, %v16700_v25  ;;  %6851 = vperm.xlu1 %8942, %v5197_v38   ;;  %v13699_v39 = vmul.f32 %v16701_v0, %v6925_v34  ;;  %v16703_v55 = vld [vmem:[#allocation178_spill] sm:$0xff]  ;;  %v13734_v26 = vpop.permute.xlu0 %7281 }
 0xd61   : > { %16694 = vst [vmem:[#allocation252_spill] sm:$0xff] %v13686_v62  ;;  %vm16704_vm2 = vcmp.lt.s32.totalorder %v9525_v14, 29  ;;  %6804 = vperm.xlu0 %8941, %v13545_v41   ;;  %v13707_v28 = vmul.f32 %v16705_v60, %v6055_v13  ;;  %v13710_v3 = vmul.f32 %v16706_v32, %v6053_v30  ;;  %v16708_v34 = vld [vmem:[#allocation270_spill] sm:$0xff]  ;;  %vm16710_vm3 = vcmp.lt.s32.totalorder %v9525_v14, 110  ;;  %v16711_v41 = vld [vmem:[#allocation175_spill] sm:$0xff]  ;;  %v16714_v32 = vld [vmem:[#allocation269_spill] sm:$0xff]  ;;  %v5846_v16 = vpop.permute.xlu1 %5845 }
 0xd62   : > { %v6101_v50 = vsel %vm16704_vm2, %v16703_v55, %v16702_v7  ;;  %vm16707_vm5 = vmmov %vm16704_vm2  ;;  %v16709_v27 = vld [vmem:[#allocation214_spill] sm:$0xff]  ;;  %v5804_v42 = vadd.f32 %v5800_v48, %v5756_v36  ;;  %v5805_v25 = vadd.f32 %v5801_v54, %v5757_v52  ;;  %v13721_v0 = vmul.f32 %v16711_v41, %v6970_v20  ;;  %v16712_v13 = vld [vmem:[#allocation431_spill] sm:$0xff]  ;;  %16717 = vst [vmem:[#allocation139_spill] sm:$0xff] %v13734_v26 }
 0xd63   : > { %v6103_v38 = vsel %vm16707_vm5, %v16702_v7, %v16703_v55  ;;  %v7017_v22 = vsel %vm16710_vm3, %v16709_v27, %v16708_v34  ;;  %v13724_v60 = vmul.f32 %v16712_v13, %v6972_v10  ;;  %vm16713_vm0 = vmmov %vm16710_vm3  ;;  %v16715_v7 = vld [vmem:[#allocation180_spill] sm:$0xff]  ;;  %vm16716_vm12 = vcmp.lt.s32.totalorder %v9525_v14, 19  ;;  %v16725_v26 = vld [vmem:[#allocation271_spill] sm:$0xff] }
 0xd64   : > { %v7019_v30 = vsel %vm16713_vm0, %v16708_v34, %v16709_v27  ;;  %v6149_v55 = vsel %vm16716_vm12, %v16715_v7, %v16714_v32  ;;  %vm16718_vm9 = vmmov %vm16716_vm12  ;;  %v16719_v52 = vld [vmem:[#allocation272_spill] sm:$0xff]  ;;  %v5850_v48 = vmul.f32 %v5846_v16, %v13511_v1  ;;  %v5851_v54 = vmul.f32 %v5846_v16, %v13536_v58  ;;  %6898 = vperm.xlu1 %8942, %v5207_v8   ;;  %v16724_v1 = vld [vmem:[#allocation182_spill] sm:$0xff] }
 0xd65   : > { %v6151_v36 = vsel %vm16718_vm9, %v16714_v32, %v16715_v7  ;;  %v16720_v20 = vld [vmem:[#allocation216_spill] sm:$0xff]  ;;  %6856 = vperm.xlu0 %8941, %v13577_v40   ;;  %v16723_v7 = vld [vmem:[#allocation393_spill] sm:$0xff]  ;;  %vm16726_vm14 = vcmp.lt.s32.totalorder %v9525_v14, 18  ;;  %v16727_v16 = vld [vmem:[#allocation274_spill] sm:$0xff]  ;;  %vm16745_vm13 = vcmp.lt.s32.totalorder %v9525_v14, 17  ;;  %vm16751_vm1 = vcmp.lt.s32.totalorder %v9525_v14, 98 }
 0xd66   : > { %v7065_v10 = vsel %vm7063_vm7, %v16720_v20, %v16719_v52  ;;  %v16721_v34 = vld [vmem:[#allocation432_spill] sm:$0xff]  ;;  %v7067_v41 = vsel %vm7063_vm7, %v16719_v52, %v16720_v20  ;;  %v13758_v5 = vmul.f32 %v16723_v7, %v6101_v50  ;;  %v6198_v58 = vsel %vm16726_vm14, %v16725_v26, %v16724_v1  ;;  %v16728_v8 = vld [vmem:[#allocation218_spill] sm:$0xff]  ;;  %v16729_v20 = vld [vmem:[#allocation177_spill] sm:$0xff]  ;;  %v13774_v50 = vpop.permute.xlu1 %7276  ;;  %v5841_v7 = vpop.permute.xlu0 %5840 }
 0xd67   : > { %v13747_v27 = vmul.f32 %v16721_v34, %v7017_v22  ;;  %v16722_v13 = vld [vmem:[#allocation392_spill] sm:$0xff]  ;;  %v7113_v22 = vsel %vm7111_vm15, %v16728_v8, %v16727_v16  ;;  %v5854_v34 = vadd.f32 %v5850_v48, %v5806_v15  ;;  %v5855_v52 = vadd.f32 %v5851_v54, %v5807_v53  ;;  %16731 = vst [vmem:[#allocation251_spill] sm:$0xff] %v13774_v50  ;;  %v16732_v11 = vld [vmem:[#allocation394_spill] sm:$0xff]  ;;  %v16734_v62 = vld [vmem:[#allocation395_spill] sm:$0xff] }
 0xd68   : > { %v13755_v32 = vmul.f32 %v16722_v13, %v6103_v38  ;;  %v13769_v40 = vmul.f32 %v16729_v20, %v7019_v30  ;;  %v16730_v38 = vld [vmem:[#allocation436_spill] sm:$0xff]  ;;  %v13777_v29 = vmul.f32 %v16732_v11, %v6151_v36  ;;  %v13780_v45 = vmul.f32 %v16734_v62, %v6149_v55  ;;  %vm16736_vm7 = vmmov %vm16726_vm14  ;;  %v16738_v48 = vld [vmem:[#allocation191_spill] sm:$0xff] }
 0xd69   : > { %v13772_v13 = vmul.f32 %v16730_v38, %v7065_v10  ;;  %v6196_v15 = vsel %vm16736_vm7, %v16724_v1, %v16725_v26  ;;  %v7115_v53 = vsel %vm7111_vm15, %v16727_v16, %v16728_v8  ;;  %v16737_v30 = vld [vmem:[#allocation132_spill] sm:$0xff]  ;;  %v5849_v54 = vmul.f32 %v5841_v7, %v16738_v48  ;;  %v16739_v11 = vld [vmem:[#allocation91_spill] sm:$0xff]  ;;  %v16740_v62 = vld [vmem:[#allocation437_spill] sm:$0xff]  ;;  %6903 = vperm.xlu0 %8941, %v13655_v24  }
 0xd6a   : > { %16733 = vst [vmem:[#allocation162_spill] sm:$0xff] %v13777_v29  ;;  %16735 = vst [vmem:[#allocation254_spill] sm:$0xff] %v13780_v45  ;;  %v5848_v10 = vmul.f32 %v5841_v7, %v16737_v30  ;;  %7628 = vrot.lane.b32.xlu1 %v16739_v11, %s9091_s28  ;;  %v13795_v55 = vmul.f32 %v16740_v62, %v7067_v41  ;;  %v16741_v36 = vld [vmem:[#allocation440_spill] sm:$0xff]  ;;  %v16743_v26 = vld [vmem:[#allocation273_spill] sm:$0xff]  ;;  %vm16757_vm5 = vcmp.lt.s32.totalorder %v9525_v14, 16  ;;  %v13827_v21 = vpop.permute.xlu0 %7328  ;;  %vm16764_vm0 = vcmp.lt.s32.totalorder %v9525_v14, 97 }
 0xd6b   : > { %v13798_v20 = vmul.f32 %v16741_v36, %v7113_v22  ;;  %v16744_v1 = vld [vmem:[#allocation184_spill] sm:$0xff]  ;;  %vm16748_vm15 = vmmov %vm16745_vm13  ;;  %v5853_v62 = vadd.f32 %v5849_v54, %v5805_v25  ;;  %v5367_v36 = vpop.f32.mrf.mxu1  ;;  %v16752_v50 = vld [vmem:[#allocation441_spill] sm:$0xff]  ;;  %16758 = vst [vmem:[#allocation164_spill] sm:$0xff] %v13827_v21  ;;  %vm16775_vm9 = vcmp.lt.s32.totalorder %v9525_v14, 15  ;;  %vm16788_vm7 = vcmp.lt.s32.totalorder %v9525_v14, 96 }
 0xd6c   : > { %v6243_v38 = vsel %vm16745_vm13, %v16744_v1, %v16743_v26  ;;  %v16746_v16 = vld [vmem:[#allocation396_spill] sm:$0xff]  ;;  %v6245_v7 = vsel %vm16748_vm15, %v16743_v26, %v16744_v1  ;;  %v5852_v48 = vadd.f32 %v5848_v10, %v5804_v42  ;;  %v13817_v49 = vmul.f32 %v16752_v50, %v7115_v53  ;;  %vm16754_vm2 = vmmov %vm16751_vm1  ;;  %v5893_v1 = vpop.permute.xlu1 %5892  ;;  %v16762_v50 = vld [vmem:[#allocation278_spill] sm:$0xff] }
 0xd6d   : > { %16742 = vst [vmem:[#allocation141_spill] sm:$0xff] %v13798_v20  ;;  %v13806_v8 = vmul.f32 %v16746_v16, %v6198_v58  ;;  %v16749_v41 = vld [vmem:[#allocation276_spill] sm:$0xff]  ;;  %v16755_v58 = vld [vmem:[#allocation275_spill] sm:$0xff]  ;;  %v16756_v16 = vld [vmem:[#allocation186_spill] sm:$0xff]  ;;  %v13830_v42 = vmul.f32 %v16759_v56, %v6196_v15  ;;  %v5897_v54 = vmul.f32 %v5893_v1, %v13580_v35  ;;  %v13855_v19 = vmul.f32 %v16771_v47, %v6243_v38 }
 0xd6e   : > { %v16750_v30 = vld [vmem:[#allocation220_spill] sm:$0xff]  ;;  %16753 = vst [vmem:[#allocation253_spill] sm:$0xff] %v13817_v49  ;;  %v6290_v26 = vsel %vm16757_vm5, %v16756_v16, %v16755_v58  ;;  %vm16761_vm3 = vmmov %vm16757_vm5  ;;  %v16763_v53 = vld [vmem:[#allocation222_spill] sm:$0xff]  ;;  %7658 = vperm.xlu1 %8942, %v5367_v36   ;;  %v5888_v38 = vpop.permute.xlu0 %5887  ;;  %vm16795_vm15 = vcmp.lt.s32.totalorder %v9525_v14, 14 }
 0xd6f   : > { %16747 = vst [vmem:[#allocation115_spill] sm:$0xff] %v13806_v8  ;;  %v7160_v22 = vsel %vm16751_vm1, %v16750_v30, %v16749_v41  ;;  %v7162_v24 = vsel %vm16754_vm2, %v16749_v41, %v16750_v30  ;;  %16760 = vst [vmem:[#allocation80_spill] sm:$0xff] %v13830_v42  ;;  %v6292_v25 = vsel %vm16761_vm3, %v16755_v58, %v16756_v16  ;;  %v16766_v15 = vld [vmem:[#allocation181_spill] sm:$0xff]  ;;  %v16769_v16 = vld [vmem:[#allocation399_spill] sm:$0xff]  ;;  %vm16805_vm1 = vcmp.lt.s32.totalorder %v9525_v14, 95 }
 0xd70   : > { %v7207_v10 = vsel %vm16764_vm0, %v16763_v53, %v16762_v50  ;;  %v5898_v41 = vmul.f32 %v5893_v1, %v13593_v57  ;;  %vm16765_vm12 = vmmov %vm16764_vm0  ;;  %v13847_v30 = vmul.f32 %v16766_v15, %v7160_v22  ;;  %v16768_v58 = vld [vmem:[#allocation113_spill] sm:$0xff]  ;;  %v13852_v21 = vmul.f32 %v16769_v16, %v6245_v7  ;;  %16772 = vst [vmem:[#allocation256_spill] sm:$0xff] %v13855_v19  ;;  %v16774_v57 = vld [vmem:[#allocation188_spill] sm:$0xff]  ;;  %v13871_v47 = vpop.permute.xlu1 %7323 }
 0xd71   : > { %v7209_v56 = vsel %vm16765_vm12, %v16762_v50, %v16763_v53  ;;  %7582 = vrot.lane.b32.xlu0 %v16768_v58, %s15822_s23  ;;  %v16773_v35 = vld [vmem:[#allocation277_spill] sm:$0xff]  ;;  %vm16776_vm14 = vmmov %vm16775_vm9  ;;  %v5901_v1 = vadd.f32 %v5897_v54, %v5854_v34  ;;  %v16777_v53 = vld [vmem:[#allocation124_spill] sm:$0xff]  ;;  %16781 = vst [vmem:[#allocation255_spill] sm:$0xff] %v13871_v47  ;;  %vm16810_vm3 = vcmp.lt.s32.totalorder %v9525_v14, 13  ;;  %vm16819_vm12 = vcmp.lt.s32.totalorder %v9525_v14, 94  ;;  %s9092_s23 = smov 78  }
 0xd72   : > { %16767 = vst [vmem:[#allocation378_spill] sm:$0xff] %v13847_v30  ;;  %16770 = vst [vmem:[#allocation134_spill] sm:$0xff] %v13852_v21  ;;  %v6337_v36 = vsel %vm16775_vm9, %v16774_v57, %v16773_v35  ;;  %v6339_v22 = vsel %vm16776_vm14, %v16773_v35, %v16774_v57  ;;  %v5902_v50 = vadd.f32 %v5898_v41, %v5855_v52  ;;  %v16779_v7 = vld [vmem:[#allocation183_spill] sm:$0xff]  ;;  %v16782_v30 = vld [vmem:[#allocation401_spill] sm:$0xff]  ;;  %vm16828_vm14 = vcmp.lt.s32.totalorder %v9525_v14, 3 }
 0xd73   : > { %v13866_v15 = vmul.f32 %v16777_v53, %v7162_v24  ;;  %v13869_v16 = vmul.f32 %v16779_v7, %v7207_v10  ;;  %v13874_v49 = vmul.f32 %v16782_v30, %v6292_v25  ;;  %v16784_v20 = vld [vmem:[#allocation404_spill] sm:$0xff]  ;;  %vm16789_vm13 = vmmov %vm16788_vm7  ;;  %v16791_v54 = vld [vmem:[#allocation193_spill] sm:$0xff] }
 0xd74   : > { %v13877_v19 = vmul.f32 %v16784_v20, %v6290_v26  ;;  %v16786_v21 = vld [vmem:[#allocation280_spill] sm:$0xff]  ;;  %v5896_v41 = vmul.f32 %v5888_v38, %v16791_v54  ;;  %v16792_v25 = vld [vmem:[#allocation69_spill] sm:$0xff]  ;;  %v16793_v30 = vld [vmem:[#allocation190_spill] sm:$0xff] }
 0xd75   : > { %16778 = vst [vmem:[#allocation143_spill] sm:$0xff] %v13866_v15  ;;  %16780 = vst [vmem:[#allocation166_spill] sm:$0xff] %v13869_v16  ;;  %v16787_v42 = vld [vmem:[#allocation224_spill] sm:$0xff]  ;;  %7626 = vrot.lane.b32.xlu1 %v16792_v25, %s9091_s28  ;;  %v16794_v20 = vld [vmem:[#allocation279_spill] sm:$0xff]  ;;  %v8839_v16 = vpop.f32.mrf.mxu1 }
 0xd76   : > { %16783 = vst [vmem:[#allocation379_spill] sm:$0xff] %v13874_v49  ;;  %16785 = vst [vmem:[#allocation381_spill] sm:$0xff] %v13877_v19  ;;  %v7254_v34 = vsel %vm16788_vm7, %v16787_v42, %v16786_v21  ;;  %v7256_v52 = vsel %vm16789_vm13, %v16786_v21, %v16787_v42  ;;  %v16790_v24 = vld [vmem:[#allocation136_spill] sm:$0xff]  ;;  %v6386_v26 = vsel %vm16795_vm15, %v16794_v20, %v16793_v30  ;;  %v16796_v35 = vld [vmem:[#allocation126_spill] sm:$0xff]  ;;  %vm7586_vm13 = vcmp.lt.s32.totalorder %v9525_v14, 80 }
 0xd77   : > { %v5895_v10 = vmul.f32 %v5888_v38, %v16790_v24  ;;  %v13896_v57 = vmul.f32 %v16796_v35, %v7209_v56  ;;  %v16798_v53 = vld [vmem:[#allocation160_spill] sm:$0xff]  ;;  %v16799_v7 = vld [vmem:[#allocation405_spill] sm:$0xff]  ;;  %v16801_v42 = vld [vmem:[#allocation406_spill] sm:$0xff] }
 0xd78   : > { %7632 = vrot.lane.b32.xlu0 %v16798_v53, %s9091_s28  ;;  %v13901_v21 = vmul.f32 %v16799_v7, %v6339_v22  ;;  %v13904_v24 = vmul.f32 %v16801_v42, %v6337_v36  ;;  %v16803_v38 = vld [vmem:[#allocation282_spill] sm:$0xff]  ;;  %vm16806_vm2 = vmmov %vm16805_vm1  ;;  %v16808_v36 = vld [vmem:[#allocation281_spill] sm:$0xff] }
 0xd79   : > { %16797 = vst [vmem:[#allocation258_spill] sm:$0xff] %v13896_v57  ;;  %v16804_v54 = vld [vmem:[#allocation226_spill] sm:$0xff]  ;;  %v5899_v35 = vadd.f32 %v5895_v10, %v5852_v48  ;;  %v5900_v57 = vadd.f32 %v5896_v41, %v5853_v62  ;;  %vm16807_vm5 = vmmov %vm16795_vm15  ;;  %v16809_v7 = vld [vmem:[#allocation192_spill] sm:$0xff]  ;;  %v13928_v48 = vpop.permute.xlu0 %7375  ;;  %7676 = vrot.lane.b32.xlu1 %v16739_v11, %s9092_s23  ;;  %vm16844_vm15 = vcmp.lt.s32.totalorder %v9525_v14, 2 }
 0xd7a   : > { %16800 = vst [vmem:[#allocation145_spill] sm:$0xff] %v13901_v21  ;;  %16802 = vst [vmem:[#allocation382_spill] sm:$0xff] %v13904_v24  ;;  %v7301_v47 = vsel %vm16805_vm1, %v16804_v54, %v16803_v38  ;;  %v7303_v56 = vsel %vm16806_vm2, %v16803_v38, %v16804_v54  ;;  %v6384_v22 = vsel %vm16807_vm5, %v16793_v30, %v16794_v20  ;;  %v16811_v15 = vld [vmem:[#allocation446_spill] sm:$0xff]  ;;  %v16813_v21 = vld [vmem:[#allocation448_spill] sm:$0xff]  ;;  %v5940_v38 = vpop.permute.xlu1 %5939  ;;  %vm16855_vm1 = vcmp.lt.s32.totalorder %v9525_v14, 1 }
 0xd7b   : > { %v6432_v42 = vsel %vm16810_vm3, %v16809_v7, %v16808_v36  ;;  %v13923_v24 = vmul.f32 %v16811_v15, %v7254_v34  ;;  %v13926_v19 = vmul.f32 %v16813_v21, %v7256_v52  ;;  %16815 = vst [vmem:[#allocation434_spill] sm:$0xff] %v13928_v48  ;;  %vm16816_vm0 = vmmov %vm16810_vm3  ;;  %v16817_v10 = vld [vmem:[#allocation284_spill] sm:$0xff]  ;;  %v5944_v20 = vmul.f32 %v5940_v38, %v13607_v23  ;;  %v16822_v21 = vld [vmem:[#allocation451_spill] sm:$0xff] }
 0xd7c   : > { %v6434_v62 = vsel %vm16816_vm0, %v16808_v36, %v16809_v7  ;;  %v16818_v41 = vld [vmem:[#allocation228_spill] sm:$0xff]  ;;  %v5945_v15 = vmul.f32 %v5940_v38, %v13610_v46  ;;  %vm16820_vm9 = vmmov %vm16819_vm12  ;;  %v13947_v52 = vmul.f32 %v12779_v12, %v7301_v47  ;;  %v13950_v54 = vmul.f32 %v16822_v21, %v7303_v56  ;;  %7711 = vperm.xlu0 %8941, %v8839_v16   ;;  %v16824_v36 = vld [vmem:[#allocation407_spill] sm:$0xff]  ;;  %v5377_v47 = vpop.f32.mrf.mxu1 }
 0xd7d   : > { %16812 = vst [vmem:[#allocation435_spill] sm:$0xff] %v13923_v24  ;;  %16814 = vst [vmem:[#allocation438_spill] sm:$0xff] %v13926_v19  ;;  %v7348_v30 = vsel %vm16819_vm12, %v16818_v41, %v16817_v10  ;;  %v7350_v34 = vsel %vm16820_vm9, %v16817_v10, %v16818_v41  ;;  %v13953_v23 = vmul.f32 %v16824_v36, %v6386_v26  ;;  %v16826_v46 = vld [vmem:[#allocation283_spill] sm:$0xff]  ;;  %v16827_v7 = vld [vmem:[#allocation194_spill] sm:$0xff]  ;;  %v5935_v56 = vpop.permute.xlu0 %5934  ;;  %7706 = vperm.xlu1 %8942, %v5377_v47  }
 0xd7e   : > { %16821 = vst [vmem:[#allocation120_spill] sm:$0xff] %v13947_v52  ;;  %16823 = vst [vmem:[#allocation122_spill] sm:$0xff] %v13950_v54  ;;  %v6480_v38 = vsel %vm16828_vm14, %v16827_v7, %v16826_v46  ;;  %v13963_v41 = vadd.f32 %v5944_v20, %v5901_v1  ;;  %v13965_v12 = vadd.f32 %v5945_v15, %v5902_v50  ;;  %v13970_v26 = vpop.permute.xlu1 %7370  ;;  %v16832_v21 = vld [vmem:[#allocation408_spill] sm:$0xff]  ;;  %v16834_v48 = vld [vmem:[#allocation409_spill] sm:$0xff]  ;;  %vm17062_vm3 = vcmp.lt.s32.totalorder %v9525_v14, 115 }
 0xd7f   : > { %16825 = vst [vmem:[#allocation439_spill] sm:$0xff] %v13953_v23  ;;  %vm16829_vm7 = vmmov %vm16828_vm14  ;;  %v13968_v16 = vmul.f32 %v12808_v6, %v7348_v30  ;;  %v13973_v36 = vmul.f32 %v16832_v21, %v6384_v22  ;;  %v13976_v54 = vmul.f32 %v16834_v48, %v6434_v62  ;;  %v16836_v52 = vld [vmem:[#allocation410_spill] sm:$0xff]  ;;  %v16840_v22 = vld [vmem:[#allocation453_spill] sm:$0xff]  ;;  %vm7634_vm0 = vcmp.lt.s32.totalorder %v9525_v14, 79 }
 0xd80   : > { %v6482_v10 = vsel %vm16829_vm7, %v16826_v46, %v16827_v7  ;;  %16831 = vst [vmem:[#allocation168_spill] sm:$0xff] %v13970_v26  ;;  %v13979_v19 = vmul.f32 %v16836_v52, %v6432_v42  ;;  %v16838_v1 = vld [vmem:[#allocation286_spill] sm:$0xff]  ;;  %v5942_v30 = vmul.f32 %v5935_v56, %v16840_v22  ;;  %v16841_v15 = vld [vmem:[#allocation455_spill] sm:$0xff]  ;;  %v16842_v62 = vld [vmem:[#allocation196_spill] sm:$0xff]  ;;  %v13997_v46 = vmul.f32 %v16616_v17, %v7350_v34 }
 0xd81   : > { %16830 = vst [vmem:[#allocation257_spill] sm:$0xff] %v13968_v16  ;;  %16833 = vst [vmem:[#allocation457_spill] sm:$0xff] %v13973_v36  ;;  %v16839_v20 = vld [vmem:[#allocation230_spill] sm:$0xff]  ;;  %v5943_v48 = vmul.f32 %v5935_v56, %v16841_v15  ;;  %v16843_v42 = vld [vmem:[#allocation285_spill] sm:$0xff]  ;;  %7630 = vrot.lane.b32.xlu0 %v16768_v58, %s9091_s28  ;;  %7674 = vrot.lane.b32.xlu1 %v16792_v25, %s9092_s23  ;;  %vm7682_vm12 = vcmp.lt.s32.totalorder %v9525_v14, 78  ;;  %vm7730_vm9 = vcmp.lt.s32.totalorder %v9525_v14, 77 }
 0xd82   : > { %16835 = vst [vmem:[#allocation260_spill] sm:$0xff] %v13976_v54  ;;  %16837 = vst [vmem:[#allocation147_spill] sm:$0xff] %v13979_v19  ;;  %v7396_v50 = vsel %vm7394_vm11, %v16839_v20, %v16838_v1  ;;  %v7398_v6 = vsel %vm7394_vm11, %v16838_v1, %v16839_v20  ;;  %v6529_v52 = vsel %vm16844_vm15, %v16843_v42, %v16842_v62  ;;  %v16846_v7 = vld [vmem:[#allocation411_spill] sm:$0xff]  ;;  %v16848_v1 = vld [vmem:[#allocation412_spill] sm:$0xff]  ;;  %v14025_v26 = vpop.permute.xlu1 %5986  ;;  %vm7818_vm14 = vcmask 261120  }
 0xd83   : > { %16845 = vst [vmem:[#allocation444_spill] sm:$0xff] %v13997_v46  ;;  %v14002_v21 = vmul.f32 %v16846_v7, %v6482_v10  ;;  %v14005_v20 = vmul.f32 %v16848_v1, %v6480_v38  ;;  %vm16850_vm11 = vmmov %vm16844_vm15  ;;  %v16851_v56 = vld [vmem:[#allocation288_spill] sm:$0xff]  ;;  %v5946_v34 = vadd.f32 %v5942_v30, %v5899_v35  ;;  %v14015_v15 = vadd.f32 %v5943_v48, %v5900_v57  ;;  %v16853_v38 = vld [vmem:[#allocation197_spill] sm:$0xff]  ;;  %v14033_v57 = vpop.permute.xlu0 %7423  ;;  %v8842_v46 = vpop.f32.mrf.mxu1 }
 0xd84   : > { %v6527_v47 = vsel %vm16850_vm11, %v16842_v62, %v16843_v42  ;;  %v16852_v22 = vld [vmem:[#allocation232_spill] sm:$0xff]  ;;  %v16854_v7 = vld [vmem:[#allocation287_spill] sm:$0xff]  ;;  %v14028_v62 = vmul.f32 %v12826_v37, %v7396_v50  ;;  %v14031_v42 = vmul.f32 %v12840_v59, %v7398_v6  ;;  %16858 = vst [vmem:[#allocation170_spill] sm:$0xff] %v14033_v57  ;;  %vm16859_vm2 = vmmov %vm16855_vm1 }
 0xd85   : > { %16847 = vst [vmem:[#allocation445_spill] sm:$0xff] %v14002_v21  ;;  %16849 = vst [vmem:[#allocation128_spill] sm:$0xff] %v14005_v20  ;;  %v7444_v17 = vsel %vm7442_vm8, %v16852_v22, %v16851_v56  ;;  %v7446_v10 = vsel %vm7442_vm8, %v16851_v56, %v16852_v22  ;;  %v6576_v1 = vsel %vm16855_vm1, %v16854_v7, %v16853_v38  ;;  %v16860_v30 = vld [vmem:[#allocation290_spill] sm:$0xff]  ;;  %v16862_v59 = vld [vmem:[#allocation413_spill] sm:$0xff]  ;;  %vm16866_vm8 = vcmp.lt.s32.totalorder %v9525_v14, 127 }
 0xd86   : > { %16856 = vst [vmem:[#allocation185_spill] sm:$0xff] %v14028_v62  ;;  %16857 = vst [vmem:[#allocation259_spill] sm:$0xff] %v14031_v42  ;;  %v6574_v35 = vsel %vm16859_vm2, %v16853_v38, %v16854_v7  ;;  %v16861_v48 = vld [vmem:[#allocation234_spill] sm:$0xff]  ;;  %v14050_v50 = vmul.f32 %v16862_v59, %v6529_v52  ;;  %v16864_v6 = vld [vmem:[#allocation289_spill] sm:$0xff]  ;;  %7680 = vrot.lane.b32.xlu0 %v16798_v53, %s9092_s23  ;;  %v14077_v16 = vmul.f32 %v12853_v31, %v7446_v10 }
 0xd87   : > { %v7492_v56 = vsel %vm7490_vm4, %v16861_v48, %v16860_v30  ;;  %v7494_v37 = vsel %vm7490_vm4, %v16860_v30, %v16861_v48  ;;  %v16865_v22 = vld [vmem:[#allocation198_spill] sm:$0xff]  ;;  %v16867_v7 = vld [vmem:[#allocation292_spill] sm:$0xff]  ;;  %v14063_v30 = vmul.f32 %v12850_v4, %v7444_v17  ;;  %vm16872_vm4 = vmmov %vm16866_vm8  ;;  %7724 = vrot.lane.b32.xlu1 %v16739_v11, %s9093_s1 }
 0xd88   : > { %16863 = vst [vmem:[#allocation383_spill] sm:$0xff] %v14050_v50  ;;  %v6639_v38 = vsel %vm16866_vm8, %v16865_v22, %v16864_v6  ;;  %v16868_v42 = vld [vmem:[#allocation236_spill] sm:$0xff]  ;;  %v16870_v48 = vld [vmem:[#allocation414_spill] sm:$0xff]  ;;  %v6641_v52 = vsel %vm16872_vm4, %v16864_v6, %v16865_v22  ;;  %16873 = vst [vmem:[#allocation384_spill] sm:$0xff] %v14077_v16  ;;  %v14089_v6 = vmul.f32 %v12867_v2, %v7492_v56 }
 0xd89   : > { %v7540_v57 = vsel %vm7538_vm6, %v16868_v42, %v16867_v7  ;;  %16869 = vst [vmem:[#allocation262_spill] sm:$0xff] %v14063_v30  ;;  %v14066_v62 = vmul.f32 %v16870_v48, %v6527_v47  ;;  %v7542_v59 = vsel %vm7538_vm6, %v16867_v7, %v16868_v42  ;;  %v16874_v24 = vld [vmem:[#allocation415_spill] sm:$0xff]  ;;  %v16876_v17 = vld [vmem:[#allocation356_spill] sm:$0xff]  ;;  %v14084_v30 = vpop.permute.xlu1 %7418  ;;  %v14092_v22 = vmul.f32 %v16644_v18, %v7494_v37  ;;  %v16883_v31 = vld [vmem:[#allocation357_spill] sm:$0xff] }
 0xd8a   : > { %v14080_v4 = vmul.f32 %v16874_v24, %v6576_v1  ;;  %v16877_v47 = vld [vmem:[#allocation300_spill] sm:$0xff]  ;;  %16878 = vst [vmem:[#allocation187_spill] sm:$0xff] %v14084_v30  ;;  %16879 = vst [vmem:[#allocation447_spill] sm:$0xff] %v14089_v6  ;;  %v16886_v2 = vld [vmem:[#allocation417_spill] sm:$0xff]  ;;  %7759 = vperm.xlu0 %8941, %v8842_v46   ;;  %vm16897_vm6 = vcmp.lt.s32.totalorder %v9525_v14, 126  ;;  %v5387_v46 = vpop.f32.mrf.mxu1 }
 0xd8b   : > { %16871 = vst [vmem:[#allocation206_spill] sm:$0xff] %v14066_v62  ;;  %v3097_v48 = vmul.f32 %v16877_v47, %v16876_v17  ;;  %v14086_v62 = vpop.permute.xlu0 %5981  ;;  %16880 = vst [vmem:[#allocation261_spill] sm:$0xff] %v14092_v22  ;;  %v16881_v42 = vld [vmem:[#allocation416_spill] sm:$0xff]  ;;  %v3098_v24 = vmul.f32 %v16877_v47, %v16883_v31  ;;  %v14104_v17 = vmul.f32 %v16664_v33, %v7540_v57  ;;  %v16891_v22 = vld [vmem:[#allocation302_spill] sm:$0xff]  ;;  %7754 = vperm.xlu1 %8942, %v5387_v46  }
 0xd8c   : > { %16875 = vst [vmem:[#allocation138_spill] sm:$0xff] %v14080_v4  ;;  %v14095_v7 = vmul.f32 %v16881_v42, %v6574_v35  ;;  %v16884_v10 = vld [vmem:[#allocation456_spill] sm:$0xff]  ;;  %v14107_v56 = vmul.f32 %v16886_v2, %v6639_v38  ;;  %v16890_v42 = vld [vmem:[#allocation362_spill] sm:$0xff]  ;;  %v14114_v47 = vmul.f32 %v12929_v44, %v7542_v59  ;;  %v16895_v16 = vld [vmem:[#allocation291_spill] sm:$0xff] }
 0xd8d   : > { %v5989_v1 = vmul.f32 %v14086_v62, %v16884_v10  ;;  %16885 = vst [vmem:[#allocation385_spill] sm:$0xff] %v14104_v17  ;;  %v16888_v18 = vld [vmem:[#allocation352_spill] sm:$0xff]  ;;  %v3145_v6 = vmul.f32 %v16891_v22, %v16890_v42  ;;  %v16893_v31 = vld [vmem:[#allocation418_spill] sm:$0xff]  ;;  %v16898_v57 = vld [vmem:[#allocation353_spill] sm:$0xff] }
 0xd8e   : > { %16882 = vst [vmem:[#allocation172_spill] sm:$0xff] %v14095_v7  ;;  %16887 = vst [vmem:[#allocation386_spill] sm:$0xff] %v14107_v56  ;;  %v16889_v37 = vld [vmem:[#allocation296_spill] sm:$0xff]  ;;  %v14117_v10 = vmul.f32 %v16893_v31, %v6641_v52  ;;  %v16899_v2 = vld [vmem:[#allocation363_spill] sm:$0xff]  ;;  %7678 = vrot.lane.b32.xlu0 %v16768_v58, %s9092_s23 }
 0xd8f   : > { %v3053_v35 = vmul.f32 %v16889_v37, %v16888_v18  ;;  %16892 = vst [vmem:[#allocation264_spill] sm:$0xff] %v14114_v47  ;;  %v16896_v30 = vld [vmem:[#allocation200_spill] sm:$0xff]  ;;  %v3054_v38 = vmul.f32 %v16889_v37, %v16898_v57  ;;  %v3146_v18 = vmul.f32 %v16891_v22, %v16899_v2  ;;  %v14127_v17 = vadd.f32 %v5989_v1, %v5946_v34  ;;  %vm16900_vm5 = vmmov %vm16897_vm6  ;;  %v16901_v52 = vld [vmem:[#allocation294_spill] sm:$0xff]  ;;  %v14143_v22 = vpop.permute.xlu1 %6033  ;;  %v14145_v34 = vpop.permute.xlu0 %7471 }
 0xd90   : > { %16894 = vst [vmem:[#allocation208_spill] sm:$0xff] %v14117_v10  ;;  %v6686_v33 = vsel %vm16897_vm6, %v16896_v30, %v16895_v16  ;;  %v14133_v44 = vsel %vm16900_vm5, %v16895_v16, %v16896_v30  ;;  %v16902_v59 = vld [vmem:[#allocation238_spill] sm:$0xff]  ;;  %v16904_v57 = vld [vmem:[#allocation304_spill] sm:$0xff]  ;;  %16905 = vst [vmem:[#allocation263_spill] sm:$0xff] %v14145_v34  ;;  %7726 = vrot.lane.b32.xlu1 %v16768_v58, %s9093_s1 }
 0xd91   : > { %v14139_v42 = vsel %vm7586_vm13, %v16902_v59, %v16901_v52  ;;  %v3101_v31 = vadd.f32 %v3097_v48, %v3053_v35  ;;  %v16903_v37 = vld [vmem:[#allocation366_spill] sm:$0xff]  ;;  %v14151_v16 = vsel %vm7586_vm13, %v16901_v52, %v16902_v59  ;;  %v3102_v30 = vadd.f32 %v3098_v24, %v3054_v38  ;;  %v16906_v1 = vld [vmem:[#allocation355_spill] sm:$0xff]  ;;  %v16907_v2 = vld [vmem:[#allocation301_spill] sm:$0xff]  ;;  %v14163_v52 = vpop.f32.mrf.mxu1 }
 0xd92   : > { %v3193_v47 = vmul.f32 %v16904_v57, %v16903_v37  ;;  %v3096_v10 = vmul.f32 %v16907_v2, %v16906_v1  ;;  %v16908_v56 = vld [vmem:[#allocation367_spill] sm:$0xff]  ;;  %v16909_v35 = vld [vmem:[#allocation354_spill] sm:$0xff]  ;;  %v16912_v24 = vld [vmem:[#allocation420_spill] sm:$0xff]  ;;  %7728 = vrot.lane.b32.xlu0 %v16798_v53, %s9093_s1 }
 0xd93   : > { %v3194_v48 = vmul.f32 %v16904_v57, %v16908_v56  ;;  %v3095_v37 = vmul.f32 %v16907_v2, %v16909_v35  ;;  %v3149_v11 = vadd.f32 %v3145_v6, %v3101_v31  ;;  %v16910_v7 = vld [vmem:[#allocation370_spill] sm:$0xff]  ;;  %v14166_v38 = vmul.f32 %v16912_v24, %v6686_v33  ;;  %v16914_v59 = vld [vmem:[#allocation351_spill] sm:$0xff]  ;;  %v16915_v1 = vld [vmem:[#allocation297_spill] sm:$0xff] }
 0xd94   : > { %v16911_v34 = vld [vmem:[#allocation306_spill] sm:$0xff]  ;;  %v3052_v50 = vmul.f32 %v16915_v1, %v16914_v59  ;;  %v3150_v56 = vadd.f32 %v3146_v18, %v3102_v30  ;;  %v16916_v46 = vld [vmem:[#allocation361_spill] sm:$0xff]  ;;  %v16917_v57 = vld [vmem:[#allocation303_spill] sm:$0xff]  ;;  %v14182_v59 = vpop.permute.xlu0 %6028 }
 0xd95   : > { %v3241_v4 = vmul.f32 %v16911_v34, %v16910_v7  ;;  %16913 = vst [vmem:[#allocation174_spill] sm:$0xff] %v14166_v38  ;;  %v3144_v20 = vmul.f32 %v16917_v57, %v16916_v46  ;;  %v16918_v2 = vld [vmem:[#allocation371_spill] sm:$0xff]  ;;  %v16919_v31 = vld [vmem:[#allocation350_spill] sm:$0xff]  ;;  %v3197_v19 = vadd.f32 %v3193_v47, %v3149_v11  ;;  %v16921_v54 = vld [vmem:[#allocation376_spill] sm:$0xff]  ;;  %v14180_v38 = vpop.permute.xlu1 %7466 }
 0xd96   : > { %v3242_v6 = vmul.f32 %v16911_v34, %v16918_v2  ;;  %v3051_v7 = vmul.f32 %v16915_v1, %v16919_v31  ;;  %v16920_v35 = vld [vmem:[#allocation358_spill] sm:$0xff]  ;;  %v16922_v33 = vld [vmem:[#allocation308_spill] sm:$0xff]  ;;  %16923 = vst [vmem:[#allocation266_spill] sm:$0xff] %v14180_v38  ;;  %v3100_v18 = vadd.f32 %v3096_v10, %v3052_v50  ;;  %v3198_v30 = vadd.f32 %v3194_v48, %v3150_v56  ;;  %v16924_v46 = vld [vmem:[#allocation365_spill] sm:$0xff]  ;;  %v5468_v50 = vpop.f32.mrf.mxu1 }
 0xd97   : > { %v3143_v21 = vmul.f32 %v16917_v57, %v16920_v35  ;;  %v3289_v24 = vmul.f32 %v16922_v33, %v16921_v54  ;;  %v16925_v36 = vld [vmem:[#allocation305_spill] sm:$0xff]  ;;  %v16927_v11 = vld [vmem:[#allocation364_spill] sm:$0xff]  ;;  %v3245_v54 = vadd.f32 %v3241_v4, %v3197_v19  ;;  %v16929_v31 = vld [vmem:[#allocation310_spill] sm:$0xff]  ;;  %7772 = vperm.xlu1 %8942, %v5468_v50   ;;  %7722 = vrot.lane.b32.xlu0 %v16792_v25, %s9093_s1 }
 0xd98   : > { %v3192_v23 = vmul.f32 %v16925_v36, %v16924_v46  ;;  %v16926_v34 = vld [vmem:[#allocation377_spill] sm:$0xff]  ;;  %v3099_v1 = vadd.f32 %v3095_v37, %v3051_v7  ;;  %v3191_v47 = vmul.f32 %v16925_v36, %v16927_v11  ;;  %v3148_v10 = vadd.f32 %v3144_v20, %v3100_v18  ;;  %v16931_v46 = vld [vmem:[#allocation307_spill] sm:$0xff]  ;;  %v16933_v7 = vld [vmem:[#allocation368_spill] sm:$0xff]  ;;  %v14206_v53 = vpop.permute.xlu0 %7519 }
 0xd99   : > { %v3290_v2 = vmul.f32 %v16922_v33, %v16926_v34  ;;  %v16928_v57 = vld [vmem:[#allocation81_spill] sm:$0xff]  ;;  %v3246_v48 = vadd.f32 %v3242_v6, %v3198_v30  ;;  %v16932_v34 = vld [vmem:[#allocation314_spill] sm:$0xff]  ;;  %v3239_v19 = vmul.f32 %v16931_v46, %v16933_v7  ;;  %v3293_v36 = vadd.f32 %v3289_v24, %v3245_v54  ;;  %v16935_v4 = vld [vmem:[#allocation48_spill] sm:$0xff]  ;;  %v14204_v58 = vpop.permute.xlu1 %6080  ;;  %16937 = vst [vmem:[#allocation210_spill] sm:$0xff] %v14206_v53 }
 0xd9a   : > { %v3336_v35 = vmul.f32 %v16929_v31, %v16928_v57  ;;  %v16930_v56 = vld [vmem:[#allocation369_spill] sm:$0xff]  ;;  %v3337_v38 = vmul.f32 %v16929_v31, %v16932_v34  ;;  %v3147_v37 = vadd.f32 %v3143_v21, %v3099_v1  ;;  %v16936_v11 = vld [vmem:[#allocation312_spill] sm:$0xff]  ;;  %v3196_v20 = vadd.f32 %v3192_v23, %v3148_v10  ;;  %v16938_v18 = vld [vmem:[#allocation375_spill] sm:$0xff] }
 0xd9b   : > { %v3240_v33 = vmul.f32 %v16931_v46, %v16930_v56  ;;  %v3383_v57 = vmul.f32 %v16936_v11, %v16935_v4  ;;  %v3294_v6 = vadd.f32 %v3290_v2, %v3246_v48  ;;  %v16939_v30 = vld [vmem:[#allocation309_spill] sm:$0xff]  ;;  %v16940_v49 = vld [vmem:[#allocation326_spill] sm:$0xff]  ;;  %v16942_v46 = vld [vmem:[#allocation84_spill] sm:$0xff]  ;;  %7777 = vperm.xlu0 %8941, %v14163_v52  }
 0xd9c   : > { %v3288_v56 = vmul.f32 %v16939_v30, %v16938_v18  ;;  %v3384_v21 = vmul.f32 %v16936_v11, %v16940_v49  ;;  %v3195_v1 = vadd.f32 %v3191_v47, %v3147_v37  ;;  %v16941_v31 = vld [vmem:[#allocation374_spill] sm:$0xff]  ;;  %v3340_v54 = vadd.f32 %v3336_v35, %v3293_v36  ;;  %v16943_v34 = vld [vmem:[#allocation331_spill] sm:$0xff]  ;;  %v7807_v23 = vld [vmem:[%s16934_s24 + $0x8] sm:$0xff] }
 0xd9d   : > { %v3287_v24 = vmul.f32 %v16939_v30, %v16941_v31  ;;  %v3430_v7 = vmul.f32 %v16943_v34, %v16942_v46  ;;  %v3244_v2 = vadd.f32 %v3240_v33, %v3196_v20  ;;  %v3341_v10 = vadd.f32 %v3337_v38, %v3294_v6  ;;  %v16944_v48 = vld [vmem:[#allocation37_spill] sm:$0xff]  ;;  %v16945_v4 = vld [vmem:[#allocation311_spill] sm:$0xff]  ;;  %v16946_v53 = vld [vmem:[#allocation50_spill] sm:$0xff]  ;;  %v14227_v31 = vpop.permute.xlu1 %7514  ;;  %v14229_v46 = vpop.permute.xlu0 %6075  ;;  %7815 = vperm.xlu1 %8942, %v7807_v23  }
 0xd9e   : > { %v3335_v18 = vmul.f32 %v16945_v4, %v16944_v48  ;;  %v3431_v49 = vmul.f32 %v16943_v34, %v16946_v53  ;;  %v3243_v47 = vadd.f32 %v3239_v19, %v3195_v1  ;;  %v16947_v50 = vld [vmem:[#allocation36_spill] sm:$0xff]  ;;  %v3387_v35 = vadd.f32 %v3383_v57, %v3340_v54  ;;  %v16948_v36 = vld [vmem:[#allocation318_spill] sm:$0xff]  ;;  %16950 = vst [vmem:[#allocation388_spill] sm:$0xff] %v14227_v31  ;;  %v16952_v6 = vld [vmem:[#allocation313_spill] sm:$0xff] }
 0xd9f   : > { %v3334_v37 = vmul.f32 %v16945_v4, %v16947_v50  ;;  %v16949_v11 = vld [vmem:[#allocation348_spill] sm:$0xff]  ;;  %v3292_v38 = vadd.f32 %v3288_v56, %v3244_v2  ;;  %v3388_v33 = vadd.f32 %v3384_v21, %v3341_v10  ;;  %v16951_v20 = vld [vmem:[#allocation82_spill] sm:$0xff]  ;;  %v16953_v25 = vld [vmem:[#allocation319_spill] sm:$0xff] }
 0xda0   : > { %v3478_v30 = vmul.f32 %v16949_v11, %v16948_v36  ;;  %v3382_v48 = vmul.f32 %v16952_v6, %v16951_v20  ;;  %v3479_v53 = vmul.f32 %v16949_v11, %v16953_v25  ;;  %v3291_v19 = vadd.f32 %v3287_v24, %v3243_v47  ;;  %v16954_v1 = vld [vmem:[#allocation315_spill] sm:$0xff]  ;;  %v16957_v21 = vld [vmem:[#allocation317_spill] sm:$0xff]  ;;  %v16958_v2 = vld [vmem:[#allocation332_spill] sm:$0xff] }
 0xda1   : > { %v3381_v57 = vmul.f32 %v16952_v6, %v16954_v1  ;;  %v3434_v54 = vadd.f32 %v3430_v7, %v3387_v35  ;;  %v16955_v34 = vld [vmem:[#allocation87_spill] sm:$0xff]  ;;  %v3339_v36 = vadd.f32 %v3335_v18, %v3292_v38  ;;  %v3435_v56 = vadd.f32 %v3431_v49, %v3388_v33  ;;  %v16959_v20 = vld [vmem:[#allocation53_spill] sm:$0xff]  ;;  %v7806_v25 = vld [vmem:[%s16934_s24] sm:$0xff]  ;;  %v14249_v1 = vpop.permute.xlu1 %6128  ;;  %v14251_v52 = vpop.permute.xlu0 %7567 }
 0xda2   : > { %v16956_v4 = vld [vmem:[#allocation359_spill] sm:$0xff]  ;;  %v3429_v10 = vmul.f32 %v16958_v2, %v16957_v21  ;;  %v3338_v23 = vadd.f32 %v3334_v37, %v3291_v19  ;;  %v16960_v24 = vld [vmem:[#allocation316_spill] sm:$0xff]  ;;  %v16961_v7 = vld [vmem:[#allocation322_spill] sm:$0xff]  ;;  %16963 = vst [vmem:[#allocation389_spill] sm:$0xff] %v14251_v52  ;;  %7810 = vperm.xlu0 %8941, %v7806_v25  }
 0xda3   : > { %v3526_v50 = vmul.f32 %v16956_v4, %v16955_v34  ;;  %v3527_v31 = vmul.f32 %v16956_v4, %v16959_v20  ;;  %v3428_v47 = vmul.f32 %v16958_v2, %v16960_v24  ;;  %v3482_v11 = vadd.f32 %v3478_v30, %v3434_v54  ;;  %v16962_v35 = vld [vmem:[#allocation372_spill] sm:$0xff]  ;;  %v16964_v38 = vld [vmem:[#allocation85_spill] sm:$0xff]  ;;  %v16966_v21 = vld [vmem:[#allocation323_spill] sm:$0xff] }
 0xda4   : > { %v3573_v6 = vmul.f32 %v16962_v35, %v16961_v7  ;;  %v3386_v18 = vadd.f32 %v3382_v48, %v3339_v36  ;;  %v3483_v49 = vadd.f32 %v3479_v53, %v3435_v56  ;;  %v16965_v33 = vld [vmem:[#allocation349_spill] sm:$0xff]  ;;  %v3574_v4 = vmul.f32 %v16962_v35, %v16966_v21  ;;  %v16967_v19 = vld [vmem:[#allocation51_spill] sm:$0xff]  ;;  %v16968_v54 = vld [vmem:[#allocation38_spill] sm:$0xff] }
 0xda5   : > { %v3477_v34 = vmul.f32 %v16965_v33, %v16964_v38  ;;  %v3385_v37 = vadd.f32 %v3381_v57, %v3338_v23  ;;  %v3476_v2 = vmul.f32 %v16965_v33, %v16967_v19  ;;  %v3530_v30 = vadd.f32 %v3526_v50, %v3482_v11  ;;  %v16969_v20 = vld [vmem:[#allocation49_spill] sm:$0xff]  ;;  %v16970_v52 = vld [vmem:[#allocation52_spill] sm:$0xff]  ;;  %v16972_v36 = vld [vmem:[#allocation39_spill] sm:$0xff]  ;;  %v14269_v11 = vpop.permute.xlu1 %7562  ;;  %v14271_v21 = vpop.permute.xlu0 %6123 }
 0xda6   : > { %v3591_v24 = vmul.f32 %v16969_v20, %v16968_v54  ;;  %v3433_v7 = vadd.f32 %v3429_v10, %v3386_v18  ;;  %v3531_v8 = vadd.f32 %v3527_v31, %v3483_v49  ;;  %v16971_v48 = vld [vmem:[#allocation360_spill] sm:$0xff]  ;;  %v3592_v56 = vmul.f32 %v16969_v20, %v16972_v36  ;;  %v16973_v45 = vld [vmem:[#allocation86_spill] sm:$0xff]  ;;  %16976 = vst [vmem:[#allocation265_spill] sm:$0xff] %v14269_v11  ;;  %v16978_v18 = vld [vmem:[#allocation373_spill] sm:$0xff] }
 0xda7   : > { %v3525_v53 = vmul.f32 %v16971_v48, %v16970_v52  ;;  %v3432_v38 = vadd.f32 %v3428_v47, %v3385_v37  ;;  %v3524_v57 = vmul.f32 %v16971_v48, %v16973_v45  ;;  %v3577_v23 = vadd.f32 %v3573_v6, %v3530_v30  ;;  %v16974_v35 = vld [vmem:[#allocation90_spill] sm:$0xff]  ;;  %v16975_v33 = vld [vmem:[#allocation320_spill] sm:$0xff]  ;;  %v16981_v30 = vld [vmem:[#allocation93_spill] sm:$0xff] }
 0xda8   : > { %v3638_v50 = vmul.f32 %v16975_v33, %v16974_v35  ;;  %v3481_v10 = vadd.f32 %v3477_v34, %v3433_v7  ;;  %v3578_v31 = vadd.f32 %v3574_v4, %v3531_v8  ;;  %v16977_v25 = vld [vmem:[#allocation54_spill] sm:$0xff]  ;;  %v16979_v49 = vld [vmem:[#allocation56_spill] sm:$0xff]  ;;  %v16983_v35 = vld [vmem:[#allocation47_spill] sm:$0xff] }
 0xda9   : > { %v3572_v52 = vmul.f32 %v16978_v18, %v16977_v25  ;;  %v3639_v19 = vmul.f32 %v16975_v33, %v16979_v49  ;;  %v3480_v47 = vadd.f32 %v3476_v2, %v3432_v38  ;;  %v16980_v37 = vld [vmem:[#allocation88_spill] sm:$0xff]  ;;  %v3595_v6 = vadd.f32 %v3591_v24, %v3577_v23  ;;  %v16984_v11 = vld [vmem:[#allocation83_spill] sm:$0xff]  ;;  %v16985_v8 = vld [vmem:[#allocation58_spill] sm:$0xff]  ;;  %v14289_v24 = vpop.permute.xlu1 %6176  ;;  %v14291_v23 = vpop.permute.xlu0 %7615 }
 0xdaa   : > { %v3571_v45 = vmul.f32 %v16978_v18, %v16980_v37  ;;  %v16982_v54 = vld [vmem:[#allocation92_spill] sm:$0xff]  ;;  %v3529_v48 = vadd.f32 %v3525_v53, %v3481_v10  ;;  %v3596_v36 = vadd.f32 %v3592_v56, %v3578_v31  ;;  %v3590_v34 = vmul.f32 %v16984_v11, %v16983_v35  ;;  %v16986_v25 = vld [vmem:[#allocation42_spill] sm:$0xff]  ;;  %v16988_v49 = vld [vmem:[#allocation97_spill] sm:$0xff]  ;;  %16989 = vst [vmem:[#allocation176_spill] sm:$0xff] %v14289_v24 }
 0xdab   : > { %v3686_v20 = vmul.f32 %v16982_v54, %v16981_v30  ;;  %v3687_v4 = vmul.f32 %v16982_v54, %v16985_v8  ;;  %v3528_v7 = vadd.f32 %v3524_v57, %v3480_v47  ;;  %v3589_v33 = vmul.f32 %v16984_v11, %v16986_v25  ;;  %v16987_v38 = vld [vmem:[#allocation94_spill] sm:$0xff]  ;;  %16990 = vst [vmem:[#allocation268_spill] sm:$0xff] %v14291_v23  ;;  %v16991_v10 = vld [vmem:[#allocation89_spill] sm:$0xff]  ;;  %v16993_v30 = vld [vmem:[#allocation59_spill] sm:$0xff] }
 0xdac   : > { %v3642_v2 = vadd.f32 %v3638_v50, %v3595_v6  ;;  %v3734_v18 = vmul.f32 %v16988_v49, %v16987_v38  ;;  %v3576_v53 = vadd.f32 %v3572_v52, %v3529_v48  ;;  %v3643_v56 = vadd.f32 %v3639_v19, %v3596_v36  ;;  %v16992_v31 = vld [vmem:[#allocation321_spill] sm:$0xff]  ;;  %v16994_v47 = vld [vmem:[#allocation55_spill] sm:$0xff]  ;;  %v16995_v6 = vld [vmem:[#allocation330_spill] sm:$0xff] }
 0xdad   : > { %v3637_v37 = vmul.f32 %v16992_v31, %v16991_v10  ;;  %v3735_v54 = vmul.f32 %v16988_v49, %v16993_v30  ;;  %v3575_v57 = vadd.f32 %v3571_v45, %v3528_v7  ;;  %v3636_v11 = vmul.f32 %v16992_v31, %v16994_v47  ;;  %v16996_v35 = vld [vmem:[#allocation337_spill] sm:$0xff]  ;;  %v16999_v19 = vld [vmem:[#allocation96_spill] sm:$0xff]  ;;  %v17006_v47 = vld [vmem:[#allocation98_spill] sm:$0xff] }
 0xdae   : > { %v3690_v50 = vadd.f32 %v3686_v20, %v3642_v2  ;;  %v3781_v8 = vmul.f32 %v16996_v35, %v16995_v6  ;;  %v3594_v25 = vadd.f32 %v3590_v34, %v3576_v53  ;;  %v3691_v38 = vadd.f32 %v3687_v4, %v3643_v56  ;;  %v16997_v24 = vld [vmem:[#allocation325_spill] sm:$0xff]  ;;  %v17000_v10 = vld [vmem:[#allocation324_spill] sm:$0xff]  ;;  %v14309_v20 = vpop.permute.xlu1 %7610  ;;  %v14311_v2 = vpop.permute.xlu0 %6171  ;;  %v17005_v56 = vld [vmem:[#allocation63_spill] sm:$0xff] }
 0xdaf   : > { %v16998_v23 = vld [vmem:[#allocation57_spill] sm:$0xff]  ;;  %v3782_v48 = vmul.f32 %v16996_v35, %v16999_v19  ;;  %v3593_v36 = vadd.f32 %v3589_v33, %v3575_v57  ;;  %17003 = vst [vmem:[#allocation212_spill] sm:$0xff] %v14309_v20  ;;  %v17004_v53 = vld [vmem:[#allocation328_spill] sm:$0xff]  ;;  %v17007_v57 = vld [vmem:[#allocation327_spill] sm:$0xff] }
 0xdb0   : > { %v3685_v52 = vmul.f32 %v16998_v23, %v16997_v24  ;;  %v3684_v49 = vmul.f32 %v16998_v23, %v17000_v10  ;;  %v3738_v45 = vadd.f32 %v3734_v18, %v3690_v50  ;;  %v17001_v7 = vld [vmem:[#allocation333_spill] sm:$0xff]  ;;  %v3641_v34 = vadd.f32 %v3637_v37, %v3594_v25  ;;  %v17008_v50 = vld [vmem:[#allocation335_spill] sm:$0xff]  ;;  %v17011_v29 = vld [vmem:[#allocation338_spill] sm:$0xff] }
 0xdb1   : > { %v17002_v30 = vld [vmem:[#allocation341_spill] sm:$0xff]  ;;  %v3739_v4 = vadd.f32 %v3735_v54, %v3691_v38  ;;  %v3733_v24 = vmul.f32 %v17005_v56, %v17004_v53  ;;  %v3640_v33 = vadd.f32 %v3636_v11, %v3593_v36  ;;  %v3732_v23 = vmul.f32 %v17005_v56, %v17007_v57  ;;  %v17009_v35 = vld [vmem:[#allocation347_spill] sm:$0xff]  ;;  %v17012_v54 = vld [vmem:[#allocation100_spill] sm:$0xff] }
 0xdb2   : > { %v3828_v31 = vmul.f32 %v17002_v30, %v17001_v7  ;;  %v3829_v6 = vmul.f32 %v17002_v30, %v17006_v47  ;;  %v3785_v18 = vadd.f32 %v3781_v8, %v3738_v45  ;;  %v3875_v19 = vmul.f32 %v17009_v35, %v17008_v50  ;;  %v17010_v20 = vld [vmem:[#allocation329_spill] sm:$0xff]  ;;  %v17013_v53 = vld [vmem:[#allocation95_spill] sm:$0xff]  ;;  %v17014_v36 = vld [vmem:[#allocation66_spill] sm:$0xff]  ;;  %v14329_v8 = vpop.permute.xlu1 %6223  ;;  %v14331_v45 = vpop.permute.xlu0 %7663 }
 0xdb3   : > { %v3689_v10 = vadd.f32 %v3685_v52, %v3641_v34  ;;  %v3786_v7 = vadd.f32 %v3782_v48, %v3739_v4  ;;  %v3780_v37 = vmul.f32 %v17011_v29, %v17010_v20  ;;  %v3876_v25 = vmul.f32 %v17009_v35, %v17012_v54  ;;  %v17015_v47 = vld [vmem:[#allocation398_spill] sm:$0xff]  ;;  %17016 = vst [vmem:[#allocation450_spill] sm:$0xff] %v14329_v8  ;;  %v17023_v35 = vld [vmem:[#allocation424_spill] sm:$0xff] }
 0xdb4   : > { %v3688_v38 = vadd.f32 %v3684_v49, %v3640_v33  ;;  %v3779_v30 = vmul.f32 %v17011_v29, %v17013_v53  ;;  %v3832_v11 = vadd.f32 %v3828_v31, %v3785_v18  ;;  %v3923_v56 = vmul.f32 %v17015_v47, %v17014_v36  ;;  %17017 = vst [vmem:[#allocation189_spill] sm:$0xff] %v14331_v45  ;;  %v17018_v34 = vld [vmem:[#allocation62_spill] sm:$0xff]  ;;  %v17021_v33 = vld [vmem:[#allocation61_spill] sm:$0xff]  ;;  %v17022_v18 = vld [vmem:[#allocation68_spill] sm:$0xff] }
 0xdb5   : > { %v3737_v52 = vadd.f32 %v3733_v24, %v3689_v10  ;;  %v3833_v48 = vadd.f32 %v3829_v6, %v3786_v7  ;;  %v17019_v4 = vld [vmem:[#allocation342_spill] sm:$0xff]  ;;  %v3971_v54 = vmul.f32 %v17023_v35, %v17022_v18  ;;  %v17024_v8 = vld [vmem:[#allocation64_spill] sm:$0xff] }
 0xdb6   : > { %v3827_v20 = vmul.f32 %v17019_v4, %v17018_v34  ;;  %v17020_v57 = vld [vmem:[#allocation102_spill] sm:$0xff]  ;;  %v3736_v49 = vadd.f32 %v3732_v23, %v3688_v38  ;;  %v3826_v29 = vmul.f32 %v17019_v4, %v17021_v33  ;;  %v3879_v31 = vadd.f32 %v3875_v19, %v3832_v11  ;;  %v17025_v45 = vld [vmem:[#allocation380_spill] sm:$0xff]  ;;  %v17027_v34 = vld [vmem:[#allocation99_spill] sm:$0xff]  ;;  %v14349_v19 = vpop.permute.xlu1 %6270  ;;  %v14355_v18 = vpop.permute.xlu0 %6218 }
 0xdb7   : > { %v3924_v50 = vmul.f32 %v17015_v47, %v17020_v57  ;;  %v3784_v53 = vadd.f32 %v3780_v37, %v3737_v52  ;;  %v3880_v36 = vadd.f32 %v3876_v25, %v3833_v48  ;;  %v3874_v24 = vmul.f32 %v17025_v45, %v17024_v8  ;;  %v17026_v6 = vld [vmem:[#allocation104_spill] sm:$0xff]  ;;  %v17028_v38 = vld [vmem:[#allocation71_spill] sm:$0xff]  ;;  %17030 = vst [vmem:[#allocation118_spill] sm:$0xff] %v14349_v19  ;;  %v17031_v37 = vld [vmem:[#allocation101_spill] sm:$0xff] }
 0xdb8   : > { %v3972_v10 = vmul.f32 %v17023_v35, %v17026_v6  ;;  %v3783_v7 = vadd.f32 %v3779_v30, %v3736_v49  ;;  %v3873_v47 = vmul.f32 %v17025_v45, %v17027_v34  ;;  %v3927_v23 = vadd.f32 %v3923_v56, %v3879_v31  ;;  %v17029_v57 = vld [vmem:[#allocation179_spill] sm:$0xff]  ;;  %v17032_v25 = vld [vmem:[#allocation402_spill] sm:$0xff]  ;;  %v17033_v48 = vld [vmem:[#allocation72_spill] sm:$0xff]  ;;  %17034 = vst [vmem:[#allocation267_spill] sm:$0xff] %v14355_v18 }
 0xdb9   : > { %v4019_v4 = vmul.f32 %v17029_v57, %v17028_v38  ;;  %v3831_v11 = vadd.f32 %v3827_v20, %v3784_v53  ;;  %v3928_v33 = vadd.f32 %v3924_v50, %v3880_v36  ;;  %v3922_v52 = vmul.f32 %v17032_v25, %v17031_v37  ;;  %v17035_v49 = vld [vmem:[#allocation65_spill] sm:$0xff]  ;;  %v17036_v31 = vld [vmem:[#allocation108_spill] sm:$0xff]  ;;  %v17037_v35 = vld [vmem:[#allocation130_spill] sm:$0xff] }
 0xdba   : > { %v4020_v8 = vmul.f32 %v17029_v57, %v17033_v48  ;;  %v3830_v30 = vadd.f32 %v3826_v29, %v3783_v7  ;;  %v3921_v45 = vmul.f32 %v17032_v25, %v17035_v49  ;;  %v3975_v56 = vadd.f32 %v3971_v54, %v3927_v23  ;;  %v17038_v20 = vld [vmem:[#allocation103_spill] sm:$0xff]  ;;  %v17039_v50 = vld [vmem:[#allocation173_spill] sm:$0xff]  ;;  %v17040_v36 = vld [vmem:[#allocation74_spill] sm:$0xff]  ;;  %v14369_v54 = vpop.permute.xlu1 %6317 }
 0xdbb   : > { %v4067_v6 = vmul.f32 %v17037_v35, %v17036_v31  ;;  %v3878_v34 = vadd.f32 %v3874_v24, %v3831_v11  ;;  %v3976_v38 = vadd.f32 %v3972_v10, %v3928_v33  ;;  %v3970_v53 = vmul.f32 %v17039_v50, %v17038_v20  ;;  %v17041_v57 = vld [vmem:[#allocation67_spill] sm:$0xff]  ;;  %v17042_v7 = vld [vmem:[#allocation344_spill] sm:$0xff]  ;;  %17044 = vst [vmem:[#allocation178_spill] sm:$0xff] %v14369_v54  ;;  %v17045_v24 = vld [vmem:[#allocation105_spill] sm:$0xff]  ;;  %v14375_v20 = vpop.permute.xlu0 %6265 }
 0xdbc   : > { %v4068_v37 = vmul.f32 %v17037_v35, %v17040_v36  ;;  %v3877_v19 = vadd.f32 %v3873_v47, %v3830_v30  ;;  %v3969_v48 = vmul.f32 %v17039_v50, %v17041_v57  ;;  %v4023_v29 = vadd.f32 %v4019_v4, %v3975_v56  ;;  %v17043_v18 = vld [vmem:[#allocation452_spill] sm:$0xff]  ;;  %v17046_v10 = vld [vmem:[#allocation442_spill] sm:$0xff]  ;;  %v17047_v33 = vld [vmem:[#allocation345_spill] sm:$0xff] }
 0xdbd   : > { %v4115_v25 = vmul.f32 %v17043_v18, %v17042_v7  ;;  %v3926_v23 = vadd.f32 %v3922_v52, %v3878_v34  ;;  %v4024_v49 = vadd.f32 %v4020_v8, %v3976_v38  ;;  %v4018_v11 = vmul.f32 %v17046_v10, %v17045_v24  ;;  %v17048_v30 = vld [vmem:[#allocation70_spill] sm:$0xff]  ;;  %v17049_v56 = vld [vmem:[#allocation112_spill] sm:$0xff]  ;;  %v17051_v52 = vld [vmem:[#allocation107_spill] sm:$0xff] }
 0xdbe   : > { %v4116_v31 = vmul.f32 %v17043_v18, %v17047_v33  ;;  %v3925_v47 = vadd.f32 %v3921_v45, %v3877_v19  ;;  %v4017_v35 = vmul.f32 %v17046_v10, %v17048_v30  ;;  %v4071_v4 = vadd.f32 %v4067_v6, %v4023_v29  ;;  %v17050_v50 = vld [vmem:[#allocation142_spill] sm:$0xff]  ;;  %v17052_v8 = vld [vmem:[#allocation449_spill] sm:$0xff]  ;;  %v17056_v33 = vld [vmem:[#allocation340_spill] sm:$0xff]  ;;  %v14391_v10 = vpop.permute.xlu1 %6364 }
 0xdbf   : > { %v4163_v36 = vmul.f32 %v17050_v50, %v17049_v56  ;;  %v3974_v57 = vadd.f32 %v3970_v53, %v3926_v23  ;;  %v4072_v7 = vadd.f32 %v4068_v37, %v4024_v49  ;;  %v4066_v34 = vmul.f32 %v17052_v8, %v17051_v52  ;;  %v17053_v38 = vld [vmem:[#allocation78_spill] sm:$0xff]  ;;  %v17054_v54 = vld [vmem:[#allocation293_spill] sm:$0xff]  ;;  %17057 = vst [vmem:[#allocation390_spill] sm:$0xff] %v14391_v10  ;;  %v17058_v49 = vld [vmem:[#allocation343_spill] sm:$0xff] }
 0xdc0   : > { %v4164_v24 = vmul.f32 %v17050_v50, %v17053_v38  ;;  %v17055_v18 = vld [vmem:[#allocation202_spill] sm:$0xff]  ;;  %v3973_v45 = vadd.f32 %v3969_v48, %v3925_v47  ;;  %v4065_v6 = vmul.f32 %v17052_v8, %v17056_v33  ;;  %v4119_v29 = vadd.f32 %v4115_v25, %v4071_v4  ;;  %v14399_v50 = vpop.permute.xlu0 %6312  ;;  %v17060_v52 = vld [vmem:[#allocation295_spill] sm:$0xff]  ;;  %v17061_v48 = vld [vmem:[#allocation204_spill] sm:$0xff] }
 0xdc1   : > { %v6734_v19 = vsel %vm6732_vm10, %v17055_v18, %v17054_v54  ;;  %v6736_v53 = vsel %vm6732_vm10, %v17054_v54, %v17055_v18  ;;  %v4022_v37 = vadd.f32 %v4018_v11, %v3974_v57  ;;  %v4120_v23 = vadd.f32 %v4116_v31, %v4072_v7  ;;  %v17059_v30 = vld [vmem:[#allocation454_spill] sm:$0xff]  ;;  %v17063_v4 = vld [vmem:[#allocation75_spill] sm:$0xff]  ;;  %vm17064_vm10 = vmmov %vm17062_vm3 }
 0xdc2   : > { %v4114_v56 = vmul.f32 %v17059_v30, %v17058_v49  ;;  %v6782_v47 = vsel %vm17062_vm3, %v17061_v48, %v17060_v52  ;;  %v4021_v25 = vadd.f32 %v4017_v35, %v3973_v45  ;;  %v4113_v8 = vmul.f32 %v17059_v30, %v17063_v4  ;;  %v17065_v57 = vld [vmem:[#allocation111_spill] sm:$0xff]  ;;  %v17066_v7 = vld [vmem:[#allocation146_spill] sm:$0xff]  ;;  %v17067_v49 = vld [vmem:[#allocation233_spill] sm:$0xff] }
 0xdc3   : > { %v4167_v38 = vadd.f32 %v4163_v36, %v4119_v29  ;;  %v6784_v54 = vsel %vm17064_vm10, %v17060_v52, %v17061_v48  ;;  %v4070_v11 = vadd.f32 %v4066_v34, %v4022_v37  ;;  %v4168_v31 = vadd.f32 %v4164_v24, %v4120_v23  ;;  %v17069_v35 = vld [vmem:[#allocation119_spill] sm:$0xff]  ;;  %v14421_v36 = vpop.permute.xlu1 %6411  ;;  %v17071_v29 = vld [vmem:[#allocation421_spill] sm:$0xff]  ;;  %v17072_v37 = vld [vmem:[#allocation422_spill] sm:$0xff] }
 0xdc4   : > { %v4162_v18 = vmul.f32 %v17066_v7, %v17065_v57  ;;  %v4069_v33 = vadd.f32 %v4065_v6, %v4021_v25  ;;  %v14415_v10 = vmul.f32 %v17067_v49, %v14139_v42  ;;  %v14419_v45 = vmul.f32 %v17069_v35, %v14151_v16  ;;  %v14427_v24 = vpop.permute.xlu0 %6359  ;;  %v17073_v6 = vld [vmem:[#allocation423_spill] sm:$0xff]  ;;  %v17074_v42 = vld [vmem:[#allocation425_spill] sm:$0xff]  ;;  %v17076_v25 = vld [vmem:[#allocation298_spill] sm:$0xff] }
 0xdc5   : > { %v14425_v30 = vmul.f32 %v17071_v29, %v14133_v44  ;;  %v4118_v34 = vadd.f32 %v4114_v56, %v4070_v11  ;;  %v14430_v23 = vmul.f32 %v17072_v37, %v6734_v19  ;;  %v14433_v52 = vmul.f32 %v17073_v6, %v6736_v53  ;;  %v17078_v57 = vld [vmem:[#allocation346_spill] sm:$0xff]  ;;  %v17086_v37 = vld [vmem:[#allocation239_spill] sm:$0xff] }
 0xdc6   : > { %17068 = vst [vmem:[#allocation391_spill] sm:$0xff] %v14415_v10  ;;  %17070 = vst [vmem:[#allocation270_spill] sm:$0xff] %v14419_v45  ;;  %v14436_v48 = vmul.f32 %v17074_v42, %v6782_v47  ;;  %v14438_v16 = vadd.f32 %v4113_v8, %v4069_v33  ;;  %v14441_v4 = vadd.f32 %v17076_v25, %v4167_v38  ;;  %v17080_v56 = vld [vmem:[#allocation426_spill] sm:$0xff]  ;;  %v17083_v47 = vld [vmem:[#allocation211_spill] sm:$0xff] }
 0xdc7   : > { %v14445_v44 = vmul.f32 %v17066_v7, %v17078_v57  ;;  %v14448_v11 = vmul.f32 %v17080_v56, %v6784_v54  ;;  %v14451_v19 = vadd.f32 %v17076_v25, %v4168_v31  ;;  %v14453_v53 = vadd.f32 %v4162_v18, %v4118_v34  ;;  %v17084_v38 = vld [vmem:[#allocation123_spill] sm:$0xff]  ;;  %v17085_v33 = vld [vmem:[#allocation221_spill] sm:$0xff]  ;;  %v17087_v31 = vld [vmem:[#allocation336_spill] sm:$0xff]  ;;  %v14477_v6 = vpop.permute.xlu1 %6459 }
 0xdc8   : > { %17075 = vst [vmem:[#allocation214_spill] sm:$0xff] %v14438_v16  ;;  %17077 = vst [vmem:[#allocation175_spill] sm:$0xff] %v14441_v4  ;;  %v14457_v29 = vmul.f32 %v17083_v47, %v13675_v43  ;;  %v14461_v8 = vmul.f32 %v17083_v47, %v13699_v39  ;;  %v14465_v7 = vmul.f32 %v17085_v33, %v17084_v38  ;;  %v17088_v34 = vld [vmem:[#allocation195_spill] sm:$0xff]  ;;  %v17089_v42 = vld [vmem:[#allocation125_spill] sm:$0xff] }
 0xdc9   : > { %17079 = vst [vmem:[#allocation431_spill] sm:$0xff] %v14445_v44  ;;  %17081 = vst [vmem:[#allocation269_spill] sm:$0xff] %v14451_v19  ;;  %v14469_v54 = vmul.f32 %v17085_v33, %v17086_v37  ;;  %v14473_v18 = vmul.f32 %v17087_v31, %v13721_v0  ;;  %v5990_v43 = vmul.f32 %v14086_v62, %v17088_v34  ;;  %v17090_v25 = vld [vmem:[#allocation427_spill] sm:$0xff]  ;;  %v17091_v56 = vld [vmem:[#allocation428_spill] sm:$0xff]  ;;  %v14495_v33 = vpop.permute.xlu0 %6406 }
 0xdca   : > { %17082 = vst [vmem:[#allocation180_spill] sm:$0xff] %v14453_v53  ;;  %v14481_v39 = vmul.f32 %v17087_v31, %v13724_v60  ;;  %v14485_v57 = vmul.f32 %v17090_v25, %v17089_v42  ;;  %v14489_v47 = vmul.f32 %v17090_v25, %v17091_v56  ;;  %v17092_v0 = vld [vmem:[#allocation243_spill] sm:$0xff]  ;;  %v17093_v60 = vld [vmem:[#allocation429_spill] sm:$0xff]  ;;  %v17094_v37 = vld [vmem:[#allocation116_spill] sm:$0xff] }
 0xdcb   : > { %v14493_v38 = vmul.f32 %v17092_v0, %v13747_v27  ;;  %v14499_v62 = vmul.f32 %v17092_v0, %v13769_v40  ;;  %v14503_v31 = vmul.f32 %v17094_v37, %v17093_v60  ;;  %v17095_v34 = vld [vmem:[#allocation140_spill] sm:$0xff]  ;;  %v17096_v53 = vld [vmem:[#allocation199_spill] sm:$0xff]  ;;  %v17097_v56 = vld [vmem:[#allocation430_spill] sm:$0xff]  ;;  %v5991_v40 = vmul.f32 %v14025_v26, %v13658_v63 }
 0xdcc   : > { %v6036_v42 = vmul.f32 %v14182_v59, %v17095_v34  ;;  %v6037_v25 = vmul.f32 %v14182_v59, %v17096_v53  ;;  %v14511_v27 = vmul.f32 %v17094_v37, %v17097_v56  ;;  %v17098_v19 = vld [vmem:[#allocation242_spill] sm:$0xff]  ;;  %v5992_v0 = vmul.f32 %v14025_v26, %v13661_v61  ;;  %v17099_v53 = vld [vmem:[#allocation201_spill] sm:$0xff]  ;;  %v17100_v34 = vld [vmem:[#allocation203_spill] sm:$0xff] }
 0xdcd   : > { %v14515_v44 = vmul.f32 %v17098_v19, %v13772_v13  ;;  %v14523_v60 = vmul.f32 %v17098_v19, %v13795_v55  ;;  %v5994_v59 = vadd.f32 %v5990_v43, %v14015_v15  ;;  %v6083_v37 = vmul.f32 %v14229_v46, %v17099_v53  ;;  %v14530_v13 = vpop.permute.xlu1 %6507  ;;  %v17101_v16 = vld [vmem:[#allocation241_spill] sm:$0xff]  ;;  %v17103_v45 = vld [vmem:[#allocation127_spill] sm:$0xff]  ;;  %v14544_v15 = vpop.permute.xlu0 %6454  ;;  %v17104_v43 = vld [vmem:[#allocation144_spill] sm:$0xff] }
 0xdce   : > { %v6084_v56 = vmul.f32 %v14229_v46, %v17100_v34  ;;  %v17102_v4 = vld [vmem:[#allocation133_spill] sm:$0xff]  ;;  %v6038_v55 = vmul.f32 %v14143_v22, %v13680_v9  ;;  %v6039_v26 = vmul.f32 %v14143_v22, %v13683_v51  ;;  %v6040_v46 = vadd.f32 %v6036_v42, %v14127_v17  ;;  %v17106_v17 = vld [vmem:[#allocation148_spill] sm:$0xff] }
 0xdcf   : > { %v14534_v63 = vmul.f32 %v17102_v4, %v17101_v16  ;;  %v14538_v61 = vmul.f32 %v17102_v4, %v17103_v45  ;;  %v6041_v19 = vadd.f32 %v6037_v25, %v5994_v59  ;;  %v6131_v53 = vmul.f32 %v14271_v21, %v17104_v43  ;;  %v17105_v16 = vld [vmem:[#allocation205_spill] sm:$0xff]  ;;  %v17107_v25 = vld [vmem:[#allocation207_spill] sm:$0xff] }
 0xdd0   : > { %v6132_v34 = vmul.f32 %v14271_v21, %v17105_v16  ;;  %v5995_v45 = vadd.f32 %v5991_v40, %v13963_v41  ;;  %v5996_v4 = vadd.f32 %v5992_v0, %v13965_v12  ;;  %v6085_v9 = vmul.f32 %v14204_v58, %v13707_v28  ;;  %v17108_v0 = vld [vmem:[#allocation458_spill] sm:$0xff] }
 0xdd1   : > { %v6086_v51 = vmul.f32 %v14204_v58, %v13710_v3  ;;  %v6087_v22 = vadd.f32 %v6083_v37, %v6040_v46  ;;  %v6088_v10 = vadd.f32 %v6084_v56, %v6041_v19  ;;  %v6179_v42 = vmul.f32 %v14311_v2, %v17106_v17  ;;  %v14561_v43 = vpop.permute.xlu1 %6554  ;;  %v6503_v40 = vpop.permute.xlu0 %6502  ;;  %v17109_v37 = vld [vmem:[#allocation267_spill] sm:$0xff]  ;;  %v17110_v46 = vld [vmem:[#allocation209_spill] sm:$0xff]  ;;  %v17111_v17 = vld [vmem:[#allocation162_spill] sm:$0xff] }
 0xdd2   : > { %v6180_v59 = vmul.f32 %v14311_v2, %v17107_v25  ;;  %v6042_v21 = vadd.f32 %v6038_v55, %v5995_v45  ;;  %v6043_v41 = vadd.f32 %v6039_v26, %v5996_v4  ;;  %v6133_v12 = vmul.f32 %v14249_v1, %v13755_v32  ;;  %v17112_v55 = vld [vmem:[#allocation176_spill] sm:$0xff]  ;;  %v17113_v45 = vld [vmem:[#allocation254_spill] sm:$0xff] }
 0xdd3   : > { %v6134_v28 = vmul.f32 %v14249_v1, %v13758_v5  ;;  %v6135_v3 = vadd.f32 %v6131_v53, %v6087_v22  ;;  %v6136_v58 = vadd.f32 %v6132_v34, %v6088_v10  ;;  %v6226_v56 = vmul.f32 %v17109_v37, %v17108_v0  ;;  %v17114_v5 = vld [vmem:[#allocation150_spill] sm:$0xff]  ;;  %v17115_v10 = vld [vmem:[#allocation152_spill] sm:$0xff] }
 0xdd4   : > { %v6227_v19 = vmul.f32 %v17109_v37, %v17110_v46  ;;  %v6089_v2 = vadd.f32 %v6085_v9, %v6042_v21  ;;  %v6090_v16 = vadd.f32 %v6086_v51, %v6043_v41  ;;  %v6181_v26 = vmul.f32 %v17112_v55, %v17111_v17  ;;  %v17116_v9 = vld [vmem:[#allocation115_spill] sm:$0xff]  ;;  %v17117_v51 = vld [vmem:[#allocation450_spill] sm:$0xff]  ;;  %v17118_v41 = vld [vmem:[#allocation80_spill] sm:$0xff] }
 0xdd5   : > { %v6182_v32 = vmul.f32 %v17112_v55, %v17113_v45  ;;  %v6183_v4 = vadd.f32 %v6179_v42, %v6135_v3  ;;  %v6184_v25 = vadd.f32 %v6180_v59, %v6136_v58  ;;  %v6273_v1 = vmul.f32 %v14375_v20, %v17114_v5  ;;  %v14579_v34 = vpop.permute.xlu1 %6601  ;;  %v6550_v46 = vpop.permute.xlu0 %6549  ;;  %v17119_v59 = vld [vmem:[#allocation213_spill] sm:$0xff]  ;;  %v17120_v58 = vld [vmem:[#allocation154_spill] sm:$0xff] }
 0xdd6   : > { %v6274_v53 = vmul.f32 %v14375_v20, %v17115_v10  ;;  %v6137_v22 = vadd.f32 %v6133_v12, %v6089_v2  ;;  %v6138_v0 = vadd.f32 %v6134_v28, %v6090_v16  ;;  %v6228_v21 = vmul.f32 %v17117_v51, %v17116_v9  ;;  %v17121_v5 = vld [vmem:[#allocation134_spill] sm:$0xff]  ;;  %v17123_v2 = vld [vmem:[#allocation256_spill] sm:$0xff] }
 0xdd7   : > { %v6229_v37 = vmul.f32 %v17117_v51, %v17118_v41  ;;  %v6230_v17 = vadd.f32 %v6226_v56, %v6183_v4  ;;  %v6231_v42 = vadd.f32 %v6227_v19, %v6184_v25  ;;  %v6320_v3 = vmul.f32 %v14399_v50, %v17119_v59  ;;  %v17122_v12 = vld [vmem:[#allocation118_spill] sm:$0xff]  ;;  %v17124_v51 = vld [vmem:[#allocation215_spill] sm:$0xff]  ;;  %v17125_v19 = vld [vmem:[#allocation156_spill] sm:$0xff] }
 0xdd8   : > { %v6321_v55 = vmul.f32 %v14399_v50, %v17120_v58  ;;  %v6185_v20 = vadd.f32 %v6181_v26, %v6137_v22  ;;  %v6186_v45 = vadd.f32 %v6182_v32, %v6138_v0  ;;  %v6275_v28 = vmul.f32 %v17122_v12, %v17121_v5  ;;  %v17126_v26 = vld [vmem:[#allocation379_spill] sm:$0xff]  ;;  %v17127_v32 = vld [vmem:[#allocation178_spill] sm:$0xff]  ;;  %v17128_v0 = vld [vmem:[#allocation381_spill] sm:$0xff] }
 0xdd9   : > { %v6276_v16 = vmul.f32 %v17122_v12, %v17123_v2  ;;  %v6277_v10 = vadd.f32 %v6273_v1, %v6230_v17  ;;  %v6278_v9 = vadd.f32 %v6274_v53, %v6231_v42  ;;  %v6367_v56 = vmul.f32 %v14427_v24, %v17124_v51  ;;  %v14597_v25 = vpop.permute.xlu1 %6619  ;;  %v6597_v58 = vpop.permute.xlu0 %6596  ;;  %v17129_v53 = vld [vmem:[#allocation158_spill] sm:$0xff]  ;;  %v17130_v42 = vld [vmem:[#allocation217_spill] sm:$0xff] }
 0xdda   : > { %v6368_v4 = vmul.f32 %v14427_v24, %v17125_v19  ;;  %v6232_v41 = vadd.f32 %v6228_v21, %v6185_v20  ;;  %v6233_v50 = vadd.f32 %v6229_v37, %v6186_v45  ;;  %v6322_v22 = vmul.f32 %v17127_v32, %v17126_v26  ;;  %v17131_v51 = vld [vmem:[#allocation145_spill] sm:$0xff]  ;;  %v17132_v21 = vld [vmem:[#allocation390_spill] sm:$0xff] }
 0xddb   : > { %v6323_v59 = vmul.f32 %v17127_v32, %v17128_v0  ;;  %v6324_v5 = vadd.f32 %v6320_v3, %v6277_v10  ;;  %v6325_v1 = vadd.f32 %v6321_v55, %v6278_v9  ;;  %v6414_v17 = vmul.f32 %v14495_v33, %v17129_v53  ;;  %v17133_v20 = vld [vmem:[#allocation382_spill] sm:$0xff]  ;;  %v17134_v32 = vld [vmem:[#allocation161_spill] sm:$0xff]  ;;  %v17135_v55 = vld [vmem:[#allocation219_spill] sm:$0xff] }
 0xddc   : > { %v6415_v12 = vmul.f32 %v14495_v33, %v17130_v42  ;;  %v6279_v24 = vadd.f32 %v6275_v28, %v6232_v41  ;;  %v6280_v2 = vadd.f32 %v6276_v16, %v6233_v50  ;;  %v6369_v37 = vmul.f32 %v17132_v21, %v17131_v51  ;;  %v17136_v33 = vld [vmem:[#allocation439_spill] sm:$0xff]  ;;  %v17137_v16 = vld [vmem:[#allocation457_spill] sm:$0xff] }
 0xddd   : > { %v6370_v45 = vmul.f32 %v17132_v21, %v17133_v20  ;;  %v6371_v19 = vadd.f32 %v6367_v56, %v6324_v5  ;;  %v6372_v26 = vadd.f32 %v6368_v4, %v6325_v1  ;;  %v6462_v3 = vmul.f32 %v14544_v15, %v17134_v32  ;;  %v6667_v9 = vpop.permute.xlu1 %6666  ;;  %v6615_v50 = vpop.permute.xlu0 %6614  ;;  %v17138_v56 = vld [vmem:[#allocation60_spill] sm:$0xff]  ;;  %v17139_v5 = vld [vmem:[#allocation163_spill] sm:$0xff] }
 0xdde   : > { %v6463_v10 = vmul.f32 %v14544_v15, %v17135_v55  ;;  %v6326_v0 = vadd.f32 %v6322_v22, %v6279_v24  ;;  %v6327_v53 = vadd.f32 %v6323_v59, %v6280_v2  ;;  %v6416_v28 = vmul.f32 %v14421_v36, %v17136_v33  ;;  %v17140_v32 = vld [vmem:[#allocation260_spill] sm:$0xff]  ;;  %v17141_v22 = vld [vmem:[#allocation147_spill] sm:$0xff] }
 0xddf   : > { %v6417_v41 = vmul.f32 %v14421_v36, %v17137_v16  ;;  %v6418_v42 = vadd.f32 %v6414_v17, %v6371_v19  ;;  %v6419_v51 = vadd.f32 %v6415_v12, %v6372_v26  ;;  %v6510_v4 = vmul.f32 %v6503_v40, %v17138_v56  ;;  %v17142_v55 = vld [vmem:[#allocation223_spill] sm:$0xff]  ;;  %v17143_v36 = vld [vmem:[#allocation165_spill] sm:$0xff] }
 0xde0   : > { %v6511_v1 = vmul.f32 %v6503_v40, %v17139_v5  ;;  %v6373_v21 = vadd.f32 %v6369_v37, %v6326_v0  ;;  %v6374_v20 = vadd.f32 %v6370_v45, %v6327_v53  ;;  %v6464_v15 = vmul.f32 %v14477_v6, %v17140_v32  ;;  %v17144_v26 = vld [vmem:[#allocation445_spill] sm:$0xff]  ;;  %v17145_v37 = vld [vmem:[#allocation128_spill] sm:$0xff]  ;;  %v17148_v32 = vld [vmem:[#allocation383_spill] sm:$0xff] }
 0xde1   : > { %v6465_v59 = vmul.f32 %v14477_v6, %v17141_v22  ;;  %v6466_v24 = vadd.f32 %v6462_v3, %v6418_v42  ;;  %v6467_v2 = vadd.f32 %v6463_v10, %v6419_v51  ;;  %v6557_v33 = vmul.f32 %v6550_v46, %v17142_v55  ;;  %v6714_v17 = vpop.permute.xlu1 %6713  ;;  %v6662_v0 = vpop.permute.xlu0 %6661  ;;  %v17146_v5 = vld [vmem:[#allocation225_spill] sm:$0xff]  ;;  %v17147_v3 = vld [vmem:[#allocation167_spill] sm:$0xff] }
 0xde2   : > { %v6558_v16 = vmul.f32 %v6550_v46, %v17143_v36  ;;  %v6420_v12 = vadd.f32 %v6416_v28, %v6373_v21  ;;  %v6421_v19 = vadd.f32 %v6417_v41, %v6374_v20  ;;  %v6512_v40 = vmul.f32 %v14530_v13, %v17144_v26  ;;  %v17149_v28 = vld [vmem:[#allocation206_spill] sm:$0xff]  ;;  %v17150_v22 = vld [vmem:[#allocation69_spill] sm:$0xff] }
 0xde3   : > { %v6513_v45 = vmul.f32 %v14530_v13, %v17145_v37  ;;  %v6514_v53 = vadd.f32 %v6510_v4, %v6466_v24  ;;  %v6515_v56 = vadd.f32 %v6511_v1, %v6467_v2  ;;  %v6604_v6 = vmul.f32 %v6597_v58, %v17146_v5  ;;  %v17151_v13 = vld [vmem:[#allocation113_spill] sm:$0xff]  ;;  %v17152_v2 = vld [vmem:[#allocation138_spill] sm:$0xff]  ;;  %v17154_v37 = vld [vmem:[#allocation227_spill] sm:$0xff] }
 0xde4   : > { %v6605_v10 = vmul.f32 %v6597_v58, %v17147_v3  ;;  %v6468_v42 = vadd.f32 %v6464_v15, %v6420_v12  ;;  %v6469_v51 = vadd.f32 %v6465_v59, %v6421_v19  ;;  %v6559_v46 = vmul.f32 %v14561_v43, %v17148_v32  ;;  %v17153_v15 = vld [vmem:[#allocation172_spill] sm:$0xff]  ;;  %v17156_v5 = vld [vmem:[#allocation91_spill] sm:$0xff] }
 0xde5   : > { %v6560_v41 = vmul.f32 %v14561_v43, %v17149_v28  ;;  %v6561_v21 = vadd.f32 %v6557_v33, %v6514_v53  ;;  %v6562_v20 = vadd.f32 %v6558_v16, %v6515_v56  ;;  %v6622_v55 = vmul.f32 %v6615_v50, %v17150_v22  ;;  %v6762_v4 = vpop.permute.xlu1 %6761  ;;  %v6709_v12 = vpop.permute.xlu0 %6708  ;;  %v17155_v33 = vld [vmem:[#allocation169_spill] sm:$0xff] }
 0xde6   : > { %v6623_v36 = vmul.f32 %v6615_v50, %v17151_v13  ;;  %v6516_v1 = vadd.f32 %v6512_v40, %v6468_v42  ;;  %v6517_v24 = vadd.f32 %v6513_v45, %v6469_v51  ;;  %v6606_v58 = vmul.f32 %v14579_v34, %v17152_v2  ;;  %v17157_v40 = vld [vmem:[#allocation160_spill] sm:$0xff]  ;;  %v17158_v51 = vld [vmem:[#allocation229_spill] sm:$0xff] }
 0xde7   : > { %v6607_v59 = vmul.f32 %v14579_v34, %v17153_v15  ;;  %v6608_v19 = vadd.f32 %v6604_v6, %v6561_v21  ;;  %v6609_v26 = vadd.f32 %v6605_v10, %v6562_v20  ;;  %v6669_v43 = vmul.f32 %v6662_v0, %v17154_v37  ;;  %v17159_v34 = vld [vmem:[#allocation171_spill] sm:$0xff]  ;;  %v17160_v20 = vld [vmem:[#allocation386_spill] sm:$0xff]  ;;  %v17165_v37 = vld [vmem:[#allocation141_spill] sm:$0xff] }
 0xde8   : > { %v6670_v16 = vmul.f32 %v6662_v0, %v17155_v33  ;;  %v6563_v53 = vadd.f32 %v6559_v46, %v6516_v1  ;;  %v6564_v56 = vadd.f32 %v6560_v41, %v6517_v24  ;;  %v6624_v50 = vmul.f32 %v14597_v25, %v17156_v5  ;;  %v17161_v0 = vld [vmem:[#allocation208_spill] sm:$0xff]  ;;  %v17162_v24 = vld [vmem:[#allocation334_spill] sm:$0xff]  ;;  %v17163_v15 = vld [vmem:[#allocation231_spill] sm:$0xff] }
 0xde9   : > { %v6625_v45 = vmul.f32 %v14597_v25, %v17157_v40  ;;  %v6626_v3 = vadd.f32 %v6622_v55, %v6608_v19  ;;  %v6627_v42 = vadd.f32 %v6623_v36, %v6609_v26  ;;  %v6716_v32 = vmul.f32 %v6709_v12, %v17158_v51  ;;  %v6810_v6 = vpop.permute.xlu1 %6809  ;;  %v6757_v41 = vpop.permute.xlu0 %6756  ;;  %v17164_v19 = vld [vmem:[#allocation174_spill] sm:$0xff]  ;;  %v17167_v33 = vld [vmem:[#allocation253_spill] sm:$0xff] }
 0xdea   : > { %v6717_v28 = vmul.f32 %v6709_v12, %v17159_v34  ;;  %v6610_v10 = vadd.f32 %v6606_v58, %v6563_v53  ;;  %v6611_v21 = vadd.f32 %v6607_v59, %v6564_v56  ;;  %v6671_v22 = vmul.f32 %v6667_v9, %v17160_v20  ;;  %v17166_v58 = vld [vmem:[#allocation249_spill] sm:$0xff]  ;;  %v17169_v51 = vld [vmem:[#allocation106_spill] sm:$0xff] }
 0xdeb   : > { %v6672_v46 = vmul.f32 %v6667_v9, %v17161_v0  ;;  %v6673_v13 = vadd.f32 %v6669_v43, %v6626_v3  ;;  %v6674_v1 = vadd.f32 %v6670_v16, %v6627_v42  ;;  %v6764_v2 = vmul.f32 %v6757_v41, %v17162_v24  ;;  %v17171_v0 = vld [vmem:[#allocation235_spill] sm:$0xff] }
 0xdec   : > { %v6765_v25 = vmul.f32 %v6757_v41, %v17163_v15  ;;  %v6628_v55 = vadd.f32 %v6624_v50, %v6610_v10  ;;  %v6629_v36 = vadd.f32 %v6625_v45, %v6611_v21  ;;  %v6718_v26 = vmul.f32 %v6714_v17, %v17164_v19  ;;  %v17174_v19 = vld [vmem:[#allocation248_spill] sm:$0xff] }
 0xded   : > { %v6719_v12 = vmul.f32 %v6714_v17, %v14425_v30  ;;  %v14659_v59 = vmul.f32 %v17166_v58, %v17165_v37  ;;  %v14663_v9 = vmul.f32 %v17166_v58, %v17167_v33  ;;  %v6720_v43 = vadd.f32 %v6716_v32, %v6673_v13  ;;  %v6852_v53 = vpop.permute.xlu1 %6851  ;;  %v6805_v45 = vpop.permute.xlu0 %6804  ;;  %v17168_v17 = vld [vmem:[#allocation117_spill] sm:$0xff]  ;;  %v17178_v58 = vld [vmem:[#allocation387_spill] sm:$0xff] }
 0xdee   : > { %v6721_v16 = vadd.f32 %v6717_v28, %v6674_v1  ;;  %v6675_v56 = vadd.f32 %v6671_v22, %v6628_v55  ;;  %v6676_v5 = vadd.f32 %v6672_v46, %v6629_v36  ;;  %v6766_v50 = vmul.f32 %v6762_v4, %v14430_v23  ;;  %v17170_v28 = vld [vmem:[#allocation109_spill] sm:$0xff] }
 0xdef   : > { %v6767_v40 = vmul.f32 %v6762_v4, %v14433_v52  ;;  %v6768_v3 = vadd.f32 %v6764_v2, %v6720_v43  ;;  %v6812_v42 = vmul.f32 %v6805_v45, %v17168_v17  ;;  %v6813_v34 = vmul.f32 %v6805_v45, %v17169_v51  ;;  %v17172_v1 = vld [vmem:[#allocation121_spill] sm:$0xff]  ;;  %v17182_v17 = vld [vmem:[#allocation79_spill] sm:$0xff] }
 0xdf0   : > { %v6769_v30 = vadd.f32 %v6765_v25, %v6721_v16  ;;  %v6722_v10 = vadd.f32 %v6718_v26, %v6675_v56  ;;  %v6723_v21 = vadd.f32 %v6719_v12, %v6676_v5  ;;  %v6814_v20 = vmul.f32 %v6810_v6, %v14436_v48  ;;  %v17173_v2 = vld [vmem:[#allocation237_spill] sm:$0xff]  ;;  %v17175_v26 = vld [vmem:[#allocation159_spill] sm:$0xff]  ;;  %v17177_v12 = vld [vmem:[#allocation246_spill] sm:$0xff] }
 0xdf1   : > { %v6815_v32 = vmul.f32 %v6810_v6, %v14448_v11  ;;  %v6859_v22 = vmul.f32 %v6852_v53, %v17170_v28  ;;  %v6860_v46 = vmul.f32 %v6852_v53, %v17171_v0  ;;  %v6816_v23 = vadd.f32 %v6812_v42, %v6768_v3  ;;  %v6899_v52 = vpop.permute.xlu1 %6898  ;;  %v6857_v25 = vpop.permute.xlu0 %6856  ;;  %v17176_v6 = vld [vmem:[#allocation129_spill] sm:$0xff]  ;;  %v17179_v53 = vld [vmem:[#allocation378_spill] sm:$0xff]  ;;  %v17183_v42 = vld [vmem:[#allocation76_spill] sm:$0xff] }
 0xdf2   : > { %v6817_v41 = vadd.f32 %v6813_v34, %v6769_v30  ;;  %v6770_v4 = vadd.f32 %v6766_v50, %v6722_v10  ;;  %v6771_v13 = vadd.f32 %v6767_v40, %v6723_v21  ;;  %v6906_v24 = vmul.f32 %v6899_v52, %v17172_v1  ;;  %v17180_v56 = vld [vmem:[#allocation110_spill] sm:$0xff]  ;;  %v17181_v50 = vld [vmem:[#allocation143_spill] sm:$0xff]  ;;  %v17184_v34 = vld [vmem:[#allocation240_spill] sm:$0xff] }
 0xdf3   : > { %v6907_v15 = vmul.f32 %v6899_v52, %v17173_v2  ;;  %v6863_v55 = vadd.f32 %v6859_v22, %v6816_v23  ;;  %v6861_v48 = vmul.f32 %v6857_v25, %v17174_v19  ;;  %v6862_v11 = vmul.f32 %v6857_v25, %v17175_v26  ;;  %v17185_v0 = vld [vmem:[#allocation77_spill] sm:$0xff]  ;;  %v17186_v23 = vld [vmem:[#allocation252_spill] sm:$0xff]  ;;  %v17187_v52 = vld [vmem:[#allocation166_spill] sm:$0xff] }
 0xdf4   : > { %v6864_v36 = vadd.f32 %v6860_v46, %v6817_v41  ;;  %v7143_v37 = vmul.f32 %v17177_v12, %v17176_v6  ;;  %v7144_v33 = vmul.f32 %v17177_v12, %v17178_v58  ;;  %v6818_v43 = vadd.f32 %v6814_v20, %v6770_v4  ;;  %v17188_v4 = vld [vmem:[#allocation137_spill] sm:$0xff]  ;;  %v17189_v1 = vld [vmem:[#allocation258_spill] sm:$0xff]  ;;  %v17190_v2 = vld [vmem:[#allocation151_spill] sm:$0xff] }
 0xdf5   : > { %v6819_v16 = vadd.f32 %v6815_v32, %v6771_v13  ;;  %v14683_v5 = vmul.f32 %v17180_v56, %v17179_v53  ;;  %v14687_v40 = vmul.f32 %v17180_v56, %v17181_v50  ;;  %v6910_v45 = vadd.f32 %v6906_v24, %v6863_v55  ;;  %v14689_v30 = vpop.permute.xlu1 %7628  ;;  %v6904_v32 = vpop.permute.xlu0 %6903  ;;  %v17192_v55 = vld [vmem:[#allocation245_spill] sm:$0xff]  ;;  %v17193_v6 = vld [vmem:[#allocation435_spill] sm:$0xff] }
 0xdf6   : > { %v6911_v3 = vadd.f32 %v6907_v15, %v6864_v36  ;;  %v7190_v51 = vmul.f32 %v17183_v42, %v17182_v17  ;;  %v7191_v10 = vmul.f32 %v17183_v42, %v17184_v34  ;;  %v6865_v21 = vadd.f32 %v6861_v48, %v6818_v43  ;;  %v17191_v15 = vld [vmem:[#allocation114_spill] sm:$0xff]  ;;  %v17194_v12 = vld [vmem:[#allocation139_spill] sm:$0xff] }
 0xdf7   : > { %v6866_v20 = vadd.f32 %v6862_v11, %v6819_v16  ;;  %v6957_v28 = vadd.f32 %v14465_v7, %v6910_v45  ;;  %v6908_v46 = vmul.f32 %v6904_v32, %v17185_v0  ;;  %v6909_v41 = vmul.f32 %v6904_v32, %v17186_v23  ;;  %v8297_v11 = vld [vmem:[%s16196_s26 + $0x5c] sm:$0x3]  ;;  %v17195_v43 = vld [vmem:[#allocation438_spill] sm:$0xff]  ;;  %v17198_v45 = vld [vmem:[#allocation153_spill] sm:$0xff] }
 0xdf8   : > { %v6958_v22 = vadd.f32 %v14469_v54, %v6911_v3  ;;  %v14701_v13 = vmul.f32 %v17188_v4, %v17187_v52  ;;  %v14705_v24 = vmul.f32 %v17188_v4, %v17189_v1  ;;  %v7237_v25 = vmul.f32 %v17191_v15, %v17190_v2  ;;  %v17196_v53 = vld [vmem:[#allocation131_spill] sm:$0xff]  ;;  %v17202_v0 = vld [vmem:[#allocation45_spill] sm:$0xff]  ;;  %v17203_v23 = vld [vmem:[#allocation46_spill] sm:$0xff] }
 0xdf9   : > { %v7238_v7 = vmul.f32 %v17191_v15, %v17192_v55  ;;  %v7004_v54 = vadd.f32 %v14485_v57, %v6957_v28  ;;  %v6912_v19 = vadd.f32 %v6908_v46, %v6865_v21  ;;  %v6913_v48 = vadd.f32 %v6909_v41, %v6866_v20  ;;  %v14713_v26 = vpop.permute.xlu1 %7658  ;;  %v17197_v56 = vld [vmem:[#allocation251_spill] sm:$0xff]  ;;  %v17199_v21 = vld [vmem:[#allocation120_spill] sm:$0xff]  ;;  %v17201_v28 = vld [vmem:[#allocation122_spill] sm:$0xff] }
 0xdfa   : > { %v7005_v36 = vadd.f32 %v14489_v47, %v6958_v22  ;;  %v14718_v58 = vmul.f32 %v17194_v12, %v17193_v6  ;;  %v14722_v16 = vmul.f32 %v17194_v12, %v17195_v43  ;;  %v7284_v50 = vmul.f32 %v17197_v56, %v17196_v53  ;;  %v14728_v47 = vpop.permute.xlu0 %7582  ;;  %v17200_v20 = vld [vmem:[#allocation164_spill] sm:$0xff]  ;;  %v8298_v4 = vld [vmem:[%s16196_s26 + $0x5e] sm:$0x3] }
 0xdfb   : > { %v7285_v57 = vmul.f32 %v17197_v56, %v17198_v45  ;;  %v7051_v3 = vadd.f32 %v14503_v31, %v7004_v54  ;;  %v6959_v42 = vadd.f32 %v14457_v29, %v6912_v19  ;;  %v6960_v34 = vadd.f32 %v14461_v8, %v6913_v48  ;;  %v17204_v1 = vld [vmem:[#allocation419_spill] sm:$0xff]  ;;  %v17208_v19 = vld [vmem:[#allocation434_spill] sm:$0xff]  ;;  %v17211_v53 = vld [vmem:[#allocation168_spill] sm:$0xff] }
 0xdfc   : > { %v7052_v17 = vadd.f32 %v14511_v27, %v7005_v36  ;;  %v14736_v32 = vmul.f32 %v17200_v20, %v17199_v21  ;;  %v14740_v22 = vmul.f32 %v17200_v20, %v17201_v28  ;;  %v14743_v46 = vrot.slane %v8297_v11, %v17202_v0  ;;  %v17205_v2 = vld [vmem:[#allocation255_spill] sm:$0xff]  ;;  %v17207_v36 = vld [vmem:[#allocation257_spill] sm:$0xff]  ;;  %v8299_v21 = vld [vmem:[%s16196_s26 + $0x60] sm:$0x3] }
 0xdfd   : > { %v14746_v41 = vrot.slane %v8297_v11, %v17203_v23  ;;  %v7099_v31 = vadd.f32 %v14534_v63, %v7051_v3  ;;  %v7006_v8 = vadd.f32 %v14473_v18, %v6959_v42  ;;  %v7007_v27 = vadd.f32 %v14481_v39, %v6960_v34  ;;  %v14752_v52 = vpop.permute.xlu1 %7626  ;;  %v17206_v55 = vld [vmem:[#allocation339_spill] sm:$0xff]  ;;  %v17209_v63 = vld [vmem:[#allocation444_spill] sm:$0xff]  ;;  %v17213_v20 = vld [vmem:[#allocation185_spill] sm:$0xff] }
 0xdfe   : > { %v7100_v29 = vadd.f32 %v14538_v61, %v7052_v17  ;;  %v7331_v15 = vmul.f32 %v17205_v2, %v17204_v1  ;;  %v7332_v54 = vmul.f32 %v17205_v2, %v17206_v55  ;;  %v14761_v48 = vmul.f32 %v17208_v19, %v17207_v36  ;;  %v7633_v18 = vpop.permute.xlu0 %7632  ;;  %v17210_v43 = vld [vmem:[#allocation247_spill] sm:$0xff]  ;;  %v17214_v28 = vld [vmem:[#allocation170_spill] sm:$0xff] }
 0xdff   : > { %v14765_v61 = vmul.f32 %v17208_v19, %v17209_v63  ;;  %v7147_v39 = vadd.f32 %v7143_v37, %v7099_v31  ;;  %v7053_v6 = vadd.f32 %v14493_v38, %v7006_v8  ;;  %v7054_v12 = vadd.f32 %v14499_v62, %v7007_v27  ;;  %v17212_v45 = vld [vmem:[#allocation403_spill] sm:$0xff]  ;;  %v17216_v27 = vld [vmem:[#allocation244_spill] sm:$0xff]  ;;  %v17219_v19 = vld [vmem:[#allocation262_spill] sm:$0xff] }
 0xe00   : > { %v7148_v11 = vadd.f32 %v7144_v33, %v7100_v29  ;;  %v7378_v56 = vmul.f32 %v17211_v53, %v17210_v43  ;;  %v7379_v3 = vmul.f32 %v17211_v53, %v17212_v45  ;;  %v14775_v17 = vrot.slane %v8298_v4, %v17202_v0  ;;  %v17215_v29 = vld [vmem:[#allocation259_spill] sm:$0xff] }
 0xe01   : > { %v14778_v42 = vrot.slane %v8298_v4, %v17203_v23  ;;  %v7194_v37 = vadd.f32 %v7190_v51, %v7147_v39  ;;  %v7101_v38 = vadd.f32 %v14515_v44, %v7053_v6  ;;  %v7102_v62 = vadd.f32 %v14523_v60, %v7054_v12  ;;  %v14782_v34 = vpop.permute.xlu1 %7676  ;;  %v17217_v4 = vld [vmem:[#allocation187_spill] sm:$0xff] }
 0xe02   : > { %v7195_v33 = vadd.f32 %v7191_v10, %v7148_v11  ;;  %v14787_v31 = vmul.f32 %v17214_v28, %v17213_v20  ;;  %v14791_v8 = vmul.f32 %v17214_v28, %v17215_v29  ;;  %v7426_v1 = vmul.f32 %v17217_v4, %v17216_v27  ;;  %v17218_v51 = vld [vmem:[#allocation155_spill] sm:$0xff]  ;;  %v14797_v44 = vpop.permute.xlu0 %7711  ;;  %v17221_v11 = vld [vmem:[#allocation384_spill] sm:$0xff]  ;;  %v17226_v20 = vld [vmem:[#allocation210_spill] sm:$0xff] }
 0xe03   : > { %v7427_v10 = vmul.f32 %v17217_v4, %v17218_v51  ;;  %v7241_v60 = vadd.f32 %v7237_v25, %v7194_v37  ;;  %v7149_v55 = vadd.f32 %v14659_v59, %v7101_v38  ;;  %v7150_v36 = vadd.f32 %v14663_v9, %v7102_v62  ;;  %v17220_v63 = vld [vmem:[#allocation263_spill] sm:$0xff]  ;;  %v17223_v37 = vld [vmem:[#allocation266_spill] sm:$0xff]  ;;  %v17224_v38 = vld [vmem:[#allocation73_spill] sm:$0xff] }
 0xe04   : > { %v7242_v2 = vadd.f32 %v7238_v7, %v7195_v33  ;;  %v7476_v39 = vmul.f32 %v17220_v63, %v17219_v19  ;;  %v7477_v6 = vmul.f32 %v17220_v63, %v17221_v11  ;;  %v14806_v12 = vrot.slane %v8299_v21, %v17202_v0  ;;  %v17222_v9 = vld [vmem:[#allocation135_spill] sm:$0xff]  ;;  %v17228_v27 = vld [vmem:[#allocation157_spill] sm:$0xff]  ;;  %v17229_v4 = vld [vmem:[#allocation388_spill] sm:$0xff] }
 0xe05   : > { %v14809_v43 = vrot.slane %v8299_v21, %v17203_v23  ;;  %v7288_v53 = vadd.f32 %v7284_v50, %v7241_v60  ;;  %v7196_v25 = vadd.f32 %v14683_v5, %v7149_v55  ;;  %v7197_v59 = vadd.f32 %v14687_v40, %v7150_v36  ;;  %v14813_v7 = vpop.permute.xlu1 %7706  ;;  %v17225_v62 = vld [vmem:[#allocation447_spill] sm:$0xff]  ;;  %v17227_v21 = vld [vmem:[#allocation261_spill] sm:$0xff] }
 0xe06   : > { %v7289_v45 = vadd.f32 %v7285_v57, %v7242_v2  ;;  %v7474_v33 = vmul.f32 %v17223_v37, %v17222_v9  ;;  %v7475_v0 = vmul.f32 %v17223_v37, %v17224_v38  ;;  %v7524_v23 = vmul.f32 %v17226_v20, %v17225_v62  ;;  %v7631_v57 = vpop.permute.xlu0 %7630  ;;  %v17230_v60 = vld [vmem:[#allocation443_spill] sm:$0xff]  ;;  %v17231_v55 = vld [vmem:[#allocation149_spill] sm:$0xff] }
 0xe07   : > { %v7525_v50 = vmul.f32 %v17226_v20, %v17227_v21  ;;  %v7243_v5 = vadd.f32 %v14701_v13, %v7196_v25  ;;  %v7244_v40 = vadd.f32 %v14705_v24, %v7197_v59  ;;  %v7335_v28 = vadd.f32 %v7331_v15, %v7288_v53  ;;  %v17232_v11 = vld [vmem:[#allocation385_spill] sm:$0xff]  ;;  %v17234_v25 = vld [vmem:[#allocation264_spill] sm:$0xff]  ;;  %v17237_v21 = vld [vmem:[#allocation250_spill] sm:$0xff] }
 0xe08   : > { %v7336_v29 = vadd.f32 %v7332_v54, %v7289_v45  ;;  %v7522_v51 = vmul.f32 %v17229_v4, %v17228_v27  ;;  %v7523_v2 = vmul.f32 %v17229_v4, %v17230_v60  ;;  %v7587_v36 = vsel %vm7586_vm13, %v17231_v55, %v14728_v47  ;;  %v17233_v53 = vld [vmem:[#allocation389_spill] sm:$0xff]  ;;  %v17238_v4 = vld [vmem:[#allocation391_spill] sm:$0xff]  ;;  %v17239_v60 = vld [vmem:[#allocation268_spill] sm:$0xff] }
 0xe09   : > { %v7589_v13 = vsel %vm7586_vm13, %v14728_v47, %v17231_v55  ;;  %v7290_v24 = vadd.f32 %v14718_v58, %v7243_v5  ;;  %v7291_v15 = vadd.f32 %v14722_v16, %v7244_v40  ;;  %v7382_v54 = vadd.f32 %v7378_v56, %v7335_v28  ;;  %v7675_v63 = vpop.permute.xlu1 %7674  ;;  %v17235_v38 = vld [vmem:[#allocation433_spill] sm:$0xff] }
 0xe0a   : > { %v7383_v19 = vadd.f32 %v7379_v3, %v7336_v29  ;;  %v7572_v45 = vmul.f32 %v17233_v53, %v17232_v11  ;;  %v7573_v59 = vmul.f32 %v17233_v53, %v17234_v25  ;;  %v7636_v9 = vsel %vm7634_vm0, %v14689_v30, %v7633_v18  ;;  %v7681_v58 = vpop.permute.xlu0 %7680  ;;  %v17236_v62 = vld [vmem:[#allocation265_spill] sm:$0xff] }
 0xe0b   : > { %v7638_v47 = vsel %vm7634_vm0, %v7633_v18, %v14689_v30  ;;  %v7430_v37 = vadd.f32 %v7426_v1, %v7382_v54  ;;  %v7337_v56 = vadd.f32 %v14736_v32, %v7290_v24  ;;  %v7338_v3 = vadd.f32 %v14740_v22, %v7291_v15  ;;  %v17241_v15 = vld [vmem:[#allocation212_spill] sm:$0xff] }
 0xe0c   : > { %v7431_v16 = vadd.f32 %v7427_v10, %v7383_v19  ;;  %v7570_v20 = vmul.f32 %v17236_v62, %v17235_v38  ;;  %v7571_v5 = vmul.f32 %v17236_v62, %v17237_v21  ;;  %v7604_v40 = vmul.f32 %v17067_v49, %v7587_v36  ;;  %v17240_v36 = vld [vmem:[#allocation270_spill] sm:$0xff] }
 0xe0d   : > { %v7605_v28 = vmul.f32 %v17069_v35, %v7589_v13  ;;  %v7478_v30 = vadd.f32 %v7474_v33, %v7430_v37  ;;  %v7384_v1 = vadd.f32 %v14761_v48, %v7337_v56  ;;  %v7385_v32 = vadd.f32 %v14765_v61, %v7338_v3  ;;  %v7725_v35 = vpop.permute.xlu1 %7724 }
 0xe0e   : > { %v7479_v18 = vadd.f32 %v7475_v0, %v7431_v16  ;;  %v7654_v22 = vmul.f32 %v14743_v46, %v7636_v9  ;;  %v7655_v10 = vmul.f32 %v14746_v41, %v7638_v47  ;;  %v7635_v29 = vsel %vm7634_vm0, %v14752_v52, %v7631_v57  ;;  %v7760_v27 = vpop.permute.xlu0 %7759  ;;  %v17242_v47 = vld [vmem:[#allocation189_spill] sm:$0xff] }
 0xe0f   : > { %v7637_v49 = vsel %vm7634_vm0, %v7631_v57, %v14752_v52  ;;  %v7526_v33 = vadd.f32 %v7522_v51, %v7478_v30  ;;  %v7432_v48 = vadd.f32 %v14787_v31, %v7384_v1  ;;  %v7433_v61 = vadd.f32 %v14791_v8, %v7385_v32 }
 0xe10   : > { %v7527_v0 = vadd.f32 %v7523_v2, %v7479_v18  ;;  %v7620_v55 = vmul.f32 %v17239_v60, %v17238_v4  ;;  %v7621_v13 = vmul.f32 %v17239_v60, %v17240_v36  ;;  %v7684_v24 = vsel %vm7682_vm12, %v14782_v34, %v7681_v58  ;;  %v17244_v60 = vld [vmem:[#allocation214_spill] sm:$0xff] }
 0xe11   : > { %v7686_v52 = vsel %vm7682_vm12, %v7681_v58, %v14782_v34  ;;  %v7574_v57 = vadd.f32 %v7570_v20, %v7526_v33  ;;  %v7480_v2 = vadd.f32 %v7476_v39, %v7432_v48  ;;  %v7481_v31 = vadd.f32 %v7477_v6, %v7433_v61  ;;  %v7755_v6 = vpop.permute.xlu1 %7754  ;;  %v17243_v61 = vld [vmem:[#allocation175_spill] sm:$0xff] }
 0xe12   : > { %v7575_v51 = vadd.f32 %v7571_v5, %v7527_v0  ;;  %v7618_v8 = vmul.f32 %v17241_v15, %v7604_v40  ;;  %v7619_v54 = vmul.f32 %v17241_v15, %v7605_v28  ;;  %v7652_v19 = vmul.f32 %v14743_v46, %v7635_v29  ;;  %v7679_v53 = vpop.permute.xlu0 %7678 }
 0xe13   : > { %v7653_v11 = vmul.f32 %v14746_v41, %v7637_v49  ;;  %v7528_v25 = vadd.f32 %v7524_v23, %v7480_v2  ;;  %v7529_v9 = vadd.f32 %v7525_v50, %v7481_v31  ;;  %v7668_v37 = vmul.f32 %v17242_v47, %v7654_v22 }
 0xe14   : > { %v7669_v16 = vmul.f32 %v17242_v47, %v7655_v10  ;;  %v7702_v34 = vmul.f32 %v14775_v17, %v7684_v24  ;;  %v7703_v39 = vmul.f32 %v14778_v42, %v7686_v52  ;;  %v7683_v58 = vsel %vm7682_vm12, %v7675_v63, %v7679_v53  ;;  %v17246_v24 = vld [vmem:[#allocation269_spill] sm:$0xff]  ;;  %v17247_v52 = vld [vmem:[#allocation180_spill] sm:$0xff] }
 0xe15   : > { %v7685_v46 = vsel %vm7682_vm12, %v7679_v53, %v7675_v63  ;;  %v7622_v56 = vadd.f32 %v7618_v8, %v7574_v57  ;;  %v7623_v41 = vadd.f32 %v7619_v54, %v7575_v51  ;;  %v7576_v3 = vadd.f32 %v7572_v45, %v7528_v25  ;;  %v7727_v10 = vpop.permute.xlu1 %7726  ;;  %v17248_v57 = vld [vmem:[#allocation299_spill] sm:$0xff] }
 0xe16   : > { %v7577_v23 = vadd.f32 %v7573_v59, %v7529_v9  ;;  %v7666_v50 = vmul.f32 %v14713_v26, %v7652_v19  ;;  %v7667_v38 = vmul.f32 %v14713_v26, %v7653_v11  ;;  %v7700_v62 = vmul.f32 %v14775_v17, %v7683_v58  ;;  %v7729_v21 = vpop.permute.xlu0 %7728 }
 0xe17   : > { %v7701_v20 = vmul.f32 %v14778_v42, %v7685_v46  ;;  %v7624_v5 = vadd.f32 %v7620_v55, %v7576_v3  ;;  %v7732_v28 = vsel %vm7730_vm9, %v7725_v35, %v7729_v21  ;;  %v7734_v63 = vsel %vm7730_vm9, %v7729_v21, %v7725_v35  ;;  %v17245_v55 = vld [vmem:[#allocation431_spill] sm:$0xff] }
 0xe18   : > { %v7625_v40 = vadd.f32 %v7621_v13, %v7577_v23  ;;  %v7716_v45 = vmul.f32 %v14797_v44, %v7702_v34  ;;  %v7717_v59 = vmul.f32 %v14797_v44, %v7703_v39  ;;  %v7750_v30 = vmul.f32 %v14806_v12, %v7732_v28 }
 0xe19   : > { %v7751_v26 = vmul.f32 %v14809_v43, %v7734_v63  ;;  %v7672_v17 = vadd.f32 %v7668_v37, %v7624_v5  ;;  %v7670_v42 = vadd.f32 %v7666_v50, %v7622_v56  ;;  %v7671_v1 = vadd.f32 %v7667_v38, %v7623_v41  ;;  %v7773_v47 = vpop.permute.xlu1 %7772 }
 0xe1a   : > { %v7673_v18 = vadd.f32 %v7669_v16, %v7625_v40  ;;  %v7714_v32 = vmul.f32 %v14813_v7, %v7700_v62  ;;  %v7715_v22 = vmul.f32 %v14813_v7, %v7701_v20  ;;  %v7764_v29 = vmul.f32 %v7760_v27, %v7750_v30  ;;  %v7723_v35 = vpop.permute.xlu0 %7722 }
 0xe1b   : > { %v7765_v49 = vmul.f32 %v7760_v27, %v7751_v26  ;;  %v7731_v33 = vsel %vm7730_vm9, %v7723_v35, %v7727_v10  ;;  %v7733_v44 = vsel %vm7730_vm9, %v7727_v10, %v7723_v35  ;;  %v7720_v0 = vadd.f32 %v7716_v45, %v7672_v17 }
 0xe1c   : > { %v7721_v48 = vadd.f32 %v7717_v59, %v7673_v18  ;;  %v4189_v4 = vmul.f32 0.70710677, %v17243_v61  ;;  %v4165_v36 = vadd.f32 %v17245_v55, %v17244_v60  ;;  %v7748_v13 = vmul.f32 %v14806_v12, %v7731_v33  ;;  %v7804_v60 = vld [vmem:[%s17249_s18] sm:$0xff]  ;;  %v7805_v55 = vld [vmem:[%s17249_s18 + $0x8] sm:$0xff] }
 0xe1d   : > { %v7749_v7 = vmul.f32 %v14809_v43, %v7733_v44  ;;  %v4190_v27 = vmul.f32 0.70710677, %v17246_v24  ;;  %v4180_v51 = vadd.f32 %v17248_v57, %v17247_v52  ;;  %v7768_v2 = vadd.f32 %v7764_v29, %v7720_v0 }
 0xe1e   : > { %v7769_v31 = vadd.f32 %v7765_v49, %v7721_v48  ;;  %v7718_v14 = vadd.f32 %v7714_v32, %v7670_v42  ;;  %v7719_v15 = vadd.f32 %v7715_v22, %v7671_v1  ;;  %v7762_v8 = vmul.f32 %v7755_v6, %v7748_v13  ;;  %v7778_v19 = vpop.permute.xlu0 %7777 }
 0xe1f   : > { %v7763_v54 = vmul.f32 %v7755_v6, %v7749_v7  ;;  %v7782_v11 = vadd.f32 %v7778_v19, %v7768_v2  ;;  %v4179_v25 = vadd.f32 %v17248_v57, %v4165_v36  ;;  %8987 = verf.f32 %v4189_v4 }
 0xe20   : > { %v7783_v53 = vadd.f32 %v7778_v19, %v7769_v31  ;;  %v7766_v9 = vadd.f32 %v7762_v8, %v7718_v14  ;;  %v4188_v43 = vmul.f32 0.70710677, %v4180_v51  ;;  %8989 = verf.f32 %v4190_v27  ;;  %v17253_v27 = vld [vmem:[#allocation40_spill] sm:$0xff] }
 0xe21   : > { %v7767_v12 = vadd.f32 %v7763_v54, %v7719_v15  ;;  %v7790_v37 = vmul.f32 0.70710677, %v7782_v11  ;;  %v4187_v58 = vmul.f32 0.70710677, %v4179_v25  ;;  %v7786_v50 = vmul.f32 0.5, %v7782_v11  ;;  %v17254_v31 = vld [vmem:[#allocation44_spill] sm:$0xff] }
 0xe22   : > { %v7791_v16 = vmul.f32 0.70710677, %v7783_v53  ;;  %v7780_v34 = vadd.f32 %v7773_v47, %v7766_v9  ;;  %v7787_v20 = vmul.f32 0.5, %v7783_v53  ;;  %v4186_v22 = vmul.f32 0.5, %v17246_v24  ;;  %v7811_v36 = vpop.permute.xlu0 %7810  ;;  %v17255_v54 = vld [vmem:[#allocation41_spill] sm:$0xff]  ;;  %v17256_v53 = vld [vmem:[#allocation43_spill] sm:$0xff] }
 0xe23   : > { %v7781_v39 = vadd.f32 %v7773_v47, %v7767_v12  ;;  %8991 = verf.f32 %v7790_v37  ;;  %v4185_v29 = vmul.f32 0.5, %v17243_v61  ;;  %v4184_v33 = vmul.f32 0.5, %v4180_v51  ;;  %v7816_v51 = vpop.permute.xlu1 %7815 }
 0xe24   : > { %v7788_v46 = vmul.f32 0.70710677, %v7780_v34  ;;  %8993 = verf.f32 %v7791_v16  ;;  %v7784_v45 = vmul.f32 0.5, %v7780_v34  ;;  %v4183_v0 = vmul.f32 0.5, %v4179_v25 }
 0xe25   : > { %v7789_v6 = vmul.f32 0.70710677, %v7781_v39  ;;  %8995 = verf.f32 %v4188_v43  ;;  %v7785_v26 = vmul.f32 0.5, %v7781_v39  ;;  %v17252_v61 = vmov 0.0  }
 0xe26   : > { %8997 = verf.f32 %v7788_v46 }
 0xe27   : > { %8999 = verf.f32 %v7789_v6 }
 0xe28   : > { %9001 = verf.f32 %v4187_v58 }
 0xe2c   : > { %v8988_v56 = vpop.eup %8987 }
 0xe2d   : > { %v8990_v41 = vpop.eup %8989  ;;  %v4197_v1 = vadd.f32 1.0, %v8988_v56 }
 0xe2e   : > { %v4198_v18 = vadd.f32 1.0, %v8990_v41 }
 0xe2f   : > { %v4201_v44 = vmul.f32 %v4197_v1, %v4185_v29 }
 0xe30   : > { %v8992_v3 = vpop.eup %8991  ;;  %v4202_v35 = vmul.f32 %v4198_v18, %v4186_v22 }
 0xe31   : > { %v8994_v23 = vpop.eup %8993  ;;  %v7798_v38 = vadd.f32 1.0, %v8992_v3 }
 0xe32   : > { %v8996_v62 = vpop.eup %8995  ;;  %v7799_v21 = vadd.f32 1.0, %v8994_v23 }
 0xe33   : > { %v8998_v5 = vpop.eup %8997  ;;  %v7802_v40 = vmul.f32 %v7798_v38, %v7786_v50  ;;  %v4196_v10 = vadd.f32 1.0, %v8996_v62 }
 0xe34   : > { %v9000_v28 = vpop.eup %8999  ;;  %v7803_v63 = vmul.f32 %v7799_v21, %v7787_v20  ;;  %v7796_v59 = vadd.f32 1.0, %v8998_v5 }
 0xe35   : > { %v9002_v30 = vpop.eup %9001  ;;  %v7797_v17 = vadd.f32 1.0, %v9000_v28  ;;  %v4200_v48 = vmul.f32 %v4196_v10, %v4184_v33 }
 0xe36   : > { %7849 = vmatprep.subr.mxu1 %v7803_v63  ;;  %v7800_v42 = vmul.f32 %v7796_v59, %v7784_v45  ;;  %v4195_v49 = vadd.f32 1.0, %v9002_v30 }
 0xe37   : > { %7850 = vmatpush1.msra.mxu1 %v7802_v40  ;;  %v7801_v32 = vmul.f32 %v7797_v17, %v7785_v26 }
 0xe38   : > { %v4199_v4 = vmul.f32 %v4195_v49, %v4183_v0 }
 0xe39   : > { %7851 = vmatprep.subr.mxu1 %v7801_v32 }
 0xe3a   : > { %7852 = vmatpush1.msra.mxu1 %v7800_v42 }
 0xe3b   : > { %7853 = vmatprep.subr.mxu1 %v4202_v35 }
 0xe3c   : > { %7854 = vmatpush1.msra.mxu1 %v4201_v44 }
 0xe3d   : > { %7855 = vmatprep.subr.mxu1 %v4200_v48 }
 0xe3e   : > { %7856 = vmatpush1.msra.mxu1 %v4199_v4 }
 0xe3f   : > { %8300 = vmatmul.mubr.msk.f32.vlgmr.msra.gmra.mxu1 %vm7818_vm14, %v7804_v60 }
 0xe40   : > { %7895 = vmatprep.mubr.f32.mxu1 %v17252_v61 }
 0xe43   : > { %8301 = vmatmul.mubr.msk.f32.gmra.mxu1 %vm7818_vm14, %v7805_v55 }
 0xeff   : > { %v7891_v13 = vpop.f32.mrf.mxu1 }
 0xf00   : > { %v7892_v7 = vadd.f32 %v7891_v13, %v7811_v36 }
 0xf01   : > { %v7893_v24 = vpop.f32.mrf.mxu1 }
 0xf02   : > { %v7902_v52 = vadd.f32 %v7892_v7, %v17253_v27  ;;  %v7894_v57 = vadd.f32 %v7893_v24, %v7811_v36 }
 0xf03   : > { %v7897_v2 = vpop.f32.mrf.mxu1 }
 0xf04   : > { %7906 = vst [vmem:[%s998_s30] sm:$0xff] %v7902_v52  ;;  %v7903_v14 = vadd.f32 %v7894_v57, %v17254_v31  ;;  %v7898_v15 = vadd.f32 %v7897_v2, %v7816_v51 }
 0xf05   : > { %v7899_v8 = vpop.f32.mrf.mxu1 }
 0xf06   : > { %7907 = vst [vmem:[%s998_s30 + $0x8] sm:$0xff] %v7903_v14  ;;  %v7904_v19 = vadd.f32 %v7898_v15, %v17255_v54  ;;  %v7900_v11 = vadd.f32 %v7899_v8, %v7816_v51 }
 0xf08   : > { %7908 = vst [vmem:[%s998_s30 + $0x10] sm:$0xff] %v7904_v19  ;;  %v7905_v25 = vadd.f32 %v7900_v11, %v17256_v53 }
 0xf0a   : > { %7909 = vst [vmem:[%s998_s30 + $0x18] sm:$0xff] %v7905_v25 }
 0xf0b PF: > { %s17257_s25 = sld [smem:[#allocation34_spill]] }
 0xf11   : > { %s73_s22 = sadd.s32 1, %s17257_s25  }
 0xf12   : > { %p70_p4 = scmp.ge.s32.totalorder %s73_s22, 4  }
 0xf14   :  { %72 = sbr.rel (!%p70_p4) target bundleno = 75 (0x4b), region = 296 }

</bundles_post_ra>
